<compile_context>
chip_gen: v7x
topology: tpu7x:2x2x1
jax: 0.10.0
libtpu: 0.0.40
codegen_flags: <defaults>
</compile_context>

<pallas_src>
import functools

import jax
import jax.numpy as jnp
from jax.experimental import pallas as pl
from jax.experimental.pallas import tpu as pltpu

# ----------------------------- model dims --------------------------------
C_IN = 3            # RGB frames
K = 3               # conv-stem kernel
STRIDE = 2
PAD = 1
C_STEM = 32         # efficientnet_lite0 stem channels
FEAT = 1280         # efficientnet_lite0 feature dim (LSTM input_size)
HIDDEN = 256        # LSTM hidden_size
NUM_CLASSES = 2
KC = C_IN * K * K   # 27
KC_PAD = 32         # zero-padded contraction dim (clean sublane packing)


def _largest_divisor_leq(n, cap):
    for d in range(max(1, min(n, cap)), 0, -1):
        if n % d == 0:
            return d
    return 1


# -------------------- frontend kernel: stem + pool + head + x@W_ih --------------------
def feature_frontend_kernel(patch_ref, w_stem_ref, b_stem_ref, w_head_ref,
                            b_head_ref, w_ih_ref, b_lstm_ref, gx_ref):
    # patch_ref: (FB, P, KC_PAD)   gx_ref: (FB, 4*HIDDEN)
    FB, P, Kc = patch_ref.shape

    # Conv stem as one dense matmul over all FB*P patch rows (P % 8 == 0, so the reshape
    # collapsing/splitting the leading dims is layout-free).
    patches = patch_ref[...].reshape(FB * P, Kc)                       # (FB*P, 32)
    conv = jnp.dot(patches, w_stem_ref[...],
                   preferred_element_type=jnp.float32)                 # (FB*P, C_STEM)
    conv = jnp.clip(conv + b_stem_ref[...], 0.0, 6.0)                  # ReLU6

    # Global average pool per frame (sublane-direction reduce).
    pooled = jnp.sum(conv.reshape(FB, P, C_STEM), axis=1) * (1.0 / P)  # (FB, C_STEM)

    # 1x1 head projection to the 1280-d feature (dense M = FB rows).
    feats = jnp.dot(pooled, w_head_ref[...],
                    preferred_element_type=jnp.float32)                # (FB, FEAT)
    feats = jnp.clip(feats + b_head_ref[...], 0.0, 6.0)                # ReLU6

    # Hoisted LSTM input projection: x_t @ W_ih^T + (b_ih + b_hh); bf16 weights, f32 accum.
    gx = jnp.dot(feats.astype(jnp.bfloat16), w_ih_ref[...],
                 preferred_element_type=jnp.float32)                   # (FB, 4*HIDDEN)
    gx_ref[...] = gx + b_lstm_ref[...]


def feature_frontend(patches, w_stem, b_stem, w_head, b_head, w_ih_bf16, b_lstm,
                     frames_per_block=8):
    # patches: (N, P, KC_PAD) -> pre-gated LSTM inputs (N, 4*HIDDEN)
    N, P, Kc = patches.shape
    # Cap the frame block so the (FB, P, Kc) f32 activation slab stays <= ~4 MiB
    # (double-buffered), comfortably inside v7x's 64 MiB VMEM alongside the weights.
    vmem_cap_frames = max(1, (4 << 20) // (P * Kc * 4))
    FB = _largest_divisor_leq(N, min(frames_per_block, vmem_cap_frames))

    grid_spec = pltpu.PrefetchScalarGridSpec(
        num_scalar_prefetch=0,
        grid=(N // FB,),
        in_specs=[
            pl.BlockSpec((FB, P, Kc), lambda n: (n, 0, 0)),
            pl.BlockSpec((Kc, C_STEM), lambda n: (0, 0)),
            pl.BlockSpec((1, C_STEM), lambda n: (0, 0)),
            pl.BlockSpec((C_STEM, FEAT), lambda n: (0, 0)),
            pl.BlockSpec((1, FEAT), lambda n: (0, 0)),
            pl.BlockSpec((FEAT, 4 * HIDDEN), lambda n: (0, 0)),
            pl.BlockSpec((1, 4 * HIDDEN), lambda n: (0, 0)),
        ],
        out_specs=pl.BlockSpec((FB, 4 * HIDDEN), lambda n: (n, 0)),
    )
    return pl.pallas_call(
        feature_frontend_kernel,
        out_shape=jax.ShapeDtypeStruct((N, 4 * HIDDEN), jnp.float32),
        grid_spec=grid_spec,
        compiler_params=pltpu.CompilerParams(dimension_semantics=("parallel",)),
    )(patches, w_stem, b_stem, w_head, b_head, w_ih_bf16, b_lstm)


# ---------------- LSTM recurrence + FC kernel (only h @ W_hh per step) ----------------
def lstm_fc_kernel(gx_ref, whh_ref, wfc_ref, bfc_ref, out_ref, h_sc, c_sc):
    # gx_ref: (TB, B, 4*HIDDEN) block of pre-gated inputs; TB steps unrolled per grid step.
    tb = pl.program_id(0)
    TB = gx_ref.shape[0]

    @pl.when(tb == 0)
    def _():
        h_sc[...] = jnp.zeros_like(h_sc)
        c_sc[...] = jnp.zeros_like(c_sc)

    for i in range(TB):  # static, fully unrolled (TB is small)
        # gates = (x_t @ W_ih + b)  [precomputed in the frontend]  +  h_{t-1} @ W_hh
        gates = gx_ref[i] + jnp.dot(h_sc[...].astype(jnp.bfloat16), whh_ref[...],
                                    preferred_element_type=jnp.float32)   # (B, 4*HIDDEN)
        ig = jax.nn.sigmoid(gates[:, 0 * HIDDEN:1 * HIDDEN])              # PyTorch order i,f,g,o
        fg = jax.nn.sigmoid(gates[:, 1 * HIDDEN:2 * HIDDEN])
        gg = jnp.tanh(gates[:, 2 * HIDDEN:3 * HIDDEN])
        og = jax.nn.sigmoid(gates[:, 3 * HIDDEN:4 * HIDDEN])
        c_new = fg * c_sc[...] + ig * gg
        h_new = og * jnp.tanh(c_new)
        c_sc[...] = c_new
        h_sc[...] = h_new

    @pl.when(tb == pl.num_programs(0) - 1)
    def _():
        out_ref[...] = (jnp.dot(h_sc[...], wfc_ref[...],
                                preferred_element_type=jnp.float32) + bfc_ref[...])


def lstm_fc(gx_tbg, w_hh_bf16, w_fc_t, b_fc, time_block=8):
    # gx_tbg: (T, B, 4*HIDDEN) pre-gated inputs -> logits (B, NUM_CLASSES)
    T, B, G = gx_tbg.shape
    TB = _largest_divisor_leq(T, time_block)
    grid_spec = pltpu.PrefetchScalarGridSpec(
        num_scalar_prefetch=0,
        grid=(T // TB,),
        in_specs=[
            pl.BlockSpec((TB, B, G), lambda t: (t, 0, 0)),
            pl.BlockSpec((HIDDEN, 4 * HIDDEN), lambda t: (0, 0)),
            pl.BlockSpec((HIDDEN, NUM_CLASSES), lambda t: (0, 0)),
            pl.BlockSpec((1, NUM_CLASSES), lambda t: (0, 0)),
        ],
        out_specs=pl.BlockSpec((B, NUM_CLASSES), lambda t: (0, 0)),
        scratch_shapes=[
            pltpu.VMEM((B, HIDDEN), jnp.float32),   # h state
            pltpu.VMEM((B, HIDDEN), jnp.float32),   # c state
        ],
    )
    return pl.pallas_call(
        lstm_fc_kernel,
        out_shape=jax.ShapeDtypeStruct((B, NUM_CLASSES), jnp.float32),
        grid_spec=grid_spec,
        compiler_params=pltpu.CompilerParams(dimension_semantics=("arbitrary",)),
    )(gx_tbg, w_hh_bf16, w_fc_t, b_fc)


# ------------------------------- glue (JAX) -------------------------------
def im2col(x_nchw, k=K, stride=STRIDE, pad=PAD):
    # x: (N, C, H, W) -> patches (N, Ho*Wo, C*k*k), ordering (C, kh, kw) to match
    # PyTorch Conv2d weight layout (Cout, Cin, kh, kw).
    N, C, H, W = x_nchw.shape
    xp = jnp.pad(x_nchw, ((0, 0), (0, 0), (pad, pad), (pad, pad)))
    Ho = (H + 2 * pad - k) // stride + 1
    Wo = (W + 2 * pad - k) // stride + 1
    cols = []
    for di in range(k):
        for dj in range(k):
            cols.append(xp[:, :, di:di + stride * Ho:stride, dj:dj + stride * Wo:stride])
    patches = jnp.stack(cols, axis=-1)                     # (N, C, Ho, Wo, k*k)
    patches = patches.transpose(0, 2, 3, 1, 4)             # (N, Ho, Wo, C, k*k)
    return patches.reshape(N, Ho * Wo, C * k * k), Ho, Wo


def init_params(key):
    keys = jax.random.split(key, 8)
    s = 0.05
    conv_w = s * jax.random.normal(keys[0], (C_STEM, C_IN, K, K), jnp.float32)
    conv_b = s * jax.random.normal(keys[1], (C_STEM,), jnp.float32)        # folded-BN stand-in
    head_w = s * jax.random.normal(keys[2], (C_STEM, FEAT), jnp.float32)   # 1x1 head projection
    head_b = s * jax.random.normal(keys[3], (FEAT,), jnp.float32)
    # PyTorch LSTM params: W_ih (4H, F), W_hh (4H, H), b_ih (4H,), b_hh (4H,)
    w_ih = s * jax.random.normal(keys[4], (4 * HIDDEN, FEAT), jnp.float32)
    w_hh = s * jax.random.normal(keys[5], (4 * HIDDEN, HIDDEN), jnp.float32)
    b_ih = s * jax.random.normal(keys[6], (4 * HIDDEN,), jnp.float32)
    b_hh = jnp.zeros((4 * HIDDEN,), jnp.float32)
    w_fc = s * jax.random.normal(keys[7], (NUM_CLASSES, HIDDEN), jnp.float32)
    b_fc = jnp.zeros((NUM_CLASSES,), jnp.float32)

    w_stem = conv_w.reshape(C_STEM, KC).T                                 # (27, 32)
    w_stem = jnp.pad(w_stem, ((0, KC_PAD - KC), (0, 0)))                  # (32, 32) zero-padded K
    return dict(
        w_stem=w_stem,
        b_stem=conv_b.reshape(1, C_STEM),
        w_head=head_w,                                                    # (32, 1280)
        b_head=head_b.reshape(1, FEAT),
        w_ih_t=w_ih.T.astype(jnp.bfloat16),                               # (1280, 1024) bf16
        w_hh_t=w_hh.T.astype(jnp.bfloat16),                               # (256, 1024) bf16
        b_lstm=(b_ih + b_hh).reshape(1, 4 * HIDDEN),
        w_fc_t=w_fc.T,                                                    # (256, 2)
        b_fc=b_fc.reshape(1, NUM_CLASSES),
    )


@functools.partial(jax.jit, static_argnames=())
def deepfake_detector_forward(x, params):
    # x: (B, T, C, H, W)  -> logits (B, 2)
    B, T, C, H, W = x.shape
    # Reorder frames as (T, B) so the frontend output reshapes straight to (T, B, 4H).
    x_frames = jnp.transpose(x, (1, 0, 2, 3, 4)).reshape(T * B, C, H, W)
    patches, _, _ = im2col(x_frames)                                      # (T*B, P, 27)
    patches = jnp.pad(patches, ((0, 0), (0, 0), (0, KC_PAD - KC)))        # pad K dim 27 -> 32
    gx = feature_frontend(patches, params["w_stem"], params["b_stem"],
                          params["w_head"], params["b_head"],
                          params["w_ih_t"], params["b_lstm"])             # (T*B, 4*HIDDEN)
    gx_tbg = gx.reshape(T, B, 4 * HIDDEN)
    logits = lstm_fc(gx_tbg, params["w_hh_t"], params["w_fc_t"], params["b_fc"])  # (B, 2)
    return logits


if __name__ == "__main__":
    key = jax.random.PRNGKey(0)
    k_x, k_p = jax.random.split(key)
    B, T, C, H, W = 2, 4, C_IN, 32, 32
    x = jax.random.normal(k_x, (B, T, C, H, W), jnp.float32)
    params = init_params(k_p)

    out = deepfake_detector_forward(x, params)
    out = jax.block_until_ready(out)
    assert out.shape == (B, NUM_CLASSES) and out.dtype == jnp.float32
    assert bool(jnp.all(jnp.isfinite(out)))
    print("KERNEL_OK")
</pallas_src>

<mosaic_0001>
module attributes {stable_mosaic.version = 11 : i64} {
  func.func @feature_frontend_kernel(%arg0: i32, %arg1: memref<8x256x32xf32, #tpu.memory_space<vmem>>, %arg2: memref<32x32xf32, #tpu.memory_space<vmem>>, %arg3: memref<1x32xf32, #tpu.memory_space<vmem>>, %arg4: memref<32x1280xf32, #tpu.memory_space<vmem>>, %arg5: memref<1x1280xf32, #tpu.memory_space<vmem>>, %arg6: memref<1280x1024xbf16, #tpu.memory_space<vmem>>, %arg7: memref<1x1024xf32, #tpu.memory_space<vmem>>, %arg8: memref<8x1024xf32, #tpu.memory_space<vmem>>) attributes {dimension_semantics = [#tpu.dimension_semantics<parallel>], iteration_bounds = array<i64: 1>, scalar_prefetch = 0 : i64, scratch_operands = 0 : i64, tpu.core_type = #tpu.core_type<tc>, window_params = [{transform_indices = @transform_0, window_bounds = array<i64: 8, 256, 32>}, {pipeline_mode = #tpu.pipeline_mode<synchronous>, transform_indices = @transform_1, window_bounds = array<i64: 32, 32>}, {pipeline_mode = #tpu.pipeline_mode<synchronous>, transform_indices = @transform_2, window_bounds = array<i64: 1, 32>}, {pipeline_mode = #tpu.pipeline_mode<synchronous>, transform_indices = @transform_3, window_bounds = array<i64: 32, 1280>}, {pipeline_mode = #tpu.pipeline_mode<synchronous>, transform_indices = @transform_4, window_bounds = array<i64: 1, 1280>}, {pipeline_mode = #tpu.pipeline_mode<synchronous>, transform_indices = @transform_5, window_bounds = array<i64: 1280, 1024>}, {pipeline_mode = #tpu.pipeline_mode<synchronous>, transform_indices = @transform_6, window_bounds = array<i64: 1, 1024>}, {transform_indices = @transform_7, window_bounds = array<i64: 8, 1024>}]} {
    %c0 = arith.constant 0 : index
    %c0_0 = arith.constant 0 : index
    %c0_1 = arith.constant 0 : index
    %0 = vector.load %arg1[%c0, %c0_0, %c0_1] : memref<8x256x32xf32, #tpu.memory_space<vmem>>, vector<8x256x32xf32>
    %1 = vector.shape_cast %0 : vector<8x256x32xf32> to vector<2048x32xf32>
    %c0_2 = arith.constant 0 : index
    %c0_3 = arith.constant 0 : index
    %2 = vector.load %arg2[%c0_2, %c0_3] : memref<32x32xf32, #tpu.memory_space<vmem>>, vector<32x32xf32>
    %cst = arith.constant dense<0.000000e+00> : vector<2048x32xf32>
    %3 = tpu.matmul %1, %2, %cst {dimension_numbers = #tpu.dot_dimension_numbers<[1], [0], [0], [1], [0, 0, 1, 1], [], []>} : vector<2048x32xf32>, vector<32x32xf32>, vector<2048x32xf32> -> vector<2048x32xf32>
    %c0_4 = arith.constant 0 : index
    %c0_5 = arith.constant 0 : index
    %4 = vector.load %arg3[%c0_4, %c0_5] : memref<1x32xf32, #tpu.memory_space<vmem>>, vector<1x32xf32>
    %5 = vector.broadcast %4 : vector<1x32xf32> to vector<2048x32xf32>
    %6 = arith.addf %3, %5 : vector<2048x32xf32>
    %cst_6 = arith.constant 0.000000e+00 : f32
    %cst_7 = arith.constant 6.000000e+00 : f32
    %7 = vector.broadcast %cst_6 : f32 to vector<2048x32xf32>
    %8 = arith.maximumf %7, %6 : vector<2048x32xf32>
    %9 = vector.broadcast %cst_7 : f32 to vector<2048x32xf32>
    %10 = arith.minimumf %9, %8 : vector<2048x32xf32>
    %11 = vector.shape_cast %10 : vector<2048x32xf32> to vector<8x256x32xf32>
    %cst_8 = arith.constant dense<0.000000e+00> : vector<8x32xf32>
    %12 = vector.multi_reduction <add>, %11, %cst_8 [1] : vector<8x256x32xf32> to vector<8x32xf32>
    %cst_9 = arith.constant 3.906250e-03 : f32
    %13 = vector.broadcast %cst_9 : f32 to vector<8x32xf32>
    %14 = arith.mulf %12, %13 : vector<8x32xf32>
    %c0_10 = arith.constant 0 : index
    %c0_11 = arith.constant 0 : index
    %15 = vector.load %arg4[%c0_10, %c0_11] : memref<32x1280xf32, #tpu.memory_space<vmem>>, vector<32x1280xf32>
    %cst_12 = arith.constant dense<0.000000e+00> : vector<8x1280xf32>
    %16 = tpu.matmul %14, %15, %cst_12 {dimension_numbers = #tpu.dot_dimension_numbers<[1], [0], [0], [1], [0, 0, 1, 1], [], []>} : vector<8x32xf32>, vector<32x1280xf32>, vector<8x1280xf32> -> vector<8x1280xf32>
    %c0_13 = arith.constant 0 : index
    %c0_14 = arith.constant 0 : index
    %17 = vector.load %arg5[%c0_13, %c0_14] : memref<1x1280xf32, #tpu.memory_space<vmem>>, vector<1x1280xf32>
    %18 = vector.broadcast %17 : vector<1x1280xf32> to vector<8x1280xf32>
    %19 = arith.addf %16, %18 : vector<8x1280xf32>
    %cst_15 = arith.constant 0.000000e+00 : f32
    %cst_16 = arith.constant 6.000000e+00 : f32
    %20 = vector.broadcast %cst_15 : f32 to vector<8x1280xf32>
    %21 = arith.maximumf %20, %19 : vector<8x1280xf32>
    %22 = vector.broadcast %cst_16 : f32 to vector<8x1280xf32>
    %23 = arith.minimumf %22, %21 : vector<8x1280xf32>
    %24 = arith.truncf %23 : vector<8x1280xf32> to vector<8x1280xbf16>
    %c0_17 = arith.constant 0 : index
    %c0_18 = arith.constant 0 : index
    %25 = vector.load %arg6[%c0_17, %c0_18] : memref<1280x1024xbf16, #tpu.memory_space<vmem>>, vector<1280x1024xbf16>
    %cst_19 = arith.constant dense<0.000000e+00> : vector<8x1024xf32>
    %26 = tpu.matmul %24, %25, %cst_19 {dimension_numbers = #tpu.dot_dimension_numbers<[1], [0], [0], [1], [0, 0, 1, 1], [], []>} : vector<8x1280xbf16>, vector<1280x1024xbf16>, vector<8x1024xf32> -> vector<8x1024xf32>
    %c0_20 = arith.constant 0 : index
    %c0_21 = arith.constant 0 : index
    %27 = vector.load %arg7[%c0_20, %c0_21] : memref<1x1024xf32, #tpu.memory_space<vmem>>, vector<1x1024xf32>
    %28 = vector.broadcast %27 : vector<1x1024xf32> to vector<8x1024xf32>
    %29 = arith.addf %26, %28 : vector<8x1024xf32>
    %c0_22 = arith.constant 0 : index
    %c0_23 = arith.constant 0 : index
    %30 = vector.load %arg8[%c0_22, %c0_23] : memref<8x1024xf32, #tpu.memory_space<vmem>>, vector<8x1024xf32>
    tpu.vector_store %arg8[%c0_22, %c0_23], %29 {strides = array<i32>} : memref<8x1024xf32, #tpu.memory_space<vmem>>, vector<8x1024xf32>,
    return
  }
  func.func @transform_0(%arg0: i32) -> (i32, i32, i32) {
    %c0_i32 = arith.constant 0 : i32
    %c0_i32_0 = arith.constant 0 : i32
    %c0_i32_1 = arith.constant 0 : i32
    return %arg0, %c0_i32, %c0_i32_0 : i32, i32, i32
  }
  func.func @transform_1(%arg0: i32) -> (i32, i32) {
    %c0_i32 = arith.constant 0 : i32
    %c0_i32_0 = arith.constant 0 : i32
    %c0_i32_1 = arith.constant 0 : i32
    return %c0_i32, %c0_i32_0 : i32, i32
  }
  func.func @transform_2(%arg0: i32) -> (i32, i32) {
    %c0_i32 = arith.constant 0 : i32
    %c0_i32_0 = arith.constant 0 : i32
    %c0_i32_1 = arith.constant 0 : i32
    return %c0_i32, %c0_i32_0 : i32, i32
  }
  func.func @transform_3(%arg0: i32) -> (i32, i32) {
    %c0_i32 = arith.constant 0 : i32
    %c0_i32_0 = arith.constant 0 : i32
    %c0_i32_1 = arith.constant 0 : i32
    return %c0_i32, %c0_i32_0 : i32, i32
  }
  func.func @transform_4(%arg0: i32) -> (i32, i32) {
    %c0_i32 = arith.constant 0 : i32
    %c0_i32_0 = arith.constant 0 : i32
    %c0_i32_1 = arith.constant 0 : i32
    return %c0_i32, %c0_i32_0 : i32, i32
  }
  func.func @transform_5(%arg0: i32) -> (i32, i32) {
    %c0_i32 = arith.constant 0 : i32
    %c0_i32_0 = arith.constant 0 : i32
    %c0_i32_1 = arith.constant 0 : i32
    return %c0_i32, %c0_i32_0 : i32, i32
  }
  func.func @transform_6(%arg0: i32) -> (i32, i32) {
    %c0_i32 = arith.constant 0 : i32
    %c0_i32_0 = arith.constant 0 : i32
    %c0_i32_1 = arith.constant 0 : i32
    return %c0_i32, %c0_i32_0 : i32, i32
  }
  func.func @transform_7(%arg0: i32) -> (i32, i32) {
    %c0_i32 = arith.constant 0 : i32
    %c0_i32_0 = arith.constant 0 : i32
    return %arg0, %c0_i32 : i32, i32
  }
}

module attributes {stable_mosaic.version = 11 : i64} {
  func.func @lstm_fc_kernel(%arg0: i32, %arg1: memref<4x2x1024xf32, #tpu.memory_space<vmem>>, %arg2: memref<256x1024xbf16, #tpu.memory_space<vmem>>, %arg3: memref<256x2xf32, #tpu.memory_space<vmem>>, %arg4: memref<1x2xf32, #tpu.memory_space<vmem>>, %arg5: memref<2x2xf32, #tpu.memory_space<vmem>>, %arg6: memref<2x256xf32, #tpu.memory_space<vmem>>, %arg7: memref<2x256xf32, #tpu.memory_space<vmem>>) attributes {dimension_semantics = [#tpu.dimension_semantics<arbitrary>], iteration_bounds = array<i64: 1>, scalar_prefetch = 0 : i64, scratch_operands = 2 : i64, tpu.core_type = #tpu.core_type<tc>, window_params = [{transform_indices = @transform_0, window_bounds = array<i64: 4, 2, 1024>}, {pipeline_mode = #tpu.pipeline_mode<synchronous>, transform_indices = @transform_1, window_bounds = array<i64: 256, 1024>}, {pipeline_mode = #tpu.pipeline_mode<synchronous>, transform_indices = @transform_2, window_bounds = array<i64: 256, 2>}, {pipeline_mode = #tpu.pipeline_mode<synchronous>, transform_indices = @transform_3, window_bounds = array<i64: 1, 2>}, {pipeline_mode = #tpu.pipeline_mode<synchronous>, transform_indices = @transform_4, window_bounds = array<i64: 2, 2>}]} {
    %c0_i32 = arith.constant 0 : i32
    %0 = arith.cmpi eq, %arg0, %c0_i32 : i32
    %1 = arith.extui %0 : i1 to i32
    %c0_i32_0 = arith.constant 0 : i32
    %2 = arith.cmpi ne, %1, %c0_i32_0 : i32
    scf.if %2 {
      %cst_66 = arith.constant 0.000000e+00 : f32
      %146 = vector.broadcast %cst_66 : f32 to vector<2x256xf32>
      %c0_67 = arith.constant 0 : index
      %c0_68 = arith.constant 0 : index
      %147 = vector.load %arg6[%c0_67, %c0_68] : memref<2x256xf32, #tpu.memory_space<vmem>>, vector<2x256xf32>
      tpu.vector_store %arg6[%c0_67, %c0_68], %146 {strides = array<i32>} : memref<2x256xf32, #tpu.memory_space<vmem>>, vector<2x256xf32>,
      %cst_69 = arith.constant 0.000000e+00 : f32
      %148 = vector.broadcast %cst_69 : f32 to vector<2x256xf32>
      %c0_70 = arith.constant 0 : index
      %c0_71 = arith.constant 0 : index
      %149 = vector.load %arg7[%c0_70, %c0_71] : memref<2x256xf32, #tpu.memory_space<vmem>>, vector<2x256xf32>
      tpu.vector_store %arg7[%c0_70, %c0_71], %148 {strides = array<i32>} : memref<2x256xf32, #tpu.memory_space<vmem>>, vector<2x256xf32>,
    } else {
    }
    %c0 = arith.constant 0 : index
    %c0_1 = arith.constant 0 : index
    %c0_2 = arith.constant 0 : index
    %3 = vector.load %arg1[%c0, %c0_1, %c0_2] : memref<4x2x1024xf32, #tpu.memory_space<vmem>>, vector<1x2x1024xf32>
    %4 = vector.shape_cast %3 : vector<1x2x1024xf32> to vector<2x1024xf32>
    %c0_3 = arith.constant 0 : index
    %c0_4 = arith.constant 0 : index
    %5 = vector.load %arg6[%c0_3, %c0_4] : memref<2x256xf32, #tpu.memory_space<vmem>>, vector<2x256xf32>
    %6 = arith.truncf %5 : vector<2x256xf32> to vector<2x256xbf16>
    %c0_5 = arith.constant 0 : index
    %c0_6 = arith.constant 0 : index
    %7 = vector.load %arg2[%c0_5, %c0_6] : memref<256x1024xbf16, #tpu.memory_space<vmem>>, vector<256x1024xbf16>
    %cst = arith.constant dense<0.000000e+00> : vector<2x1024xf32>
    %8 = tpu.matmul %6, %7, %cst {dimension_numbers = #tpu.dot_dimension_numbers<[1], [0], [0], [1], [0, 0, 1, 1], [], []>} : vector<2x256xbf16>, vector<256x1024xbf16>, vector<2x1024xf32> -> vector<2x1024xf32>
    %9 = arith.addf %4, %8 : vector<2x1024xf32>
    %10 = vector.extract_strided_slice %9 {offsets = [0, 0], sizes = [2, 256], strides = [1, 1]} : vector<2x1024xf32> to vector<2x256xf32>
    %11 = arith.negf %10 : vector<2x256xf32>
    %12 = math.exp %11 : vector<2x256xf32>
    %cst_7 = arith.constant 1.000000e+00 : f32
    %13 = vector.broadcast %cst_7 : f32 to vector<2x256xf32>
    %14 = arith.addf %13, %12 : vector<2x256xf32>
    %15 = arith.divf %13, %14 : vector<2x256xf32>
    %16 = vector.extract_strided_slice %9 {offsets = [0, 256], sizes = [2, 256], strides = [1, 1]} : vector<2x1024xf32> to vector<2x256xf32>
    %17 = arith.negf %16 : vector<2x256xf32>
    %18 = math.exp %17 : vector<2x256xf32>
    %cst_8 = arith.constant 1.000000e+00 : f32
    %19 = vector.broadcast %cst_8 : f32 to vector<2x256xf32>
    %20 = arith.addf %19, %18 : vector<2x256xf32>
    %21 = arith.divf %19, %20 : vector<2x256xf32>
    %22 = vector.extract_strided_slice %9 {offsets = [0, 512], sizes = [2, 256], strides = [1, 1]} : vector<2x1024xf32> to vector<2x256xf32>
    %23 = math.tanh %22 : vector<2x256xf32>
    %24 = vector.extract_strided_slice %9 {offsets = [0, 768], sizes = [2, 256], strides = [1, 1]} : vector<2x1024xf32> to vector<2x256xf32>
    %25 = arith.negf %24 : vector<2x256xf32>
    %26 = math.exp %25 : vector<2x256xf32>
    %cst_9 = arith.constant 1.000000e+00 : f32
    %27 = vector.broadcast %cst_9 : f32 to vector<2x256xf32>
    %28 = arith.addf %27, %26 : vector<2x256xf32>
    %29 = arith.divf %27, %28 : vector<2x256xf32>
    %c0_10 = arith.constant 0 : index
    %c0_11 = arith.constant 0 : index
    %30 = vector.load %arg7[%c0_10, %c0_11] : memref<2x256xf32, #tpu.memory_space<vmem>>, vector<2x256xf32>
    %31 = arith.mulf %21, %30 : vector<2x256xf32>
    %32 = arith.mulf %15, %23 : vector<2x256xf32>
    %33 = arith.addf %31, %32 : vector<2x256xf32>
    %34 = math.tanh %33 : vector<2x256xf32>
    %35 = arith.mulf %29, %34 : vector<2x256xf32>
    %c0_12 = arith.constant 0 : index
    %c0_13 = arith.constant 0 : index
    %36 = vector.load %arg7[%c0_12, %c0_13] : memref<2x256xf32, #tpu.memory_space<vmem>>, vector<2x256xf32>
    tpu.vector_store %arg7[%c0_12, %c0_13], %33 {strides = array<i32>} : memref<2x256xf32, #tpu.memory_space<vmem>>, vector<2x256xf32>,
    %c0_14 = arith.constant 0 : index
    %c0_15 = arith.constant 0 : index
    %37 = vector.load %arg6[%c0_14, %c0_15] : memref<2x256xf32, #tpu.memory_space<vmem>>, vector<2x256xf32>
    tpu.vector_store %arg6[%c0_14, %c0_15], %35 {strides = array<i32>} : memref<2x256xf32, #tpu.memory_space<vmem>>, vector<2x256xf32>,
    %c1 = arith.constant 1 : index
    %c0_16 = arith.constant 0 : index
    %c0_17 = arith.constant 0 : index
    %38 = vector.load %arg1[%c1, %c0_16, %c0_17] : memref<4x2x1024xf32, #tpu.memory_space<vmem>>, vector<1x2x1024xf32>
    %39 = vector.shape_cast %38 : vector<1x2x1024xf32> to vector<2x1024xf32>
    %c0_18 = arith.constant 0 : index
    %c0_19 = arith.constant 0 : index
    %40 = vector.load %arg6[%c0_18, %c0_19] : memref<2x256xf32, #tpu.memory_space<vmem>>, vector<2x256xf32>
    %41 = arith.truncf %40 : vector<2x256xf32> to vector<2x256xbf16>
    %c0_20 = arith.constant 0 : index
    %c0_21 = arith.constant 0 : index
    %42 = vector.load %arg2[%c0_20, %c0_21] : memref<256x1024xbf16, #tpu.memory_space<vmem>>, vector<256x1024xbf16>
    %cst_22 = arith.constant dense<0.000000e+00> : vector<2x1024xf32>
    %43 = tpu.matmul %41, %42, %cst_22 {dimension_numbers = #tpu.dot_dimension_numbers<[1], [0], [0], [1], [0, 0, 1, 1], [], []>} : vector<2x256xbf16>, vector<256x1024xbf16>, vector<2x1024xf32> -> vector<2x1024xf32>
    %44 = arith.addf %39, %43 : vector<2x1024xf32>
    %45 = vector.extract_strided_slice %44 {offsets = [0, 0], sizes = [2, 256], strides = [1, 1]} : vector<2x1024xf32> to vector<2x256xf32>
    %46 = arith.negf %45 : vector<2x256xf32>
    %47 = math.exp %46 : vector<2x256xf32>
    %cst_23 = arith.constant 1.000000e+00 : f32
    %48 = vector.broadcast %cst_23 : f32 to vector<2x256xf32>
    %49 = arith.addf %48, %47 : vector<2x256xf32>
    %50 = arith.divf %48, %49 : vector<2x256xf32>
    %51 = vector.extract_strided_slice %44 {offsets = [0, 256], sizes = [2, 256], strides = [1, 1]} : vector<2x1024xf32> to vector<2x256xf32>
    %52 = arith.negf %51 : vector<2x256xf32>
    %53 = math.exp %52 : vector<2x256xf32>
    %cst_24 = arith.constant 1.000000e+00 : f32
    %54 = vector.broadcast %cst_24 : f32 to vector<2x256xf32>
    %55 = arith.addf %54, %53 : vector<2x256xf32>
    %56 = arith.divf %54, %55 : vector<2x256xf32>
    %57 = vector.extract_strided_slice %44 {offsets = [0, 512], sizes = [2, 256], strides = [1, 1]} : vector<2x1024xf32> to vector<2x256xf32>
    %58 = math.tanh %57 : vector<2x256xf32>
    %59 = vector.extract_strided_slice %44 {offsets = [0, 768], sizes = [2, 256], strides = [1, 1]} : vector<2x1024xf32> to vector<2x256xf32>
    %60 = arith.negf %59 : vector<2x256xf32>
    %61 = math.exp %60 : vector<2x256xf32>
    %cst_25 = arith.constant 1.000000e+00 : f32
    %62 = vector.broadcast %cst_25 : f32 to vector<2x256xf32>
    %63 = arith.addf %62, %61 : vector<2x256xf32>
    %64 = arith.divf %62, %63 : vector<2x256xf32>
    %c0_26 = arith.constant 0 : index
    %c0_27 = arith.constant 0 : index
    %65 = vector.load %arg7[%c0_26, %c0_27] : memref<2x256xf32, #tpu.memory_space<vmem>>, vector<2x256xf32>
    %66 = arith.mulf %56, %65 : vector<2x256xf32>
    %67 = arith.mulf %50, %58 : vector<2x256xf32>
    %68 = arith.addf %66, %67 : vector<2x256xf32>
    %69 = math.tanh %68 : vector<2x256xf32>
    %70 = arith.mulf %64, %69 : vector<2x256xf32>
    %c0_28 = arith.constant 0 : index
    %c0_29 = arith.constant 0 : index
    %71 = vector.load %arg7[%c0_28, %c0_29] : memref<2x256xf32, #tpu.memory_space<vmem>>, vector<2x256xf32>
    tpu.vector_store %arg7[%c0_28, %c0_29], %68 {strides = array<i32>} : memref<2x256xf32, #tpu.memory_space<vmem>>, vector<2x256xf32>,
    %c0_30 = arith.constant 0 : index
    %c0_31 = arith.constant 0 : index
    %72 = vector.load %arg6[%c0_30, %c0_31] : memref<2x256xf32, #tpu.memory_space<vmem>>, vector<2x256xf32>
    tpu.vector_store %arg6[%c0_30, %c0_31], %70 {strides = array<i32>} : memref<2x256xf32, #tpu.memory_space<vmem>>, vector<2x256xf32>,
    %c2 = arith.constant 2 : index
    %c0_32 = arith.constant 0 : index
    %c0_33 = arith.constant 0 : index
    %73 = vector.load %arg1[%c2, %c0_32, %c0_33] : memref<4x2x1024xf32, #tpu.memory_space<vmem>>, vector<1x2x1024xf32>
    %74 = vector.shape_cast %73 : vector<1x2x1024xf32> to vector<2x1024xf32>
    %c0_34 = arith.constant 0 : index
    %c0_35 = arith.constant 0 : index
    %75 = vector.load %arg6[%c0_34, %c0_35] : memref<2x256xf32, #tpu.memory_space<vmem>>, vector<2x256xf32>
    %76 = arith.truncf %75 : vector<2x256xf32> to vector<2x256xbf16>
    %c0_36 = arith.constant 0 : index
    %c0_37 = arith.constant 0 : index
    %77 = vector.load %arg2[%c0_36, %c0_37] : memref<256x1024xbf16, #tpu.memory_space<vmem>>, vector<256x1024xbf16>
    %cst_38 = arith.constant dense<0.000000e+00> : vector<2x1024xf32>
    %78 = tpu.matmul %76, %77, %cst_38 {dimension_numbers = #tpu.dot_dimension_numbers<[1], [0], [0], [1], [0, 0, 1, 1], [], []>} : vector<2x256xbf16>, vector<256x1024xbf16>, vector<2x1024xf32> -> vector<2x1024xf32>
    %79 = arith.addf %74, %78 : vector<2x1024xf32>
    %80 = vector.extract_strided_slice %79 {offsets = [0, 0], sizes = [2, 256], strides = [1, 1]} : vector<2x1024xf32> to vector<2x256xf32>
    %81 = arith.negf %80 : vector<2x256xf32>
    %82 = math.exp %81 : vector<2x256xf32>
    %cst_39 = arith.constant 1.000000e+00 : f32
    %83 = vector.broadcast %cst_39 : f32 to vector<2x256xf32>
    %84 = arith.addf %83, %82 : vector<2x256xf32>
    %85 = arith.divf %83, %84 : vector<2x256xf32>
    %86 = vector.extract_strided_slice %79 {offsets = [0, 256], sizes = [2, 256], strides = [1, 1]} : vector<2x1024xf32> to vector<2x256xf32>
    %87 = arith.negf %86 : vector<2x256xf32>
    %88 = math.exp %87 : vector<2x256xf32>
    %cst_40 = arith.constant 1.000000e+00 : f32
    %89 = vector.broadcast %cst_40 : f32 to vector<2x256xf32>
    %90 = arith.addf %89, %88 : vector<2x256xf32>
    %91 = arith.divf %89, %90 : vector<2x256xf32>
    %92 = vector.extract_strided_slice %79 {offsets = [0, 512], sizes = [2, 256], strides = [1, 1]} : vector<2x1024xf32> to vector<2x256xf32>
    %93 = math.tanh %92 : vector<2x256xf32>
    %94 = vector.extract_strided_slice %79 {offsets = [0, 768], sizes = [2, 256], strides = [1, 1]} : vector<2x1024xf32> to vector<2x256xf32>
    %95 = arith.negf %94 : vector<2x256xf32>
    %96 = math.exp %95 : vector<2x256xf32>
    %cst_41 = arith.constant 1.000000e+00 : f32
    %97 = vector.broadcast %cst_41 : f32 to vector<2x256xf32>
    %98 = arith.addf %97, %96 : vector<2x256xf32>
    %99 = arith.divf %97, %98 : vector<2x256xf32>
    %c0_42 = arith.constant 0 : index
    %c0_43 = arith.constant 0 : index
    %100 = vector.load %arg7[%c0_42, %c0_43] : memref<2x256xf32, #tpu.memory_space<vmem>>, vector<2x256xf32>
    %101 = arith.mulf %91, %100 : vector<2x256xf32>
    %102 = arith.mulf %85, %93 : vector<2x256xf32>
    %103 = arith.addf %101, %102 : vector<2x256xf32>
    %104 = math.tanh %103 : vector<2x256xf32>
    %105 = arith.mulf %99, %104 : vector<2x256xf32>
    %c0_44 = arith.constant 0 : index
    %c0_45 = arith.constant 0 : index
    %106 = vector.load %arg7[%c0_44, %c0_45] : memref<2x256xf32, #tpu.memory_space<vmem>>, vector<2x256xf32>
    tpu.vector_store %arg7[%c0_44, %c0_45], %103 {strides = array<i32>} : memref<2x256xf32, #tpu.memory_space<vmem>>, vector<2x256xf32>,
    %c0_46 = arith.constant 0 : index
    %c0_47 = arith.constant 0 : index
    %107 = vector.load %arg6[%c0_46, %c0_47] : memref<2x256xf32, #tpu.memory_space<vmem>>, vector<2x256xf32>
    tpu.vector_store %arg6[%c0_46, %c0_47], %105 {strides = array<i32>} : memref<2x256xf32, #tpu.memory_space<vmem>>, vector<2x256xf32>,
    %c3 = arith.constant 3 : index
    %c0_48 = arith.constant 0 : index
    %c0_49 = arith.constant 0 : index
    %108 = vector.load %arg1[%c3, %c0_48, %c0_49] : memref<4x2x1024xf32, #tpu.memory_space<vmem>>, vector<1x2x1024xf32>
    %109 = vector.shape_cast %108 : vector<1x2x1024xf32> to vector<2x1024xf32>
    %c0_50 = arith.constant 0 : index
    %c0_51 = arith.constant 0 : index
    %110 = vector.load %arg6[%c0_50, %c0_51] : memref<2x256xf32, #tpu.memory_space<vmem>>, vector<2x256xf32>
    %111 = arith.truncf %110 : vector<2x256xf32> to vector<2x256xbf16>
    %c0_52 = arith.constant 0 : index
    %c0_53 = arith.constant 0 : index
    %112 = vector.load %arg2[%c0_52, %c0_53] : memref<256x1024xbf16, #tpu.memory_space<vmem>>, vector<256x1024xbf16>
    %cst_54 = arith.constant dense<0.000000e+00> : vector<2x1024xf32>
    %113 = tpu.matmul %111, %112, %cst_54 {dimension_numbers = #tpu.dot_dimension_numbers<[1], [0], [0], [1], [0, 0, 1, 1], [], []>} : vector<2x256xbf16>, vector<256x1024xbf16>, vector<2x1024xf32> -> vector<2x1024xf32>
    %114 = arith.addf %109, %113 : vector<2x1024xf32>
    %115 = vector.extract_strided_slice %114 {offsets = [0, 0], sizes = [2, 256], strides = [1, 1]} : vector<2x1024xf32> to vector<2x256xf32>
    %116 = arith.negf %115 : vector<2x256xf32>
    %117 = math.exp %116 : vector<2x256xf32>
    %cst_55 = arith.constant 1.000000e+00 : f32
    %118 = vector.broadcast %cst_55 : f32 to vector<2x256xf32>
    %119 = arith.addf %118, %117 : vector<2x256xf32>
    %120 = arith.divf %118, %119 : vector<2x256xf32>
    %121 = vector.extract_strided_slice %114 {offsets = [0, 256], sizes = [2, 256], strides = [1, 1]} : vector<2x1024xf32> to vector<2x256xf32>
    %122 = arith.negf %121 : vector<2x256xf32>
    %123 = math.exp %122 : vector<2x256xf32>
    %cst_56 = arith.constant 1.000000e+00 : f32
    %124 = vector.broadcast %cst_56 : f32 to vector<2x256xf32>
    %125 = arith.addf %124, %123 : vector<2x256xf32>
    %126 = arith.divf %124, %125 : vector<2x256xf32>
    %127 = vector.extract_strided_slice %114 {offsets = [0, 512], sizes = [2, 256], strides = [1, 1]} : vector<2x1024xf32> to vector<2x256xf32>
    %128 = math.tanh %127 : vector<2x256xf32>
    %129 = vector.extract_strided_slice %114 {offsets = [0, 768], sizes = [2, 256], strides = [1, 1]} : vector<2x1024xf32> to vector<2x256xf32>
    %130 = arith.negf %129 : vector<2x256xf32>
    %131 = math.exp %130 : vector<2x256xf32>
    %cst_57 = arith.constant 1.000000e+00 : f32
    %132 = vector.broadcast %cst_57 : f32 to vector<2x256xf32>
    %133 = arith.addf %132, %131 : vector<2x256xf32>
    %134 = arith.divf %132, %133 : vector<2x256xf32>
    %c0_58 = arith.constant 0 : index
    %c0_59 = arith.constant 0 : index
    %135 = vector.load %arg7[%c0_58, %c0_59] : memref<2x256xf32, #tpu.memory_space<vmem>>, vector<2x256xf32>
    %136 = arith.mulf %126, %135 : vector<2x256xf32>
    %137 = arith.mulf %120, %128 : vector<2x256xf32>
    %138 = arith.addf %136, %137 : vector<2x256xf32>
    %139 = math.tanh %138 : vector<2x256xf32>
    %140 = arith.mulf %134, %139 : vector<2x256xf32>
    %c0_60 = arith.constant 0 : index
    %c0_61 = arith.constant 0 : index
    %141 = vector.load %arg7[%c0_60, %c0_61] : memref<2x256xf32, #tpu.memory_space<vmem>>, vector<2x256xf32>
    tpu.vector_store %arg7[%c0_60, %c0_61], %138 {strides = array<i32>} : memref<2x256xf32, #tpu.memory_space<vmem>>, vector<2x256xf32>,
    %c0_62 = arith.constant 0 : index
    %c0_63 = arith.constant 0 : index
    %142 = vector.load %arg6[%c0_62, %c0_63] : memref<2x256xf32, #tpu.memory_space<vmem>>, vector<2x256xf32>
    tpu.vector_store %arg6[%c0_62, %c0_63], %140 {strides = array<i32>} : memref<2x256xf32, #tpu.memory_space<vmem>>, vector<2x256xf32>,
    %c0_i32_64 = arith.constant 0 : i32
    %143 = arith.cmpi eq, %arg0, %c0_i32_64 : i32
    %144 = arith.extui %143 : i1 to i32
    %c0_i32_65 = arith.constant 0 : i32
    %145 = arith.cmpi ne, %144, %c0_i32_65 : i32
    scf.if %145 {
      %c0_66 = arith.constant 0 : index
      %c0_67 = arith.constant 0 : index
      %146 = vector.load %arg6[%c0_66, %c0_67] : memref<2x256xf32, #tpu.memory_space<vmem>>, vector<2x256xf32>
      %c0_68 = arith.constant 0 : index
      %c0_69 = arith.constant 0 : index
      %147 = vector.load %arg3[%c0_68, %c0_69] : memref<256x2xf32, #tpu.memory_space<vmem>>, vector<256x2xf32>
      %cst_70 = arith.constant dense<0.000000e+00> : vector<2x2xf32>
      %148 = tpu.matmul %146, %147, %cst_70 {dimension_numbers = #tpu.dot_dimension_numbers<[1], [0], [0], [1], [0, 0, 1, 1], [], []>} : vector<2x256xf32>, vector<256x2xf32>, vector<2x2xf32> -> vector<2x2xf32>
      %c0_71 = arith.constant 0 : index
      %c0_72 = arith.constant 0 : index
      %149 = vector.load %arg4[%c0_71, %c0_72] : memref<1x2xf32, #tpu.memory_space<vmem>>, vector<1x2xf32>
      %150 = vector.broadcast %149 : vector<1x2xf32> to vector<2x2xf32>
      %151 = arith.addf %148, %150 : vector<2x2xf32>
      %c0_73 = arith.constant 0 : index
      %c0_74 = arith.constant 0 : index
      %152 = vector.load %arg5[%c0_73, %c0_74] : memref<2x2xf32, #tpu.memory_space<vmem>>, vector<2x2xf32>
      tpu.vector_store %arg5[%c0_73, %c0_74], %151 {strides = array<i32>} : memref<2x2xf32, #tpu.memory_space<vmem>>, vector<2x2xf32>,
    } else {
    }
    return
  }
  func.func @transform_0(%arg0: i32) -> (i32, i32, i32) {
    %c0_i32 = arith.constant 0 : i32
    %c0_i32_0 = arith.constant 0 : i32
    %c0_i32_1 = arith.constant 0 : i32
    return %arg0, %c0_i32, %c0_i32_0 : i32, i32, i32
  }
  func.func @transform_1(%arg0: i32) -> (i32, i32) {
    %c0_i32 = arith.constant 0 : i32
    %c0_i32_0 = arith.constant 0 : i32
    %c0_i32_1 = arith.constant 0 : i32
    return %c0_i32, %c0_i32_0 : i32, i32
  }
  func.func @transform_2(%arg0: i32) -> (i32, i32) {
    %c0_i32 = arith.constant 0 : i32
    %c0_i32_0 = arith.constant 0 : i32
    %c0_i32_1 = arith.constant 0 : i32
    return %c0_i32, %c0_i32_0 : i32, i32
  }
  func.func @transform_3(%arg0: i32) -> (i32, i32) {
    %c0_i32 = arith.constant 0 : i32
    %c0_i32_0 = arith.constant 0 : i32
    %c0_i32_1 = arith.constant 0 : i32
    return %c0_i32, %c0_i32_0 : i32, i32
  }
  func.func @transform_4(%arg0: i32) -> (i32, i32) {
    %c0_i32 = arith.constant 0 : i32
    %c0_i32_0 = arith.constant 0 : i32
    %c0_i32_1 = arith.constant 0 : i32
    return %c0_i32, %c0_i32_0 : i32, i32
  }
}

</mosaic_0001>

<bundles_post_ra>
// kernel: deepfake_detector_forward.3
= control target key start
LH: loop header
LB: loop body
LE: loop exit
PB: predicated region body
PF: predicated region fallthrough
CT: control target
= control target key end

     0   :  { %v4969_v8 = vmov 0.0   ;;  %s6978_s0 = inlined_call_operand.vmem [shape: f32[4,2,1024], index: 0, kind: input, shape index: {}]   ;;  %s6979_s1 = inlined_call_operand.vmem [shape: bf16[256,1024], index: 1, kind: input, shape index: {}]   ;;  %s6980_s2 = inlined_call_operand.vmem [shape: f32[256,2], index: 2, kind: input, shape index: {}]   ;;  %s6981_s3 = inlined_call_operand.vmem [shape: f32[1,2], index: 3, kind: input, shape index: {}]   ;;  %s6982_s4 = inlined_call_operand.hbm [shape: f32[2,2], index: 4, kind: output, shape index: {}]  }
   0x1   :  { %v40_v0 = vld [vmem:[%s6979_s1] sm:$0xff]  ;;  %v41_v2 = vld [vmem:[%s6979_s1 + $0x8] sm:$0xff]  ;;  %22 = vst [vmem:[#allocation2] sm:$0xf] %v4969_v8  ;;  %23 = vst [vmem:[#allocation3] sm:$0xf] %v4969_v8 }
   0x2   :  { %v44_v1 = vld [vmem:[%s6979_s1 + $0x20] sm:$0xff]  ;;  %v45_v4 = vld [vmem:[%s6979_s1 + $0x28] sm:$0xff] }
   0x3   :  { %v5006_v3 = vcombine.high %v40_v0, %v44_v1  ;;  %v5011_v5 = vcombine.low %v40_v0, %v44_v1  ;;  %v48_v6 = vld [vmem:[%s6979_s1 + $0x40] sm:$0xff]  ;;  %v5019_v9 = vcombine.high %v41_v2, %v45_v4  ;;  %v5021_v10 = vcombine.low %v41_v2, %v45_v4  ;;  %v49_v12 = vld [vmem:[%s6979_s1 + $0x48] sm:$0xff] }
   0x4   :  { %v52_v7 = vld [vmem:[%s6979_s1 + $0x60] sm:$0xff]  ;;  %v53_v13 = vld [vmem:[%s6979_s1 + $0x68] sm:$0xff] }
   0x5   :  { %v5023_v11 = vcombine.high %v48_v6, %v52_v7  ;;  %v56_v14 = vld [vmem:[%s6979_s1 + $0x80] sm:$0xff]  ;;  %808 = vmatprep.subr.bf16.mxu0 %v5006_v3  ;;  %v5035_v15 = vcombine.high %v49_v12, %v53_v13  ;;  %v57_v17 = vld [vmem:[%s6979_s1 + $0x88] sm:$0xff]  ;;  %849 = vmatprep.subr.bf16.mxu1 %v5019_v9  ;;  %v5048_v19 = vcombine.low %v48_v6, %v52_v7 }
   0x6   :  { %v60_v16 = vld [vmem:[%s6979_s1 + $0xa0] sm:$0xff]  ;;  %v61_v18 = vld [vmem:[%s6979_s1 + $0xa8] sm:$0xff]  ;;  %809 = vmatpush1.bf16.msra.mxu0 %v5011_v5  ;;  %850 = vmatpush1.bf16.msra.mxu1 %v5021_v10  ;;  %v5052_v20 = vcombine.low %v49_v12, %v53_v13 }
   0x7   :  { %810 = vmatprep.subr.bf16.mxu0 %v5023_v11  ;;  %v5054_v21 = vcombine.high %v56_v14, %v60_v16  ;;  %851 = vmatprep.subr.bf16.mxu1 %v5035_v15  ;;  %v5057_v22 = vcombine.high %v57_v17, %v61_v18  ;;  %v64_v23 = vld [vmem:[%s6979_s1 + $0xc0] sm:$0xff]  ;;  %v65_v25 = vld [vmem:[%s6979_s1 + $0xc8] sm:$0xff]  ;;  %v5072_v27 = vcombine.low %v56_v14, %v60_v16 }
   0x8   :  { %v68_v24 = vld [vmem:[%s6979_s1 + $0xe0] sm:$0xff]  ;;  %v69_v26 = vld [vmem:[%s6979_s1 + $0xe8] sm:$0xff]  ;;  %v5076_v28 = vcombine.low %v57_v17, %v61_v18 }
   0x9   :  { %v5078_v29 = vcombine.high %v64_v23, %v68_v24  ;;  %v5081_v30 = vcombine.high %v65_v25, %v69_v26  ;;  %v72_v31 = vld [vmem:[%s6979_s1 + $0x100] sm:$0xff]  ;;  %v73_v33 = vld [vmem:[%s6979_s1 + $0x108] sm:$0xff]  ;;  %v5096_v35 = vcombine.low %v64_v23, %v68_v24  ;;  %v5100_v36 = vcombine.low %v65_v25, %v69_v26 }
   0xa   :  { %811 = vmatpush1.bf16.msra.mxu0 %v5048_v19  ;;  %852 = vmatpush1.bf16.msra.mxu1 %v5052_v20  ;;  %v76_v32 = vld [vmem:[%s6979_s1 + $0x120] sm:$0xff]  ;;  %v77_v34 = vld [vmem:[%s6979_s1 + $0x128] sm:$0xff] }
   0xb   :  { %812 = vmatprep.subr.bf16.mxu0 %v5054_v21  ;;  %853 = vmatprep.subr.bf16.mxu1 %v5057_v22  ;;  %v5102_v37 = vcombine.high %v72_v31, %v76_v32  ;;  %v5105_v38 = vcombine.high %v73_v33, %v77_v34  ;;  %v80_v39 = vld [vmem:[%s6979_s1 + $0x140] sm:$0xff]  ;;  %v81_v41 = vld [vmem:[%s6979_s1 + $0x148] sm:$0xff]  ;;  %v5120_v43 = vcombine.low %v72_v31, %v76_v32 }
   0xc   :  { %v84_v40 = vld [vmem:[%s6979_s1 + $0x160] sm:$0xff]  ;;  %v85_v42 = vld [vmem:[%s6979_s1 + $0x168] sm:$0xff]  ;;  %v5124_v44 = vcombine.low %v73_v33, %v77_v34 }
   0xd   :  { %v5126_v45 = vcombine.high %v80_v39, %v84_v40  ;;  %v5129_v46 = vcombine.high %v81_v41, %v85_v42  ;;  %v88_v47 = vld [vmem:[%s6979_s1 + $0x180] sm:$0xff]  ;;  %v89_v49 = vld [vmem:[%s6979_s1 + $0x188] sm:$0xff]  ;;  %v5144_v51 = vcombine.low %v80_v39, %v84_v40  ;;  %v5148_v52 = vcombine.low %v81_v41, %v85_v42 }
   0xe   :  { %813 = vmatpush1.bf16.msra.mxu0 %v5072_v27  ;;  %854 = vmatpush1.bf16.msra.mxu1 %v5076_v28  ;;  %v92_v48 = vld [vmem:[%s6979_s1 + $0x1a0] sm:$0xff]  ;;  %v93_v50 = vld [vmem:[%s6979_s1 + $0x1a8] sm:$0xff] }
   0xf   :  { %814 = vmatprep.subr.bf16.mxu0 %v5078_v29  ;;  %855 = vmatprep.subr.bf16.mxu1 %v5081_v30  ;;  %v5150_v53 = vcombine.high %v88_v47, %v92_v48  ;;  %v5152_v54 = vld.sshfl [vmem:[#allocation2] sm:$0x33 pattern:$0x76325410]  ;;  %v5155_v55 = vcombine.high %v89_v49, %v93_v50  ;;  %v97_v59 = vld [vmem:[%s6979_s1 + $0x1c8] sm:$0xff]  ;;  %v5172_v61 = vcombine.low %v88_v47, %v92_v48 }
  0x10   :  { %v96_v56 = vld [vmem:[%s6979_s1 + $0x1c0] sm:$0xff]  ;;  %v35_v58 = vcombine.high %v5152_v54, %v5152_v54  ;;  %v101_v60 = vld [vmem:[%s6979_s1 + $0x1e8] sm:$0xff]  ;;  %v5178_v63 = vcombine.low %v89_v49, %v93_v50 }
  0x11   :  { %v100_v57 = vld [vmem:[%s6979_s1 + $0x1e0] sm:$0xff]  ;;  %v5183_v1 = vcombine.high %v97_v59, %v101_v60  ;;  %v105_v6 = vld [vmem:[%s6979_s1 + $0x208] sm:$0xff]  ;;  %v5204_v12 = vcombine.low %v97_v59, %v101_v60 }
  0x12   :  { %815 = vmatpush1.bf16.msra.mxu0 %v5096_v35  ;;  %856 = vmatpush1.bf16.msra.mxu1 %v5100_v36  ;;  %v5174_v62 = vpack.c.bf16 %v35_v58, %v35_v58  ;;  %v5180_v0 = vcombine.high %v96_v56, %v100_v57  ;;  %v104_v2 = vld [vmem:[%s6979_s1 + $0x200] sm:$0xff]  ;;  %v109_v7 = vld [vmem:[%s6979_s1 + $0x228] sm:$0xff]  ;;  %v5200_v8 = vcombine.low %v96_v56, %v100_v57 }
  0x13   :  { %816 = vmatprep.subr.bf16.mxu0 %v5102_v37  ;;  %857 = vmatprep.subr.bf16.mxu1 %v5105_v38  ;;  %v108_v4 = vld [vmem:[%s6979_s1 + $0x220] sm:$0xff]  ;;  %v5209_v14 = vcombine.high %v105_v6, %v109_v7  ;;  %v113_v18 = vld [vmem:[%s6979_s1 + $0x248] sm:$0xff]  ;;  %v5228_v25 = vcombine.low %v105_v6, %v109_v7 }
  0x14   :  { %840 = vmatprep.mubr.bf16.mxu0 %v5174_v62  ;;  %881 = vmatprep.mubr.bf16.mxu1 %v5174_v62  ;;  %v5206_v13 = vcombine.high %v104_v2, %v108_v4  ;;  %v112_v16 = vld [vmem:[%s6979_s1 + $0x240] sm:$0xff]  ;;  %v117_v23 = vld [vmem:[%s6979_s1 + $0x268] sm:$0xff]  ;;  %v5224_v24 = vcombine.low %v104_v2, %v108_v4 }
  0x15   :  { %v116_v17 = vld [vmem:[%s6979_s1 + $0x260] sm:$0xff]  ;;  %v5233_v31 = vcombine.high %v113_v18, %v117_v23  ;;  %v121_v34 = vld [vmem:[%s6979_s1 + $0x288] sm:$0xff]  ;;  %v5252_v41 = vcombine.low %v113_v18, %v117_v23 }
  0x16   :  { %817 = vmatpush1.bf16.msra.mxu0 %v5120_v43  ;;  %858 = vmatpush1.bf16.msra.mxu1 %v5124_v44  ;;  %v5230_v26 = vcombine.high %v112_v16, %v116_v17  ;;  %v120_v32 = vld [vmem:[%s6979_s1 + $0x280] sm:$0xff]  ;;  %v125_v39 = vld [vmem:[%s6979_s1 + $0x2a8] sm:$0xff]  ;;  %v5248_v40 = vcombine.low %v112_v16, %v116_v17 }
  0x17   :  { %818 = vmatprep.subr.bf16.mxu0 %v5126_v45  ;;  %859 = vmatprep.subr.bf16.mxu1 %v5129_v46  ;;  %v124_v33 = vld [vmem:[%s6979_s1 + $0x2a0] sm:$0xff]  ;;  %v5257_v47 = vcombine.high %v121_v34, %v125_v39  ;;  %v129_v50 = vld [vmem:[%s6979_s1 + $0x2c8] sm:$0xff]  ;;  %v5276_v58 = vcombine.low %v121_v34, %v125_v39 }
  0x18   :  { %v5254_v42 = vcombine.high %v120_v32, %v124_v33  ;;  %v128_v48 = vld [vmem:[%s6979_s1 + $0x2c0] sm:$0xff]  ;;  %v133_v56 = vld [vmem:[%s6979_s1 + $0x2e8] sm:$0xff]  ;;  %v5272_v57 = vcombine.low %v120_v32, %v124_v33 }
  0x19   :  { %v132_v49 = vld [vmem:[%s6979_s1 + $0x2e0] sm:$0xff]  ;;  %v5281_v60 = vcombine.high %v129_v50, %v133_v56  ;;  %v137_v6 = vld [vmem:[%s6979_s1 + $0x308] sm:$0xff] }
  0x1a   :  { %819 = vmatpush1.bf16.msra.mxu0 %v5144_v51  ;;  %860 = vmatpush1.bf16.msra.mxu1 %v5148_v52  ;;  %v5278_v59 = vcombine.high %v128_v48, %v132_v49  ;;  %v136_v2 = vld [vmem:[%s6979_s1 + $0x300] sm:$0xff]  ;;  %v141_v7 = vld [vmem:[%s6979_s1 + $0x328] sm:$0xff] }
  0x1b   :  { %820 = vmatprep.subr.bf16.mxu0 %v5150_v53  ;;  %861 = vmatprep.subr.bf16.mxu1 %v5155_v55  ;;  %7129 = vst [vmem:[#allocation7_spill] sm:$0xff] %v5281_v60  ;;  %v140_v4 = vld [vmem:[%s6979_s1 + $0x320] sm:$0xff] }
  0x1e   :  { %821 = vmatpush1.bf16.msra.mxu0 %v5172_v61  ;;  %862 = vmatpush1.bf16.msra.mxu1 %v5178_v63 }
  0x1f   :  { %822 = vmatprep.subr.bf16.mxu0 %v5180_v0  ;;  %863 = vmatprep.subr.bf16.mxu1 %v5183_v1 }
  0x22   :  { %823 = vmatpush1.bf16.msra.mxu0 %v5200_v8  ;;  %864 = vmatpush1.bf16.msra.mxu1 %v5204_v12 }
  0x23   :  { %824 = vmatprep.subr.bf16.mxu0 %v5206_v13  ;;  %865 = vmatprep.subr.bf16.mxu1 %v5209_v14 }
  0x26   :  { %825 = vmatpush1.bf16.msra.mxu0 %v5224_v24  ;;  %866 = vmatpush1.bf16.msra.mxu1 %v5228_v25 }
  0x27   :  { %826 = vmatprep.subr.bf16.mxu0 %v5230_v26  ;;  %867 = vmatprep.subr.bf16.mxu1 %v5233_v31 }
  0x2a   :  { %827 = vmatpush1.bf16.msra.mxu0 %v5248_v40  ;;  %868 = vmatpush1.bf16.msra.mxu1 %v5252_v41 }
  0x2b   :  { %828 = vmatprep.subr.bf16.mxu0 %v5254_v42  ;;  %869 = vmatprep.subr.bf16.mxu1 %v5257_v47 }
  0x2c   :  { %9 = vsyncpa [#allocation5], 0  ;;  %v5296_v16 = vcombine.low %v128_v48, %v132_v49  ;;  %v5300_v17 = vcombine.low %v129_v50, %v133_v56  ;;  %v5302_v18 = vcombine.high %v136_v2, %v140_v4  ;;  %v5305_v23 = vcombine.high %v137_v6, %v141_v7  ;;  %v144_v32 = vld [vmem:[%s6979_s1 + $0x340] sm:$0xff]  ;;  %v145_v34 = vld [vmem:[%s6979_s1 + $0x348] sm:$0xff]  ;;  %s4971_s6 = smov [#allocation4]  }
  0x2d   :  { %v148_v33 = vld [vmem:[%s6979_s1 + $0x360] sm:$0xff]  ;;  %v149_v39 = vld [vmem:[%s6979_s1 + $0x368] sm:$0xff]  ;;  %v5320_v48 = vcombine.low %v136_v2, %v140_v4  ;;  %v5324_v49 = vcombine.low %v137_v6, %v141_v7  ;;  %s4267_s7 = sshll.u32 %s4971_s6, 4  ;;  %vm4259_vm0 = vcmask 9216   ;;  %s4268_s7 = int_to_ptr.vmem [resolvable:$true] %s4267_s7 }
  0x2e   :  { %829 = vmatpush1.bf16.msra.mxu0 %v5272_v57  ;;  %7130 = vst [vmem:[#allocation8_spill] sm:$0xff] %v5296_v16  ;;  %870 = vmatpush1.bf16.msra.mxu1 %v5276_v58  ;;  %7131 = vst [vmem:[#allocation9_spill] sm:$0xff] %v5300_v17  ;;  %v5326_v50 = vcombine.high %v144_v32, %v148_v33  ;;  %v5329_v56 = vcombine.high %v145_v34, %v149_v39  ;;  %v156_v2 = vld [vmem:[%s6979_s1 + $0x3a0] sm:$0xff]  ;;  %v153_v4 = vld [vmem:[%s6979_s1 + $0x388] sm:$0xff]  ;;  %s4945_s8 = scalar_lea.vmem %s4268_s7, 32  ;;  %p4950_p1 = scmp.lt.s32.totalorder %s4268_s7, %s4268_s7 }
  0x2f   :  { %830 = vmatprep.subr.bf16.mxu0 %v5278_v59  ;;  %7132 = vst [vmem:[#allocation10_spill] sm:$0xff] %v5302_v18  ;;  %871 = vmatprep.subr.bf16.mxu1 %v5281_v60  ;;  %7133 = vst [vmem:[#allocation11_spill] sm:$0xff] %v5305_v23  ;;  %v152_v60 = vld [vmem:[%s6979_s1 + $0x380] sm:$0xff]  ;;  %v157_v6 = vld [vmem:[%s6979_s1 + $0x3a8] sm:$0xff]  ;;  %v5344_v7 = vcombine.low %v144_v32, %v148_v33  ;;  %p4946_p0 = scmp.ne.s32.totalorder %s4268_s7, %s4945_s8  ;;  %p4951_p2 = scmp.lt.s32.totalorder %s4945_s8, %s4945_s8 }
  0x30   :  { %7134 = vst [vmem:[#allocation12_spill] sm:$0xff] %v5320_v48  ;;  %7135 = vst [vmem:[#allocation13_spill] sm:$0xff] %v5324_v49  ;;  %v164_v32 = vld [vmem:[%s6979_s1 + $0x3e0] sm:$0xff]  ;;  %v161_v33 = vld [vmem:[%s6979_s1 + $0x3c8] sm:$0xff] }
  0x31   :  { %7136 = vst [vmem:[#allocation14_spill] sm:$0xff] %v5326_v50  ;;  %7137 = vst [vmem:[#allocation15_spill] sm:$0xff] %v5329_v56  ;;  %p4952_p3 = por %p4951_p2, %p4950_p1 }
  0x32   :  { %831 = vmatpush1.bf16.msra.mxu0 %v5296_v16  ;;  %872 = vmatpush1.bf16.msra.mxu1 %v5300_v17  ;;  %7138 = vst [vmem:[#allocation16_spill] sm:$0xff] %v5344_v7  ;;  %v5353_v17 = vcombine.high %v153_v4, %v157_v6  ;;  %v160_v16 = vld [vmem:[%s6979_s1 + $0x3c0] sm:$0xff] }
  0x33   :  { %832 = vmatprep.subr.bf16.mxu0 %v5302_v18  ;;  %873 = vmatprep.subr.bf16.mxu1 %v5305_v23  ;;  %v5348_v23 = vcombine.low %v145_v34, %v149_v39  ;;  %v5350_v18 = vcombine.high %v152_v60, %v156_v2  ;;  %v165_v34 = vld [vmem:[%s6979_s1 + $0x3e8] sm:$0xff]  ;;  %v5368_v39 = vcombine.low %v152_v60, %v156_v2  ;;  %v46_v60 = vld [vmem:[%s6979_s1 + $0x30] sm:$0xff]  ;;  %v43_v2 = vld [vmem:[%s6979_s1 + $0x18] sm:$0xff]  ;;  %p4953_p4 = pnand %p4952_p3, %p4946_p0 }
  0x34   :  { %7141 = vst [vmem:[#allocation19_spill] sm:$0xff] %v5353_v17 }
  0x35   :  { %7139 = vst [vmem:[#allocation17_spill] sm:$0xff] %v5348_v23  ;;  %7140 = vst [vmem:[#allocation18_spill] sm:$0xff] %v5350_v18 }
  0x36   :  { %833 = vmatpush1.bf16.msra.mxu0 %v5320_v48  ;;  %874 = vmatpush1.bf16.msra.mxu1 %v5324_v49  ;;  %7142 = vst [vmem:[#allocation20_spill] sm:$0xff] %v5368_v39  ;;  %v5377_v49 = vcombine.high %v161_v33, %v165_v34  ;;  %v42_v48 = vld [vmem:[%s6979_s1 + $0x10] sm:$0xff] }
  0x37   :  { %834 = vmatprep.subr.bf16.mxu0 %v5326_v50  ;;  %875 = vmatprep.subr.bf16.mxu1 %v5329_v56  ;;  %v5372_v56 = vcombine.low %v153_v4, %v157_v6  ;;  %v5374_v50 = vcombine.high %v160_v16, %v164_v32  ;;  %v47_v4 = vld [vmem:[%s6979_s1 + $0x38] sm:$0xff]  ;;  %v5392_v6 = vcombine.low %v160_v16, %v164_v32  ;;  %v54_v16 = vld [vmem:[%s6979_s1 + $0x70] sm:$0xff] }
  0x38   :  { %7145 = vst [vmem:[#allocation23_spill] sm:$0xff] %v5377_v49  ;;  %v5411_v32 = vpack.c.bf16 %v5152_v54, %v5152_v54 }
  0x39   :  { %7143 = vst [vmem:[#allocation21_spill] sm:$0xff] %v5372_v56  ;;  %7144 = vst [vmem:[#allocation22_spill] sm:$0xff] %v5374_v50 }
  0x3a   :  { %835 = vmatpush1.bf16.msra.mxu0 %v5344_v7  ;;  %876 = vmatpush1.bf16.msra.mxu1 %v5348_v23  ;;  %7146 = vst [vmem:[#allocation24_spill] sm:$0xff] %v5392_v6  ;;  %v5401_v23 = vcombine.high %v43_v2, %v47_v4  ;;  %v50_v7 = vld [vmem:[%s6979_s1 + $0x50] sm:$0xff] }
  0x3b   :  { %836 = vmatprep.subr.bf16.mxu0 %v5350_v18  ;;  %877 = vmatprep.subr.bf16.mxu1 %v5353_v17  ;;  %v5396_v17 = vcombine.low %v161_v33, %v165_v34  ;;  %v5398_v18 = vcombine.high %v42_v48, %v46_v60  ;;  %v51_v33 = vld [vmem:[%s6979_s1 + $0x58] sm:$0xff]  ;;  %v5426_v54 = vcombine.high %v50_v7, %v54_v16 }
  0x3c   :  { %7149 = vst [vmem:[#allocation27_spill] sm:$0xff] %v5401_v23  ;;  %v55_v34 = vld [vmem:[%s6979_s1 + $0x78] sm:$0xff] }
  0x3d   :  { %7147 = vst [vmem:[#allocation25_spill] sm:$0xff] %v5396_v17  ;;  %7148 = vst [vmem:[#allocation26_spill] sm:$0xff] %v5398_v18 }
  0x3e   :  { %837 = vmatpush1.bf16.msra.mxu0 %v5368_v39  ;;  %878 = vmatpush1.bf16.msra.mxu1 %v5372_v56  ;;  %7151 = vst [vmem:[#allocation29_spill] sm:$0xff] %v5426_v54  ;;  %v5429_v56 = vcombine.high %v51_v33, %v55_v34  ;;  %v58_v39 = vld [vmem:[%s6979_s1 + $0x90] sm:$0xff] }
  0x3f   :  { %838 = vmatprep.subr.bf16.mxu0 %v5374_v50  ;;  %879 = vmatprep.subr.bf16.mxu1 %v5377_v49  ;;  %v5420_v49 = vcombine.low %v42_v48, %v46_v60  ;;  %v5424_v50 = vcombine.low %v43_v2, %v47_v4  ;;  %v62_v48 = vld [vmem:[%s6979_s1 + $0xb0] sm:$0xff]  ;;  %v59_v60 = vld [vmem:[%s6979_s1 + $0x98] sm:$0xff]  ;;  %v5446_v4 = vcombine.low %v50_v7, %v54_v16 }
  0x40   :  { %7152 = vst [vmem:[#allocation30_spill] sm:$0xff] %v5429_v56  ;;  %v63_v2 = vld [vmem:[%s6979_s1 + $0xb8] sm:$0xff]  ;;  %v70_v7 = vld [vmem:[%s6979_s1 + $0xf0] sm:$0xff] }
  0x41   :  { %7150 = vst [vmem:[#allocation28_spill] sm:$0xff] %v5424_v50  ;;  %7153 = vst [vmem:[#allocation31_spill] sm:$0xff] %v5446_v4  ;;  %v67_v16 = vld [vmem:[%s6979_s1 + $0xd8] sm:$0xff] }
  0x42   :  { %839 = vmatpush1.bf16.msra.mxu0 %v5392_v6  ;;  %880 = vmatpush1.bf16.msra.mxu1 %v5396_v17  ;;  %v5455_v17 = vcombine.high %v59_v60, %v63_v2  ;;  %v66_v6 = vld [vmem:[%s6979_s1 + $0xd0] sm:$0xff] }
  0x43   :  { %890 = vmatprep.subr.bf16.mxu0 %v5398_v18  ;;  %931 = vmatprep.subr.bf16.mxu1 %v5401_v23  ;;  %v5450_v23 = vcombine.low %v51_v33, %v55_v34  ;;  %v5452_v18 = vcombine.high %v58_v39, %v62_v48  ;;  %v71_v33 = vld [vmem:[%s6979_s1 + $0xf8] sm:$0xff]  ;;  %v5472_v34 = vcombine.low %v58_v39, %v62_v48  ;;  %v78_v39 = vld [vmem:[%s6979_s1 + $0x130] sm:$0xff] }
  0x44   :  { %7156 = vst [vmem:[#allocation34_spill] sm:$0xff] %v5455_v17  ;;  %v75_v48 = vld [vmem:[%s6979_s1 + $0x118] sm:$0xff] }
  0x45   :  { %841 = vmatmul.mubr.bf16.vlgmr.msra.gmra.mrb[0].mxu0 %v5411_v32  ;;  %882 = vmatmul.mubr.bf16.vlgmr.msra.gmra.mrb[0].mxu1 %v5411_v32  ;;  %7154 = vst [vmem:[#allocation32_spill] sm:$0xff] %v5450_v23  ;;  %7155 = vst [vmem:[#allocation33_spill] sm:$0xff] %v5452_v18 }
  0x46   :  { %891 = vmatpush1.bf16.msra.mxu0 %v5420_v49  ;;  %932 = vmatpush1.bf16.msra.mxu1 %v5424_v50  ;;  %7157 = vst [vmem:[#allocation35_spill] sm:$0xff] %v5472_v34  ;;  %v5481_v50 = vcombine.high %v67_v16, %v71_v33 }
  0x47   :  { %892 = vmatprep.subr.bf16.mxu0 %v5426_v54  ;;  %933 = vmatprep.subr.bf16.mxu1 %v5429_v56  ;;  %v5476_v56 = vcombine.low %v59_v60, %v63_v2  ;;  %v5478_v54 = vcombine.high %v66_v6, %v70_v7  ;;  %v79_v60 = vld [vmem:[%s6979_s1 + $0x138] sm:$0xff]  ;;  %v5496_v2 = vcombine.low %v66_v6, %v70_v7  ;;  %v86_v6 = vld [vmem:[%s6979_s1 + $0x170] sm:$0xff] }
  0x48   :  { %922 = vmatprep.mubr.bf16.mxu0 %v5174_v62  ;;  %963 = vmatprep.mubr.bf16.mxu1 %v5174_v62  ;;  %7160 = vst [vmem:[#allocation38_spill] sm:$0xff] %v5481_v50  ;;  %v74_v62 = vld [vmem:[%s6979_s1 + $0x110] sm:$0xff]  ;;  %v83_v7 = vld [vmem:[%s6979_s1 + $0x158] sm:$0xff] }
  0x49   :  { %7158 = vst [vmem:[#allocation36_spill] sm:$0xff] %v5476_v56  ;;  %7159 = vst [vmem:[#allocation37_spill] sm:$0xff] %v5478_v54 }
  0x4a   :  { %893 = vmatpush1.bf16.msra.mxu0 %v5446_v4  ;;  %934 = vmatpush1.bf16.msra.mxu1 %v5450_v23  ;;  %7161 = vst [vmem:[#allocation39_spill] sm:$0xff] %v5496_v2  ;;  %v5505_v23 = vcombine.high %v75_v48, %v79_v60  ;;  %v82_v4 = vld [vmem:[%s6979_s1 + $0x150] sm:$0xff] }
  0x4b   :  { %894 = vmatprep.subr.bf16.mxu0 %v5452_v18  ;;  %935 = vmatprep.subr.bf16.mxu1 %v5455_v17  ;;  %v5500_v17 = vcombine.low %v67_v16, %v71_v33  ;;  %v5502_v18 = vcombine.high %v74_v62, %v78_v39  ;;  %v87_v16 = vld [vmem:[%s6979_s1 + $0x178] sm:$0xff]  ;;  %v5520_v33 = vcombine.low %v74_v62, %v78_v39  ;;  %v94_v62 = vld [vmem:[%s6979_s1 + $0x1b0] sm:$0xff] }
  0x4c   :  { %7164 = vst [vmem:[#allocation42_spill] sm:$0xff] %v5505_v23  ;;  %v91_v39 = vld [vmem:[%s6979_s1 + $0x198] sm:$0xff] }
  0x4d   :  { %7162 = vst [vmem:[#allocation40_spill] sm:$0xff] %v5500_v17  ;;  %7163 = vst [vmem:[#allocation41_spill] sm:$0xff] %v5502_v18 }
  0x4e   :  { %895 = vmatpush1.bf16.msra.mxu0 %v5472_v34  ;;  %936 = vmatpush1.bf16.msra.mxu1 %v5476_v56  ;;  %7165 = vst [vmem:[#allocation43_spill] sm:$0xff] %v5520_v33  ;;  %v5529_v56 = vcombine.high %v83_v7, %v87_v16  ;;  %v90_v34 = vld [vmem:[%s6979_s1 + $0x190] sm:$0xff] }
  0x4f   :  { %896 = vmatprep.subr.bf16.mxu0 %v5478_v54  ;;  %937 = vmatprep.subr.bf16.mxu1 %v5481_v50  ;;  %v5524_v50 = vcombine.low %v75_v48, %v79_v60  ;;  %v5526_v54 = vcombine.high %v82_v4, %v86_v6  ;;  %v95_v48 = vld [vmem:[%s6979_s1 + $0x1b8] sm:$0xff]  ;;  %v5544_v60 = vcombine.low %v82_v4, %v86_v6  ;;  %v102_v4 = vld [vmem:[%s6979_s1 + $0x1f0] sm:$0xff] }
  0x50   :  { %7168 = vst [vmem:[#allocation46_spill] sm:$0xff] %v5529_v56  ;;  %v99_v6 = vld [vmem:[%s6979_s1 + $0x1d8] sm:$0xff] }
  0x51   :  { %7166 = vst [vmem:[#allocation44_spill] sm:$0xff] %v5524_v50  ;;  %7167 = vst [vmem:[#allocation45_spill] sm:$0xff] %v5526_v54 }
  0x52   :  { %897 = vmatpush1.bf16.msra.mxu0 %v5496_v2  ;;  %938 = vmatpush1.bf16.msra.mxu1 %v5500_v17  ;;  %7169 = vst [vmem:[#allocation47_spill] sm:$0xff] %v5544_v60  ;;  %v5553_v17 = vcombine.high %v91_v39, %v95_v48  ;;  %v98_v2 = vld [vmem:[%s6979_s1 + $0x1d0] sm:$0xff] }
  0x53   :  { %898 = vmatprep.subr.bf16.mxu0 %v5502_v18  ;;  %939 = vmatprep.subr.bf16.mxu1 %v5505_v23  ;;  %v5548_v23 = vcombine.low %v83_v7, %v87_v16  ;;  %v5550_v18 = vcombine.high %v90_v34, %v94_v62  ;;  %v103_v7 = vld [vmem:[%s6979_s1 + $0x1f8] sm:$0xff]  ;;  %v5568_v16 = vcombine.low %v90_v34, %v94_v62  ;;  %v110_v34 = vld [vmem:[%s6979_s1 + $0x230] sm:$0xff] }
  0x54   :  { %7172 = vst [vmem:[#allocation50_spill] sm:$0xff] %v5553_v17  ;;  %v107_v62 = vld [vmem:[%s6979_s1 + $0x218] sm:$0xff] }
  0x55   :  { %7170 = vst [vmem:[#allocation48_spill] sm:$0xff] %v5548_v23  ;;  %7171 = vst [vmem:[#allocation49_spill] sm:$0xff] %v5550_v18 }
  0x56   :  { %899 = vmatpush1.bf16.msra.mxu0 %v5520_v33  ;;  %940 = vmatpush1.bf16.msra.mxu1 %v5524_v50  ;;  %7173 = vst [vmem:[#allocation51_spill] sm:$0xff] %v5568_v16  ;;  %v5577_v50 = vcombine.high %v99_v6, %v103_v7  ;;  %v106_v33 = vld [vmem:[%s6979_s1 + $0x210] sm:$0xff] }
  0x57   :  { %900 = vmatprep.subr.bf16.mxu0 %v5526_v54  ;;  %941 = vmatprep.subr.bf16.mxu1 %v5529_v56  ;;  %v5572_v56 = vcombine.low %v91_v39, %v95_v48  ;;  %v5574_v54 = vcombine.high %v98_v2, %v102_v4  ;;  %v111_v39 = vld [vmem:[%s6979_s1 + $0x238] sm:$0xff]  ;;  %v5592_v48 = vcombine.low %v98_v2, %v102_v4  ;;  %v118_v2 = vld [vmem:[%s6979_s1 + $0x270] sm:$0xff] }
  0x58   :  { %7176 = vst [vmem:[#allocation54_spill] sm:$0xff] %v5577_v50  ;;  %v115_v4 = vld [vmem:[%s6979_s1 + $0x258] sm:$0xff] }
  0x59   :  { %7174 = vst [vmem:[#allocation52_spill] sm:$0xff] %v5572_v56  ;;  %7175 = vst [vmem:[#allocation53_spill] sm:$0xff] %v5574_v54 }
  0x5a   :  { %901 = vmatpush1.bf16.msra.mxu0 %v5544_v60  ;;  %942 = vmatpush1.bf16.msra.mxu1 %v5548_v23  ;;  %7177 = vst [vmem:[#allocation55_spill] sm:$0xff] %v5592_v48  ;;  %v5601_v23 = vcombine.high %v107_v62, %v111_v39  ;;  %v114_v60 = vld [vmem:[%s6979_s1 + $0x250] sm:$0xff] }
  0x5b   :  { %902 = vmatprep.subr.bf16.mxu0 %v5550_v18  ;;  %943 = vmatprep.subr.bf16.mxu1 %v5553_v17  ;;  %v5596_v17 = vcombine.low %v99_v6, %v103_v7  ;;  %v5598_v18 = vcombine.high %v106_v33, %v110_v34  ;;  %v119_v6 = vld [vmem:[%s6979_s1 + $0x278] sm:$0xff]  ;;  %v5616_v7 = vcombine.low %v106_v33, %v110_v34  ;;  %v126_v33 = vld [vmem:[%s6979_s1 + $0x2b0] sm:$0xff] }
  0x5c   :  { %7180 = vst [vmem:[#allocation58_spill] sm:$0xff] %v5601_v23  ;;  %v123_v34 = vld [vmem:[%s6979_s1 + $0x298] sm:$0xff] }
  0x5d   :  { %7178 = vst [vmem:[#allocation56_spill] sm:$0xff] %v5596_v17  ;;  %7179 = vst [vmem:[#allocation57_spill] sm:$0xff] %v5598_v18 }
  0x5e   :  { %903 = vmatpush1.bf16.msra.mxu0 %v5568_v16  ;;  %944 = vmatpush1.bf16.msra.mxu1 %v5572_v56  ;;  %7181 = vst [vmem:[#allocation59_spill] sm:$0xff] %v5616_v7  ;;  %v5625_v56 = vcombine.high %v115_v4, %v119_v6  ;;  %v122_v16 = vld [vmem:[%s6979_s1 + $0x290] sm:$0xff] }
  0x5f   :  { %904 = vmatprep.subr.bf16.mxu0 %v5574_v54  ;;  %945 = vmatprep.subr.bf16.mxu1 %v5577_v50  ;;  %v5620_v50 = vcombine.low %v107_v62, %v111_v39  ;;  %v5622_v54 = vcombine.high %v114_v60, %v118_v2  ;;  %v127_v62 = vld [vmem:[%s6979_s1 + $0x2b8] sm:$0xff]  ;;  %v5640_v39 = vcombine.low %v114_v60, %v118_v2  ;;  %v134_v60 = vld [vmem:[%s6979_s1 + $0x2f0] sm:$0xff] }
  0x60   :  { %7184 = vst [vmem:[#allocation62_spill] sm:$0xff] %v5625_v56  ;;  %v131_v2 = vld [vmem:[%s6979_s1 + $0x2d8] sm:$0xff] }
  0x61   :  { %7182 = vst [vmem:[#allocation60_spill] sm:$0xff] %v5620_v50  ;;  %7183 = vst [vmem:[#allocation61_spill] sm:$0xff] %v5622_v54 }
  0x62   :  { %905 = vmatpush1.bf16.msra.mxu0 %v5592_v48  ;;  %946 = vmatpush1.bf16.msra.mxu1 %v5596_v17  ;;  %7185 = vst [vmem:[#allocation63_spill] sm:$0xff] %v5640_v39  ;;  %v5649_v17 = vcombine.high %v123_v34, %v127_v62  ;;  %v130_v48 = vld [vmem:[%s6979_s1 + $0x2d0] sm:$0xff] }
  0x63   :  { %906 = vmatprep.subr.bf16.mxu0 %v5598_v18  ;;  %947 = vmatprep.subr.bf16.mxu1 %v5601_v23  ;;  %v5644_v23 = vcombine.low %v115_v4, %v119_v6  ;;  %v5646_v18 = vcombine.high %v122_v16, %v126_v33  ;;  %v135_v4 = vld [vmem:[%s6979_s1 + $0x2f8] sm:$0xff]  ;;  %v5664_v6 = vcombine.low %v122_v16, %v126_v33  ;;  %v142_v16 = vld [vmem:[%s6979_s1 + $0x330] sm:$0xff] }
  0x64   :  { %7188 = vst [vmem:[#allocation66_spill] sm:$0xff] %v5649_v17  ;;  %v139_v33 = vld [vmem:[%s6979_s1 + $0x318] sm:$0xff] }
  0x65   :  { %7186 = vst [vmem:[#allocation64_spill] sm:$0xff] %v5644_v23  ;;  %7187 = vst [vmem:[#allocation65_spill] sm:$0xff] %v5646_v18 }
  0x66   :  { %907 = vmatpush1.bf16.msra.mxu0 %v5616_v7  ;;  %948 = vmatpush1.bf16.msra.mxu1 %v5620_v50  ;;  %7189 = vst [vmem:[#allocation67_spill] sm:$0xff] %v5664_v6  ;;  %v5673_v50 = vcombine.high %v131_v2, %v135_v4  ;;  %v138_v7 = vld [vmem:[%s6979_s1 + $0x310] sm:$0xff] }
  0x67   :  { %908 = vmatprep.subr.bf16.mxu0 %v5622_v54  ;;  %949 = vmatprep.subr.bf16.mxu1 %v5625_v56  ;;  %v5668_v56 = vcombine.low %v123_v34, %v127_v62  ;;  %v5670_v54 = vcombine.high %v130_v48, %v134_v60  ;;  %v143_v34 = vld [vmem:[%s6979_s1 + $0x338] sm:$0xff]  ;;  %v5688_v62 = vcombine.low %v130_v48, %v134_v60  ;;  %v150_v48 = vld [vmem:[%s6979_s1 + $0x370] sm:$0xff] }
  0x68   :  { %7192 = vst [vmem:[#allocation70_spill] sm:$0xff] %v5673_v50  ;;  %v147_v60 = vld [vmem:[%s6979_s1 + $0x358] sm:$0xff] }
  0x69   :  { %7190 = vst [vmem:[#allocation68_spill] sm:$0xff] %v5668_v56  ;;  %7191 = vst [vmem:[#allocation69_spill] sm:$0xff] %v5670_v54 }
  0x6a   :  { %909 = vmatpush1.bf16.msra.mxu0 %v5640_v39  ;;  %950 = vmatpush1.bf16.msra.mxu1 %v5644_v23  ;;  %7193 = vst [vmem:[#allocation71_spill] sm:$0xff] %v5688_v62  ;;  %v5697_v23 = vcombine.high %v139_v33, %v143_v34  ;;  %v146_v39 = vld [vmem:[%s6979_s1 + $0x350] sm:$0xff] }
  0x6b   :  { %910 = vmatprep.subr.bf16.mxu0 %v5646_v18  ;;  %951 = vmatprep.subr.bf16.mxu1 %v5649_v17  ;;  %v5692_v17 = vcombine.low %v131_v2, %v135_v4  ;;  %v5694_v18 = vcombine.high %v138_v7, %v142_v16  ;;  %v151_v2 = vld [vmem:[%s6979_s1 + $0x378] sm:$0xff]  ;;  %v5712_v4 = vcombine.low %v138_v7, %v142_v16  ;;  %v158_v7 = vld [vmem:[%s6979_s1 + $0x3b0] sm:$0xff] }
  0x6c   :  { %7196 = vst [vmem:[#allocation74_spill] sm:$0xff] %v5697_v23  ;;  %v155_v16 = vld [vmem:[%s6979_s1 + $0x398] sm:$0xff] }
  0x6d   :  { %7194 = vst [vmem:[#allocation72_spill] sm:$0xff] %v5692_v17  ;;  %7195 = vst [vmem:[#allocation73_spill] sm:$0xff] %v5694_v18 }
  0x6e   :  { %911 = vmatpush1.bf16.msra.mxu0 %v5664_v6  ;;  %952 = vmatpush1.bf16.msra.mxu1 %v5668_v56  ;;  %7197 = vst [vmem:[#allocation75_spill] sm:$0xff] %v5712_v4  ;;  %v5721_v56 = vcombine.high %v147_v60, %v151_v2  ;;  %v154_v6 = vld [vmem:[%s6979_s1 + $0x390] sm:$0xff] }
  0x6f   :  { %912 = vmatprep.subr.bf16.mxu0 %v5670_v54  ;;  %953 = vmatprep.subr.bf16.mxu1 %v5673_v50  ;;  %v5716_v50 = vcombine.low %v139_v33, %v143_v34  ;;  %v5718_v54 = vcombine.high %v146_v39, %v150_v48  ;;  %v159_v33 = vld [vmem:[%s6979_s1 + $0x3b8] sm:$0xff]  ;;  %v5736_v34 = vcombine.low %v146_v39, %v150_v48  ;;  %v166_v39 = vld [vmem:[%s6979_s1 + $0x3f0] sm:$0xff] }
  0x70   :  { %7200 = vst [vmem:[#allocation78_spill] sm:$0xff] %v5721_v56  ;;  %v163_v48 = vld [vmem:[%s6979_s1 + $0x3d8] sm:$0xff] }
  0x71   :  { %7198 = vst [vmem:[#allocation76_spill] sm:$0xff] %v5716_v50  ;;  %7199 = vst [vmem:[#allocation77_spill] sm:$0xff] %v5718_v54 }
  0x72   :  { %913 = vmatpush1.bf16.msra.mxu0 %v5688_v62  ;;  %954 = vmatpush1.bf16.msra.mxu1 %v5692_v17  ;;  %v5745_v17 = vcombine.high %v155_v16, %v159_v33  ;;  %v162_v62 = vld [vmem:[%s6979_s1 + $0x3d0] sm:$0xff] }
  0x73   :  { %914 = vmatprep.subr.bf16.mxu0 %v5694_v18  ;;  %955 = vmatprep.subr.bf16.mxu1 %v5697_v23  ;;  %v5740_v23 = vcombine.low %v147_v60, %v151_v2  ;;  %v5742_v18 = vcombine.high %v154_v6, %v158_v7  ;;  %v167_v60 = vld [vmem:[%s6979_s1 + $0x3f8] sm:$0xff]  ;;  %v5760_v2 = vcombine.low %v154_v6, %v158_v7 }
  0x74   :  { %v5776_v6 = vcombine.low %v163_v48, %v167_v60 }
  0x76   :  { %915 = vmatpush1.bf16.msra.mxu0 %v5712_v4  ;;  %956 = vmatpush1.bf16.msra.mxu1 %v5716_v50  ;;  %v5769_v50 = vcombine.high %v163_v48, %v167_v60  ;;  %v5772_v4 = vcombine.low %v162_v62, %v166_v39 }
  0x77   :  { %916 = vmatprep.subr.bf16.mxu0 %v5718_v54  ;;  %957 = vmatprep.subr.bf16.mxu1 %v5721_v56  ;;  %v5764_v56 = vcombine.low %v155_v16, %v159_v33  ;;  %v5766_v54 = vcombine.high %v162_v62, %v166_v39 }
  0x7a   :  { %917 = vmatpush1.bf16.msra.mxu0 %v5736_v34  ;;  %958 = vmatpush1.bf16.msra.mxu1 %v5740_v23 }
  0x7b   :  { %918 = vmatprep.subr.bf16.mxu0 %v5742_v18  ;;  %959 = vmatprep.subr.bf16.mxu1 %v5745_v17 }
  0x7e   :  { %919 = vmatpush1.bf16.msra.mxu0 %v5760_v2  ;;  %960 = vmatpush1.bf16.msra.mxu1 %v5764_v56 }
  0x7f   :  { %920 = vmatprep.subr.bf16.mxu0 %v5766_v54  ;;  %961 = vmatprep.subr.bf16.mxu1 %v5769_v50 }
  0x82   :  { %921 = vmatpush1.bf16.msra.mxu0 %v5772_v4  ;;  %962 = vmatpush1.bf16.msra.mxu1 %v5776_v6 }
  0x83   :  { %1836 = vmatprep.subr.bf16.mxu0 %v5006_v3  ;;  %1877 = vmatprep.subr.bf16.mxu1 %v5019_v9  ;;  %v7201_v3 = vld [vmem:[#allocation7_spill] sm:$0xff]  ;;  %v7203_v9 = vld [vmem:[#allocation9_spill] sm:$0xff] }
  0x85   :  { %923 = vmatmul.mubr.bf16.vlgmr.msra.gmra.mrb[4].mxu0 %v5411_v32  ;;  %964 = vmatmul.mubr.bf16.vlgmr.msra.gmra.mrb[4].mxu1 %v5411_v32 }
  0x86   :  { %1837 = vmatpush1.bf16.msra.mxu0 %v5011_v5  ;;  %1878 = vmatpush1.bf16.msra.mxu1 %v5021_v10  ;;  %v7202_v5 = vld [vmem:[#allocation8_spill] sm:$0xff]  ;;  %v7204_v10 = vld [vmem:[#allocation10_spill] sm:$0xff] }
  0x87   :  { %1838 = vmatprep.subr.bf16.mxu0 %v5023_v11  ;;  %1879 = vmatprep.subr.bf16.mxu1 %v5035_v15  ;;  %v7205_v11 = vld [vmem:[#allocation11_spill] sm:$0xff]  ;;  %v7206_v15 = vld [vmem:[#allocation12_spill] sm:$0xff] }
  0x8a   :  { %1839 = vmatpush1.bf16.msra.mxu0 %v5048_v19  ;;  %1880 = vmatpush1.bf16.msra.mxu1 %v5052_v20  ;;  %v7207_v19 = vld [vmem:[#allocation13_spill] sm:$0xff]  ;;  %v7208_v20 = vld [vmem:[#allocation14_spill] sm:$0xff] }
  0x8b   :  { %1840 = vmatprep.subr.bf16.mxu0 %v5054_v21  ;;  %1881 = vmatprep.subr.bf16.mxu1 %v5057_v22  ;;  %v7209_v21 = vld [vmem:[#allocation15_spill] sm:$0xff]  ;;  %v7210_v22 = vld [vmem:[#allocation16_spill] sm:$0xff] }
  0x8e   :  { %1841 = vmatpush1.bf16.msra.mxu0 %v5072_v27  ;;  %1882 = vmatpush1.bf16.msra.mxu1 %v5076_v28  ;;  %v7211_v27 = vld [vmem:[#allocation17_spill] sm:$0xff]  ;;  %v7212_v28 = vld [vmem:[#allocation18_spill] sm:$0xff] }
  0x8f   :  { %1842 = vmatprep.subr.bf16.mxu0 %v5078_v29  ;;  %1883 = vmatprep.subr.bf16.mxu1 %v5081_v30  ;;  %v7213_v29 = vld [vmem:[#allocation19_spill] sm:$0xff]  ;;  %v7214_v30 = vld [vmem:[#allocation20_spill] sm:$0xff] }
  0x92   :  { %1843 = vmatpush1.bf16.msra.mxu0 %v5096_v35  ;;  %1884 = vmatpush1.bf16.msra.mxu1 %v5100_v36  ;;  %v7215_v35 = vld [vmem:[#allocation21_spill] sm:$0xff]  ;;  %v7216_v36 = vld [vmem:[#allocation22_spill] sm:$0xff] }
  0x93   :  { %1844 = vmatprep.subr.bf16.mxu0 %v5102_v37  ;;  %1885 = vmatprep.subr.bf16.mxu1 %v5105_v38  ;;  %v7217_v37 = vld [vmem:[#allocation23_spill] sm:$0xff]  ;;  %v7218_v38 = vld [vmem:[#allocation24_spill] sm:$0xff] }
  0x96   :  { %1845 = vmatpush1.bf16.msra.mxu0 %v5120_v43  ;;  %1886 = vmatpush1.bf16.msra.mxu1 %v5124_v44  ;;  %v7219_v43 = vld [vmem:[#allocation25_spill] sm:$0xff]  ;;  %v7220_v44 = vld [vmem:[#allocation26_spill] sm:$0xff] }
  0x97   :  { %1846 = vmatprep.subr.bf16.mxu0 %v5126_v45  ;;  %1887 = vmatprep.subr.bf16.mxu1 %v5129_v46  ;;  %v7221_v45 = vld [vmem:[#allocation27_spill] sm:$0xff]  ;;  %v4970_v46 = vmov 1983009808  }
  0x9a   :  { %1847 = vmatpush1.bf16.msra.mxu0 %v5144_v51  ;;  %1888 = vmatpush1.bf16.msra.mxu1 %v5148_v52  ;;  %v983_v51 = vunpack.c.l.s4 %v4970_v46  ;;  %v985_v52 = vlaneseq }
  0x9b   :  { %1848 = vmatprep.subr.bf16.mxu0 %v5150_v53  ;;  %1889 = vmatprep.subr.bf16.mxu1 %v5155_v55 }
  0x9c   :  { %v984_v53 = vunpack.c.0.s8 %v983_v51  ;;  %v986_v55 = vshrl.u32 %v985_v52, 7 }
  0x9e   :  { %1849 = vmatpush1.bf16.msra.mxu0 %v5172_v61  ;;  %1890 = vmatpush1.bf16.msra.mxu1 %v5178_v63  ;;  %v5849_v63 = vsub.s32 %v984_v53, %v986_v55 }
  0x9f   :  { %1850 = vmatprep.subr.bf16.mxu0 %v5180_v0  ;;  %1891 = vmatprep.subr.bf16.mxu1 %v5183_v1 }
  0xa2   :  { %1851 = vmatpush1.bf16.msra.mxu0 %v5200_v8  ;;  %1892 = vmatpush1.bf16.msra.mxu1 %v5204_v12 }
  0xa3   :  { %1852 = vmatprep.subr.bf16.mxu0 %v5206_v13  ;;  %1893 = vmatprep.subr.bf16.mxu1 %v5209_v14 }
  0xa6   :  { %1853 = vmatpush1.bf16.msra.mxu0 %v5224_v24  ;;  %1894 = vmatpush1.bf16.msra.mxu1 %v5228_v25 }
  0xa7   :  { %1854 = vmatprep.subr.bf16.mxu0 %v5230_v26  ;;  %1895 = vmatprep.subr.bf16.mxu1 %v5233_v31 }
  0xaa   :  { %1855 = vmatpush1.bf16.msra.mxu0 %v5248_v40  ;;  %1896 = vmatpush1.bf16.msra.mxu1 %v5252_v41 }
  0xab   :  { %1856 = vmatprep.subr.bf16.mxu0 %v5254_v42  ;;  %1897 = vmatprep.subr.bf16.mxu1 %v5257_v47  ;;  %v24_v42 = vld [vmem:[%s6978_s0] sm:$0xff] }
  0xae   :  { %1857 = vmatpush1.bf16.msra.mxu0 %v5272_v57  ;;  %1898 = vmatpush1.bf16.msra.mxu1 %v5276_v58 }
  0xaf   :  { %1858 = vmatprep.subr.bf16.mxu0 %v5278_v59  ;;  %1899 = vmatprep.subr.bf16.mxu1 %v7201_v3 }
  0xb2   :  { %1859 = vmatpush1.bf16.msra.mxu0 %v7202_v5  ;;  %1900 = vmatpush1.bf16.msra.mxu1 %v7203_v9 }
  0xb3   :  { %1860 = vmatprep.subr.bf16.mxu0 %v7204_v10  ;;  %1901 = vmatprep.subr.bf16.mxu1 %v7205_v11 }
  0xb6   :  { %1861 = vmatpush1.bf16.msra.mxu0 %v7206_v15  ;;  %1902 = vmatpush1.bf16.msra.mxu1 %v7207_v19 }
  0xb7   :  { %1862 = vmatprep.subr.bf16.mxu0 %v7208_v20  ;;  %1903 = vmatprep.subr.bf16.mxu1 %v7209_v21  ;;  %v25_v21 = vld [vmem:[%s6978_s0 + $0x8] sm:$0xff] }
  0xba   :  { %1863 = vmatpush1.bf16.msra.mxu0 %v7210_v22  ;;  %1904 = vmatpush1.bf16.msra.mxu1 %v7211_v27 }
  0xbb   :  { %1864 = vmatprep.subr.bf16.mxu0 %v7212_v28  ;;  %1905 = vmatprep.subr.bf16.mxu1 %v7213_v29 }
  0xbe   :  { %1865 = vmatpush1.bf16.msra.mxu0 %v7214_v30  ;;  %1906 = vmatpush1.bf16.msra.mxu1 %v7215_v35  ;;  %v1043_v35 = vld [vmem:[#allocation3] sm:$0xf] }
  0xbf   :  { %1866 = vmatprep.subr.bf16.mxu0 %v7216_v36  ;;  %1907 = vmatprep.subr.bf16.mxu1 %v7217_v37 }
  0xc2   :  { %1867 = vmatpush1.bf16.msra.mxu0 %v7218_v38  ;;  %1908 = vmatpush1.bf16.msra.mxu1 %v7219_v43 }
  0xc3   :  { %1918 = vmatprep.subr.bf16.mxu0 %v7220_v44  ;;  %1959 = vmatprep.subr.bf16.mxu1 %v7221_v45 }
 0x118   :  { %v842_v61 = vpop.f32.mrb[0].mxu0  ;;  %v883_v0 = vpop.f32.mrb[0].mxu1 }
 0x119   :  { %v844_v1 = vpop.f32.mrb[1].mxu0  ;;  %v885_v12 = vpop.f32.mrb[1].mxu1 }
 0x11a   :  { %v980_v8 = vcombine.low %v842_v61, %v844_v1  ;;  %v846_v13 = vpop.f32.mrb[2].mxu0  ;;  %v981_v14 = vcombine.low %v883_v0, %v885_v12  ;;  %v887_v24 = vpop.f32.mrb[2].mxu1  ;;  %v7223_v12 = vld [vmem:[#allocation29_spill] sm:$0xff] }
 0x11b   :  { %v847_v25 = vpop.f32.mrb[3].mxu0  ;;  %v888_v31 = vpop.f32.mrb[3].mxu1  ;;  %v7224_v13 = vld [vmem:[#allocation30_spill] sm:$0xff]  ;;  %v7226_v24 = vld [vmem:[#allocation32_spill] sm:$0xff] }
 0x11c   :  { %v988_v26 = vrot.slane %v980_v8, %v5849_v63  ;;  %v995_v40 = vrot.slane %v981_v14, %v5849_v63  ;;  %v7222_v8 = vld [vmem:[#allocation28_spill] sm:$0xff]  ;;  %v7225_v14 = vld [vmem:[#allocation31_spill] sm:$0xff]  ;;  %v7227_v25 = vld [vmem:[#allocation33_spill] sm:$0xff] }
 0x11d   :  { %v7229_v31 = vld [vmem:[#allocation35_spill] sm:$0xff] }
 0x11e   :  { %v996_v41 = vcombine.low %v988_v26, %v995_v40  ;;  %v7228_v26 = vld [vmem:[#allocation34_spill] sm:$0xff]  ;;  %v7230_v40 = vld [vmem:[#allocation36_spill] sm:$0xff] }
 0x120   :  { %v1016_v47 = vadd.f32 %v996_v41, %v24_v42  ;;  %v7232_v41 = vld [vmem:[#allocation38_spill] sm:$0xff]  ;;  %v7233_v42 = vld [vmem:[#allocation39_spill] sm:$0xff] }
 0x122   :  { %v1025_v57 = vrot.slane %v1016_v47, 4  ;;  %v4404_v59 = vmul.f32 -1.442695, %v1016_v47  ;;  %v7234_v47 = vld [vmem:[#allocation40_spill] sm:$0xff] }
 0x124   :  { %v4405_v58 = vmul.f32 -1.442695, %v1025_v57  ;;  %v7235_v57 = vld [vmem:[#allocation41_spill] sm:$0xff] }
 0x126   :  { %4881 = vpow2.f32 %v4405_v58  ;;  %v7236_v58 = vld [vmem:[#allocation42_spill] sm:$0xff] }
 0x127   :  { %4883 = vpow2.f32 %v4404_v59  ;;  %v7237_v59 = vld [vmem:[#allocation43_spill] sm:$0xff] }
 0x130   :  { %v4882_v16 = vpop.eup %4881 }
 0x131   :  { %v4884_v60 = vpop.eup %4883  ;;  %v1030_v15 = vadd.f32 1.0, %v4882_v16  ;;  %v7241_v16 = vld [vmem:[#allocation47_spill] sm:$0xff] }
 0x132   :  { %v1021_v20 = vadd.f32 1.0, %v4884_v60  ;;  %v7245_v60 = vld [vmem:[#allocation51_spill] sm:$0xff] }
 0x133   :  { %4885 = vrcp.f32 %v1030_v15  ;;  %v7251_v15 = vld [vmem:[#allocation57_spill] sm:$0xff] }
 0x134   :  { %4887 = vrcp.f32 %v1021_v20  ;;  %v7253_v20 = vld [vmem:[#allocation59_spill] sm:$0xff] }
 0x13d   :  { %v4886_v30 = vpop.eup %4885 }
 0x13e   :  { %v4888_v36 = vpop.eup %4887  ;;  %v1044_v38 = vmul.f32 %v4886_v30, %v1043_v35  ;;  %v7259_v30 = vld [vmem:[#allocation65_spill] sm:$0xff]  ;;  %v7260_v35 = vld [vmem:[#allocation66_spill] sm:$0xff] }
 0x158   :  { %v924_v32 = vpop.f32.mrb[4].mxu0  ;;  %v965_v62 = vpop.f32.mrb[4].mxu1 }
 0x159   :  { %v926_v7 = vpop.f32.mrb[5].mxu0  ;;  %v967_v39 = vpop.f32.mrb[5].mxu1 }
 0x15a   :  { %v997_v33 = vcombine.low %v924_v32, %v926_v7  ;;  %v928_v48 = vpop.f32.mrb[6].mxu0  ;;  %v998_v3 = vcombine.low %v965_v62, %v967_v39  ;;  %v969_v5 = vpop.f32.mrb[6].mxu1  ;;  %v7238_v32 = vld [vmem:[#allocation44_spill] sm:$0xff]  ;;  %v7239_v62 = vld [vmem:[#allocation45_spill] sm:$0xff]  ;;  %v7240_v7 = vld [vmem:[#allocation46_spill] sm:$0xff] }
 0x15b   :  { %v929_v9 = vpop.f32.mrb[7].mxu0  ;;  %v970_v11 = vpop.f32.mrb[7].mxu1  ;;  %v7243_v39 = vld [vmem:[#allocation49_spill] sm:$0xff]  ;;  %v7244_v48 = vld [vmem:[#allocation50_spill] sm:$0xff] }
 0x15c   :  { %v1005_v10 = vrot.slane %v997_v33, %v5849_v63  ;;  %v1012_v19 = vrot.slane %v998_v3, %v5849_v63  ;;  %v7242_v33 = vld [vmem:[#allocation48_spill] sm:$0xff]  ;;  %v7247_v5 = vld [vmem:[#allocation53_spill] sm:$0xff]  ;;  %v7248_v9 = vld [vmem:[#allocation54_spill] sm:$0xff] }
 0x15d   :  { %v7246_v3 = vld [vmem:[#allocation52_spill] sm:$0xff] }
 0x15e   :  { %v1013_v22 = vcombine.low %v1005_v10, %v1012_v19  ;;  %v7249_v10 = vld [vmem:[#allocation55_spill] sm:$0xff]  ;;  %v7250_v11 = vld [vmem:[#allocation56_spill] sm:$0xff]  ;;  %v7252_v19 = vld [vmem:[#allocation58_spill] sm:$0xff] }
 0x160   :  { %v1017_v27 = vadd.f32 %v1013_v22, %v25_v21  ;;  %v7254_v21 = vld [vmem:[#allocation60_spill] sm:$0xff]  ;;  %v7255_v22 = vld [vmem:[#allocation61_spill] sm:$0xff] }
 0x162   :  { %4889 = vtanh.f32 %v1017_v27  ;;  %v1035_v28 = vrot.slane %v1017_v27, 4  ;;  %v7256_v27 = vld [vmem:[#allocation62_spill] sm:$0xff] }
 0x164   :  { %v4406_v29 = vmul.f32 -1.442695, %v1035_v28  ;;  %v7257_v28 = vld [vmem:[#allocation63_spill] sm:$0xff] }
 0x166   :  { %4891 = vpow2.f32 %v4406_v29  ;;  %v7258_v29 = vld [vmem:[#allocation64_spill] sm:$0xff] }
 0x16c   :  { %v4890_v37 = vpop.eup %4889 }
 0x16d   :  { %v1045_v43 = vmul.f32 %v4890_v37, %v4888_v36  ;;  %v7261_v36 = vld [vmem:[#allocation67_spill] sm:$0xff]  ;;  %v7262_v37 = vld [vmem:[#allocation68_spill] sm:$0xff] }
 0x16f   :  { %v1046_v44 = vadd.f32 %v1045_v43, %v1044_v38  ;;  %v7263_v38 = vld [vmem:[#allocation69_spill] sm:$0xff]  ;;  %v7264_v43 = vld [vmem:[#allocation70_spill] sm:$0xff] }
 0x170   :  { %v4892_v45 = vpop.eup %4891 }
 0x171   :  { %v1040_v46 = vadd.f32 1.0, %v4892_v45  ;;  %1049 = vst [vmem:[#allocation3] sm:$0xf] %v1046_v44  ;;  %4893 = vtanh.f32 %v1046_v44  ;;  %v7265_v44 = vld [vmem:[#allocation71_spill] sm:$0xff]  ;;  %v7266_v45 = vld [vmem:[#allocation72_spill] sm:$0xff] }
 0x173   :  { %4895 = vrcp.f32 %v1040_v46  ;;  %v7267_v46 = vld [vmem:[#allocation73_spill] sm:$0xff] }
 0x17b   :  { %v4894_v51 = vpop.eup %4893 }
 0x17d   :  { %v4896_v52 = vpop.eup %4895 }
 0x17e   :  { %v1048_v53 = vmul.f32 %v4896_v52, %v4894_v51  ;;  %v7268_v51 = vld [vmem:[#allocation74_spill] sm:$0xff]  ;;  %v7269_v52 = vld [vmem:[#allocation75_spill] sm:$0xff] }
 0x180   :  { %1050 = vst [vmem:[#allocation2] sm:$0xf] %v1048_v53  ;;  %v7270_v53 = vld [vmem:[#allocation76_spill] sm:$0xff] }
 0x187   :  { %v4409_v55 = vld.sshfl [vmem:[#allocation2] sm:$0x33 pattern:$0x76325410] }
 0x188   :  { %v1063_v61 = vcombine.high %v4409_v55, %v4409_v55  ;;  %v5861_v1 = vpack.c.bf16 %v4409_v55, %v4409_v55  ;;  %v7271_v55 = vld [vmem:[#allocation77_spill] sm:$0xff] }
 0x18a   :  { %v1067_v0 = vpack.c.bf16 %v1063_v61, %v1063_v61  ;;  %v7272_v61 = vld [vmem:[#allocation78_spill] sm:$0xff] }
 0x18c   :  { %1868 = vmatprep.mubr.bf16.mxu0 %v1067_v0  ;;  %1909 = vmatprep.mubr.bf16.mxu1 %v1067_v0 }
 0x18d   :  { %1869 = vmatmul.mubr.bf16.vlgmr.msra.gmra.mrb[8].mxu0 %v5861_v1  ;;  %1910 = vmatmul.mubr.bf16.vlgmr.msra.gmra.mrb[8].mxu1 %v5861_v1 }
 0x18e   :  { %1919 = vmatpush1.bf16.msra.mxu0 %v5420_v49  ;;  %1960 = vmatpush1.bf16.msra.mxu1 %v7222_v8  ;;  %v7231_v49 = vld [vmem:[#allocation37_spill] sm:$0xff]  ;;  %v2109_v8 = vld [vmem:[%s6979_s1 + $0x68] sm:$0xff] }
 0x18f   :  { %1950 = vmatprep.mubr.bf16.mxu0 %v1067_v0  ;;  %1991 = vmatprep.mubr.bf16.mxu1 %v1067_v0 }
 0x190   :  { %1920 = vmatprep.subr.bf16.mxu0 %v7223_v12  ;;  %1961 = vmatprep.subr.bf16.mxu1 %v7224_v13  ;;  %v2112_v12 = vld [vmem:[%s6979_s1 + $0x80] sm:$0xff] }
 0x192   :  { %1921 = vmatpush1.bf16.msra.mxu0 %v7225_v14  ;;  %1962 = vmatpush1.bf16.msra.mxu1 %v7226_v24  ;;  %v2116_v14 = vld [vmem:[%s6979_s1 + $0xa0] sm:$0xff]  ;;  %v2113_v24 = vld [vmem:[%s6979_s1 + $0x88] sm:$0xff] }
 0x193   :  { %1922 = vmatprep.subr.bf16.mxu0 %v7227_v25  ;;  %1963 = vmatprep.subr.bf16.mxu1 %v7228_v26  ;;  %v2117_v25 = vld [vmem:[%s6979_s1 + $0xa8] sm:$0xff] }
 0x196   :  { %1923 = vmatpush1.bf16.msra.mxu0 %v7229_v31  ;;  %1964 = vmatpush1.bf16.msra.mxu1 %v7230_v40  ;;  %v5986_v40 = vcombine.high %v2112_v12, %v2116_v14 }
 0x197   :  { %1924 = vmatprep.subr.bf16.mxu0 %v7231_v49  ;;  %1965 = vmatprep.subr.bf16.mxu1 %v7232_v41  ;;  %v5989_v49 = vcombine.high %v2113_v24, %v2117_v25  ;;  %v5992_v41 = vcombine.low %v2112_v12, %v2116_v14  ;;  %v2168_v14 = vld [vmem:[%s6979_s1 + $0x240] sm:$0xff] }
 0x19a   :  { %1925 = vmatpush1.bf16.msra.mxu0 %v7233_v42  ;;  %1966 = vmatpush1.bf16.msra.mxu1 %v7234_v47  ;;  %v5996_v42 = vcombine.low %v2113_v24, %v2117_v25  ;;  %v2120_v47 = vld [vmem:[%s6979_s1 + $0xc0] sm:$0xff]  ;;  %v2169_v25 = vld [vmem:[%s6979_s1 + $0x248] sm:$0xff] }
 0x19b   :  { %1926 = vmatprep.subr.bf16.mxu0 %v7235_v57  ;;  %1967 = vmatprep.subr.bf16.mxu1 %v7236_v58  ;;  %v2124_v57 = vld [vmem:[%s6979_s1 + $0xe0] sm:$0xff]  ;;  %v2121_v58 = vld [vmem:[%s6979_s1 + $0xc8] sm:$0xff] }
 0x19c   :  { %v2172_v24 = vld [vmem:[%s6979_s1 + $0x260] sm:$0xff] }
 0x19e   :  { %1927 = vmatpush1.bf16.msra.mxu0 %v7237_v59  ;;  %1968 = vmatpush1.bf16.msra.mxu1 %v7238_v32  ;;  %v6010_v59 = vcombine.high %v2120_v47, %v2124_v57  ;;  %v2125_v32 = vld [vmem:[%s6979_s1 + $0xe8] sm:$0xff] }
 0x19f   :  { %1928 = vmatprep.subr.bf16.mxu0 %v7239_v62  ;;  %1969 = vmatprep.subr.bf16.mxu1 %v7240_v7  ;;  %v6015_v62 = vcombine.low %v2120_v47, %v2124_v57  ;;  %v6017_v7 = vcombine.low %v2121_v58, %v2125_v32  ;;  %v6154_v47 = vcombine.high %v2168_v14, %v2172_v24  ;;  %v2173_v57 = vld [vmem:[%s6979_s1 + $0x268] sm:$0xff] }
 0x1a2   :  { %1929 = vmatpush1.bf16.msra.mxu0 %v7241_v16  ;;  %1970 = vmatpush1.bf16.msra.mxu1 %v7242_v33  ;;  %v6019_v16 = vcombine.high %v2121_v58, %v2125_v32  ;;  %v2128_v33 = vld [vmem:[%s6979_s1 + $0x100] sm:$0xff]  ;;  %v6159_v58 = vcombine.low %v2168_v14, %v2172_v24  ;;  %v6161_v32 = vcombine.low %v2169_v25, %v2173_v57  ;;  %v2197_v24 = vld [vmem:[%s6979_s1 + $0x328] sm:$0xff] }
 0x1a3   :  { %1930 = vmatprep.subr.bf16.mxu0 %v7243_v39  ;;  %1971 = vmatprep.subr.bf16.mxu1 %v7244_v48  ;;  %v2132_v39 = vld [vmem:[%s6979_s1 + $0x120] sm:$0xff]  ;;  %v2129_v48 = vld [vmem:[%s6979_s1 + $0x108] sm:$0xff] }
 0x1a6   :  { %1931 = vmatpush1.bf16.msra.mxu0 %v7245_v60  ;;  %1972 = vmatpush1.bf16.msra.mxu1 %v7246_v3  ;;  %v6034_v60 = vcombine.high %v2128_v33, %v2132_v39  ;;  %v2133_v3 = vld [vmem:[%s6979_s1 + $0x128] sm:$0xff] }
 0x1a7   :  { %1932 = vmatprep.subr.bf16.mxu0 %v7247_v5  ;;  %1973 = vmatprep.subr.bf16.mxu1 %v7248_v9  ;;  %v6039_v5 = vcombine.low %v2128_v33, %v2132_v39  ;;  %v6041_v9 = vcombine.low %v2129_v48, %v2133_v3  ;;  %v6163_v33 = vcombine.high %v2169_v25, %v2173_v57  ;;  %v2176_v39 = vld [vmem:[%s6979_s1 + $0x280] sm:$0xff] }
 0x1aa   :  { %1933 = vmatpush1.bf16.msra.mxu0 %v7249_v10  ;;  %1974 = vmatpush1.bf16.msra.mxu1 %v7250_v11  ;;  %v6043_v10 = vcombine.high %v2129_v48, %v2133_v3  ;;  %v2136_v11 = vld [vmem:[%s6979_s1 + $0x140] sm:$0xff]  ;;  %v2177_v3 = vld [vmem:[%s6979_s1 + $0x288] sm:$0xff] }
 0x1ab   :  { %1934 = vmatprep.subr.bf16.mxu0 %v7251_v15  ;;  %1975 = vmatprep.subr.bf16.mxu1 %v7252_v19  ;;  %v2140_v15 = vld [vmem:[%s6979_s1 + $0x160] sm:$0xff]  ;;  %v2137_v19 = vld [vmem:[%s6979_s1 + $0x148] sm:$0xff] }
 0x1ac   :  { %v2180_v48 = vld [vmem:[%s6979_s1 + $0x2a0] sm:$0xff] }
 0x1ae   :  { %1935 = vmatpush1.bf16.msra.mxu0 %v7253_v20  ;;  %1976 = vmatpush1.bf16.msra.mxu1 %v7254_v21  ;;  %v6058_v20 = vcombine.high %v2136_v11, %v2140_v15  ;;  %v2141_v21 = vld [vmem:[%s6979_s1 + $0x168] sm:$0xff] }
 0x1af   :  { %1936 = vmatprep.subr.bf16.mxu0 %v7255_v22  ;;  %1977 = vmatprep.subr.bf16.mxu1 %v7256_v27  ;;  %v6063_v22 = vcombine.low %v2136_v11, %v2140_v15  ;;  %v6065_v27 = vcombine.low %v2137_v19, %v2141_v21  ;;  %v6178_v11 = vcombine.high %v2176_v39, %v2180_v48  ;;  %v2181_v15 = vld [vmem:[%s6979_s1 + $0x2a8] sm:$0xff] }
 0x1b2   :  { %1937 = vmatpush1.bf16.msra.mxu0 %v7257_v28  ;;  %1978 = vmatpush1.bf16.msra.mxu1 %v7258_v29  ;;  %v6067_v28 = vcombine.high %v2137_v19, %v2141_v21  ;;  %v2144_v29 = vld [vmem:[%s6979_s1 + $0x180] sm:$0xff]  ;;  %v6183_v19 = vcombine.low %v2176_v39, %v2180_v48  ;;  %v6185_v21 = vcombine.low %v2177_v3, %v2181_v15 }
 0x1b3   :  { %1938 = vmatprep.subr.bf16.mxu0 %v7259_v30  ;;  %1979 = vmatprep.subr.bf16.mxu1 %v7260_v35  ;;  %v2148_v30 = vld [vmem:[%s6979_s1 + $0x1a0] sm:$0xff]  ;;  %v2145_v35 = vld [vmem:[%s6979_s1 + $0x188] sm:$0xff] }
 0x1b4   :  { %7273 = vst [vmem:[#allocation7_spill] sm:$0xff] %v6183_v19  ;;  %7274 = vst [vmem:[#allocation8_spill] sm:$0xff] %v6185_v21  ;;  %v2200_v48 = vld [vmem:[%s6979_s1 + $0x340] sm:$0xff] }
 0x1b6   :  { %1939 = vmatpush1.bf16.msra.mxu0 %v7261_v36  ;;  %1980 = vmatpush1.bf16.msra.mxu1 %v7262_v37  ;;  %v6082_v36 = vcombine.high %v2144_v29, %v2148_v30  ;;  %v2149_v37 = vld [vmem:[%s6979_s1 + $0x1a8] sm:$0xff] }
 0x1b7   :  { %1940 = vmatprep.subr.bf16.mxu0 %v7263_v38  ;;  %1981 = vmatprep.subr.bf16.mxu1 %v7264_v43  ;;  %v6087_v38 = vcombine.low %v2144_v29, %v2148_v30  ;;  %v6089_v43 = vcombine.low %v2145_v35, %v2149_v37  ;;  %v6187_v29 = vcombine.high %v2177_v3, %v2181_v15  ;;  %v2184_v30 = vld [vmem:[%s6979_s1 + $0x2c0] sm:$0xff]  ;;  %v2201_v15 = vld [vmem:[%s6979_s1 + $0x348] sm:$0xff] }
 0x1b8   :  { %v2204_v3 = vld [vmem:[%s6979_s1 + $0x360] sm:$0xff] }
 0x1ba   :  { %1941 = vmatpush1.bf16.msra.mxu0 %v7265_v44  ;;  %1982 = vmatpush1.bf16.msra.mxu1 %v7266_v45  ;;  %v6091_v44 = vcombine.high %v2145_v35, %v2149_v37  ;;  %v2152_v45 = vld [vmem:[%s6979_s1 + $0x1c0] sm:$0xff]  ;;  %v2185_v37 = vld [vmem:[%s6979_s1 + $0x2c8] sm:$0xff] }
 0x1bb   :  { %1942 = vmatprep.subr.bf16.mxu0 %v7267_v46  ;;  %1983 = vmatprep.subr.bf16.mxu1 %v7268_v51  ;;  %v2156_v46 = vld [vmem:[%s6979_s1 + $0x1e0] sm:$0xff]  ;;  %v2153_v51 = vld [vmem:[%s6979_s1 + $0x1c8] sm:$0xff] }
 0x1bc   :  { %v2188_v35 = vld [vmem:[%s6979_s1 + $0x2e0] sm:$0xff] }
 0x1be   :  { %1943 = vmatpush1.bf16.msra.mxu0 %v7269_v52  ;;  %1984 = vmatpush1.bf16.msra.mxu1 %v7270_v53  ;;  %v6106_v52 = vcombine.high %v2152_v45, %v2156_v46  ;;  %v2157_v53 = vld [vmem:[%s6979_s1 + $0x1e8] sm:$0xff] }
 0x1bf   :  { %1944 = vmatprep.subr.bf16.mxu0 %v7271_v55  ;;  %1985 = vmatprep.subr.bf16.mxu1 %v7272_v61  ;;  %v6111_v55 = vcombine.low %v2152_v45, %v2156_v46  ;;  %v6113_v61 = vcombine.low %v2153_v51, %v2157_v53  ;;  %v6202_v45 = vcombine.high %v2184_v30, %v2188_v35  ;;  %v2189_v46 = vld [vmem:[%s6979_s1 + $0x2e8] sm:$0xff] }
 0x1c1   :  { %7275 = vst [vmem:[#allocation9_spill] sm:$0xff] %v6202_v45 }
 0x1c2   :  { %1945 = vmatpush1.bf16.msra.mxu0 %v5736_v34  ;;  %1986 = vmatpush1.bf16.msra.mxu1 %v5740_v23  ;;  %v2097_v23 = vld [vmem:[%s6979_s1 + $0x8] sm:$0xff]  ;;  %v2108_v34 = vld [vmem:[%s6979_s1 + $0x60] sm:$0xff] }
 0x1c3   :  { %1946 = vmatprep.subr.bf16.mxu0 %v5742_v18  ;;  %1987 = vmatprep.subr.bf16.mxu1 %v5745_v17  ;;  %v2096_v17 = vld [vmem:[%s6979_s1] sm:$0xff] }
 0x1c4   :  { %v2100_v18 = vld [vmem:[%s6979_s1 + $0x20] sm:$0xff] }
 0x1c6   :  { %1947 = vmatpush1.bf16.msra.mxu0 %v5760_v2  ;;  %1988 = vmatpush1.bf16.msra.mxu1 %v5764_v56  ;;  %v5940_v56 = vcombine.high %v2096_v17, %v2100_v18 }
 0x1c7   :  { %1948 = vmatprep.subr.bf16.mxu0 %v5766_v54  ;;  %1989 = vmatprep.subr.bf16.mxu1 %v5769_v50  ;;  %v5938_v50 = vcombine.low %v2096_v17, %v2100_v18  ;;  %v2101_v54 = vld [vmem:[%s6979_s1 + $0x28] sm:$0xff]  ;;  %v6115_v17 = vcombine.high %v2153_v51, %v2157_v53  ;;  %v2160_v18 = vld [vmem:[%s6979_s1 + $0x200] sm:$0xff]  ;;  %v6207_v51 = vcombine.low %v2184_v30, %v2188_v35 }
 0x1c8   :  { %v5951_v2 = vcombine.low %v2097_v23, %v2101_v54  ;;  %v6209_v53 = vcombine.low %v2185_v37, %v2189_v46  ;;  %v6250_v30 = vcombine.high %v2200_v48, %v2204_v3  ;;  %v2205_v35 = vld [vmem:[%s6979_s1 + $0x368] sm:$0xff] }
 0x1c9   :  { %7276 = vst [vmem:[#allocation10_spill] sm:$0xff] %v6207_v51 }
 0x1ca   :  { %1949 = vmatpush1.bf16.msra.mxu0 %v5772_v4  ;;  %1990 = vmatpush1.bf16.msra.mxu1 %v5776_v6  ;;  %v2104_v4 = vld [vmem:[%s6979_s1 + $0x40] sm:$0xff]  ;;  %v5953_v6 = vcombine.high %v2097_v23, %v2101_v54  ;;  %v2161_v54 = vld [vmem:[%s6979_s1 + $0x208] sm:$0xff]  ;;  %7277 = vst [vmem:[#allocation11_spill] sm:$0xff] %v6209_v53  ;;  %7283 = vst [vmem:[#allocation17_spill] sm:$0xff] %v6250_v30 }
 0x1cb   :  { %v5955_v0 = vcombine.high %v2104_v4, %v2108_v34  ;;  %2864 = vmatprep.subr.bf16.mxu0 %v5940_v56  ;;  %v5980_v26 = vcombine.low %v2104_v4, %v2108_v34  ;;  %v2164_v23 = vld [vmem:[%s6979_s1 + $0x220] sm:$0xff]  ;;  %v2165_v34 = vld [vmem:[%s6979_s1 + $0x228] sm:$0xff] }
 0x1cc   :  { %2905 = vmatprep.subr.bf16.mxu1 %v5953_v6  ;;  %v6130_v4 = vcombine.high %v2160_v18, %v2164_v23  ;;  %v6139_v12 = vcombine.high %v2161_v54, %v2165_v34 }
 0x1cd   :  { %1951 = vmatmul.mubr.bf16.vlgmr.msra.gmra.mrb[12].mxu0 %v5861_v1  ;;  %1992 = vmatmul.mubr.bf16.vlgmr.msra.gmra.mrb[12].mxu1 %v5861_v1  ;;  %v2105_v1 = vld [vmem:[%s6979_s1 + $0x48] sm:$0xff] }
 0x1ce   :  { %v5967_v13 = vcombine.high %v2105_v1, %v2109_v8  ;;  %2865 = vmatpush1.bf16.msra.mxu0 %v5938_v50  ;;  %2906 = vmatpush1.bf16.msra.mxu1 %v5951_v2  ;;  %v5984_v31 = vcombine.low %v2105_v1, %v2109_v8  ;;  %v6135_v1 = vcombine.low %v2160_v18, %v2164_v23  ;;  %v2192_v23 = vld [vmem:[%s6979_s1 + $0x300] sm:$0xff] }
 0x1cf   :  { %2866 = vmatprep.subr.bf16.mxu0 %v5955_v0  ;;  %v6137_v8 = vcombine.low %v2161_v54, %v2165_v34  ;;  %v6211_v18 = vcombine.high %v2185_v37, %v2189_v46  ;;  %v2196_v54 = vld [vmem:[%s6979_s1 + $0x320] sm:$0xff]  ;;  %v2193_v34 = vld [vmem:[%s6979_s1 + $0x308] sm:$0xff]  ;;  %v6255_v37 = vcombine.low %v2200_v48, %v2204_v3  ;;  %v6257_v46 = vcombine.low %v2201_v15, %v2205_v35 }
 0x1d0   :  { %2907 = vmatprep.subr.bf16.mxu1 %v5967_v13  ;;  %v6226_v14 = vcombine.high %v2192_v23, %v2196_v54  ;;  %v6231_v25 = vcombine.low %v2192_v23, %v2196_v54  ;;  %v6233_v57 = vcombine.low %v2193_v34, %v2197_v24  ;;  %v6235_v39 = vcombine.high %v2193_v34, %v2197_v24  ;;  %v2208_v54 = vld [vmem:[%s6979_s1 + $0x380] sm:$0xff]  ;;  %v2209_v24 = vld [vmem:[%s6979_s1 + $0x388] sm:$0xff] }
 0x1d1   :  { %7278 = vst [vmem:[#allocation12_spill] sm:$0xff] %v6211_v18  ;;  %7284 = vst [vmem:[#allocation18_spill] sm:$0xff] %v6255_v37  ;;  %v6259_v23 = vcombine.high %v2201_v15, %v2205_v35  ;;  %v2212_v34 = vld [vmem:[%s6979_s1 + $0x3a0] sm:$0xff]  ;;  %v2213_v15 = vld [vmem:[%s6979_s1 + $0x3a8] sm:$0xff] }
 0x1d2   :  { %2867 = vmatpush1.bf16.msra.mxu0 %v5980_v26  ;;  %2908 = vmatpush1.bf16.msra.mxu1 %v5984_v31  ;;  %7279 = vst [vmem:[#allocation13_spill] sm:$0xff] %v6226_v14  ;;  %7280 = vst [vmem:[#allocation14_spill] sm:$0xff] %v6231_v25  ;;  %v6273_v48 = vcombine.low %v2208_v54, %v2212_v34  ;;  %v6275_v3 = vcombine.high %v2208_v54, %v2212_v34  ;;  %v2216_v35 = vld [vmem:[%s6979_s1 + $0x3c0] sm:$0xff]  ;;  %v2217_v34 = vld [vmem:[%s6979_s1 + $0x3c8] sm:$0xff] }
 0x1d3   :  { %2868 = vmatprep.subr.bf16.mxu0 %v5986_v40  ;;  %2909 = vmatprep.subr.bf16.mxu1 %v5989_v49  ;;  %7281 = vst [vmem:[#allocation15_spill] sm:$0xff] %v6233_v57  ;;  %7282 = vst [vmem:[#allocation16_spill] sm:$0xff] %v6235_v39 }
 0x1d4   :  { %7285 = vst [vmem:[#allocation19_spill] sm:$0xff] %v6257_v46  ;;  %7286 = vst [vmem:[#allocation20_spill] sm:$0xff] %v6259_v23 }
 0x1d5   :  { %7287 = vst [vmem:[#allocation21_spill] sm:$0xff] %v6273_v48  ;;  %7288 = vst [vmem:[#allocation22_spill] sm:$0xff] %v6275_v3 }
 0x1d6   :  { %2869 = vmatpush1.bf16.msra.mxu0 %v5992_v41  ;;  %2910 = vmatpush1.bf16.msra.mxu1 %v5996_v42 }
 0x1d7   :  { %2870 = vmatprep.subr.bf16.mxu0 %v6010_v59  ;;  %2911 = vmatprep.subr.bf16.mxu1 %v6019_v16 }
 0x1da   :  { %2871 = vmatpush1.bf16.msra.mxu0 %v6015_v62  ;;  %2912 = vmatpush1.bf16.msra.mxu1 %v6017_v7 }
 0x1db   :  { %2872 = vmatprep.subr.bf16.mxu0 %v6034_v60  ;;  %2913 = vmatprep.subr.bf16.mxu1 %v6043_v10 }
 0x1de   :  { %2873 = vmatpush1.bf16.msra.mxu0 %v6039_v5  ;;  %2914 = vmatpush1.bf16.msra.mxu1 %v6041_v9 }
 0x1df   :  { %2874 = vmatprep.subr.bf16.mxu0 %v6058_v20  ;;  %2915 = vmatprep.subr.bf16.mxu1 %v6067_v28 }
 0x1e2   :  { %2875 = vmatpush1.bf16.msra.mxu0 %v6063_v22  ;;  %2916 = vmatpush1.bf16.msra.mxu1 %v6065_v27 }
 0x1e3   :  { %2876 = vmatprep.subr.bf16.mxu0 %v6082_v36  ;;  %2917 = vmatprep.subr.bf16.mxu1 %v6091_v44 }
 0x1e6   :  { %2877 = vmatpush1.bf16.msra.mxu0 %v6087_v38  ;;  %2918 = vmatpush1.bf16.msra.mxu1 %v6089_v43 }
 0x1e7   :  { %2878 = vmatprep.subr.bf16.mxu0 %v6106_v52  ;;  %2919 = vmatprep.subr.bf16.mxu1 %v6115_v17 }
 0x1ea   :  { %2879 = vmatpush1.bf16.msra.mxu0 %v6111_v55  ;;  %2920 = vmatpush1.bf16.msra.mxu1 %v6113_v61 }
 0x1eb   :  { %2880 = vmatprep.subr.bf16.mxu0 %v6130_v4  ;;  %2921 = vmatprep.subr.bf16.mxu1 %v6139_v12 }
 0x1ee   :  { %2881 = vmatpush1.bf16.msra.mxu0 %v6135_v1  ;;  %2922 = vmatpush1.bf16.msra.mxu1 %v6137_v8 }
 0x1ef   :  { %2882 = vmatprep.subr.bf16.mxu0 %v6154_v47  ;;  %2923 = vmatprep.subr.bf16.mxu1 %v6163_v33 }
 0x1f2   :  { %2883 = vmatpush1.bf16.msra.mxu0 %v6159_v58  ;;  %2924 = vmatpush1.bf16.msra.mxu1 %v6161_v32 }
 0x1f3   :  { %2884 = vmatprep.subr.bf16.mxu0 %v6178_v11  ;;  %2925 = vmatprep.subr.bf16.mxu1 %v6187_v29 }
 0x1f6   :  { %2885 = vmatpush1.bf16.msra.mxu0 %v6183_v19  ;;  %2926 = vmatpush1.bf16.msra.mxu1 %v6185_v21 }
 0x1f7   :  { %2886 = vmatprep.subr.bf16.mxu0 %v6202_v45  ;;  %2927 = vmatprep.subr.bf16.mxu1 %v6211_v18 }
 0x1fa   :  { %2887 = vmatpush1.bf16.msra.mxu0 %v6207_v51  ;;  %2928 = vmatpush1.bf16.msra.mxu1 %v6209_v53 }
 0x1fb   :  { %2888 = vmatprep.subr.bf16.mxu0 %v6226_v14  ;;  %2929 = vmatprep.subr.bf16.mxu1 %v6235_v39 }
 0x1fe   :  { %2889 = vmatpush1.bf16.msra.mxu0 %v6231_v25  ;;  %2930 = vmatpush1.bf16.msra.mxu1 %v6233_v57  ;;  %v2221_v57 = vld [vmem:[%s6979_s1 + $0x3e8] sm:$0xff] }
 0x1ff   :  { %2890 = vmatprep.subr.bf16.mxu0 %v6250_v30  ;;  %2931 = vmatprep.subr.bf16.mxu1 %v6259_v23  ;;  %v2220_v30 = vld [vmem:[%s6979_s1 + $0x3e0] sm:$0xff]  ;;  %v6287_v23 = vcombine.low %v2209_v24, %v2213_v15  ;;  %v6300_v25 = vcombine.high %v2217_v34, %v2221_v57 }
 0x200   :  { %v6291_v54 = vcombine.high %v2216_v35, %v2220_v30 }
 0x201   :  { %7289 = vst [vmem:[#allocation23_spill] sm:$0xff] %v6287_v23  ;;  %7292 = vst [vmem:[#allocation26_spill] sm:$0xff] %v6300_v25 }
 0x202   :  { %2891 = vmatpush1.bf16.msra.mxu0 %v6255_v37  ;;  %2932 = vmatpush1.bf16.msra.mxu1 %v6257_v46  ;;  %v6289_v37 = vcombine.high %v2209_v24, %v2213_v15  ;;  %7291 = vst [vmem:[#allocation25_spill] sm:$0xff] %v6291_v54  ;;  %v6304_v24 = vcombine.low %v2216_v35, %v2220_v30  ;;  %v2099_v30 = vld [vmem:[%s6979_s1 + $0x18] sm:$0xff] }
 0x203   :  { %2892 = vmatprep.subr.bf16.mxu0 %v6275_v3  ;;  %v6308_v15 = vcombine.low %v2217_v34, %v2221_v57  ;;  %v2098_v3 = vld [vmem:[%s6979_s1 + $0x10] sm:$0xff]  ;;  %v2103_v35 = vld [vmem:[%s6979_s1 + $0x38] sm:$0xff] }
 0x204   :  { %7290 = vst [vmem:[#allocation24_spill] sm:$0xff] %v6289_v37  ;;  %2933 = vmatprep.subr.bf16.mxu1 %v6289_v37  ;;  %7293 = vst [vmem:[#allocation27_spill] sm:$0xff] %v6304_v24 }
 0x205   :  { %7294 = vst [vmem:[#allocation28_spill] sm:$0xff] %v6308_v15 }
 0x206   :  { %2893 = vmatpush1.bf16.msra.mxu0 %v6273_v48  ;;  %2934 = vmatpush1.bf16.msra.mxu1 %v6287_v23  ;;  %v2102_v48 = vld [vmem:[%s6979_s1 + $0x30] sm:$0xff] }
 0x207   :  { %2894 = vmatprep.subr.bf16.mxu0 %v6291_v54  ;;  %2935 = vmatprep.subr.bf16.mxu1 %v6300_v25  ;;  %v6322_v57 = vcombine.high %v2098_v3, %v2102_v48  ;;  %v6327_v34 = vcombine.low %v2098_v3, %v2102_v48  ;;  %v6331_v25 = vcombine.high %v2099_v30, %v2103_v35 }
 0x209   :  { %7295 = vst [vmem:[#allocation29_spill] sm:$0xff] %v6322_v57  ;;  %7296 = vst [vmem:[#allocation30_spill] sm:$0xff] %v6331_v25 }
 0x20a   :  { %2895 = vmatpush1.bf16.msra.mxu0 %v6304_v24  ;;  %2936 = vmatpush1.bf16.msra.mxu1 %v6308_v15  ;;  %v6329_v24 = vcombine.low %v2099_v30, %v2103_v35  ;;  %v4407_v35 = vld [vmem:[%s6978_s0 + $0x10] sm:$0xff] }
 0x20b   :  { %2946 = vmatprep.subr.bf16.mxu0 %v6322_v57  ;;  %2987 = vmatprep.subr.bf16.mxu1 %v6331_v25 }
 0x260   :  { %v1870_v54 = vpop.f32.mrb[8].mxu0  ;;  %v1911_v23 = vpop.f32.mrb[8].mxu1 }
 0x261   :  { %v1872_v37 = vpop.f32.mrb[9].mxu0  ;;  %v1913_v15 = vpop.f32.mrb[9].mxu1 }
 0x262   :  { %v2008_v46 = vcombine.low %v1870_v54, %v1872_v37  ;;  %v2009_v39 = vcombine.low %v1911_v23, %v1913_v15  ;;  %v1874_v14 = vpop.f32.mrb[10].mxu0  ;;  %v1915_v53 = vpop.f32.mrb[10].mxu1 }
 0x263   :  { %v1875_v51 = vpop.f32.mrb[11].mxu0  ;;  %v1916_v18 = vpop.f32.mrb[11].mxu1 }
 0x264   :  { %v2016_v48 = vrot.slane %v2008_v46, %v5849_v63  ;;  %v2023_v3 = vrot.slane %v2009_v39, %v5849_v63 }
 0x266   :  { %v2024_v30 = vcombine.low %v2016_v48, %v2023_v3 }
 0x268   :  { %v2044_v25 = vadd.f32 %v4407_v35, %v2024_v30 }
 0x26a   :  { %v2053_v57 = vrot.slane %v2044_v25, 4  ;;  %v4538_v21 = vmul.f32 -1.442695, %v2044_v25 }
 0x26c   :  { %v4539_v45 = vmul.f32 -1.442695, %v2053_v57 }
 0x26e   :  { %4897 = vpow2.f32 %v4539_v45 }
 0x26f   :  { %4899 = vpow2.f32 %v4538_v21  ;;  %v4408_v21 = vld [vmem:[%s6978_s0 + $0x18] sm:$0xff] }
 0x278   :  { %v4898_v53 = vpop.eup %4897 }
 0x279   :  { %v4900_v23 = vpop.eup %4899  ;;  %v2058_v19 = vadd.f32 1.0, %v4898_v53 }
 0x27a   :  { %v2049_v25 = vadd.f32 1.0, %v4900_v23 }
 0x27b   :  { %4901 = vrcp.f32 %v2058_v19 }
 0x27c   :  { %4903 = vrcp.f32 %v2049_v25 }
 0x2a0   :  { %v1952_v37 = vpop.f32.mrb[12].mxu0  ;;  %v1993_v14 = vpop.f32.mrb[12].mxu1 }
 0x2a1   :  { %v1954_v51 = vpop.f32.mrb[13].mxu0  ;;  %v1995_v18 = vpop.f32.mrb[13].mxu1 }
 0x2a2   :  { %v2025_v46 = vcombine.low %v1952_v37, %v1954_v51  ;;  %v2026_v54 = vcombine.low %v1993_v14, %v1995_v18  ;;  %v1956_v39 = vpop.f32.mrb[14].mxu0  ;;  %v1997_v15 = vpop.f32.mrb[14].mxu1 }
 0x2a3   :  { %v1957_v48 = vpop.f32.mrb[15].mxu0  ;;  %v1998_v3 = vpop.f32.mrb[15].mxu1  ;;  %v2071_v39 = vld [vmem:[#allocation3] sm:$0xf] }
 0x2a4   :  { %v2033_v30 = vrot.slane %v2025_v46, %v5849_v63  ;;  %v2040_v57 = vrot.slane %v2026_v54, %v5849_v63  ;;  %v4902_v51 = vpop.eup %4901 }
 0x2a5   :  { %v4904_v18 = vpop.eup %4903  ;;  %v2072_v46 = vmul.f32 %v4902_v51, %v2071_v39 }
 0x2a6   :  { %v2041_v45 = vcombine.low %v2033_v30, %v2040_v57 }
 0x2a8   :  { %v2045_v35 = vadd.f32 %v4408_v21, %v2041_v45  ;;  %v2106_v21 = vld [vmem:[%s6979_s1 + $0x50] sm:$0xff] }
 0x2a9   :  { %v2110_v45 = vld [vmem:[%s6979_s1 + $0x70] sm:$0xff] }
 0x2aa   :  { %4905 = vtanh.f32 %v2045_v35  ;;  %v2063_v37 = vrot.slane %v2045_v35, 4  ;;  %v2107_v35 = vld [vmem:[%s6979_s1 + $0x58] sm:$0xff] }
 0x2ac   :  { %v4540_v14 = vmul.f32 -1.442695, %v2063_v37  ;;  %v2111_v37 = vld [vmem:[%s6979_s1 + $0x78] sm:$0xff] }
 0x2ad   :  { %v6364_v39 = vcombine.high %v2107_v35, %v2111_v37 }
 0x2ae   :  { %4907 = vpow2.f32 %v4540_v14 }
 0x2af   :  { %7297 = vst [vmem:[#allocation31_spill] sm:$0xff] %v6364_v39 }
 0x2b4   :  { %v4906_v53 = vpop.eup %4905 }
 0x2b5   :  { %v2073_v15 = vmul.f32 %v4906_v53, %v4904_v18  ;;  %v2114_v18 = vld [vmem:[%s6979_s1 + $0x90] sm:$0xff]  ;;  %v6362_v53 = vcombine.high %v2106_v21, %v2110_v45 }
 0x2b7   :  { %v2074_v54 = vadd.f32 %v2073_v15, %v2072_v46  ;;  %v2118_v46 = vld [vmem:[%s6979_s1 + $0xb0] sm:$0xff]  ;;  %v2115_v15 = vld [vmem:[%s6979_s1 + $0x98] sm:$0xff] }
 0x2b8   :  { %v4908_v23 = vpop.eup %4907 }
 0x2b9   :  { %v2068_v48 = vadd.f32 1.0, %v4908_v23  ;;  %2077 = vst [vmem:[#allocation3] sm:$0xf] %v2074_v54  ;;  %4909 = vtanh.f32 %v2074_v54  ;;  %v2119_v54 = vld [vmem:[%s6979_s1 + $0xb8] sm:$0xff]  ;;  %v6379_v23 = vcombine.low %v2106_v21, %v2110_v45  ;;  %v6403_v45 = vcombine.low %v2114_v18, %v2118_v46 }
 0x2ba   :  { %v2127_v21 = vld [vmem:[%s6979_s1 + $0xf8] sm:$0xff] }
 0x2bb   :  { %4911 = vrcp.f32 %v2068_v48  ;;  %7298 = vst [vmem:[#allocation32_spill] sm:$0xff] %v6379_v23  ;;  %v6381_v48 = vcombine.low %v2107_v35, %v2111_v37  ;;  %7302 = vst [vmem:[#allocation36_spill] sm:$0xff] %v6403_v45  ;;  %v6405_v35 = vcombine.low %v2115_v15, %v2119_v54 }
 0x2bd   :  { %7299 = vst [vmem:[#allocation33_spill] sm:$0xff] %v6381_v48  ;;  %7303 = vst [vmem:[#allocation37_spill] sm:$0xff] %v6405_v35 }
 0x2c3   :  { %v4910_v3 = vpop.eup %4909 }
 0x2c5   :  { %v4912_v19 = vpop.eup %4911 }
 0x2c6   :  { %v2076_v30 = vmul.f32 %v4912_v19, %v4910_v3  ;;  %v6383_v3 = vcombine.high %v2114_v18, %v2118_v46  ;;  %v6385_v19 = vcombine.high %v2115_v15, %v2119_v54  ;;  %v2131_v18 = vld [vmem:[%s6979_s1 + $0x118] sm:$0xff] }
 0x2c7   :  { %v2135_v46 = vld [vmem:[%s6979_s1 + $0x138] sm:$0xff] }
 0x2c8   :  { %2078 = vst [vmem:[#allocation2] sm:$0xf] %v2076_v30  ;;  %7300 = vst [vmem:[#allocation34_spill] sm:$0xff] %v6383_v3  ;;  %v2122_v30 = vld [vmem:[%s6979_s1 + $0xd0] sm:$0xff] }
 0x2c9   :  { %7301 = vst [vmem:[#allocation35_spill] sm:$0xff] %v6385_v19 }
 0x2cf   :  { %v4543_v57 = vld.sshfl [vmem:[#allocation2] sm:$0x33 pattern:$0x76325410] }
 0x2d0   :  { %v2091_v25 = vcombine.high %v4543_v57, %v4543_v57  ;;  %v6357_v51 = vpack.c.bf16 %v4543_v57, %v4543_v57  ;;  %v2126_v57 = vld [vmem:[%s6979_s1 + $0xf0] sm:$0xff] }
 0x2d1   :  { %v6409_v37 = vcombine.high %v2122_v30, %v2126_v57  ;;  %v6427_v15 = vcombine.low %v2122_v30, %v2126_v57  ;;  %v2139_v30 = vld [vmem:[%s6979_s1 + $0x158] sm:$0xff] }
 0x2d2   :  { %v2095_v14 = vpack.c.bf16 %v2091_v25, %v2091_v25  ;;  %v2123_v25 = vld [vmem:[%s6979_s1 + $0xd8] sm:$0xff] }
 0x2d3   :  { %7304 = vst [vmem:[#allocation38_spill] sm:$0xff] %v6409_v37  ;;  %7306 = vst [vmem:[#allocation40_spill] sm:$0xff] %v6427_v15  ;;  %v6429_v54 = vcombine.low %v2123_v25, %v2127_v21  ;;  %v2143_v57 = vld [vmem:[%s6979_s1 + $0x178] sm:$0xff] }
 0x2d4   :  { %2896 = vmatprep.mubr.bf16.mxu0 %v2095_v14  ;;  %2937 = vmatprep.mubr.bf16.mxu1 %v2095_v14 }
 0x2d5   :  { %2897 = vmatmul.mubr.bf16.vlgmr.msra.gmra.mrb[16].mxu0 %v6357_v51  ;;  %2938 = vmatmul.mubr.bf16.vlgmr.msra.gmra.mrb[16].mxu1 %v6357_v51  ;;  %7307 = vst [vmem:[#allocation41_spill] sm:$0xff] %v6429_v54 }
 0x2d6   :  { %2947 = vmatpush1.bf16.msra.mxu0 %v6327_v34  ;;  %2988 = vmatpush1.bf16.msra.mxu1 %v6329_v24 }
 0x2d7   :  { %2978 = vmatprep.mubr.bf16.mxu0 %v2095_v14  ;;  %3019 = vmatprep.mubr.bf16.mxu1 %v2095_v14  ;;  %v6411_v14 = vcombine.high %v2123_v25, %v2127_v21  ;;  %v6453_v21 = vcombine.low %v2131_v18, %v2135_v46 }
 0x2d8   :  { %2948 = vmatprep.subr.bf16.mxu0 %v6362_v53  ;;  %2989 = vmatprep.subr.bf16.mxu1 %v6364_v39  ;;  %v2130_v39 = vld [vmem:[%s6979_s1 + $0x110] sm:$0xff] }
 0x2d9   :  { %7305 = vst [vmem:[#allocation39_spill] sm:$0xff] %v6411_v14  ;;  %7311 = vst [vmem:[#allocation45_spill] sm:$0xff] %v6453_v21 }
 0x2da   :  { %2949 = vmatpush1.bf16.msra.mxu0 %v6379_v23  ;;  %2990 = vmatpush1.bf16.msra.mxu1 %v6381_v48  ;;  %v2134_v48 = vld [vmem:[%s6979_s1 + $0x130] sm:$0xff] }
 0x2db   :  { %2950 = vmatprep.subr.bf16.mxu0 %v6383_v3  ;;  %2991 = vmatprep.subr.bf16.mxu1 %v6385_v19  ;;  %v6433_v19 = vcombine.high %v2130_v39, %v2134_v48  ;;  %v6435_v3 = vcombine.high %v2131_v18, %v2135_v46  ;;  %v2138_v23 = vld [vmem:[%s6979_s1 + $0x150] sm:$0xff]  ;;  %v6451_v25 = vcombine.low %v2130_v39, %v2134_v48  ;;  %v2147_v39 = vld [vmem:[%s6979_s1 + $0x198] sm:$0xff] }
 0x2dc   :  { %v2151_v48 = vld [vmem:[%s6979_s1 + $0x1b8] sm:$0xff]  ;;  %v6477_v46 = vcombine.low %v2139_v30, %v2143_v57 }
 0x2dd   :  { %7308 = vst [vmem:[#allocation42_spill] sm:$0xff] %v6433_v19  ;;  %7309 = vst [vmem:[#allocation43_spill] sm:$0xff] %v6435_v3 }
 0x2de   :  { %2951 = vmatpush1.bf16.msra.mxu0 %v6403_v45  ;;  %2992 = vmatpush1.bf16.msra.mxu1 %v6405_v35  ;;  %v2142_v35 = vld [vmem:[%s6979_s1 + $0x170] sm:$0xff]  ;;  %7310 = vst [vmem:[#allocation44_spill] sm:$0xff] %v6451_v25  ;;  %7315 = vst [vmem:[#allocation49_spill] sm:$0xff] %v6477_v46 }
 0x2df   :  { %2952 = vmatprep.subr.bf16.mxu0 %v6409_v37  ;;  %2993 = vmatprep.subr.bf16.mxu1 %v6411_v14  ;;  %v6457_v14 = vcombine.high %v2138_v23, %v2142_v35  ;;  %v6459_v37 = vcombine.high %v2139_v30, %v2143_v57  ;;  %v2146_v45 = vld [vmem:[%s6979_s1 + $0x190] sm:$0xff]  ;;  %v6475_v18 = vcombine.low %v2138_v23, %v2142_v35  ;;  %v2155_v23 = vld [vmem:[%s6979_s1 + $0x1d8] sm:$0xff] }
 0x2e0   :  { %v2159_v35 = vld [vmem:[%s6979_s1 + $0x1f8] sm:$0xff]  ;;  %v6501_v57 = vcombine.low %v2147_v39, %v2151_v48 }
 0x2e1   :  { %7312 = vst [vmem:[#allocation46_spill] sm:$0xff] %v6457_v14  ;;  %7313 = vst [vmem:[#allocation47_spill] sm:$0xff] %v6459_v37 }
 0x2e2   :  { %2953 = vmatpush1.bf16.msra.mxu0 %v6427_v15  ;;  %2994 = vmatpush1.bf16.msra.mxu1 %v6429_v54  ;;  %v2150_v54 = vld [vmem:[%s6979_s1 + $0x1b0] sm:$0xff]  ;;  %7314 = vst [vmem:[#allocation48_spill] sm:$0xff] %v6475_v18  ;;  %7319 = vst [vmem:[#allocation53_spill] sm:$0xff] %v6501_v57 }
 0x2e3   :  { %2954 = vmatprep.subr.bf16.mxu0 %v6433_v19  ;;  %2995 = vmatprep.subr.bf16.mxu1 %v6435_v3  ;;  %v6481_v3 = vcombine.high %v2146_v45, %v2150_v54  ;;  %v6483_v19 = vcombine.high %v2147_v39, %v2151_v48  ;;  %v2154_v15 = vld [vmem:[%s6979_s1 + $0x1d0] sm:$0xff]  ;;  %v6499_v30 = vcombine.low %v2146_v45, %v2150_v54  ;;  %v2163_v45 = vld [vmem:[%s6979_s1 + $0x218] sm:$0xff] }
 0x2e4   :  { %v2167_v54 = vld [vmem:[%s6979_s1 + $0x238] sm:$0xff]  ;;  %v6525_v48 = vcombine.low %v2155_v23, %v2159_v35 }
 0x2e5   :  { %7316 = vst [vmem:[#allocation50_spill] sm:$0xff] %v6481_v3  ;;  %7317 = vst [vmem:[#allocation51_spill] sm:$0xff] %v6483_v19 }
 0x2e6   :  { %2955 = vmatpush1.bf16.msra.mxu0 %v6451_v25  ;;  %2996 = vmatpush1.bf16.msra.mxu1 %v6453_v21  ;;  %v2158_v21 = vld [vmem:[%s6979_s1 + $0x1f0] sm:$0xff]  ;;  %7318 = vst [vmem:[#allocation52_spill] sm:$0xff] %v6499_v30  ;;  %7323 = vst [vmem:[#allocation57_spill] sm:$0xff] %v6525_v48 }
 0x2e7   :  { %2956 = vmatprep.subr.bf16.mxu0 %v6457_v14  ;;  %2997 = vmatprep.subr.bf16.mxu1 %v6459_v37  ;;  %v6505_v37 = vcombine.high %v2154_v15, %v2158_v21  ;;  %v6507_v14 = vcombine.high %v2155_v23, %v2159_v35  ;;  %v2162_v25 = vld [vmem:[%s6979_s1 + $0x210] sm:$0xff]  ;;  %v6523_v39 = vcombine.low %v2154_v15, %v2158_v21  ;;  %v2171_v15 = vld [vmem:[%s6979_s1 + $0x258] sm:$0xff] }
 0x2e8   :  { %v2175_v21 = vld [vmem:[%s6979_s1 + $0x278] sm:$0xff]  ;;  %v6549_v35 = vcombine.low %v2163_v45, %v2167_v54 }
 0x2e9   :  { %7320 = vst [vmem:[#allocation54_spill] sm:$0xff] %v6505_v37  ;;  %7321 = vst [vmem:[#allocation55_spill] sm:$0xff] %v6507_v14 }
 0x2ea   :  { %2957 = vmatpush1.bf16.msra.mxu0 %v6475_v18  ;;  %2998 = vmatpush1.bf16.msra.mxu1 %v6477_v46  ;;  %v2166_v46 = vld [vmem:[%s6979_s1 + $0x230] sm:$0xff]  ;;  %7322 = vst [vmem:[#allocation56_spill] sm:$0xff] %v6523_v39  ;;  %7327 = vst [vmem:[#allocation61_spill] sm:$0xff] %v6549_v35 }
 0x2eb   :  { %2958 = vmatprep.subr.bf16.mxu0 %v6481_v3  ;;  %2999 = vmatprep.subr.bf16.mxu1 %v6483_v19  ;;  %v6529_v19 = vcombine.high %v2162_v25, %v2166_v46  ;;  %v6531_v3 = vcombine.high %v2163_v45, %v2167_v54  ;;  %v2170_v18 = vld [vmem:[%s6979_s1 + $0x250] sm:$0xff]  ;;  %v6547_v23 = vcombine.low %v2162_v25, %v2166_v46  ;;  %v2179_v25 = vld [vmem:[%s6979_s1 + $0x298] sm:$0xff] }
 0x2ec   :  { %v2183_v46 = vld [vmem:[%s6979_s1 + $0x2b8] sm:$0xff]  ;;  %v6573_v54 = vcombine.low %v2171_v15, %v2175_v21 }
 0x2ed   :  { %7324 = vst [vmem:[#allocation58_spill] sm:$0xff] %v6529_v19  ;;  %7325 = vst [vmem:[#allocation59_spill] sm:$0xff] %v6531_v3 }
 0x2ee   :  { %2959 = vmatpush1.bf16.msra.mxu0 %v6499_v30  ;;  %3000 = vmatpush1.bf16.msra.mxu1 %v6501_v57  ;;  %v2174_v57 = vld [vmem:[%s6979_s1 + $0x270] sm:$0xff]  ;;  %7326 = vst [vmem:[#allocation60_spill] sm:$0xff] %v6547_v23  ;;  %7331 = vst [vmem:[#allocation65_spill] sm:$0xff] %v6573_v54 }
 0x2ef   :  { %2960 = vmatprep.subr.bf16.mxu0 %v6505_v37  ;;  %3001 = vmatprep.subr.bf16.mxu1 %v6507_v14  ;;  %v6553_v14 = vcombine.high %v2170_v18, %v2174_v57  ;;  %v6555_v37 = vcombine.high %v2171_v15, %v2175_v21  ;;  %v2178_v30 = vld [vmem:[%s6979_s1 + $0x290] sm:$0xff]  ;;  %v6571_v45 = vcombine.low %v2170_v18, %v2174_v57  ;;  %v2187_v18 = vld [vmem:[%s6979_s1 + $0x2d8] sm:$0xff] }
 0x2f0   :  { %v2191_v57 = vld [vmem:[%s6979_s1 + $0x2f8] sm:$0xff]  ;;  %v6597_v21 = vcombine.low %v2179_v25, %v2183_v46 }
 0x2f1   :  { %7328 = vst [vmem:[#allocation62_spill] sm:$0xff] %v6553_v14  ;;  %7329 = vst [vmem:[#allocation63_spill] sm:$0xff] %v6555_v37 }
 0x2f2   :  { %2961 = vmatpush1.bf16.msra.mxu0 %v6523_v39  ;;  %3002 = vmatpush1.bf16.msra.mxu1 %v6525_v48  ;;  %v2182_v48 = vld [vmem:[%s6979_s1 + $0x2b0] sm:$0xff]  ;;  %7330 = vst [vmem:[#allocation64_spill] sm:$0xff] %v6571_v45  ;;  %7335 = vst [vmem:[#allocation69_spill] sm:$0xff] %v6597_v21 }
 0x2f3   :  { %2962 = vmatprep.subr.bf16.mxu0 %v6529_v19  ;;  %3003 = vmatprep.subr.bf16.mxu1 %v6531_v3  ;;  %v6577_v3 = vcombine.high %v2178_v30, %v2182_v48  ;;  %v6579_v19 = vcombine.high %v2179_v25, %v2183_v46  ;;  %v2186_v39 = vld [vmem:[%s6979_s1 + $0x2d0] sm:$0xff]  ;;  %v6595_v15 = vcombine.low %v2178_v30, %v2182_v48  ;;  %v2195_v30 = vld [vmem:[%s6979_s1 + $0x318] sm:$0xff] }
 0x2f4   :  { %v2199_v48 = vld [vmem:[%s6979_s1 + $0x338] sm:$0xff]  ;;  %v6621_v46 = vcombine.low %v2187_v18, %v2191_v57 }
 0x2f5   :  { %7332 = vst [vmem:[#allocation66_spill] sm:$0xff] %v6577_v3  ;;  %7333 = vst [vmem:[#allocation67_spill] sm:$0xff] %v6579_v19 }
 0x2f6   :  { %2963 = vmatpush1.bf16.msra.mxu0 %v6547_v23  ;;  %3004 = vmatpush1.bf16.msra.mxu1 %v6549_v35  ;;  %v2190_v35 = vld [vmem:[%s6979_s1 + $0x2f0] sm:$0xff]  ;;  %7334 = vst [vmem:[#allocation68_spill] sm:$0xff] %v6595_v15  ;;  %7339 = vst [vmem:[#allocation73_spill] sm:$0xff] %v6621_v46 }
 0x2f7   :  { %2964 = vmatprep.subr.bf16.mxu0 %v6553_v14  ;;  %3005 = vmatprep.subr.bf16.mxu1 %v6555_v37  ;;  %v6601_v37 = vcombine.high %v2186_v39, %v2190_v35  ;;  %v6603_v14 = vcombine.high %v2187_v18, %v2191_v57  ;;  %v2194_v23 = vld [vmem:[%s6979_s1 + $0x310] sm:$0xff]  ;;  %v6619_v25 = vcombine.low %v2186_v39, %v2190_v35  ;;  %v2203_v39 = vld [vmem:[%s6979_s1 + $0x358] sm:$0xff] }
 0x2f8   :  { %v2207_v35 = vld [vmem:[%s6979_s1 + $0x378] sm:$0xff]  ;;  %v6645_v57 = vcombine.low %v2195_v30, %v2199_v48 }
 0x2f9   :  { %7336 = vst [vmem:[#allocation70_spill] sm:$0xff] %v6601_v37  ;;  %7337 = vst [vmem:[#allocation71_spill] sm:$0xff] %v6603_v14 }
 0x2fa   :  { %2965 = vmatpush1.bf16.msra.mxu0 %v6571_v45  ;;  %3006 = vmatpush1.bf16.msra.mxu1 %v6573_v54  ;;  %v2198_v54 = vld [vmem:[%s6979_s1 + $0x330] sm:$0xff]  ;;  %7338 = vst [vmem:[#allocation72_spill] sm:$0xff] %v6619_v25  ;;  %7343 = vst [vmem:[#allocation77_spill] sm:$0xff] %v6645_v57 }
 0x2fb   :  { %2966 = vmatprep.subr.bf16.mxu0 %v6577_v3  ;;  %3007 = vmatprep.subr.bf16.mxu1 %v6579_v19  ;;  %v6625_v19 = vcombine.high %v2194_v23, %v2198_v54  ;;  %v6627_v3 = vcombine.high %v2195_v30, %v2199_v48  ;;  %v2202_v45 = vld [vmem:[%s6979_s1 + $0x350] sm:$0xff]  ;;  %v6643_v18 = vcombine.low %v2194_v23, %v2198_v54  ;;  %v2211_v23 = vld [vmem:[%s6979_s1 + $0x398] sm:$0xff] }
 0x2fc   :  { %v2215_v54 = vld [vmem:[%s6979_s1 + $0x3b8] sm:$0xff]  ;;  %v6669_v48 = vcombine.low %v2203_v39, %v2207_v35 }
 0x2fd   :  { %7340 = vst [vmem:[#allocation74_spill] sm:$0xff] %v6625_v19  ;;  %7341 = vst [vmem:[#allocation75_spill] sm:$0xff] %v6627_v3 }
 0x2fe   :  { %2967 = vmatpush1.bf16.msra.mxu0 %v6595_v15  ;;  %3008 = vmatpush1.bf16.msra.mxu1 %v6597_v21  ;;  %v2206_v21 = vld [vmem:[%s6979_s1 + $0x370] sm:$0xff]  ;;  %7342 = vst [vmem:[#allocation76_spill] sm:$0xff] %v6643_v18 }
 0x2ff   :  { %2968 = vmatprep.subr.bf16.mxu0 %v6601_v37  ;;  %3009 = vmatprep.subr.bf16.mxu1 %v6603_v14  ;;  %v6649_v14 = vcombine.high %v2202_v45, %v2206_v21  ;;  %v6651_v37 = vcombine.high %v2203_v39, %v2207_v35  ;;  %v2210_v15 = vld [vmem:[%s6979_s1 + $0x390] sm:$0xff]  ;;  %v6667_v30 = vcombine.low %v2202_v45, %v2206_v21  ;;  %v2219_v45 = vld [vmem:[%s6979_s1 + $0x3d8] sm:$0xff] }
 0x300   :  { %v2223_v21 = vld [vmem:[%s6979_s1 + $0x3f8] sm:$0xff]  ;;  %v6693_v35 = vcombine.low %v2211_v23, %v2215_v54 }
 0x301   :  { %7344 = vst [vmem:[#allocation78_spill] sm:$0xff] %v6649_v14  ;;  %7345 = vst [vmem:[#allocation79_spill] sm:$0xff] %v6651_v37 }
 0x302   :  { %2969 = vmatpush1.bf16.msra.mxu0 %v6619_v25  ;;  %3010 = vmatpush1.bf16.msra.mxu1 %v6621_v46  ;;  %v2214_v46 = vld [vmem:[%s6979_s1 + $0x3b0] sm:$0xff]  ;;  %7346 = vst [vmem:[#allocation80_spill] sm:$0xff] %v6667_v30 }
 0x303   :  { %2970 = vmatprep.subr.bf16.mxu0 %v6625_v19  ;;  %3011 = vmatprep.subr.bf16.mxu1 %v6627_v3  ;;  %v6673_v3 = vcombine.high %v2210_v15, %v2214_v46  ;;  %v6675_v19 = vcombine.high %v2211_v23, %v2215_v54  ;;  %v2218_v25 = vld [vmem:[%s6979_s1 + $0x3d0] sm:$0xff]  ;;  %v6691_v39 = vcombine.low %v2210_v15, %v2214_v46 }
 0x306   :  { %2971 = vmatpush1.bf16.msra.mxu0 %v6643_v18  ;;  %3012 = vmatpush1.bf16.msra.mxu1 %v6645_v57  ;;  %v2222_v57 = vld [vmem:[%s6979_s1 + $0x3f0] sm:$0xff] }
 0x307   :  { %2972 = vmatprep.subr.bf16.mxu0 %v6649_v14  ;;  %3013 = vmatprep.subr.bf16.mxu1 %v6651_v37  ;;  %v6697_v37 = vcombine.high %v2218_v25, %v2222_v57  ;;  %v6699_v14 = vcombine.high %v2219_v45, %v2223_v21  ;;  %v6703_v18 = vcombine.low %v2218_v25, %v2222_v57 }
 0x30a   :  { %2973 = vmatpush1.bf16.msra.mxu0 %v6667_v30  ;;  %3014 = vmatpush1.bf16.msra.mxu1 %v6669_v48  ;;  %v6705_v30 = vcombine.low %v2219_v45, %v2223_v21 }
 0x30b   :  { %2974 = vmatprep.subr.bf16.mxu0 %v6673_v3  ;;  %3015 = vmatprep.subr.bf16.mxu1 %v6675_v19 }
 0x30e   :  { %2975 = vmatpush1.bf16.msra.mxu0 %v6691_v39  ;;  %3016 = vmatpush1.bf16.msra.mxu1 %v6693_v35 }
 0x30f   :  { %2976 = vmatprep.subr.bf16.mxu0 %v6697_v37  ;;  %3017 = vmatprep.subr.bf16.mxu1 %v6699_v14 }
 0x312   :  { %2977 = vmatpush1.bf16.msra.mxu0 %v6703_v18  ;;  %3018 = vmatpush1.bf16.msra.mxu1 %v6705_v30 }
 0x313   :  { %3892 = vmatprep.subr.bf16.mxu0 %v5940_v56  ;;  %3933 = vmatprep.subr.bf16.mxu1 %v5953_v6  ;;  %v7348_v56 = vld [vmem:[#allocation8_spill] sm:$0xff] }
 0x314   :  { %v7350_v6 = vld [vmem:[#allocation12_spill] sm:$0xff] }
 0x315   :  { %2979 = vmatmul.mubr.bf16.vlgmr.msra.gmra.mrb[20].mxu0 %v6357_v51  ;;  %3020 = vmatmul.mubr.bf16.vlgmr.msra.gmra.mrb[20].mxu1 %v6357_v51 }
 0x316   :  { %3893 = vmatpush1.bf16.msra.mxu0 %v5938_v50  ;;  %3934 = vmatpush1.bf16.msra.mxu1 %v5951_v2  ;;  %v7347_v50 = vld [vmem:[#allocation7_spill] sm:$0xff]  ;;  %v7349_v2 = vld [vmem:[#allocation9_spill] sm:$0xff] }
 0x317   :  { %3894 = vmatprep.subr.bf16.mxu0 %v5955_v0  ;;  %3935 = vmatprep.subr.bf16.mxu1 %v5967_v13  ;;  %v7351_v0 = vld [vmem:[#allocation10_spill] sm:$0xff]  ;;  %v7352_v13 = vld [vmem:[#allocation11_spill] sm:$0xff] }
 0x31a   :  { %3895 = vmatpush1.bf16.msra.mxu0 %v5980_v26  ;;  %3936 = vmatpush1.bf16.msra.mxu1 %v5984_v31  ;;  %v7353_v26 = vld [vmem:[#allocation13_spill] sm:$0xff]  ;;  %v7354_v31 = vld [vmem:[#allocation16_spill] sm:$0xff] }
 0x31b   :  { %3896 = vmatprep.subr.bf16.mxu0 %v5986_v40  ;;  %3937 = vmatprep.subr.bf16.mxu1 %v5989_v49  ;;  %v7355_v40 = vld [vmem:[#allocation14_spill] sm:$0xff]  ;;  %v7356_v49 = vld [vmem:[#allocation15_spill] sm:$0xff] }
 0x31e   :  { %3897 = vmatpush1.bf16.msra.mxu0 %v5992_v41  ;;  %3938 = vmatpush1.bf16.msra.mxu1 %v5996_v42  ;;  %v7357_v41 = vld [vmem:[#allocation17_spill] sm:$0xff]  ;;  %v7358_v42 = vld [vmem:[#allocation20_spill] sm:$0xff] }
 0x31f   :  { %3898 = vmatprep.subr.bf16.mxu0 %v6010_v59  ;;  %3939 = vmatprep.subr.bf16.mxu1 %v6019_v16  ;;  %v7359_v59 = vld [vmem:[#allocation18_spill] sm:$0xff]  ;;  %v7362_v16 = vld [vmem:[#allocation24_spill] sm:$0xff] }
 0x322   :  { %3899 = vmatpush1.bf16.msra.mxu0 %v6015_v62  ;;  %3940 = vmatpush1.bf16.msra.mxu1 %v6017_v7  ;;  %v7360_v62 = vld [vmem:[#allocation19_spill] sm:$0xff]  ;;  %v7361_v7 = vld [vmem:[#allocation22_spill] sm:$0xff] }
 0x323   :  { %3900 = vmatprep.subr.bf16.mxu0 %v6034_v60  ;;  %3941 = vmatprep.subr.bf16.mxu1 %v6043_v10  ;;  %v7363_v60 = vld [vmem:[#allocation21_spill] sm:$0xff]  ;;  %v7366_v10 = vld [vmem:[#allocation26_spill] sm:$0xff] }
 0x326   :  { %3901 = vmatpush1.bf16.msra.mxu0 %v6039_v5  ;;  %3942 = vmatpush1.bf16.msra.mxu1 %v6041_v9  ;;  %v7364_v5 = vld [vmem:[#allocation23_spill] sm:$0xff]  ;;  %v7365_v9 = vld [vmem:[#allocation25_spill] sm:$0xff] }
 0x327   :  { %3902 = vmatprep.subr.bf16.mxu0 %v6058_v20  ;;  %3943 = vmatprep.subr.bf16.mxu1 %v6067_v28  ;;  %v7367_v20 = vld [vmem:[#allocation27_spill] sm:$0xff]  ;;  %v7370_v28 = vld [vmem:[#allocation30_spill] sm:$0xff] }
 0x32a   :  { %3903 = vmatpush1.bf16.msra.mxu0 %v6063_v22  ;;  %3944 = vmatpush1.bf16.msra.mxu1 %v6065_v27  ;;  %v7368_v22 = vld [vmem:[#allocation28_spill] sm:$0xff]  ;;  %v7369_v27 = vld [vmem:[#allocation29_spill] sm:$0xff] }
 0x32b   :  { %3904 = vmatprep.subr.bf16.mxu0 %v6082_v36  ;;  %3945 = vmatprep.subr.bf16.mxu1 %v6091_v44 }
 0x32e   :  { %3905 = vmatpush1.bf16.msra.mxu0 %v6087_v38  ;;  %3946 = vmatpush1.bf16.msra.mxu1 %v6089_v43 }
 0x32f   :  { %3906 = vmatprep.subr.bf16.mxu0 %v6106_v52  ;;  %3947 = vmatprep.subr.bf16.mxu1 %v6115_v17 }
 0x332   :  { %3907 = vmatpush1.bf16.msra.mxu0 %v6111_v55  ;;  %3948 = vmatpush1.bf16.msra.mxu1 %v6113_v61 }
 0x333   :  { %3908 = vmatprep.subr.bf16.mxu0 %v6130_v4  ;;  %3949 = vmatprep.subr.bf16.mxu1 %v6139_v12 }
 0x336   :  { %3909 = vmatpush1.bf16.msra.mxu0 %v6135_v1  ;;  %3950 = vmatpush1.bf16.msra.mxu1 %v6137_v8 }
 0x337   :  { %3910 = vmatprep.subr.bf16.mxu0 %v6154_v47  ;;  %3951 = vmatprep.subr.bf16.mxu1 %v6163_v33 }
 0x33a   :  { %3911 = vmatpush1.bf16.msra.mxu0 %v6159_v58  ;;  %3952 = vmatpush1.bf16.msra.mxu1 %v6161_v32  ;;  %v4541_v58 = vld [vmem:[%s6978_s0 + $0x20] sm:$0xff] }
 0x33b   :  { %3912 = vmatprep.subr.bf16.mxu0 %v6178_v11  ;;  %3953 = vmatprep.subr.bf16.mxu1 %v6187_v29 }
 0x33e   :  { %3913 = vmatpush1.bf16.msra.mxu0 %v7347_v50  ;;  %3954 = vmatpush1.bf16.msra.mxu1 %v7348_v56 }
 0x33f   :  { %3914 = vmatprep.subr.bf16.mxu0 %v7349_v2  ;;  %3955 = vmatprep.subr.bf16.mxu1 %v7350_v6 }
 0x342   :  { %3915 = vmatpush1.bf16.msra.mxu0 %v7351_v0  ;;  %3956 = vmatpush1.bf16.msra.mxu1 %v7352_v13 }
 0x343   :  { %3916 = vmatprep.subr.bf16.mxu0 %v7353_v26  ;;  %3957 = vmatprep.subr.bf16.mxu1 %v7354_v31  ;;  %v4542_v31 = vld [vmem:[%s6978_s0 + $0x28] sm:$0xff] }
 0x346   :  { %3917 = vmatpush1.bf16.msra.mxu0 %v7355_v40  ;;  %3958 = vmatpush1.bf16.msra.mxu1 %v7356_v49 }
 0x347   :  { %3918 = vmatprep.subr.bf16.mxu0 %v7357_v41  ;;  %3959 = vmatprep.subr.bf16.mxu1 %v7358_v42 }
 0x34a   :  { %3919 = vmatpush1.bf16.msra.mxu0 %v7359_v59  ;;  %3960 = vmatpush1.bf16.msra.mxu1 %v7360_v62 }
 0x34b   :  { %3920 = vmatprep.subr.bf16.mxu0 %v7361_v7  ;;  %3961 = vmatprep.subr.bf16.mxu1 %v7362_v16  ;;  %v3099_v16 = vld [vmem:[#allocation3] sm:$0xf] }
 0x34e   :  { %3921 = vmatpush1.bf16.msra.mxu0 %v7363_v60  ;;  %3962 = vmatpush1.bf16.msra.mxu1 %v7364_v5 }
 0x34f   :  { %3922 = vmatprep.subr.bf16.mxu0 %v7365_v9  ;;  %3963 = vmatprep.subr.bf16.mxu1 %v7366_v10 }
 0x352   :  { %3923 = vmatpush1.bf16.msra.mxu0 %v7367_v20  ;;  %3964 = vmatpush1.bf16.msra.mxu1 %v7368_v22 }
 0x353   :  { %3974 = vmatprep.subr.bf16.mxu0 %v7369_v27  ;;  %4015 = vmatprep.subr.bf16.mxu1 %v7370_v28 }
 0x3a8   :  { %v2898_v36 = vpop.f32.mrb[16].mxu0  ;;  %v2939_v38 = vpop.f32.mrb[16].mxu1 }
 0x3a9   :  { %v2900_v43 = vpop.f32.mrb[17].mxu0  ;;  %v2941_v44 = vpop.f32.mrb[17].mxu1 }
 0x3aa   :  { %v3036_v52 = vcombine.low %v2898_v36, %v2900_v43  ;;  %v3037_v55 = vcombine.low %v2939_v38, %v2941_v44  ;;  %v2902_v61 = vpop.f32.mrb[18].mxu0  ;;  %v2943_v17 = vpop.f32.mrb[18].mxu1 }
 0x3ab   :  { %v2903_v4 = vpop.f32.mrb[19].mxu0  ;;  %v2944_v1 = vpop.f32.mrb[19].mxu1  ;;  %v7373_v61 = vld [vmem:[#allocation33_spill] sm:$0xff]  ;;  %v7374_v17 = vld [vmem:[#allocation34_spill] sm:$0xff] }
 0x3ac   :  { %v3044_v8 = vrot.slane %v3036_v52, %v5849_v63  ;;  %v3051_v12 = vrot.slane %v3037_v55, %v5849_v63  ;;  %v7371_v52 = vld [vmem:[#allocation31_spill] sm:$0xff]  ;;  %v7372_v55 = vld [vmem:[#allocation32_spill] sm:$0xff] }
 0x3ad   :  { %v7375_v4 = vld [vmem:[#allocation35_spill] sm:$0xff]  ;;  %v7376_v1 = vld [vmem:[#allocation36_spill] sm:$0xff] }
 0x3ae   :  { %v3052_v47 = vcombine.low %v3044_v8, %v3051_v12  ;;  %v7377_v8 = vld [vmem:[#allocation37_spill] sm:$0xff]  ;;  %v7380_v12 = vld [vmem:[#allocation40_spill] sm:$0xff] }
 0x3b0   :  { %v3072_v32 = vadd.f32 %v4541_v58, %v3052_v47  ;;  %v7382_v47 = vld [vmem:[#allocation42_spill] sm:$0xff]  ;;  %v7383_v58 = vld [vmem:[#allocation43_spill] sm:$0xff] }
 0x3b2   :  { %v3081_v33 = vrot.slane %v3072_v32, 4  ;;  %v4672_v29 = vmul.f32 -1.442695, %v3072_v32  ;;  %v7384_v32 = vld [vmem:[#allocation44_spill] sm:$0xff] }
 0x3b4   :  { %v4673_v11 = vmul.f32 -1.442695, %v3081_v33  ;;  %v7385_v33 = vld [vmem:[#allocation45_spill] sm:$0xff] }
 0x3b6   :  { %4913 = vpow2.f32 %v4673_v11  ;;  %v7386_v11 = vld [vmem:[#allocation46_spill] sm:$0xff] }
 0x3b7   :  { %4915 = vpow2.f32 %v4672_v29  ;;  %v7387_v29 = vld [vmem:[#allocation47_spill] sm:$0xff] }
 0x3c0   :  { %v4914_v25 = vpop.eup %4913 }
 0x3c1   :  { %v4916_v23 = vpop.eup %4915  ;;  %v3086_v6 = vadd.f32 1.0, %v4914_v25  ;;  %v7390_v25 = vld [vmem:[#allocation50_spill] sm:$0xff] }
 0x3c2   :  { %v3077_v26 = vadd.f32 1.0, %v4916_v23  ;;  %v7393_v23 = vld [vmem:[#allocation53_spill] sm:$0xff] }
 0x3c3   :  { %4917 = vrcp.f32 %v3086_v6  ;;  %v7400_v6 = vld [vmem:[#allocation60_spill] sm:$0xff] }
 0x3c4   :  { %4919 = vrcp.f32 %v3077_v26  ;;  %v7403_v26 = vld [vmem:[#allocation63_spill] sm:$0xff] }
 0x3cd   :  { %v4918_v59 = vpop.eup %4917 }
 0x3ce   :  { %v4920_v62 = vpop.eup %4919  ;;  %v3100_v60 = vmul.f32 %v4918_v59, %v3099_v16  ;;  %v7409_v59 = vld [vmem:[#allocation69_spill] sm:$0xff]  ;;  %v7412_v16 = vld [vmem:[#allocation72_spill] sm:$0xff] }
 0x3e8   :  { %v2980_v51 = vpop.f32.mrb[20].mxu0  ;;  %v3021_v15 = vpop.f32.mrb[20].mxu1 }
 0x3e9   :  { %v2982_v46 = vpop.f32.mrb[21].mxu0  ;;  %v3023_v57 = vpop.f32.mrb[21].mxu1 }
 0x3ea   :  { %v3053_v54 = vcombine.low %v2980_v51, %v2982_v46  ;;  %v3054_v45 = vcombine.low %v3021_v15, %v3023_v57  ;;  %v2984_v21 = vpop.f32.mrb[22].mxu0  ;;  %v3025_v50 = vpop.f32.mrb[22].mxu1  ;;  %v7388_v51 = vld [vmem:[#allocation48_spill] sm:$0xff]  ;;  %v7389_v15 = vld [vmem:[#allocation49_spill] sm:$0xff]  ;;  %v7391_v46 = vld [vmem:[#allocation51_spill] sm:$0xff] }
 0x3eb   :  { %v2985_v56 = vpop.f32.mrb[23].mxu0  ;;  %v3026_v2 = vpop.f32.mrb[23].mxu1  ;;  %v7392_v57 = vld [vmem:[#allocation52_spill] sm:$0xff]  ;;  %v7397_v50 = vld [vmem:[#allocation57_spill] sm:$0xff] }
 0x3ec   :  { %v3061_v0 = vrot.slane %v3053_v54, %v5849_v63  ;;  %v3068_v13 = vrot.slane %v3054_v45, %v5849_v63  ;;  %v7394_v54 = vld [vmem:[#allocation54_spill] sm:$0xff]  ;;  %v7395_v45 = vld [vmem:[#allocation55_spill] sm:$0xff]  ;;  %v7396_v21 = vld [vmem:[#allocation56_spill] sm:$0xff] }
 0x3ed   :  { %v7398_v56 = vld [vmem:[#allocation58_spill] sm:$0xff]  ;;  %v7399_v2 = vld [vmem:[#allocation59_spill] sm:$0xff] }
 0x3ee   :  { %v3069_v40 = vcombine.low %v3061_v0, %v3068_v13  ;;  %v7401_v0 = vld [vmem:[#allocation61_spill] sm:$0xff]  ;;  %v7402_v13 = vld [vmem:[#allocation62_spill] sm:$0xff] }
 0x3f0   :  { %v3073_v49 = vadd.f32 %v4542_v31, %v3069_v40  ;;  %v7404_v31 = vld [vmem:[#allocation64_spill] sm:$0xff]  ;;  %v7405_v40 = vld [vmem:[#allocation65_spill] sm:$0xff] }
 0x3f2   :  { %4921 = vtanh.f32 %v3073_v49  ;;  %v3091_v41 = vrot.slane %v3073_v49, 4  ;;  %v7406_v49 = vld [vmem:[#allocation66_spill] sm:$0xff] }
 0x3f4   :  { %v4674_v42 = vmul.f32 -1.442695, %v3091_v41  ;;  %v7407_v41 = vld [vmem:[#allocation67_spill] sm:$0xff] }
 0x3f6   :  { %4923 = vpow2.f32 %v4674_v42  ;;  %v7408_v42 = vld [vmem:[#allocation68_spill] sm:$0xff] }
 0x3fc   :  { %v4922_v7 = vpop.eup %4921 }
 0x3fd   :  { %v3101_v5 = vmul.f32 %v4922_v7, %v4920_v62  ;;  %v7410_v62 = vld [vmem:[#allocation70_spill] sm:$0xff]  ;;  %v7411_v7 = vld [vmem:[#allocation71_spill] sm:$0xff] }
 0x3ff   :  { %v3102_v9 = vadd.f32 %v3101_v5, %v3100_v60  ;;  %v7413_v60 = vld [vmem:[#allocation73_spill] sm:$0xff]  ;;  %v7414_v5 = vld [vmem:[#allocation74_spill] sm:$0xff] }
 0x400   :  { %v4924_v10 = vpop.eup %4923 }
 0x401   :  { %v3096_v20 = vadd.f32 1.0, %v4924_v10  ;;  %3105 = vst [vmem:[#allocation3] sm:$0xf] %v3102_v9  ;;  %4925 = vtanh.f32 %v3102_v9  ;;  %v7415_v9 = vld [vmem:[#allocation75_spill] sm:$0xff]  ;;  %v7416_v10 = vld [vmem:[#allocation76_spill] sm:$0xff] }
 0x403   :  { %4927 = vrcp.f32 %v3096_v20  ;;  %v7417_v20 = vld [vmem:[#allocation77_spill] sm:$0xff] }
 0x40b   :  { %v4926_v22 = vpop.eup %4925 }
 0x40d   :  { %v4928_v27 = vpop.eup %4927 }
 0x40e   :  { %v3104_v28 = vmul.f32 %v4928_v27, %v4926_v22  ;;  %v7418_v22 = vld [vmem:[#allocation78_spill] sm:$0xff]  ;;  %v7419_v27 = vld [vmem:[#allocation79_spill] sm:$0xff] }
 0x410   :  { %3106 = vst [vmem:[#allocation2] sm:$0xf] %v3104_v28  ;;  %v7420_v28 = vld [vmem:[#allocation80_spill] sm:$0xff] }
 0x417   :  { %v4677_v36 = vld.sshfl [vmem:[#allocation2] sm:$0x33 pattern:$0x76325410] }
 0x418   :  { %v3119_v38 = vcombine.high %v4677_v36, %v4677_v36  ;;  %v6789_v44 = vpack.c.bf16 %v4677_v36, %v4677_v36  ;;  %v4141_v36 = vld [vmem:[%s6980_s2 + $0x10] sm:$0xff] }
 0x41a   :  { %v3123_v43 = vpack.c.bf16 %v3119_v38, %v3119_v38  ;;  %v4142_v38 = vld [vmem:[%s6980_s2 + $0x18] sm:$0xff] }
 0x41c   :  { %3924 = vmatprep.mubr.bf16.mxu0 %v3123_v43  ;;  %3965 = vmatprep.mubr.bf16.mxu1 %v3123_v43 }
 0x41d   :  { %3925 = vmatmul.mubr.bf16.vlgmr.msra.gmra.mrb[24].mxu0 %v6789_v44  ;;  %3966 = vmatmul.mubr.bf16.vlgmr.msra.gmra.mrb[24].mxu1 %v6789_v44 }
 0x41e   :  { %3975 = vmatpush1.bf16.msra.mxu0 %v6327_v34  ;;  %4016 = vmatpush1.bf16.msra.mxu1 %v6329_v24  ;;  %v7378_v34 = vld [vmem:[#allocation38_spill] sm:$0xff]  ;;  %v7379_v24 = vld [vmem:[#allocation39_spill] sm:$0xff] }
 0x41f   :  { %4006 = vmatprep.mubr.bf16.mxu0 %v3123_v43  ;;  %4047 = vmatprep.mubr.bf16.mxu1 %v3123_v43  ;;  %v4852_v43 = vpack.c.bf16 %v4142_v38, %v4141_v36 }
 0x420   :  { %3976 = vmatprep.subr.bf16.mxu0 %v6362_v53  ;;  %4017 = vmatprep.subr.bf16.mxu1 %v7371_v52  ;;  %v7381_v53 = vld [vmem:[#allocation41_spill] sm:$0xff]  ;;  %v4160_v52 = vld [vmem:[%s6980_s2 + $0xa8] sm:$0xff] }
 0x422   :  { %3977 = vmatpush1.bf16.msra.mxu0 %v7372_v55  ;;  %4018 = vmatpush1.bf16.msra.mxu1 %v7373_v61  ;;  %v4143_v61 = vld [vmem:[%s6980_s2 + $0x20] sm:$0xff] }
 0x423   :  { %3978 = vmatprep.subr.bf16.mxu0 %v7374_v17  ;;  %4019 = vmatprep.subr.bf16.mxu1 %v7375_v4  ;;  %v4144_v17 = vld [vmem:[%s6980_s2 + $0x28] sm:$0xff] }
 0x424   :  { %v4856_v4 = vpack.c.bf16 %v4144_v17, %v4143_v61 }
 0x426   :  { %3979 = vmatpush1.bf16.msra.mxu0 %v7376_v1  ;;  %4020 = vmatpush1.bf16.msra.mxu1 %v7377_v8  ;;  %v4161_v1 = vld [vmem:[%s6980_s2 + $0xb0] sm:$0xff]  ;;  %v4162_v8 = vld [vmem:[%s6980_s2 + $0xb8] sm:$0xff] }
 0x427   :  { %3980 = vmatprep.subr.bf16.mxu0 %v7378_v34  ;;  %4021 = vmatprep.subr.bf16.mxu1 %v7379_v24  ;;  %v4858_v34 = vpack.c.bf16 %v4162_v8, %v4161_v1  ;;  %v4145_v24 = vld [vmem:[%s6980_s2 + $0x30] sm:$0xff]  ;;  %v4676_v8 = vld [vmem:[%s6978_s0 + $0x38] sm:$0xff] }
 0x42a   :  { %3981 = vmatpush1.bf16.msra.mxu0 %v7380_v12  ;;  %4022 = vmatpush1.bf16.msra.mxu1 %v7381_v53  ;;  %v4146_v12 = vld [vmem:[%s6980_s2 + $0x38] sm:$0xff] }
 0x42b   :  { %3982 = vmatprep.subr.bf16.mxu0 %v7382_v47  ;;  %4023 = vmatprep.subr.bf16.mxu1 %v7383_v58  ;;  %v4860_v53 = vpack.c.bf16 %v4146_v12, %v4145_v24  ;;  %v4163_v47 = vld [vmem:[%s6980_s2 + $0xc0] sm:$0xff]  ;;  %v4164_v58 = vld [vmem:[%s6980_s2 + $0xc8] sm:$0xff] }
 0x42e   :  { %3983 = vmatpush1.bf16.msra.mxu0 %v7384_v32  ;;  %4024 = vmatpush1.bf16.msra.mxu1 %v7385_v33  ;;  %v4862_v32 = vpack.c.bf16 %v4164_v58, %v4163_v47  ;;  %v4147_v33 = vld [vmem:[%s6980_s2 + $0x40] sm:$0xff] }
 0x42f   :  { %3984 = vmatprep.subr.bf16.mxu0 %v7386_v11  ;;  %4025 = vmatprep.subr.bf16.mxu1 %v7387_v29  ;;  %v4148_v11 = vld [vmem:[%s6980_s2 + $0x48] sm:$0xff] }
 0x430   :  { %v4864_v29 = vpack.c.bf16 %v4148_v11, %v4147_v33  ;;  %v4127_v33 = vld [vmem:[#allocation3] sm:$0xf] }
 0x432   :  { %3985 = vmatpush1.bf16.msra.mxu0 %v7388_v51  ;;  %4026 = vmatpush1.bf16.msra.mxu1 %v7389_v15  ;;  %v4165_v51 = vld [vmem:[%s6980_s2 + $0xd0] sm:$0xff]  ;;  %v4166_v15 = vld [vmem:[%s6980_s2 + $0xd8] sm:$0xff] }
 0x433   :  { %3986 = vmatprep.subr.bf16.mxu0 %v7390_v25  ;;  %4027 = vmatprep.subr.bf16.mxu1 %v7391_v46  ;;  %v4866_v25 = vpack.c.bf16 %v4166_v15, %v4165_v51  ;;  %v4149_v46 = vld [vmem:[%s6980_s2 + $0x50] sm:$0xff] }
 0x436   :  { %3987 = vmatpush1.bf16.msra.mxu0 %v7392_v57  ;;  %4028 = vmatpush1.bf16.msra.mxu1 %v7393_v23  ;;  %v4150_v57 = vld [vmem:[%s6980_s2 + $0x58] sm:$0xff] }
 0x437   :  { %3988 = vmatprep.subr.bf16.mxu0 %v7394_v54  ;;  %4029 = vmatprep.subr.bf16.mxu1 %v7395_v45  ;;  %v4868_v23 = vpack.c.bf16 %v4150_v57, %v4149_v46  ;;  %v4167_v54 = vld [vmem:[%s6980_s2 + $0xe0] sm:$0xff]  ;;  %v4168_v45 = vld [vmem:[%s6980_s2 + $0xe8] sm:$0xff] }
 0x43a   :  { %3989 = vmatpush1.bf16.msra.mxu0 %v7396_v21  ;;  %4030 = vmatpush1.bf16.msra.mxu1 %v7397_v50  ;;  %v4151_v21 = vld [vmem:[%s6980_s2 + $0x60] sm:$0xff]  ;;  %v4870_v50 = vpack.c.bf16 %v4168_v45, %v4167_v54 }
 0x43b   :  { %3990 = vmatprep.subr.bf16.mxu0 %v7398_v56  ;;  %4031 = vmatprep.subr.bf16.mxu1 %v7399_v2  ;;  %v4152_v56 = vld [vmem:[%s6980_s2 + $0x68] sm:$0xff]  ;;  %v4169_v2 = vld [vmem:[%s6980_s2 + $0xf0] sm:$0xff] }
 0x43e   :  { %3991 = vmatpush1.bf16.msra.mxu0 %v7400_v6  ;;  %4032 = vmatpush1.bf16.msra.mxu1 %v7401_v0  ;;  %v4170_v6 = vld [vmem:[%s6980_s2 + $0xf8] sm:$0xff]  ;;  %v4872_v0 = vpack.c.bf16 %v4152_v56, %v4151_v21  ;;  %v4809_v21 = vld [vmem:[%s6981_s3] ss:$0 sm:$0xff] }
 0x43f   :  { %3992 = vmatprep.subr.bf16.mxu0 %v7402_v13  ;;  %4033 = vmatprep.subr.bf16.mxu1 %v7403_v26  ;;  %v4874_v13 = vpack.c.bf16 %v4170_v6, %v4169_v2  ;;  %v4153_v26 = vld [vmem:[%s6980_s2 + $0x70] sm:$0xff] }
 0x442   :  { %3993 = vmatpush1.bf16.msra.mxu0 %v7404_v31  ;;  %4034 = vmatpush1.bf16.msra.mxu1 %v7405_v40  ;;  %v4154_v31 = vld [vmem:[%s6980_s2 + $0x78] sm:$0xff] }
 0x443   :  { %3994 = vmatprep.subr.bf16.mxu0 %v7406_v49  ;;  %4035 = vmatprep.subr.bf16.mxu1 %v7407_v41  ;;  %v4876_v40 = vpack.c.bf16 %v4154_v31, %v4153_v26 }
 0x446   :  { %3995 = vmatpush1.bf16.msra.mxu0 %v7408_v42  ;;  %4036 = vmatpush1.bf16.msra.mxu1 %v7409_v59 }
 0x447   :  { %3996 = vmatprep.subr.bf16.mxu0 %v7410_v62  ;;  %4037 = vmatprep.subr.bf16.mxu1 %v7411_v7 }
 0x44a   :  { %3997 = vmatpush1.bf16.msra.mxu0 %v7412_v16  ;;  %4038 = vmatpush1.bf16.msra.mxu1 %v7413_v60 }
 0x44b   :  { %3998 = vmatprep.subr.bf16.mxu0 %v7414_v5  ;;  %4039 = vmatprep.subr.bf16.mxu1 %v7415_v9 }
 0x44e   :  { %3999 = vmatpush1.bf16.msra.mxu0 %v7416_v10  ;;  %4040 = vmatpush1.bf16.msra.mxu1 %v7417_v20 }
 0x44f   :  { %4000 = vmatprep.subr.bf16.mxu0 %v7418_v22  ;;  %4041 = vmatprep.subr.bf16.mxu1 %v7419_v27  ;;  %v4675_v27 = vld [vmem:[%s6978_s0 + $0x30] sm:$0xff] }
 0x452   :  { %4001 = vmatpush1.bf16.msra.mxu0 %v7420_v28  ;;  %4042 = vmatpush1.bf16.msra.mxu1 %v6669_v48 }
 0x453   :  { %4002 = vmatprep.subr.bf16.mxu0 %v6673_v3  ;;  %4043 = vmatprep.subr.bf16.mxu1 %v6675_v19  ;;  %v4155_v3 = vld [vmem:[%s6980_s2 + $0x80] sm:$0xff]  ;;  %v4156_v19 = vld [vmem:[%s6980_s2 + $0x88] sm:$0xff] }
 0x454   :  { %v4846_v48 = vpack.c.bf16 %v4156_v19, %v4155_v3 }
 0x456   :  { %4003 = vmatpush1.bf16.msra.mxu0 %v6691_v39  ;;  %4044 = vmatpush1.bf16.msra.mxu1 %v6693_v35  ;;  %v4158_v39 = vld [vmem:[%s6980_s2 + $0x98] sm:$0xff] }
 0x457   :  { %4004 = vmatprep.subr.bf16.mxu0 %v6697_v37  ;;  %4045 = vmatprep.subr.bf16.mxu1 %v6699_v14  ;;  %v4139_v37 = vld [vmem:[%s6980_s2] sm:$0xff]  ;;  %v4140_v14 = vld [vmem:[%s6980_s2 + $0x8] sm:$0xff] }
 0x45a   :  { %4005 = vmatpush1.bf16.msra.mxu0 %v6703_v18  ;;  %4046 = vmatpush1.bf16.msra.mxu1 %v6705_v30  ;;  %v4848_v18 = vpack.c.bf16 %v4140_v14, %v4139_v37  ;;  %v4157_v30 = vld [vmem:[%s6980_s2 + $0x90] sm:$0xff] }
 0x45b   :  { %4847 = vmatprep.subr.bf16.mxu0 %v4846_v48  ;;  %v4850_v35 = vpack.c.bf16 %v4158_v39, %v4157_v30 }
 0x45d   :  { %4007 = vmatmul.mubr.bf16.vlgmr.msra.gmra.mrb[28].mxu0 %v6789_v44  ;;  %4048 = vmatmul.mubr.bf16.vlgmr.msra.gmra.mrb[28].mxu1 %v6789_v44  ;;  %v4159_v44 = vld [vmem:[%s6980_s2 + $0xa0] sm:$0xff] }
 0x45e   :  { %4849 = vmatpush3.bf16.msra.mxu0 %v4848_v18  ;;  %v4854_v55 = vpack.c.bf16 %v4160_v52, %v4159_v44 }
 0x45f   :  { %4851 = vmatprep.subr.bf16.mxu0 %v4850_v35 }
 0x462   :  { %4853 = vmatpush3.bf16.msra.mxu0 %v4852_v43 }
 0x463   :  { %4855 = vmatprep.subr.bf16.mxu0 %v4854_v55 }
 0x466   :  { %4857 = vmatpush3.bf16.msra.mxu0 %v4856_v4 }
 0x467   :  { %4859 = vmatprep.subr.bf16.mxu0 %v4858_v34 }
 0x46a   :  { %4861 = vmatpush3.bf16.msra.mxu0 %v4860_v53 }
 0x46b   :  { %4863 = vmatprep.subr.bf16.mxu0 %v4862_v32 }
 0x46e   :  { %4865 = vmatpush3.bf16.msra.mxu0 %v4864_v29 }
 0x46f   :  { %4867 = vmatprep.subr.bf16.mxu0 %v4866_v25 }
 0x472   :  { %4869 = vmatpush3.bf16.msra.mxu0 %v4868_v23 }
 0x473   :  { %4871 = vmatprep.subr.bf16.mxu0 %v4870_v50 }
 0x476   :  { %4873 = vmatpush3.bf16.msra.mxu0 %v4872_v0 }
 0x477   :  { %4875 = vmatprep.subr.bf16.mxu0 %v4874_v13 }
 0x47a   :  { %4877 = vmatpush3.bf16.msra.mxu0 %v4876_v40 }
 0x4f0   :  { %v3926_v49 = vpop.f32.mrb[24].mxu0  ;;  %v3967_v41 = vpop.f32.mrb[24].mxu1 }
 0x4f1   :  { %v3928_v42 = vpop.f32.mrb[25].mxu0  ;;  %v3969_v59 = vpop.f32.mrb[25].mxu1 }
 0x4f2   :  { %v4064_v62 = vcombine.low %v3926_v49, %v3928_v42  ;;  %v4065_v7 = vcombine.low %v3967_v41, %v3969_v59  ;;  %v3930_v16 = vpop.f32.mrb[26].mxu0  ;;  %v3971_v60 = vpop.f32.mrb[26].mxu1 }
 0x4f3   :  { %v3931_v5 = vpop.f32.mrb[27].mxu0  ;;  %v3972_v9 = vpop.f32.mrb[27].mxu1 }
 0x4f4   :  { %v4072_v10 = vrot.slane %v4064_v62, %v5849_v63  ;;  %v4079_v20 = vrot.slane %v4065_v7, %v5849_v63 }
 0x4f6   :  { %v4080_v22 = vcombine.low %v4072_v10, %v4079_v20 }
 0x4f8   :  { %v4100_v28 = vadd.f32 %v4675_v27, %v4080_v22 }
 0x4fa   :  { %v4109_v3 = vrot.slane %v4100_v28, 4  ;;  %v4806_v48 = vmul.f32 -1.442695, %v4100_v28 }
 0x4fc   :  { %v4807_v19 = vmul.f32 -1.442695, %v4109_v3 }
 0x4fe   :  { %4929 = vpow2.f32 %v4807_v19 }
 0x4ff   :  { %4931 = vpow2.f32 %v4806_v48 }
 0x508   :  { %v4930_v18 = vpop.eup %4929 }
 0x509   :  { %v4932_v35 = vpop.eup %4931  ;;  %v4114_v61 = vadd.f32 1.0, %v4930_v18 }
 0x50a   :  { %v4105_v1 = vadd.f32 1.0, %v4932_v35 }
 0x50b   :  { %4933 = vrcp.f32 %v4114_v61 }
 0x50c   :  { %4935 = vrcp.f32 %v4105_v1 }
 0x515   :  { %v4934_v47 = vpop.eup %4933 }
 0x516   :  { %v4936_v58 = vpop.eup %4935  ;;  %v4128_v11 = vmul.f32 %v4934_v47, %v4127_v33 }
 0x530   :  { %v4008_v37 = vpop.f32.mrb[28].mxu0  ;;  %v4049_v14 = vpop.f32.mrb[28].mxu1 }
 0x531   :  { %v4010_v30 = vpop.f32.mrb[29].mxu0  ;;  %v4051_v39 = vpop.f32.mrb[29].mxu1 }
 0x532   :  { %v4081_v36 = vcombine.low %v4008_v37, %v4010_v30  ;;  %v4082_v38 = vcombine.low %v4049_v14, %v4051_v39  ;;  %v4012_v43 = vpop.f32.mrb[30].mxu0  ;;  %v4053_v44 = vpop.f32.mrb[30].mxu1 }
 0x533   :  { %v4013_v52 = vpop.f32.mrb[31].mxu0  ;;  %v4054_v55 = vpop.f32.mrb[31].mxu1 }
 0x534   :  { %v4089_v17 = vrot.slane %v4081_v36, %v5849_v63  ;;  %v4096_v4 = vrot.slane %v4082_v38, %v5849_v63 }
 0x536   :  { %v4097_v34 = vcombine.low %v4089_v17, %v4096_v4 }
 0x538   :  { %v4101_v24 = vadd.f32 %v4676_v8, %v4097_v34 }
 0x53a   :  { %4937 = vtanh.f32 %v4101_v24  ;;  %v4119_v12 = vrot.slane %v4101_v24, 4 }
 0x53c   :  { %v4808_v53 = vmul.f32 -1.442695, %v4119_v12 }
 0x53e   :  { %4939 = vpow2.f32 %v4808_v53 }
 0x544   :  { %v4938_v32 = vpop.eup %4937 }
 0x545   :  { %v4129_v29 = vmul.f32 %v4938_v32, %v4936_v58 }
 0x547   :  { %v4130_v63 = vadd.f32 %v4129_v29, %v4128_v11 }
 0x548   :  { %v4940_v51 = vpop.eup %4939 }
 0x549   :  { %v4124_v15 = vadd.f32 1.0, %v4940_v51  ;;  %4133 = vst [vmem:[#allocation3] sm:$0xf] %v4130_v63  ;;  %4941 = vtanh.f32 %v4130_v63 }
 0x54b   :  { %4943 = vrcp.f32 %v4124_v15 }
 0x553   :  { %v4942_v25 = vpop.eup %4941 }
 0x555   :  { %v4944_v46 = vpop.eup %4943 }
 0x556   :  { %v4132_v57 = vmul.f32 %v4944_v46, %v4942_v25 }
 0x558   :  { %4134 = vst [vmem:[#allocation2] sm:$0xf] %v4132_v57 }
 0x55f   :  { %v4810_v23 = vld.sshfl [vmem:[#allocation2] sm:$0x33 pattern:$0x76325410] }
 0x560   :  { %v4186_v54 = vcombine.high %v4810_v23, %v4810_v23 }
 0x562   :  { %4253 = vmatprep.mubr.f32.mxu0 %v4186_v54 }
 0x563   :  { %4254 = vmatmul.mubr.f32.vlgmr.msra.gmra.mrb[32].mxu0 %v4810_v23 }
 0x636   :  { %v4843_v45 = vpop.f32.mrb[32].mxu0 }
 0x637   :  { %v4844_v50 = vpop.f32.mrb[33].mxu0 }
 0x638   :  { %v4845_v56 = vadd.f32 %v4844_v50, %v4843_v45 }
 0x63a   :  { %v4256_v2 = vadd.f32 %v4845_v56, %v4809_v21 }
 0x63c   :  { %4260 = vst.msk [vmem:[#allocation4] sm:$0x3] %vm4259_vm0, %v4256_v2 }
 0x63d   :  { %4956 = shalt.err (!%p4953_p4)
}
 0x63e   :  { %s4957_s11 = scalar_lea.hbm %s6982_s4, 32 }
 0x63f   :  { %p4958_p5 = scmp.ne.s32.totalorder %s6982_s4, %s4957_s11  ;;  %p4961_p6 = scmp.lt.u32.totalorder %s4957_s11, %s6982_s4 }
 0x641   :  { %p4963_p7 = pnand %p4961_p6, %p4958_p5 }
 0x643   :  { %4966 = shalt.err (!%p4963_p7)
}
 0x644   :  { %4270 = dma.vmem_to_hbm [thread:$0]  %s4268_s7, 32, %s6982_s4, [#allocation5]  }
 0x645   :  { %4967 = dma.done.wait [#allocation5], 32  }
 0x646   :  { %4968 = vsyncadd [#allocation5], 4294967264 }
 0x647   :  { %4274 = vsyncpa [#allocation5], 1 }

// kernel: deepfake_detector_forward.2
= control target key start
LH: loop header
LB: loop body
LE: loop exit
PB: predicated region body
PF: predicated region fallthrough
CT: control target
= control target key end

     0   :  { %vm293_vm0 = vcmask 261120   ;;  %vm3581_vm1 = vcmask 1041409   ;;  %vm3583_vm2 = vcmask 1042434   ;;  %vm3585_vm3 = vcmask 1043459   ;;  %s14295_s1 = inlined_call_operand.vmem [shape: f32[32,32], index: 1, kind: input, shape index: {}]   ;;  %s14296_s0 = inlined_call_operand.vmem [shape: f32[8,256,32], index: 0, kind: input, shape index: {}]   ;;  %s14297_s2 = inlined_call_operand.vmem [shape: f32[1,32], index: 2, kind: input, shape index: {}]   ;;  %s14298_s3 = inlined_call_operand.vmem [shape: f32[32,1280], index: 3, kind: input, shape index: {}]   ;;  %s14299_s5 = inlined_call_operand.vmem [shape: bf16[1280,1024], index: 5, kind: input, shape index: {}]   ;;  %s14300_s4 = inlined_call_operand.vmem [shape: f32[1,1280], index: 4, kind: input, shape index: {}]   ;;  %s14301_s6 = inlined_call_operand.vmem [shape: f32[1,1024], index: 6, kind: input, shape index: {}]   ;;  %s14302_s7 = inlined_call_operand.vmem [shape: f32[8,1024], index: 7, kind: output, shape index: {}]  }
   0x1   :  { %v282_v0 = vld [vmem:[%s14295_s1] sm:$0xff]  ;;  %v283_v1 = vld [vmem:[%s14295_s1 + $0x8] sm:$0xff]  ;;  %v284_v2 = vld [vmem:[%s14295_s1 + $0x10] sm:$0xff]  ;;  %vm3587_vm4 = vcmask 1044484   ;;  %vm3589_vm5 = vcmask 1045509   ;;  %vm3591_vm6 = vcmask 1046534  }
   0x2   :  { %v10250_v3 = vpack.c.bf16 %v283_v1, %v282_v0  ;;  %v285_v4 = vld [vmem:[%s14295_s1 + $0x18] sm:$0xff]  ;;  %v26_v5 = vld [vmem:[%s14296_s0] sm:$0xff]  ;;  %v27_v7 = vld [vmem:[%s14296_s0 + $0x8] sm:$0xff]  ;;  %vm3593_vm7 = vcmask 1047559  }
   0x3   :  { %v10254_v6 = vpack.c.bf16 %v285_v4, %v284_v2  ;;  %9866 = vmatprep.mubr.msk.f32.mxu0 %vm293_vm0, %v26_v5  ;;  %v28_v8 = vld [vmem:[%s14296_s0 + $0x10] sm:$0xff]  ;;  %v29_v9 = vld [vmem:[%s14296_s0 + $0x18] sm:$0xff]  ;;  %v30_v10 = vld [vmem:[%s14296_s0 + $0x20] sm:$0xff] }
   0x4   :  { %10251 = vmatprep.subr.bf16.mxu0 %v10250_v3  ;;  %10298 = vmatprep.subr.bf16.mxu1 %v10250_v3  ;;  %v31_v11 = vld [vmem:[%s14296_s0 + $0x28] sm:$0xff]  ;;  %v32_v12 = vld [vmem:[%s14296_s0 + $0x30] sm:$0xff]  ;;  %v33_v13 = vld [vmem:[%s14296_s0 + $0x38] sm:$0xff] }
   0x5   :  { %10253 = vmatpush3.bf16.msra.mxu0 %v10250_v3  ;;  %10300 = vmatpush3.bf16.msra.mxu1 %v10250_v3  ;;  %v34_v14 = vld [vmem:[%s14296_s0 + $0x40] sm:$0xff]  ;;  %v35_v15 = vld [vmem:[%s14296_s0 + $0x48] sm:$0xff]  ;;  %v36_v16 = vld [vmem:[%s14296_s0 + $0x50] sm:$0xff] }
   0x6   :  { %10255 = vmatprep.subr.bf16.mxu0 %v10254_v6  ;;  %10299 = vmatprep.subr.bf16.mxu1 %v10254_v6  ;;  %v37_v17 = vld [vmem:[%s14296_s0 + $0x58] sm:$0xff]  ;;  %v38_v18 = vld [vmem:[%s14296_s0 + $0x60] sm:$0xff]  ;;  %v39_v19 = vld [vmem:[%s14296_s0 + $0x68] sm:$0xff] }
   0x7   :  { %v40_v20 = vld [vmem:[%s14296_s0 + $0x70] sm:$0xff]  ;;  %v41_v21 = vld [vmem:[%s14296_s0 + $0x78] sm:$0xff]  ;;  %v42_v22 = vld [vmem:[%s14296_s0 + $0x80] sm:$0xff] }
   0x8   :  { %v43_v23 = vld [vmem:[%s14296_s0 + $0x88] sm:$0xff]  ;;  %v44_v24 = vld [vmem:[%s14296_s0 + $0x90] sm:$0xff]  ;;  %v45_v25 = vld [vmem:[%s14296_s0 + $0x98] sm:$0xff] }
   0x9   :  { %10257 = vmatpush3.bf16.msra.mxu0 %v10254_v6  ;;  %10301 = vmatpush3.bf16.msra.mxu1 %v10254_v6  ;;  %v46_v26 = vld [vmem:[%s14296_s0 + $0xa0] sm:$0xff]  ;;  %v47_v27 = vld [vmem:[%s14296_s0 + $0xa8] sm:$0xff]  ;;  %v48_v28 = vld [vmem:[%s14296_s0 + $0xb0] sm:$0xff] }
   0xa   :  { %v49_v29 = vld [vmem:[%s14296_s0 + $0xb8] sm:$0xff]  ;;  %v50_v30 = vld [vmem:[%s14296_s0 + $0xc0] sm:$0xff]  ;;  %v51_v31 = vld [vmem:[%s14296_s0 + $0xc8] sm:$0xff] }
   0xb   :  { %v52_v32 = vld [vmem:[%s14296_s0 + $0xd0] sm:$0xff]  ;;  %v53_v33 = vld [vmem:[%s14296_s0 + $0xd8] sm:$0xff]  ;;  %v54_v34 = vld [vmem:[%s14296_s0 + $0xe0] sm:$0xff] }
   0xc   :  { %9867 = vmatmul.mubr.msk.f32.vlgmr.msra.gmra.mrb[0].mxu0 %vm293_vm0, %v27_v7  ;;  %v55_v35 = vld [vmem:[%s14296_s0 + $0xe8] sm:$0xff]  ;;  %v56_v36 = vld [vmem:[%s14296_s0 + $0xf0] sm:$0xff]  ;;  %v57_v37 = vld [vmem:[%s14296_s0 + $0xf8] sm:$0xff] }
   0xd   :  { %9869 = vmatprep.mubr.msk.f32.mxu0 %vm293_vm0, %v28_v8  ;;  %v58_v38 = vld [vmem:[%s14296_s0 + $0x100] sm:$0xff]  ;;  %v59_v39 = vld [vmem:[%s14296_s0 + $0x108] sm:$0xff]  ;;  %v60_v40 = vld [vmem:[%s14296_s0 + $0x110] sm:$0xff] }
   0xe   :  { %v61_v41 = vld [vmem:[%s14296_s0 + $0x118] sm:$0xff]  ;;  %v62_v42 = vld [vmem:[%s14296_s0 + $0x120] sm:$0xff]  ;;  %v63_v43 = vld [vmem:[%s14296_s0 + $0x128] sm:$0xff] }
   0xf   :  { %v64_v44 = vld [vmem:[%s14296_s0 + $0x130] sm:$0xff]  ;;  %v65_v45 = vld [vmem:[%s14296_s0 + $0x138] sm:$0xff]  ;;  %v66_v46 = vld [vmem:[%s14296_s0 + $0x140] sm:$0xff] }
  0x10   :  { %9870 = vmatmul.mubr.msk.f32.gmra.mrb[2].mxu0 %vm293_vm0, %v29_v9  ;;  %v67_v47 = vld [vmem:[%s14296_s0 + $0x148] sm:$0xff]  ;;  %v68_v48 = vld [vmem:[%s14296_s0 + $0x150] sm:$0xff]  ;;  %v69_v49 = vld [vmem:[%s14296_s0 + $0x158] sm:$0xff] }
  0x11   :  { %9872 = vmatprep.mubr.msk.f32.mxu0 %vm293_vm0, %v30_v10  ;;  %v70_v50 = vld [vmem:[%s14296_s0 + $0x160] sm:$0xff]  ;;  %v71_v51 = vld [vmem:[%s14296_s0 + $0x168] sm:$0xff]  ;;  %v72_v52 = vld [vmem:[%s14296_s0 + $0x170] sm:$0xff] }
  0x12   :  { %v73_v53 = vld [vmem:[%s14296_s0 + $0x178] sm:$0xff]  ;;  %v74_v54 = vld [vmem:[%s14296_s0 + $0x180] sm:$0xff]  ;;  %v75_v55 = vld [vmem:[%s14296_s0 + $0x188] sm:$0xff] }
  0x13   :  { %v76_v56 = vld [vmem:[%s14296_s0 + $0x190] sm:$0xff]  ;;  %v77_v57 = vld [vmem:[%s14296_s0 + $0x198] sm:$0xff]  ;;  %v78_v58 = vld [vmem:[%s14296_s0 + $0x1a0] sm:$0xff] }
  0x14   :  { %9873 = vmatmul.mubr.msk.f32.gmra.mrb[4].mxu0 %vm293_vm0, %v31_v11  ;;  %v79_v59 = vld [vmem:[%s14296_s0 + $0x1a8] sm:$0xff]  ;;  %v80_v60 = vld [vmem:[%s14296_s0 + $0x1b0] sm:$0xff]  ;;  %v81_v61 = vld [vmem:[%s14296_s0 + $0x1b8] sm:$0xff] }
  0x15   :  { %9875 = vmatprep.mubr.msk.f32.mxu0 %vm293_vm0, %v32_v12  ;;  %v82_v62 = vld [vmem:[%s14296_s0 + $0x1c0] sm:$0xff]  ;;  %v83_v63 = vld [vmem:[%s14296_s0 + $0x1c8] sm:$0xff]  ;;  %v84_v0 = vld [vmem:[%s14296_s0 + $0x1d0] sm:$0xff] }
  0x16   :  { %v85_v1 = vld [vmem:[%s14296_s0 + $0x1d8] sm:$0xff]  ;;  %v86_v2 = vld [vmem:[%s14296_s0 + $0x1e0] sm:$0xff]  ;;  %v87_v3 = vld [vmem:[%s14296_s0 + $0x1e8] sm:$0xff] }
  0x17   :  { %v88_v4 = vld [vmem:[%s14296_s0 + $0x1f0] sm:$0xff]  ;;  %v89_v5 = vld [vmem:[%s14296_s0 + $0x1f8] sm:$0xff]  ;;  %v90_v6 = vld [vmem:[%s14296_s0 + $0x200] sm:$0xff] }
  0x18   :  { %9876 = vmatmul.mubr.msk.f32.gmra.mrb[6].mxu0 %vm293_vm0, %v33_v13  ;;  %v91_v7 = vld [vmem:[%s14296_s0 + $0x208] sm:$0xff]  ;;  %v92_v8 = vld [vmem:[%s14296_s0 + $0x210] sm:$0xff]  ;;  %v93_v9 = vld [vmem:[%s14296_s0 + $0x218] sm:$0xff] }
  0x19   :  { %9878 = vmatprep.mubr.msk.f32.mxu0 %vm293_vm0, %v34_v14  ;;  %v94_v10 = vld [vmem:[%s14296_s0 + $0x220] sm:$0xff]  ;;  %v95_v11 = vld [vmem:[%s14296_s0 + $0x228] sm:$0xff]  ;;  %v96_v12 = vld [vmem:[%s14296_s0 + $0x230] sm:$0xff] }
  0x1a   :  { %v97_v13 = vld [vmem:[%s14296_s0 + $0x238] sm:$0xff]  ;;  %v98_v14 = vld [vmem:[%s14296_s0 + $0x240] sm:$0xff] }
  0x1c   :  { %9879 = vmatmul.mubr.msk.f32.gmra.mrb[8].mxu0 %vm293_vm0, %v35_v15  ;;  %v99_v15 = vld [vmem:[%s14296_s0 + $0x248] sm:$0xff] }
  0x1d   :  { %9881 = vmatprep.mubr.msk.f32.mxu0 %vm293_vm0, %v36_v16  ;;  %v100_v16 = vld [vmem:[%s14296_s0 + $0x250] sm:$0xff] }
  0x20   :  { %9882 = vmatmul.mubr.msk.f32.gmra.mrb[10].mxu0 %vm293_vm0, %v37_v17  ;;  %v101_v17 = vld [vmem:[%s14296_s0 + $0x258] sm:$0xff] }
  0x21   :  { %9884 = vmatprep.mubr.msk.f32.mxu0 %vm293_vm0, %v38_v18  ;;  %v102_v18 = vld [vmem:[%s14296_s0 + $0x260] sm:$0xff] }
  0x24   :  { %9885 = vmatmul.mubr.msk.f32.gmra.mrb[12].mxu0 %vm293_vm0, %v39_v19  ;;  %v103_v19 = vld [vmem:[%s14296_s0 + $0x268] sm:$0xff] }
  0x25   :  { %9887 = vmatprep.mubr.msk.f32.mxu0 %vm293_vm0, %v40_v20  ;;  %v104_v20 = vld [vmem:[%s14296_s0 + $0x270] sm:$0xff] }
  0x28   :  { %9888 = vmatmul.mubr.msk.f32.gmra.mrb[14].mxu0 %vm293_vm0, %v41_v21  ;;  %v105_v21 = vld [vmem:[%s14296_s0 + $0x278] sm:$0xff] }
  0x29   :  { %9890 = vmatprep.mubr.msk.f32.mxu0 %vm293_vm0, %v42_v22  ;;  %v106_v22 = vld [vmem:[%s14296_s0 + $0x280] sm:$0xff] }
  0x2c   :  { %9891 = vmatmul.mubr.msk.f32.gmra.mrb[16].mxu0 %vm293_vm0, %v43_v23  ;;  %v107_v23 = vld [vmem:[%s14296_s0 + $0x288] sm:$0xff] }
  0x2d   :  { %9893 = vmatprep.mubr.msk.f32.mxu0 %vm293_vm0, %v44_v24  ;;  %v108_v24 = vld [vmem:[%s14296_s0 + $0x290] sm:$0xff] }
  0x30   :  { %9894 = vmatmul.mubr.msk.f32.gmra.mrb[18].mxu0 %vm293_vm0, %v45_v25  ;;  %v109_v25 = vld [vmem:[%s14296_s0 + $0x298] sm:$0xff] }
  0x31   :  { %9896 = vmatprep.mubr.msk.f32.mxu0 %vm293_vm0, %v46_v26  ;;  %v110_v26 = vld [vmem:[%s14296_s0 + $0x2a0] sm:$0xff] }
  0x34   :  { %9897 = vmatmul.mubr.msk.f32.gmra.mrb[20].mxu0 %vm293_vm0, %v47_v27  ;;  %v111_v27 = vld [vmem:[%s14296_s0 + $0x2a8] sm:$0xff] }
  0x35   :  { %9899 = vmatprep.mubr.msk.f32.mxu0 %vm293_vm0, %v48_v28  ;;  %v112_v28 = vld [vmem:[%s14296_s0 + $0x2b0] sm:$0xff] }
  0x38   :  { %9900 = vmatmul.mubr.msk.f32.gmra.mrb[22].mxu0 %vm293_vm0, %v49_v29  ;;  %v113_v29 = vld [vmem:[%s14296_s0 + $0x2b8] sm:$0xff] }
  0x39   :  { %9902 = vmatprep.mubr.msk.f32.mxu0 %vm293_vm0, %v50_v30  ;;  %v114_v30 = vld [vmem:[%s14296_s0 + $0x2c0] sm:$0xff] }
  0x3c   :  { %9903 = vmatmul.mubr.msk.f32.gmra.mrb[24].mxu0 %vm293_vm0, %v51_v31  ;;  %v115_v31 = vld [vmem:[%s14296_s0 + $0x2c8] sm:$0xff] }
  0x3d   :  { %9905 = vmatprep.mubr.msk.f32.mxu0 %vm293_vm0, %v52_v32  ;;  %v116_v32 = vld [vmem:[%s14296_s0 + $0x2d0] sm:$0xff] }
  0x40   :  { %9906 = vmatmul.mubr.msk.f32.gmra.mrb[26].mxu0 %vm293_vm0, %v53_v33  ;;  %v117_v33 = vld [vmem:[%s14296_s0 + $0x2d8] sm:$0xff] }
  0x41   :  { %9908 = vmatprep.mubr.msk.f32.mxu0 %vm293_vm0, %v54_v34  ;;  %v118_v34 = vld [vmem:[%s14296_s0 + $0x2e0] sm:$0xff] }
  0x44   :  { %9909 = vmatmul.mubr.msk.f32.gmra.mrb[28].mxu0 %vm293_vm0, %v55_v35  ;;  %v119_v35 = vld [vmem:[%s14296_s0 + $0x2e8] sm:$0xff] }
  0x45   :  { %9911 = vmatprep.mubr.msk.f32.mxu0 %vm293_vm0, %v56_v36  ;;  %v120_v36 = vld [vmem:[%s14296_s0 + $0x2f0] sm:$0xff] }
  0x48   :  { %9912 = vmatmul.mubr.msk.f32.gmra.mrb[30].mxu0 %vm293_vm0, %v57_v37  ;;  %v121_v37 = vld [vmem:[%s14296_s0 + $0x2f8] sm:$0xff] }
  0x49   :  { %9914 = vmatprep.mubr.msk.f32.mxu0 %vm293_vm0, %v58_v38  ;;  %v122_v38 = vld [vmem:[%s14296_s0 + $0x300] sm:$0xff] }
  0x4c   :  { %9915 = vmatmul.mubr.msk.f32.gmra.mrb[32].mxu0 %vm293_vm0, %v59_v39  ;;  %v123_v39 = vld [vmem:[%s14296_s0 + $0x308] sm:$0xff] }
  0x4d   :  { %9917 = vmatprep.mubr.msk.f32.mxu0 %vm293_vm0, %v60_v40  ;;  %v124_v40 = vld [vmem:[%s14296_s0 + $0x310] sm:$0xff] }
  0x50   :  { %9918 = vmatmul.mubr.msk.f32.gmra.mrb[34].mxu0 %vm293_vm0, %v61_v41  ;;  %v125_v41 = vld [vmem:[%s14296_s0 + $0x318] sm:$0xff] }
  0x51   :  { %9920 = vmatprep.mubr.msk.f32.mxu0 %vm293_vm0, %v62_v42  ;;  %v126_v42 = vld [vmem:[%s14296_s0 + $0x320] sm:$0xff] }
  0x54   :  { %9921 = vmatmul.mubr.msk.f32.gmra.mrb[36].mxu0 %vm293_vm0, %v63_v43  ;;  %v127_v43 = vld [vmem:[%s14296_s0 + $0x328] sm:$0xff] }
  0x55   :  { %9923 = vmatprep.mubr.msk.f32.mxu0 %vm293_vm0, %v64_v44  ;;  %v128_v44 = vld [vmem:[%s14296_s0 + $0x330] sm:$0xff] }
  0x58   :  { %9924 = vmatmul.mubr.msk.f32.gmra.mrb[38].mxu0 %vm293_vm0, %v65_v45  ;;  %v129_v45 = vld [vmem:[%s14296_s0 + $0x338] sm:$0xff] }
  0x59   :  { %9926 = vmatprep.mubr.msk.f32.mxu0 %vm293_vm0, %v66_v46  ;;  %v130_v46 = vld [vmem:[%s14296_s0 + $0x340] sm:$0xff] }
  0x5c   :  { %9927 = vmatmul.mubr.msk.f32.gmra.mrb[40].mxu0 %vm293_vm0, %v67_v47  ;;  %v131_v47 = vld [vmem:[%s14296_s0 + $0x348] sm:$0xff] }
  0x5d   :  { %9929 = vmatprep.mubr.msk.f32.mxu0 %vm293_vm0, %v68_v48  ;;  %v132_v48 = vld [vmem:[%s14296_s0 + $0x350] sm:$0xff] }
  0x60   :  { %9930 = vmatmul.mubr.msk.f32.gmra.mrb[42].mxu0 %vm293_vm0, %v69_v49  ;;  %v10860_v49 = vld [vmem:[%s14297_s2] ss:$0 sm:$0xff] }
  0x61   :  { %9932 = vmatprep.mubr.msk.f32.mxu0 %vm293_vm0, %v70_v50  ;;  %v133_v50 = vld [vmem:[%s14296_s0 + $0x358] sm:$0xff] }
  0x64   :  { %9933 = vmatmul.mubr.msk.f32.gmra.mrb[44].mxu0 %vm293_vm0, %v71_v51  ;;  %v134_v51 = vld [vmem:[%s14296_s0 + $0x360] sm:$0xff] }
  0x65   :  { %9935 = vmatprep.mubr.msk.f32.mxu0 %vm293_vm0, %v72_v52 }
  0x68   :  { %9936 = vmatmul.mubr.msk.f32.gmra.mrb[46].mxu0 %vm293_vm0, %v73_v53 }
  0x69   :  { %9938 = vmatprep.mubr.msk.f32.mxu0 %vm293_vm0, %v74_v54 }
  0x6c   :  { %9939 = vmatmul.mubr.msk.f32.gmra.mrb[48].mxu0 %vm293_vm0, %v75_v55 }
  0x6d   :  { %9941 = vmatprep.mubr.msk.f32.mxu0 %vm293_vm0, %v76_v56  ;;  %v135_v56 = vld [vmem:[%s14296_s0 + $0x368] sm:$0xff] }
  0x70   :  { %9942 = vmatmul.mubr.msk.f32.gmra.mrb[50].mxu0 %vm293_vm0, %v77_v57 }
  0x71   :  { %9944 = vmatprep.mubr.msk.f32.mxu0 %vm293_vm0, %v78_v58  ;;  %v136_v58 = vld [vmem:[%s14296_s0 + $0x370] sm:$0xff] }
  0x74   :  { %9945 = vmatmul.mubr.msk.f32.gmra.mrb[52].mxu0 %vm293_vm0, %v79_v59 }
  0x75   :  { %9947 = vmatprep.mubr.msk.f32.mxu0 %vm293_vm0, %v80_v60 }
  0x78   :  { %9948 = vmatmul.mubr.msk.f32.gmra.mrb[54].mxu0 %vm293_vm0, %v81_v61 }
  0x79   :  { %9950 = vmatprep.mubr.msk.f32.mxu0 %vm293_vm0, %v82_v62 }
  0x7c   :  { %9951 = vmatmul.mubr.msk.f32.gmra.mrb[56].mxu0 %vm293_vm0, %v83_v63 }
  0x7d   :  { %9953 = vmatprep.mubr.msk.f32.mxu0 %vm293_vm0, %v84_v0 }
  0x80   :  { %9954 = vmatmul.mubr.msk.f32.gmra.mrb[58].mxu0 %vm293_vm0, %v85_v1 }
  0x81   :  { %9956 = vmatprep.mubr.msk.f32.mxu0 %vm293_vm0, %v86_v2  ;;  %v137_v2 = vld [vmem:[%s14296_s0 + $0x378] sm:$0xff] }
  0x84   :  { %9957 = vmatmul.mubr.msk.f32.gmra.mrb[60].mxu0 %vm293_vm0, %v87_v3 }
  0x85   :  { %9959 = vmatprep.mubr.msk.f32.mxu0 %vm293_vm0, %v88_v4 }
  0x88   :  { %9960 = vmatmul.mubr.msk.f32.gmra.mrb[62].mxu0 %vm293_vm0, %v89_v5  ;;  %v138_v5 = vld [vmem:[%s14296_s0 + $0x380] sm:$0xff] }
  0x89   :  { %9962 = vmatprep.mubr.msk.f32.mxu0 %vm293_vm0, %v90_v6 }
  0x8c   :  { %9963 = vmatmul.mubr.msk.f32.gmra.mrb[64].mxu0 %vm293_vm0, %v91_v7 }
  0x8d   :  { %9965 = vmatprep.mubr.msk.f32.mxu0 %vm293_vm0, %v92_v8 }
  0x90   :  { %9966 = vmatmul.mubr.msk.f32.gmra.mrb[66].mxu0 %vm293_vm0, %v93_v9 }
  0x91   :  { %9968 = vmatprep.mubr.msk.f32.mxu0 %vm293_vm0, %v94_v10 }
  0x94   :  { %9969 = vmatmul.mubr.msk.f32.gmra.mrb[68].mxu0 %vm293_vm0, %v95_v11 }
  0x95   :  { %9971 = vmatprep.mubr.msk.f32.mxu0 %vm293_vm0, %v96_v12 }
  0x98   :  { %9972 = vmatmul.mubr.msk.f32.gmra.mrb[70].mxu0 %vm293_vm0, %v97_v13 }
  0x99   :  { %9974 = vmatprep.mubr.msk.f32.mxu0 %vm293_vm0, %v98_v14 }
  0x9c   :  { %9975 = vmatmul.mubr.msk.f32.gmra.mrb[72].mxu0 %vm293_vm0, %v99_v15  ;;  %v139_v15 = vld [vmem:[%s14296_s0 + $0x388] sm:$0xff] }
  0x9d   :  { %9977 = vmatprep.mubr.msk.f32.mxu0 %vm293_vm0, %v100_v16 }
  0xa0   :  { %9978 = vmatmul.mubr.msk.f32.gmra.mrb[74].mxu0 %vm293_vm0, %v101_v17  ;;  %v140_v17 = vld [vmem:[%s14296_s0 + $0x390] sm:$0xff] }
  0xa1   :  { %9980 = vmatprep.mubr.msk.f32.mxu0 %vm293_vm0, %v102_v18 }
  0xa4   :  { %9981 = vmatmul.mubr.msk.f32.gmra.mrb[76].mxu0 %vm293_vm0, %v103_v19 }
  0xa5   :  { %9983 = vmatprep.mubr.msk.f32.mxu0 %vm293_vm0, %v104_v20 }
  0xa8   :  { %9984 = vmatmul.mubr.msk.f32.gmra.mrb[78].mxu0 %vm293_vm0, %v105_v21 }
  0xa9   :  { %9986 = vmatprep.mubr.msk.f32.mxu0 %vm293_vm0, %v106_v22 }
  0xac   :  { %9987 = vmatmul.mubr.msk.f32.gmra.mrb[80].mxu0 %vm293_vm0, %v107_v23 }
  0xad   :  { %9989 = vmatprep.mubr.msk.f32.mxu0 %vm293_vm0, %v108_v24 }
  0xb0   :  { %9990 = vmatmul.mubr.msk.f32.gmra.mrb[82].mxu0 %vm293_vm0, %v109_v25 }
  0xb1   :  { %9992 = vmatprep.mubr.msk.f32.mxu0 %vm293_vm0, %v110_v26 }
  0xb4   :  { %9993 = vmatmul.mubr.msk.f32.gmra.mrb[84].mxu0 %vm293_vm0, %v111_v27 }
  0xb5   :  { %9995 = vmatprep.mubr.msk.f32.mxu0 %vm293_vm0, %v112_v28  ;;  %v141_v28 = vld [vmem:[%s14296_s0 + $0x398] sm:$0xff] }
  0xb8   :  { %9996 = vmatmul.mubr.msk.f32.gmra.mrb[86].mxu0 %vm293_vm0, %v113_v29 }
  0xb9   :  { %9998 = vmatprep.mubr.msk.f32.mxu0 %vm293_vm0, %v114_v30 }
  0xbc   :  { %9999 = vmatmul.mubr.msk.f32.gmra.mrb[88].mxu0 %vm293_vm0, %v115_v31  ;;  %v142_v31 = vld [vmem:[%s14296_s0 + $0x3a0] sm:$0xff] }
  0xbd   :  { %10001 = vmatprep.mubr.msk.f32.mxu0 %vm293_vm0, %v116_v32 }
  0xc0   :  { %10002 = vmatmul.mubr.msk.f32.gmra.mrb[90].mxu0 %vm293_vm0, %v117_v33 }
  0xc1   :  { %10004 = vmatprep.mubr.msk.f32.mxu0 %vm293_vm0, %v118_v34 }
  0xc4   :  { %10005 = vmatmul.mubr.msk.f32.gmra.mrb[92].mxu0 %vm293_vm0, %v119_v35 }
  0xc5   :  { %10007 = vmatprep.mubr.msk.f32.mxu0 %vm293_vm0, %v120_v36 }
  0xc8   :  { %10008 = vmatmul.mubr.msk.f32.gmra.mrb[94].mxu0 %vm293_vm0, %v121_v37 }
  0xc9   :  { %10010 = vmatprep.mubr.msk.f32.mxu0 %vm293_vm0, %v122_v38 }
  0xcc   :  { %10011 = vmatmul.mubr.msk.f32.gmra.mrb[96].mxu0 %vm293_vm0, %v123_v39 }
  0xcd   :  { %10013 = vmatprep.mubr.msk.f32.mxu0 %vm293_vm0, %v124_v40 }
  0xd0   :  { %10014 = vmatmul.mubr.msk.f32.gmra.mrb[98].mxu0 %vm293_vm0, %v125_v41 }
  0xd1   :  { %10016 = vmatprep.mubr.msk.f32.mxu0 %vm293_vm0, %v126_v42  ;;  %v143_v42 = vld [vmem:[%s14296_s0 + $0x3a8] sm:$0xff] }
  0xd4   :  { %10017 = vmatmul.mubr.msk.f32.gmra.mrb[100].mxu0 %vm293_vm0, %v127_v43 }
  0xd5   :  { %10019 = vmatprep.mubr.msk.f32.mxu0 %vm293_vm0, %v128_v44 }
  0xd8   :  { %10020 = vmatmul.mubr.msk.f32.gmra.mrb[102].mxu0 %vm293_vm0, %v129_v45  ;;  %v144_v45 = vld [vmem:[%s14296_s0 + $0x3b0] sm:$0xff] }
  0xd9   :  { %10022 = vmatprep.mubr.msk.f32.mxu0 %vm293_vm0, %v130_v46 }
  0xdc   :  { %10023 = vmatmul.mubr.msk.f32.gmra.mrb[104].mxu0 %vm293_vm0, %v131_v47 }
  0xdd   :  { %10025 = vmatprep.mubr.msk.f32.mxu0 %vm293_vm0, %v132_v48 }
  0xdf   :  { %v9868_v52 = vpop.f32.mrb[0].mxu0 }
  0xe0   :  { %v1134_v53 = vadd.f32 %v9868_v52, %v10860_v49  ;;  %v1128_v54 = vpop.f32.mrb[1].mxu0  ;;  %10026 = vmatmul.mubr.msk.f32.gmra.mrb[106].mxu0 %vm293_vm0, %v133_v50 }
  0xe1   :  { %v1129_v55 = vadd.f32 %v10860_v49, %v1128_v54  ;;  %10028 = vmatprep.mubr.msk.f32.mxu0 %vm293_vm0, %v134_v51 }
  0xe2   :  { %v2408_v57 = vmax.f32 %v1134_v53, 0.0 }
  0xe3   :  { %v2407_v59 = vmax.f32 %v1129_v55, 0.0  ;;  %v9871_v60 = vpop.f32.mrb[2].mxu0 }
  0xe4   :  { %v2664_v61 = vmin.f32 %v2408_v57, 6.0  ;;  %v1144_v62 = vadd.f32 %v9871_v60, %v10860_v49  ;;  %v1138_v63 = vpop.f32.mrb[3].mxu0  ;;  %10029 = vmatmul.mubr.msk.f32.gmra.mrb[108].mxu0 %vm293_vm0, %v135_v56  ;;  %v145_v57 = vld [vmem:[%s14296_s0 + $0x3b8] sm:$0xff]  ;;  %v146_v60 = vld [vmem:[%s14296_s0 + $0x3c0] sm:$0xff] }
  0xe5   :  { %v2663_v0 = vmin.f32 %v2407_v59, 6.0  ;;  %v1139_v1 = vadd.f32 %v10860_v49, %v1138_v63  ;;  %10031 = vmatprep.mubr.msk.f32.mxu0 %vm293_vm0, %v136_v58 }
  0xe6   :  { %v2920_v3 = vsel %vm293_vm0, %v2664_v61, 0.0  ;;  %v2410_v4 = vmax.f32 %v1144_v62, 0.0 }
  0xe7   :  { %v2919_v6 = vsel %vm293_vm0, %v2663_v0, 0.0  ;;  %v2409_v7 = vmax.f32 %v1139_v1, 0.0  ;;  %v9874_v8 = vpop.f32.mrb[4].mxu0 }
  0xe8   :  { %v2921_v9 = vadd.f32 %v2920_v3, %v2919_v6  ;;  %v1154_v10 = vadd.f32 %v9874_v8, %v10860_v49  ;;  %v1148_v11 = vpop.f32.mrb[5].mxu0  ;;  %10032 = vmatmul.mubr.msk.f32.gmra.mrb[110].mxu0 %vm293_vm0, %v137_v2  ;;  %v2666_v12 = vmin.f32 %v2410_v4, 6.0 }
  0xe9   :  { %v2665_v13 = vmin.f32 %v2409_v7, 6.0  ;;  %v1149_v14 = vadd.f32 %v10860_v49, %v1148_v11  ;;  %10034 = vmatprep.mubr.msk.f32.mxu0 %vm293_vm0, %v138_v5  ;;  %v147_v7 = vld [vmem:[%s14296_s0 + $0x3c8] sm:$0xff] }
  0xea   :  { %v2412_v16 = vmax.f32 %v1154_v10, 0.0  ;;  %v2924_v24 = vsel %vm293_vm0, %v2666_v12, 0.0  ;;  %v148_v10 = vld [vmem:[%s14296_s0 + $0x3d0] sm:$0xff] }
  0xeb   :  { %v2922_v18 = vsel %vm293_vm0, %v2665_v13, 0.0  ;;  %v2411_v19 = vmax.f32 %v1149_v14, 0.0  ;;  %v9877_v20 = vpop.f32.mrb[6].mxu0 }
  0xec   :  { %v2923_v21 = vadd.f32 %v2922_v18, %v2921_v9  ;;  %v1164_v22 = vadd.f32 %v9877_v20, %v10860_v49  ;;  %v1158_v23 = vpop.f32.mrb[7].mxu0  ;;  %10035 = vmatmul.mubr.msk.f32.gmra.mrb[112].mxu0 %vm293_vm0, %v139_v15  ;;  %v2668_v25 = vmin.f32 %v2412_v16, 6.0 }
  0xed   :  { %v2667_v26 = vmin.f32 %v2411_v19, 6.0  ;;  %v1159_v27 = vadd.f32 %v10860_v49, %v1158_v23  ;;  %10037 = vmatprep.mubr.msk.f32.mxu0 %vm293_vm0, %v140_v17 }
  0xee   :  { %v2925_v29 = vadd.f32 %v2924_v24, %v2923_v21  ;;  %v2414_v30 = vmax.f32 %v1164_v22, 0.0  ;;  %v2928_v38 = vsel %vm293_vm0, %v2668_v25, 0.0  ;;  %v149_v21 = vld [vmem:[%s14296_s0 + $0x3d8] sm:$0xff]  ;;  %v150_v24 = vld [vmem:[%s14296_s0 + $0x3e0] sm:$0xff] }
  0xef   :  { %v2926_v32 = vsel %vm293_vm0, %v2667_v26, 0.0  ;;  %v2413_v33 = vmax.f32 %v1159_v27, 0.0  ;;  %v9880_v34 = vpop.f32.mrb[8].mxu0 }
  0xf0   :  { %v2927_v35 = vadd.f32 %v2926_v32, %v2925_v29  ;;  %v1174_v36 = vadd.f32 %v9880_v34, %v10860_v49  ;;  %v1168_v37 = vpop.f32.mrb[9].mxu0  ;;  %10038 = vmatmul.mubr.msk.f32.gmra.mrb[114].mxu0 %vm293_vm0, %v141_v28  ;;  %v2670_v39 = vmin.f32 %v2414_v30, 6.0 }
  0xf1   :  { %v2669_v40 = vmin.f32 %v2413_v33, 6.0  ;;  %v1169_v41 = vadd.f32 %v10860_v49, %v1168_v37  ;;  %10040 = vmatprep.mubr.msk.f32.mxu0 %vm293_vm0, %v142_v31 }
  0xf2   :  { %v2929_v43 = vadd.f32 %v2928_v38, %v2927_v35  ;;  %v2416_v44 = vmax.f32 %v1174_v36, 0.0  ;;  %v2932_v53 = vsel %vm293_vm0, %v2670_v39, 0.0  ;;  %v151_v35 = vld [vmem:[%s14296_s0 + $0x3e8] sm:$0xff]  ;;  %v152_v38 = vld [vmem:[%s14296_s0 + $0x3f0] sm:$0xff] }
  0xf3   :  { %v2930_v46 = vsel %vm293_vm0, %v2669_v40, 0.0  ;;  %v2415_v47 = vmax.f32 %v1169_v41, 0.0  ;;  %v9883_v48 = vpop.f32.mrb[10].mxu0 }
  0xf4   :  { %v2931_v50 = vadd.f32 %v2930_v46, %v2929_v43  ;;  %v1184_v51 = vadd.f32 %v9883_v48, %v10860_v49  ;;  %v1178_v52 = vpop.f32.mrb[11].mxu0  ;;  %10041 = vmatmul.mubr.msk.f32.gmra.mrb[116].mxu0 %vm293_vm0, %v143_v42  ;;  %v2672_v54 = vmin.f32 %v2416_v44, 6.0 }
  0xf5   :  { %v2671_v55 = vmin.f32 %v2415_v47, 6.0  ;;  %v1179_v56 = vadd.f32 %v10860_v49, %v1178_v52  ;;  %10043 = vmatprep.mubr.msk.f32.mxu0 %vm293_vm0, %v144_v45 }
  0xf6   :  { %v2933_v58 = vadd.f32 %v2932_v53, %v2931_v50  ;;  %v2418_v59 = vmax.f32 %v1184_v51, 0.0  ;;  %v2936_v3 = vsel %vm293_vm0, %v2672_v54, 0.0  ;;  %v153_v50 = vld [vmem:[%s14296_s0 + $0x3f8] sm:$0xff]  ;;  %v154_v53 = vld [vmem:[%s14296_s0 + $0x400] sm:$0xff] }
  0xf7   :  { %v2934_v61 = vsel %vm293_vm0, %v2671_v55, 0.0  ;;  %v2417_v62 = vmax.f32 %v1179_v56, 0.0  ;;  %v9886_v63 = vpop.f32.mrb[12].mxu0 }
  0xf8   :  { %v2935_v0 = vadd.f32 %v2934_v61, %v2933_v58  ;;  %v1194_v1 = vadd.f32 %v9886_v63, %v10860_v49  ;;  %v1188_v2 = vpop.f32.mrb[13].mxu0  ;;  %10044 = vmatmul.mubr.msk.f32.gmra.mrb[118].mxu0 %vm293_vm0, %v145_v57  ;;  %v2674_v4 = vmin.f32 %v2418_v59, 6.0 }
  0xf9   :  { %v2673_v5 = vmin.f32 %v2417_v62, 6.0  ;;  %v1189_v6 = vadd.f32 %v10860_v49, %v1188_v2  ;;  %10046 = vmatprep.mubr.msk.f32.mxu0 %vm293_vm0, %v146_v60 }
  0xfa   :  { %v2937_v8 = vadd.f32 %v2936_v3, %v2935_v0  ;;  %v2420_v9 = vmax.f32 %v1194_v1, 0.0  ;;  %v2940_v17 = vsel %vm293_vm0, %v2674_v4, 0.0  ;;  %v155_v0 = vld [vmem:[%s14296_s0 + $0x408] sm:$0xff]  ;;  %v156_v3 = vld [vmem:[%s14296_s0 + $0x410] sm:$0xff] }
  0xfb   :  { %v2938_v11 = vsel %vm293_vm0, %v2673_v5, 0.0  ;;  %v2419_v12 = vmax.f32 %v1189_v6, 0.0  ;;  %v9889_v13 = vpop.f32.mrb[14].mxu0 }
  0xfc   :  { %v2939_v14 = vadd.f32 %v2938_v11, %v2937_v8  ;;  %v1204_v15 = vadd.f32 %v9889_v13, %v10860_v49  ;;  %v1198_v16 = vpop.f32.mrb[15].mxu0  ;;  %10047 = vmatmul.mubr.msk.f32.gmra.mrb[120].mxu0 %vm293_vm0, %v147_v7  ;;  %v2676_v18 = vmin.f32 %v2420_v9, 6.0 }
  0xfd   :  { %v2675_v19 = vmin.f32 %v2419_v12, 6.0  ;;  %v1199_v20 = vadd.f32 %v10860_v49, %v1198_v16  ;;  %10049 = vmatprep.mubr.msk.f32.mxu0 %vm293_vm0, %v148_v10 }
  0xfe   :  { %v2941_v22 = vadd.f32 %v2940_v17, %v2939_v14  ;;  %v2422_v23 = vmax.f32 %v1204_v15, 0.0  ;;  %v2944_v31 = vsel %vm293_vm0, %v2676_v18, 0.0  ;;  %v157_v14 = vld [vmem:[%s14296_s0 + $0x418] sm:$0xff]  ;;  %v158_v17 = vld [vmem:[%s14296_s0 + $0x420] sm:$0xff] }
  0xff   :  { %v2942_v25 = vsel %vm293_vm0, %v2675_v19, 0.0  ;;  %v2421_v26 = vmax.f32 %v1199_v20, 0.0  ;;  %v9892_v27 = vpop.f32.mrb[16].mxu0 }
 0x100   :  { %v2943_v28 = vadd.f32 %v2942_v25, %v2941_v22  ;;  %v1214_v29 = vadd.f32 %v9892_v27, %v10860_v49  ;;  %v1208_v30 = vpop.f32.mrb[17].mxu0  ;;  %10050 = vmatmul.mubr.msk.f32.gmra.mrb[122].mxu0 %vm293_vm0, %v149_v21  ;;  %v2678_v32 = vmin.f32 %v2422_v23, 6.0 }
 0x101   :  { %v2677_v33 = vmin.f32 %v2421_v26, 6.0  ;;  %v1209_v34 = vadd.f32 %v10860_v49, %v1208_v30  ;;  %10052 = vmatprep.mubr.msk.f32.mxu0 %vm293_vm0, %v150_v24 }
 0x102   :  { %v2945_v36 = vadd.f32 %v2944_v31, %v2943_v28  ;;  %v2424_v37 = vmax.f32 %v1214_v29, 0.0  ;;  %v2948_v45 = vsel %vm293_vm0, %v2678_v32, 0.0  ;;  %v159_v28 = vld [vmem:[%s14296_s0 + $0x428] sm:$0xff]  ;;  %v160_v31 = vld [vmem:[%s14296_s0 + $0x430] sm:$0xff] }
 0x103   :  { %v2946_v39 = vsel %vm293_vm0, %v2677_v33, 0.0  ;;  %v2423_v40 = vmax.f32 %v1209_v34, 0.0  ;;  %v9895_v41 = vpop.f32.mrb[18].mxu0 }
 0x104   :  { %v2947_v42 = vadd.f32 %v2946_v39, %v2945_v36  ;;  %v1224_v43 = vadd.f32 %v9895_v41, %v10860_v49  ;;  %v1218_v44 = vpop.f32.mrb[19].mxu0  ;;  %10053 = vmatmul.mubr.msk.f32.gmra.mrb[124].mxu0 %vm293_vm0, %v151_v35  ;;  %v2680_v46 = vmin.f32 %v2424_v37, 6.0 }
 0x105   :  { %v2679_v47 = vmin.f32 %v2423_v40, 6.0  ;;  %v1219_v48 = vadd.f32 %v10860_v49, %v1218_v44  ;;  %10055 = vmatprep.mubr.msk.f32.mxu0 %vm293_vm0, %v152_v38 }
 0x106   :  { %v2949_v51 = vadd.f32 %v2948_v45, %v2947_v42  ;;  %v2426_v52 = vmax.f32 %v1224_v43, 0.0  ;;  %v2952_v60 = vsel %vm293_vm0, %v2680_v46, 0.0  ;;  %v161_v42 = vld [vmem:[%s14296_s0 + $0x438] sm:$0xff]  ;;  %v162_v45 = vld [vmem:[%s14296_s0 + $0x440] sm:$0xff] }
 0x107   :  { %v2950_v54 = vsel %vm293_vm0, %v2679_v47, 0.0  ;;  %v2425_v55 = vmax.f32 %v1219_v48, 0.0  ;;  %v9898_v56 = vpop.f32.mrb[20].mxu0 }
 0x108   :  { %v2951_v57 = vadd.f32 %v2950_v54, %v2949_v51  ;;  %v1234_v58 = vadd.f32 %v9898_v56, %v10860_v49  ;;  %v1228_v59 = vpop.f32.mrb[21].mxu0  ;;  %10056 = vmatmul.mubr.msk.f32.gmra.mrb[126].mxu0 %vm293_vm0, %v153_v50  ;;  %v2682_v61 = vmin.f32 %v2426_v52, 6.0 }
 0x109   :  { %v2681_v62 = vmin.f32 %v2425_v55, 6.0  ;;  %v1229_v63 = vadd.f32 %v10860_v49, %v1228_v59  ;;  %10058 = vmatprep.mubr.msk.f32.mxu0 %vm293_vm0, %v154_v53 }
 0x10a   :  { %v2953_v1 = vadd.f32 %v2952_v60, %v2951_v57  ;;  %v2428_v2 = vmax.f32 %v1234_v58, 0.0  ;;  %v2956_v10 = vsel %vm293_vm0, %v2682_v61, 0.0  ;;  %v163_v57 = vld [vmem:[%s14296_s0 + $0x448] sm:$0xff]  ;;  %v164_v60 = vld [vmem:[%s14296_s0 + $0x450] sm:$0xff] }
 0x10b   :  { %v2954_v4 = vsel %vm293_vm0, %v2681_v62, 0.0  ;;  %v2427_v5 = vmax.f32 %v1229_v63, 0.0  ;;  %v9901_v6 = vpop.f32.mrb[22].mxu0 }
 0x10c   :  { %v2955_v7 = vadd.f32 %v2954_v4, %v2953_v1  ;;  %v1244_v8 = vadd.f32 %v9901_v6, %v10860_v49  ;;  %v1238_v9 = vpop.f32.mrb[23].mxu0  ;;  %10059 = vmatmul.mubr.msk.f32.gmra.mrb[128].mxu0 %vm293_vm0, %v155_v0  ;;  %v2684_v11 = vmin.f32 %v2428_v2, 6.0 }
 0x10d   :  { %v2683_v12 = vmin.f32 %v2427_v5, 6.0  ;;  %v1239_v13 = vadd.f32 %v10860_v49, %v1238_v9  ;;  %10061 = vmatprep.mubr.msk.f32.mxu0 %vm293_vm0, %v156_v3 }
 0x10e   :  { %v2957_v15 = vadd.f32 %v2956_v10, %v2955_v7  ;;  %v2430_v16 = vmax.f32 %v1244_v8, 0.0  ;;  %v2960_v24 = vsel %vm293_vm0, %v2684_v11, 0.0  ;;  %v165_v7 = vld [vmem:[%s14296_s0 + $0x458] sm:$0xff]  ;;  %v166_v10 = vld [vmem:[%s14296_s0 + $0x460] sm:$0xff] }
 0x10f   :  { %v2958_v18 = vsel %vm293_vm0, %v2683_v12, 0.0  ;;  %v2429_v19 = vmax.f32 %v1239_v13, 0.0  ;;  %v9904_v20 = vpop.f32.mrb[24].mxu0 }
 0x110   :  { %v2959_v21 = vadd.f32 %v2958_v18, %v2957_v15  ;;  %v1254_v22 = vadd.f32 %v9904_v20, %v10860_v49  ;;  %v1248_v23 = vpop.f32.mrb[25].mxu0  ;;  %10062 = vmatmul.mubr.msk.f32.gmra.mrb[130].mxu0 %vm293_vm0, %v157_v14  ;;  %v2686_v25 = vmin.f32 %v2430_v16, 6.0 }
 0x111   :  { %v2685_v26 = vmin.f32 %v2429_v19, 6.0  ;;  %v1249_v27 = vadd.f32 %v10860_v49, %v1248_v23  ;;  %10064 = vmatprep.mubr.msk.f32.mxu0 %vm293_vm0, %v158_v17 }
 0x112   :  { %v2961_v29 = vadd.f32 %v2960_v24, %v2959_v21  ;;  %v2432_v30 = vmax.f32 %v1254_v22, 0.0  ;;  %v2964_v38 = vsel %vm293_vm0, %v2686_v25, 0.0  ;;  %v167_v21 = vld [vmem:[%s14296_s0 + $0x468] sm:$0xff]  ;;  %v168_v24 = vld [vmem:[%s14296_s0 + $0x470] sm:$0xff] }
 0x113   :  { %v2962_v32 = vsel %vm293_vm0, %v2685_v26, 0.0  ;;  %v2431_v33 = vmax.f32 %v1249_v27, 0.0  ;;  %v9907_v34 = vpop.f32.mrb[26].mxu0 }
 0x114   :  { %v2963_v35 = vadd.f32 %v2962_v32, %v2961_v29  ;;  %v1264_v36 = vadd.f32 %v9907_v34, %v10860_v49  ;;  %v1258_v37 = vpop.f32.mrb[27].mxu0  ;;  %10065 = vmatmul.mubr.msk.f32.gmra.mrb[132].mxu0 %vm293_vm0, %v159_v28  ;;  %v2688_v39 = vmin.f32 %v2432_v30, 6.0 }
 0x115   :  { %v2687_v40 = vmin.f32 %v2431_v33, 6.0  ;;  %v1259_v41 = vadd.f32 %v10860_v49, %v1258_v37  ;;  %10067 = vmatprep.mubr.msk.f32.mxu0 %vm293_vm0, %v160_v31 }
 0x116   :  { %v2965_v43 = vadd.f32 %v2964_v38, %v2963_v35  ;;  %v2434_v44 = vmax.f32 %v1264_v36, 0.0  ;;  %v2968_v53 = vsel %vm293_vm0, %v2688_v39, 0.0  ;;  %v169_v35 = vld [vmem:[%s14296_s0 + $0x478] sm:$0xff]  ;;  %v170_v39 = vld [vmem:[%s14296_s0 + $0x480] sm:$0xff] }
 0x117   :  { %v2966_v46 = vsel %vm293_vm0, %v2687_v40, 0.0  ;;  %v2433_v47 = vmax.f32 %v1259_v41, 0.0  ;;  %v9910_v48 = vpop.f32.mrb[28].mxu0 }
 0x118   :  { %v2967_v50 = vadd.f32 %v2966_v46, %v2965_v43  ;;  %v1274_v51 = vadd.f32 %v9910_v48, %v10860_v49  ;;  %v1268_v52 = vpop.f32.mrb[29].mxu0  ;;  %10068 = vmatmul.mubr.msk.f32.gmra.mrb[134].mxu0 %vm293_vm0, %v161_v42  ;;  %v2690_v54 = vmin.f32 %v2434_v44, 6.0 }
 0x119   :  { %v2689_v55 = vmin.f32 %v2433_v47, 6.0  ;;  %v1269_v56 = vadd.f32 %v10860_v49, %v1268_v52  ;;  %10070 = vmatprep.mubr.msk.f32.mxu0 %vm293_vm0, %v162_v45  ;;  %v172_v52 = vld [vmem:[%s14296_s0 + $0x490] sm:$0xff] }
 0x11a   :  { %v2969_v58 = vadd.f32 %v2968_v53, %v2967_v50  ;;  %v2436_v59 = vmax.f32 %v1274_v51, 0.0  ;;  %v2972_v3 = vsel %vm293_vm0, %v2690_v54, 0.0  ;;  %v171_v50 = vld [vmem:[%s14296_s0 + $0x488] sm:$0xff] }
 0x11b   :  { %v2970_v61 = vsel %vm293_vm0, %v2689_v55, 0.0  ;;  %v2435_v62 = vmax.f32 %v1269_v56, 0.0  ;;  %v9913_v63 = vpop.f32.mrb[30].mxu0 }
 0x11c   :  { %v2971_v0 = vadd.f32 %v2970_v61, %v2969_v58  ;;  %v1284_v1 = vadd.f32 %v9913_v63, %v10860_v49  ;;  %v1278_v2 = vpop.f32.mrb[31].mxu0  ;;  %10071 = vmatmul.mubr.msk.f32.gmra.mrb[136].mxu0 %vm293_vm0, %v163_v57  ;;  %v2692_v4 = vmin.f32 %v2436_v59, 6.0  ;;  %v173_v63 = vld [vmem:[%s14296_s0 + $0x498] sm:$0xff] }
 0x11d   :  { %v2691_v5 = vmin.f32 %v2435_v62, 6.0  ;;  %v1279_v6 = vadd.f32 %v10860_v49, %v1278_v2  ;;  %10073 = vmatprep.mubr.msk.f32.mxu0 %vm293_vm0, %v164_v60  ;;  %v174_v2 = vld [vmem:[%s14296_s0 + $0x4a0] sm:$0xff] }
 0x11e   :  { %v2973_v8 = vadd.f32 %v2972_v3, %v2971_v0  ;;  %v2438_v9 = vmax.f32 %v1284_v1, 0.0  ;;  %v2976_v17 = vsel %vm293_vm0, %v2692_v4, 0.0 }
 0x11f   :  { %v2974_v11 = vsel %vm293_vm0, %v2691_v5, 0.0  ;;  %v2437_v12 = vmax.f32 %v1279_v6, 0.0  ;;  %v9916_v13 = vpop.f32.mrb[32].mxu0 }
 0x120   :  { %v2975_v14 = vadd.f32 %v2974_v11, %v2973_v8  ;;  %v1294_v15 = vadd.f32 %v9916_v13, %v10860_v49  ;;  %v1288_v16 = vpop.f32.mrb[33].mxu0  ;;  %10074 = vmatmul.mubr.msk.f32.gmra.mrb[138].mxu0 %vm293_vm0, %v165_v7  ;;  %v2694_v18 = vmin.f32 %v2438_v9, 6.0  ;;  %v175_v13 = vld [vmem:[%s14296_s0 + $0x4a8] sm:$0xff] }
 0x121   :  { %v2693_v19 = vmin.f32 %v2437_v12, 6.0  ;;  %v1289_v20 = vadd.f32 %v10860_v49, %v1288_v16  ;;  %10076 = vmatprep.mubr.msk.f32.mxu0 %vm293_vm0, %v166_v10  ;;  %v176_v16 = vld [vmem:[%s14296_s0 + $0x4b0] sm:$0xff] }
 0x122   :  { %v2977_v22 = vadd.f32 %v2976_v17, %v2975_v14  ;;  %v2440_v23 = vmax.f32 %v1294_v15, 0.0  ;;  %v2980_v32 = vsel %vm293_vm0, %v2694_v18, 0.0 }
 0x123   :  { %v2978_v25 = vsel %vm293_vm0, %v2693_v19, 0.0  ;;  %v2439_v26 = vmax.f32 %v1289_v20, 0.0  ;;  %v9919_v27 = vpop.f32.mrb[34].mxu0 }
 0x124   :  { %v2979_v28 = vadd.f32 %v2978_v25, %v2977_v22  ;;  %v2696_v29 = vmin.f32 %v2440_v23, 6.0  ;;  %v1304_v30 = vadd.f32 %v9919_v27, %v10860_v49  ;;  %v1298_v31 = vpop.f32.mrb[35].mxu0  ;;  %10077 = vmatmul.mubr.msk.f32.gmra.mrb[140].mxu0 %vm293_vm0, %v167_v21  ;;  %v177_v27 = vld [vmem:[%s14296_s0 + $0x4b8] sm:$0xff] }
 0x125   :  { %v2695_v33 = vmin.f32 %v2439_v26, 6.0  ;;  %v1299_v34 = vadd.f32 %v10860_v49, %v1298_v31  ;;  %10079 = vmatprep.mubr.msk.f32.mxu0 %vm293_vm0, %v168_v24 }
 0x126   :  { %v11078_v36 = vadd.f32 %v2980_v32, %v2979_v28  ;;  %v2989_v37 = vsel %vm293_vm0, %v2696_v29, 0.0  ;;  %v2442_v38 = vmax.f32 %v1304_v30, 0.0  ;;  %v178_v30 = vld [vmem:[%s14296_s0 + $0x4c0] sm:$0xff] }
 0x127   :  { %v2988_v40 = vsel %vm293_vm0, %v2695_v33, 0.0  ;;  %v2441_v41 = vmax.f32 %v1299_v34, 0.0  ;;  %v9922_v42 = vpop.f32.mrb[36].mxu0 }
 0x128   :  { %v2990_v43 = vadd.f32 %v2989_v37, %v2988_v40  ;;  %v1314_v44 = vadd.f32 %v9922_v42, %v10860_v49  ;;  %v1308_v45 = vpop.f32.mrb[37].mxu0  ;;  %10080 = vmatmul.mubr.msk.f32.gmra.mrb[142].mxu0 %vm293_vm0, %v169_v35  ;;  %v2698_v46 = vmin.f32 %v2442_v38, 6.0  ;;  %v179_v42 = vld [vmem:[%s14296_s0 + $0x4c8] sm:$0xff] }
 0x129   :  { %v2697_v47 = vmin.f32 %v2441_v41, 6.0  ;;  %v1309_v48 = vadd.f32 %v10860_v49, %v1308_v45  ;;  %10082 = vmatprep.mubr.msk.f32.mxu0 %vm293_vm0, %v170_v39  ;;  %v180_v45 = vld [vmem:[%s14296_s0 + $0x4d0] sm:$0xff] }
 0x12a   :  { %v2444_v51 = vmax.f32 %v1314_v44, 0.0  ;;  %v2993_v59 = vsel %vm293_vm0, %v2698_v46, 0.0 }
 0x12b   :  { %v2991_v53 = vsel %vm293_vm0, %v2697_v47, 0.0  ;;  %v2443_v54 = vmax.f32 %v1309_v48, 0.0  ;;  %v9925_v55 = vpop.f32.mrb[38].mxu0 }
 0x12c   :  { %v2992_v56 = vadd.f32 %v2991_v53, %v2990_v43  ;;  %v1324_v57 = vadd.f32 %v9925_v55, %v10860_v49  ;;  %v1318_v58 = vpop.f32.mrb[39].mxu0  ;;  %10083 = vmatmul.mubr.msk.f32.gmra.mrb[144].mxu0 %vm293_vm0, %v171_v50  ;;  %v2700_v60 = vmin.f32 %v2444_v51, 6.0 }
 0x12d   :  { %v2699_v61 = vmin.f32 %v2443_v54, 6.0  ;;  %v1319_v62 = vadd.f32 %v10860_v49, %v1318_v58  ;;  %10085 = vmatprep.mubr.msk.f32.mxu0 %vm293_vm0, %v172_v52 }
 0x12e   :  { %v2994_v0 = vadd.f32 %v2993_v59, %v2992_v56  ;;  %v2446_v1 = vmax.f32 %v1324_v57, 0.0  ;;  %v2997_v9 = vsel %vm293_vm0, %v2700_v60, 0.0  ;;  %v181_v57 = vld [vmem:[%s14296_s0 + $0x4d8] sm:$0xff]  ;;  %v182_v60 = vld [vmem:[%s14296_s0 + $0x4e0] sm:$0xff] }
 0x12f   :  { %v2995_v3 = vsel %vm293_vm0, %v2699_v61, 0.0  ;;  %v2445_v4 = vmax.f32 %v1319_v62, 0.0  ;;  %v9928_v5 = vpop.f32.mrb[40].mxu0 }
 0x130   :  { %v2996_v6 = vadd.f32 %v2995_v3, %v2994_v0  ;;  %v1334_v7 = vadd.f32 %v9928_v5, %v10860_v49  ;;  %v1328_v8 = vpop.f32.mrb[41].mxu0  ;;  %10086 = vmatmul.mubr.msk.f32.gmra.mrb[146].mxu0 %vm293_vm0, %v173_v63  ;;  %v2702_v10 = vmin.f32 %v2446_v1, 6.0 }
 0x131   :  { %v2701_v11 = vmin.f32 %v2445_v4, 6.0  ;;  %v1329_v12 = vadd.f32 %v10860_v49, %v1328_v8  ;;  %10088 = vmatprep.mubr.msk.f32.mxu0 %vm293_vm0, %v174_v2 }
 0x132   :  { %v2998_v14 = vadd.f32 %v2997_v9, %v2996_v6  ;;  %v2448_v15 = vmax.f32 %v1334_v7, 0.0  ;;  %v3001_v23 = vsel %vm293_vm0, %v2702_v10, 0.0  ;;  %v183_v7 = vld [vmem:[%s14296_s0 + $0x4e8] sm:$0xff]  ;;  %v184_v10 = vld [vmem:[%s14296_s0 + $0x4f0] sm:$0xff] }
 0x133   :  { %v2999_v17 = vsel %vm293_vm0, %v2701_v11, 0.0  ;;  %v2447_v18 = vmax.f32 %v1329_v12, 0.0  ;;  %v9931_v19 = vpop.f32.mrb[42].mxu0 }
 0x134   :  { %v3000_v20 = vadd.f32 %v2999_v17, %v2998_v14  ;;  %v1344_v21 = vadd.f32 %v9931_v19, %v10860_v49  ;;  %v1338_v22 = vpop.f32.mrb[43].mxu0  ;;  %10089 = vmatmul.mubr.msk.f32.gmra.mrb[148].mxu0 %vm293_vm0, %v175_v13  ;;  %v2704_v24 = vmin.f32 %v2448_v15, 6.0 }
 0x135   :  { %v2703_v25 = vmin.f32 %v2447_v18, 6.0  ;;  %v1339_v26 = vadd.f32 %v10860_v49, %v1338_v22  ;;  %10091 = vmatprep.mubr.msk.f32.mxu0 %vm293_vm0, %v176_v16 }
 0x136   :  { %v3002_v28 = vadd.f32 %v3001_v23, %v3000_v20  ;;  %v2450_v29 = vmax.f32 %v1344_v21, 0.0  ;;  %v3005_v38 = vsel %vm293_vm0, %v2704_v24, 0.0  ;;  %v185_v21 = vld [vmem:[%s14296_s0 + $0x4f8] sm:$0xff]  ;;  %v186_v24 = vld [vmem:[%s14296_s0 + $0x500] sm:$0xff] }
 0x137   :  { %v3003_v31 = vsel %vm293_vm0, %v2703_v25, 0.0  ;;  %v2449_v32 = vmax.f32 %v1339_v26, 0.0  ;;  %v9934_v33 = vpop.f32.mrb[44].mxu0 }
 0x138   :  { %v3004_v34 = vadd.f32 %v3003_v31, %v3002_v28  ;;  %v1354_v35 = vadd.f32 %v9934_v33, %v10860_v49  ;;  %v1348_v37 = vpop.f32.mrb[45].mxu0  ;;  %10092 = vmatmul.mubr.msk.f32.gmra.mrb[150].mxu0 %vm293_vm0, %v177_v27  ;;  %v2706_v39 = vmin.f32 %v2450_v29, 6.0 }
 0x139   :  { %v2705_v40 = vmin.f32 %v2449_v32, 6.0  ;;  %v1349_v41 = vadd.f32 %v10860_v49, %v1348_v37  ;;  %10094 = vmatprep.mubr.msk.f32.mxu0 %vm293_vm0, %v178_v30 }
 0x13a   :  { %v3006_v43 = vadd.f32 %v3005_v38, %v3004_v34  ;;  %v2452_v44 = vmax.f32 %v1354_v35, 0.0  ;;  %v3009_v53 = vsel %vm293_vm0, %v2706_v39, 0.0  ;;  %v187_v35 = vld [vmem:[%s14296_s0 + $0x508] sm:$0xff]  ;;  %v188_v39 = vld [vmem:[%s14296_s0 + $0x510] sm:$0xff] }
 0x13b   :  { %v3007_v46 = vsel %vm293_vm0, %v2705_v40, 0.0  ;;  %v2451_v47 = vmax.f32 %v1349_v41, 0.0  ;;  %v9937_v48 = vpop.f32.mrb[46].mxu0 }
 0x13c   :  { %v3008_v50 = vadd.f32 %v3007_v46, %v3006_v43  ;;  %v1364_v51 = vadd.f32 %v9937_v48, %v10860_v49  ;;  %v1358_v52 = vpop.f32.mrb[47].mxu0  ;;  %10095 = vmatmul.mubr.msk.f32.gmra.mrb[152].mxu0 %vm293_vm0, %v179_v42  ;;  %v2708_v54 = vmin.f32 %v2452_v44, 6.0 }
 0x13d   :  { %v2707_v55 = vmin.f32 %v2451_v47, 6.0  ;;  %v1359_v56 = vadd.f32 %v10860_v49, %v1358_v52  ;;  %10097 = vmatprep.mubr.msk.f32.mxu0 %vm293_vm0, %v180_v45 }
 0x13e   :  { %v3010_v58 = vadd.f32 %v3009_v53, %v3008_v50  ;;  %v2454_v59 = vmax.f32 %v1364_v51, 0.0  ;;  %v3013_v3 = vsel %vm293_vm0, %v2708_v54, 0.0  ;;  %v189_v51 = vld [vmem:[%s14296_s0 + $0x518] sm:$0xff]  ;;  %v190_v54 = vld [vmem:[%s14296_s0 + $0x520] sm:$0xff] }
 0x13f   :  { %v3011_v61 = vsel %vm293_vm0, %v2707_v55, 0.0  ;;  %v2453_v62 = vmax.f32 %v1359_v56, 0.0  ;;  %v9940_v63 = vpop.f32.mrb[48].mxu0 }
 0x140   :  { %v3012_v0 = vadd.f32 %v3011_v61, %v3010_v58  ;;  %v1374_v1 = vadd.f32 %v9940_v63, %v10860_v49  ;;  %v1368_v2 = vpop.f32.mrb[49].mxu0  ;;  %10098 = vmatmul.mubr.msk.f32.gmra.mrb[154].mxu0 %vm293_vm0, %v181_v57  ;;  %v2710_v4 = vmin.f32 %v2454_v59, 6.0 }
 0x141   :  { %v2709_v5 = vmin.f32 %v2453_v62, 6.0  ;;  %v1369_v6 = vadd.f32 %v10860_v49, %v1368_v2  ;;  %10100 = vmatprep.mubr.msk.f32.mxu0 %vm293_vm0, %v182_v60 }
 0x142   :  { %v3014_v8 = vadd.f32 %v3013_v3, %v3012_v0  ;;  %v2456_v9 = vmax.f32 %v1374_v1, 0.0  ;;  %v3017_v17 = vsel %vm293_vm0, %v2710_v4, 0.0  ;;  %v191_v1 = vld [vmem:[%s14296_s0 + $0x528] sm:$0xff]  ;;  %v192_v4 = vld [vmem:[%s14296_s0 + $0x530] sm:$0xff] }
 0x143   :  { %v3015_v11 = vsel %vm293_vm0, %v2709_v5, 0.0  ;;  %v2455_v12 = vmax.f32 %v1369_v6, 0.0  ;;  %v9943_v13 = vpop.f32.mrb[50].mxu0 }
 0x144   :  { %v3016_v14 = vadd.f32 %v3015_v11, %v3014_v8  ;;  %v1384_v15 = vadd.f32 %v9943_v13, %v10860_v49  ;;  %v1378_v16 = vpop.f32.mrb[51].mxu0  ;;  %10101 = vmatmul.mubr.msk.f32.gmra.mrb[156].mxu0 %vm293_vm0, %v183_v7  ;;  %v2712_v18 = vmin.f32 %v2456_v9, 6.0 }
 0x145   :  { %v2711_v19 = vmin.f32 %v2455_v12, 6.0  ;;  %v1379_v20 = vadd.f32 %v10860_v49, %v1378_v16  ;;  %10103 = vmatprep.mubr.msk.f32.mxu0 %vm293_vm0, %v184_v10 }
 0x146   :  { %v3018_v22 = vadd.f32 %v3017_v17, %v3016_v14  ;;  %v2458_v23 = vmax.f32 %v1384_v15, 0.0  ;;  %v3021_v31 = vsel %vm293_vm0, %v2712_v18, 0.0  ;;  %v193_v15 = vld [vmem:[%s14296_s0 + $0x538] sm:$0xff]  ;;  %v194_v18 = vld [vmem:[%s14296_s0 + $0x540] sm:$0xff] }
 0x147   :  { %v3019_v25 = vsel %vm293_vm0, %v2711_v19, 0.0  ;;  %v2457_v26 = vmax.f32 %v1379_v20, 0.0  ;;  %v9946_v27 = vpop.f32.mrb[52].mxu0 }
 0x148   :  { %v3020_v28 = vadd.f32 %v3019_v25, %v3018_v22  ;;  %v1394_v29 = vadd.f32 %v9946_v27, %v10860_v49  ;;  %v1388_v30 = vpop.f32.mrb[53].mxu0  ;;  %10104 = vmatmul.mubr.msk.f32.gmra.mrb[158].mxu0 %vm293_vm0, %v185_v21  ;;  %v2714_v32 = vmin.f32 %v2458_v23, 6.0 }
 0x149   :  { %v2713_v33 = vmin.f32 %v2457_v26, 6.0  ;;  %v1389_v34 = vadd.f32 %v10860_v49, %v1388_v30  ;;  %10106 = vmatprep.mubr.msk.f32.mxu0 %vm293_vm0, %v186_v24 }
 0x14a   :  { %v3022_v37 = vadd.f32 %v3021_v31, %v3020_v28  ;;  %v2460_v38 = vmax.f32 %v1394_v29, 0.0  ;;  %v3025_v46 = vsel %vm293_vm0, %v2714_v32, 0.0  ;;  %v195_v29 = vld [vmem:[%s14296_s0 + $0x548] sm:$0xff]  ;;  %v196_v32 = vld [vmem:[%s14296_s0 + $0x550] sm:$0xff] }
 0x14b   :  { %v3023_v40 = vsel %vm293_vm0, %v2713_v33, 0.0  ;;  %v2459_v41 = vmax.f32 %v1389_v34, 0.0  ;;  %v9949_v42 = vpop.f32.mrb[54].mxu0 }
 0x14c   :  { %v3024_v43 = vadd.f32 %v3023_v40, %v3022_v37  ;;  %v1404_v44 = vadd.f32 %v9949_v42, %v10860_v49  ;;  %v1398_v45 = vpop.f32.mrb[55].mxu0  ;;  %10107 = vmatmul.mubr.msk.f32.gmra.mrb[160].mxu0 %vm293_vm0, %v187_v35  ;;  %v2716_v47 = vmin.f32 %v2460_v38, 6.0  ;;  %v2982_v37 = vrot.slane %v11078_v36, 4 }
 0x14d   :  { %v2715_v48 = vmin.f32 %v2459_v41, 6.0  ;;  %v1399_v50 = vadd.f32 %v10860_v49, %v1398_v45  ;;  %10109 = vmatprep.mubr.msk.f32.mxu0 %vm293_vm0, %v188_v39  ;;  %v197_v45 = vld [vmem:[%s14296_s0 + $0x558] sm:$0xff] }
 0x14e   :  { %v3026_v52 = vadd.f32 %v3025_v46, %v3024_v43  ;;  %v2462_v53 = vmax.f32 %v1404_v44, 0.0  ;;  %v3029_v61 = vsel %vm293_vm0, %v2716_v47, 0.0 }
 0x14f   :  { %v3027_v55 = vsel %vm293_vm0, %v2715_v48, 0.0  ;;  %v2461_v56 = vmax.f32 %v1399_v50, 0.0  ;;  %v9952_v57 = vpop.f32.mrb[56].mxu0  ;;  %v198_v48 = vld [vmem:[%s14296_s0 + $0x560] sm:$0xff] }
 0x150   :  { %v3028_v58 = vadd.f32 %v3027_v55, %v3026_v52  ;;  %v1414_v59 = vadd.f32 %v9952_v57, %v10860_v49  ;;  %v1408_v60 = vpop.f32.mrb[57].mxu0  ;;  %10110 = vmatmul.mubr.msk.f32.gmra.mrb[162].mxu0 %vm293_vm0, %v189_v51  ;;  %v2718_v62 = vmin.f32 %v2462_v53, 6.0  ;;  %v2983_v53 = vadd.f32 %v2982_v37, %v11078_v36 }
 0x151   :  { %v2717_v63 = vmin.f32 %v2461_v56, 6.0  ;;  %v1409_v0 = vadd.f32 %v10860_v49, %v1408_v60  ;;  %10112 = vmatprep.mubr.msk.f32.mxu0 %vm293_vm0, %v190_v54  ;;  %v11260_v60 = vld [vmem:[%s14297_s2] ss:$0 sm:$0xff] }
 0x152   :  { %v3030_v2 = vadd.f32 %v3029_v61, %v3028_v58  ;;  %v2464_v3 = vmax.f32 %v1414_v59, 0.0  ;;  %v3033_v11 = vsel %vm293_vm0, %v2718_v62, 0.0 }
 0x153   :  { %v3031_v5 = vsel %vm293_vm0, %v2717_v63, 0.0  ;;  %v2463_v6 = vmax.f32 %v1409_v0, 0.0  ;;  %v9955_v7 = vpop.f32.mrb[58].mxu0  ;;  %v200_v63 = vld [vmem:[%s14296_s0 + $0x570] sm:$0xff] }
 0x154   :  { %v3032_v8 = vadd.f32 %v3031_v5, %v3030_v2  ;;  %v1424_v9 = vadd.f32 %v9955_v7, %v10860_v49  ;;  %v1418_v10 = vpop.f32.mrb[59].mxu0  ;;  %10113 = vmatmul.mubr.msk.f32.gmra.mrb[164].mxu0 %vm293_vm0, %v191_v1  ;;  %v2720_v12 = vmin.f32 %v2464_v3, 6.0  ;;  %v2984_v3 = vrot.slane %v2983_v53, 2 }
 0x155   :  { %v2719_v13 = vmin.f32 %v2463_v6, 6.0  ;;  %v1419_v14 = vadd.f32 %v10860_v49, %v1418_v10  ;;  %10115 = vmatprep.mubr.msk.f32.mxu0 %vm293_vm0, %v192_v4 }
 0x156   :  { %v3034_v16 = vadd.f32 %v3033_v11, %v3032_v8  ;;  %v2466_v17 = vmax.f32 %v1424_v9, 0.0  ;;  %v3037_v25 = vsel %vm293_vm0, %v2720_v12, 0.0  ;;  %v201_v11 = vld [vmem:[%s14296_s0 + $0x578] sm:$0xff] }
 0x157   :  { %v3035_v19 = vsel %vm293_vm0, %v2719_v13, 0.0  ;;  %v2465_v20 = vmax.f32 %v1419_v14, 0.0  ;;  %v9958_v21 = vpop.f32.mrb[60].mxu0 }
 0x158   :  { %v3036_v22 = vadd.f32 %v3035_v19, %v3034_v16  ;;  %v1434_v23 = vadd.f32 %v9958_v21, %v10860_v49  ;;  %v1428_v24 = vpop.f32.mrb[61].mxu0  ;;  %10116 = vmatmul.mubr.msk.f32.gmra.mrb[166].mxu0 %vm293_vm0, %v193_v15  ;;  %v2722_v26 = vmin.f32 %v2466_v17, 6.0  ;;  %v202_v15 = vld [vmem:[%s14296_s0 + $0x580] sm:$0xff]  ;;  %v2985_v19 = vadd.f32 %v2984_v3, %v2983_v53 }
 0x159   :  { %v2721_v27 = vmin.f32 %v2465_v20, 6.0  ;;  %v1429_v28 = vadd.f32 %v10860_v49, %v1428_v24  ;;  %10118 = vmatprep.mubr.msk.f32.mxu0 %vm293_vm0, %v194_v18 }
 0x15a   :  { %v3038_v30 = vadd.f32 %v3037_v25, %v3036_v22  ;;  %v2468_v31 = vmax.f32 %v1434_v23, 0.0  ;;  %v3041_v41 = vsel %vm293_vm0, %v2722_v26, 0.0 }
 0x15b   :  { %v3039_v33 = vsel %vm293_vm0, %v2721_v27, 0.0  ;;  %v2467_v34 = vmax.f32 %v1429_v28, 0.0  ;;  %v9961_v35 = vpop.f32.mrb[62].mxu0  ;;  %v203_v27 = vld [vmem:[%s14296_s0 + $0x588] sm:$0xff] }
 0x15c   :  { %v3040_v38 = vadd.f32 %v3039_v33, %v3038_v30  ;;  %v1444_v39 = vadd.f32 %v9961_v35, %v10860_v49  ;;  %v1438_v40 = vpop.f32.mrb[63].mxu0  ;;  %10119 = vmatmul.mubr.msk.f32.gmra.mrb[168].mxu0 %vm293_vm0, %v195_v29  ;;  %v2724_v42 = vmin.f32 %v2468_v31, 6.0  ;;  %v204_v30 = vld [vmem:[%s14296_s0 + $0x590] sm:$0xff] }
 0x15d   :  { %v2723_v43 = vmin.f32 %v2467_v34, 6.0  ;;  %v1439_v44 = vadd.f32 %v10860_v49, %v1438_v40  ;;  %10121 = vmatprep.mubr.msk.f32.mxu0 %vm293_vm0, %v196_v32  ;;  %v2986_v34 = vrot.slane %v2985_v19, 1 }
 0x15e   :  { %v3042_v46 = vadd.f32 %v3041_v41, %v3040_v38  ;;  %v2470_v47 = vmax.f32 %v1444_v39, 0.0  ;;  %v3045_v57 = vsel %vm293_vm0, %v2724_v42, 0.0 }
 0x15f   :  { %v3043_v50 = vsel %vm293_vm0, %v2723_v43, 0.0  ;;  %v2469_v51 = vmax.f32 %v1439_v44, 0.0  ;;  %v9964_v52 = vpop.f32.mrb[64].mxu0  ;;  %v205_v44 = vld [vmem:[%s14296_s0 + $0x598] sm:$0xff]  ;;  %v2987_v53 = vadd.f32 %v2986_v34, %v2985_v19  ;;  %v275_v34 = vld [vmem:[%s14296_s0 + $0x7c8] sm:$0xff] }
 0x160   :  { %v3044_v54 = vadd.f32 %v3043_v50, %v3042_v46  ;;  %v1454_v55 = vadd.f32 %v9964_v52, %v10860_v49  ;;  %v1448_v56 = vpop.f32.mrb[65].mxu0  ;;  %10122 = vmatmul.mubr.msk.f32.gmra.mrb[170].mxu0 %vm293_vm0, %v197_v45  ;;  %v2726_v58 = vmin.f32 %v2470_v47, 6.0  ;;  %v199_v49 = vld [vmem:[%s14296_s0 + $0x568] sm:$0xff] }
 0x161   :  { %v2725_v59 = vmin.f32 %v2469_v51, 6.0  ;;  %v1449_v61 = vadd.f32 %v11260_v60, %v1448_v56  ;;  %10124 = vmatprep.mubr.msk.f32.mxu0 %vm293_vm0, %v198_v48  ;;  %v206_v48 = vld [vmem:[%s14296_s0 + $0x5a0] sm:$0xff] }
 0x162   :  { %v3046_v36 = vadd.f32 %v3045_v57, %v3044_v54  ;;  %v2472_v62 = vmax.f32 %v1454_v55, 0.0  ;;  %v3049_v8 = vsel %vm293_vm0, %v2726_v58, 0.0 }
 0x163   :  { %v3047_v0 = vsel %vm293_vm0, %v2725_v59, 0.0  ;;  %v2471_v1 = vmax.f32 %v1449_v61, 0.0  ;;  %v9967_v2 = vpop.f32.mrb[66].mxu0 }
 0x164   :  { %v3048_v4 = vadd.f32 %v3047_v0, %v3046_v36  ;;  %v2728_v5 = vmin.f32 %v2472_v62, 6.0  ;;  %v1464_v6 = vadd.f32 %v11260_v60, %v9967_v2  ;;  %v1458_v7 = vpop.f32.mrb[67].mxu0  ;;  %10125 = vmatmul.mubr.msk.f32.gmra.mrb[172].mxu0 %vm293_vm0, %v199_v49  ;;  %v207_v36 = vld [vmem:[%s14296_s0 + $0x5a8] sm:$0xff] }
 0x165   :  { %v2727_v9 = vmin.f32 %v2471_v1, 6.0  ;;  %v1459_v10 = vadd.f32 %v11260_v60, %v1458_v7  ;;  %10127 = vmatprep.mubr.msk.f32.mxu0 %vm293_vm0, %v200_v63  ;;  %v208_v1 = vld [vmem:[%s14296_s0 + $0x5b0] sm:$0xff] }
 0x166   :  { %v3050_v12 = vadd.f32 %v3049_v8, %v3048_v4  ;;  %v3058_v13 = vsel %vm293_vm0, %v2728_v5, 0.0  ;;  %v2474_v14 = vmax.f32 %v1464_v6, 0.0  ;;  %v3471_v5 = vmul.f32 0.00390625, %v2987_v53 }
 0x167   :  { %v3057_v16 = vsel %vm293_vm0, %v2727_v9, 0.0  ;;  %v2473_v17 = vmax.f32 %v1459_v10, 0.0  ;;  %v9970_v18 = vpop.f32.mrb[68].mxu0 }
 0x168   :  { %v3051_v20 = vrot.slane %v3050_v12, 4  ;;  %v3059_v21 = vadd.f32 %v3058_v13, %v3057_v16  ;;  %v1474_v22 = vadd.f32 %v11260_v60, %v9970_v18  ;;  %v1468_v23 = vpop.f32.mrb[69].mxu0  ;;  %10128 = vmatmul.mubr.msk.f32.gmra.mrb[174].mxu0 %vm293_vm0, %v201_v11  ;;  %v2730_v24 = vmin.f32 %v2474_v14, 6.0  ;;  %v209_v14 = vld [vmem:[%s14296_s0 + $0x5b8] sm:$0xff]  ;;  %v210_v18 = vld [vmem:[%s14296_s0 + $0x5c0] sm:$0xff] }
 0x169   :  { %v2729_v25 = vmin.f32 %v2473_v17, 6.0  ;;  %v1469_v26 = vadd.f32 %v11260_v60, %v1468_v23  ;;  %10130 = vmatprep.mubr.msk.f32.mxu0 %vm293_vm0, %v202_v15 }
 0x16a   :  { %v3052_v28 = vadd.f32 %v3051_v20, %v3050_v12  ;;  %v2476_v29 = vmax.f32 %v1474_v22, 0.0  ;;  %v3062_v40 = vsel %vm293_vm0, %v2730_v24, 0.0 }
 0x16b   :  { %v3060_v31 = vsel %vm293_vm0, %v2729_v25, 0.0  ;;  %v2475_v32 = vmax.f32 %v1469_v26, 0.0  ;;  %v9973_v33 = vpop.f32.mrb[70].mxu0 }
 0x16c   :  { %v3053_v35 = vrot.slane %v3052_v28, 2  ;;  %v3061_v37 = vadd.f32 %v3060_v31, %v3059_v21  ;;  %v1484_v38 = vadd.f32 %v11260_v60, %v9973_v33  ;;  %v1478_v39 = vpop.f32.mrb[71].mxu0  ;;  %10131 = vmatmul.mubr.msk.f32.gmra.mrb[176].mxu0 %vm293_vm0, %v203_v27  ;;  %v2732_v41 = vmin.f32 %v2476_v29, 6.0  ;;  %v211_v29 = vld [vmem:[%s14296_s0 + $0x5c8] sm:$0xff]  ;;  %v212_v33 = vld [vmem:[%s14296_s0 + $0x5d0] sm:$0xff] }
 0x16d   :  { %v2731_v42 = vmin.f32 %v2475_v32, 6.0  ;;  %v1479_v43 = vadd.f32 %v11260_v60, %v1478_v39  ;;  %10133 = vmatprep.mubr.msk.f32.mxu0 %vm293_vm0, %v204_v30  ;;  %v274_v30 = vld [vmem:[%s14296_s0 + $0x7c0] sm:$0xff] }
 0x16e   :  { %v3054_v45 = vadd.f32 %v3053_v35, %v3052_v28  ;;  %v3063_v46 = vadd.f32 %v3062_v40, %v3061_v37  ;;  %v2478_v47 = vmax.f32 %v1484_v38, 0.0  ;;  %v3066_v58 = vsel %vm293_vm0, %v2732_v41, 0.0  ;;  %10238 = vmatprep.mubr.msk.f32.mxu1 %vm293_vm0, %v274_v30 }
 0x16f   :  { %v3064_v50 = vsel %vm293_vm0, %v2731_v42, 0.0  ;;  %v2477_v51 = vmax.f32 %v1479_v43, 0.0  ;;  %v9976_v52 = vpop.f32.mrb[72].mxu0  ;;  %10239 = vmatmul.mubr.msk.f32.vlgmr.msra.gmra.mrb[0].mxu1 %vm293_vm0, %v275_v34  ;;  %v220_v34 = vld [vmem:[%s14296_s0 + $0x610] sm:$0xff] }
 0x170   :  { %v3055_v54 = vrot.slane %v3054_v45, 1  ;;  %v3065_v55 = vadd.f32 %v3064_v50, %v3063_v46  ;;  %v1494_v56 = vadd.f32 %v11260_v60, %v9976_v52  ;;  %v1488_v57 = vpop.f32.mrb[73].mxu0  ;;  %10134 = vmatmul.mubr.msk.f32.gmra.mrb[178].mxu0 %vm293_vm0, %v205_v44  ;;  %v2734_v59 = vmin.f32 %v2478_v47, 6.0  ;;  %v213_v46 = vld [vmem:[%s14296_s0 + $0x5d8] sm:$0xff]  ;;  %v276_v47 = vld [vmem:[%s14296_s0 + $0x7d0] sm:$0xff] }
 0x171   :  { %v2733_v61 = vmin.f32 %v2477_v51, 6.0  ;;  %v1489_v49 = vadd.f32 %v11260_v60, %v1488_v57  ;;  %10136 = vmatprep.mubr.msk.f32.mxu0 %vm293_vm0, %v206_v48  ;;  %v214_v51 = vld [vmem:[%s14296_s0 + $0x5e0] sm:$0xff]  ;;  %10241 = vmatprep.mubr.msk.f32.mxu1 %vm293_vm0, %v276_v47  ;;  %v277_v52 = vld [vmem:[%s14296_s0 + $0x7d8] sm:$0xff] }
 0x172   :  { %v3056_v62 = vadd.f32 %v3055_v54, %v3054_v45  ;;  %v3067_v63 = vadd.f32 %v3066_v58, %v3065_v55  ;;  %v2480_v0 = vmax.f32 %v1494_v56, 0.0  ;;  %v3070_v10 = vsel %vm293_vm0, %v2734_v59, 0.0 }
 0x173   :  { %v3068_v2 = vsel %vm293_vm0, %v2733_v61, 0.0  ;;  %v2479_v3 = vmax.f32 %v1489_v49, 0.0  ;;  %v9979_v4 = vpop.f32.mrb[74].mxu0  ;;  %10242 = vmatmul.mubr.msk.f32.gmra.mrb[2].mxu1 %vm293_vm0, %v277_v52 }
 0x174   :  { %v3472_v6 = vmul.f32 0.00390625, %v3056_v62  ;;  %v3069_v7 = vadd.f32 %v3068_v2, %v3067_v63  ;;  %v1504_v8 = vadd.f32 %v11260_v60, %v9979_v4  ;;  %v1498_v9 = vpop.f32.mrb[75].mxu0  ;;  %10137 = vmatmul.mubr.msk.f32.gmra.mrb[180].mxu0 %vm293_vm0, %v207_v36  ;;  %v2736_v11 = vmin.f32 %v2480_v0, 6.0  ;;  %v215_v62 = vld [vmem:[%s14296_s0 + $0x5e8] sm:$0xff]  ;;  %v278_v63 = vld [vmem:[%s14296_s0 + $0x7e0] sm:$0xff]  ;;  %v216_v2 = vld [vmem:[%s14296_s0 + $0x5f0] sm:$0xff] }
 0x175   :  { %v2735_v12 = vmin.f32 %v2479_v3, 6.0  ;;  %v1499_v13 = vadd.f32 %v11260_v60, %v1498_v9  ;;  %10139 = vmatprep.mubr.msk.f32.mxu0 %vm293_vm0, %v208_v1  ;;  %10244 = vmatprep.mubr.msk.f32.mxu1 %vm293_vm0, %v278_v63  ;;  %v279_v3 = vld [vmem:[%s14296_s0 + $0x7e8] sm:$0xff]  ;;  %v224_v63 = vld [vmem:[%s14296_s0 + $0x630] sm:$0xff] }
 0x176   :  { %v11328_v15 = vsel %vm3581_vm1, %v3472_v6, %v3471_v5  ;;  %v3071_v16 = vadd.f32 %v3070_v10, %v3069_v7  ;;  %v2482_v17 = vmax.f32 %v1504_v8, 0.0  ;;  %v3074_v25 = vsel %vm293_vm0, %v2736_v11, 0.0 }
 0x177   :  { %v3072_v19 = vsel %vm293_vm0, %v2735_v12, 0.0  ;;  %v2481_v20 = vmax.f32 %v1499_v13, 0.0  ;;  %v9982_v21 = vpop.f32.mrb[76].mxu0  ;;  %10245 = vmatmul.mubr.msk.f32.gmra.mrb[4].mxu1 %vm293_vm0, %v279_v3 }
 0x178   :  { %v3073_v22 = vadd.f32 %v3072_v19, %v3071_v16  ;;  %v1514_v23 = vadd.f32 %v11260_v60, %v9982_v21  ;;  %v1508_v24 = vpop.f32.mrb[77].mxu0  ;;  %10140 = vmatmul.mubr.msk.f32.gmra.mrb[182].mxu0 %vm293_vm0, %v209_v14  ;;  %v2738_v26 = vmin.f32 %v2482_v17, 6.0  ;;  %v217_v14 = vld [vmem:[%s14296_s0 + $0x5f8] sm:$0xff]  ;;  %v280_v16 = vld [vmem:[%s14296_s0 + $0x7f0] sm:$0xff]  ;;  %v218_v19 = vld [vmem:[%s14296_s0 + $0x600] sm:$0xff] }
 0x179   :  { %v2737_v27 = vmin.f32 %v2481_v20, 6.0  ;;  %v1509_v28 = vadd.f32 %v11260_v60, %v1508_v24  ;;  %10142 = vmatprep.mubr.msk.f32.mxu0 %vm293_vm0, %v210_v18  ;;  %10247 = vmatprep.mubr.msk.f32.mxu1 %vm293_vm0, %v280_v16  ;;  %v281_v20 = vld [vmem:[%s14296_s0 + $0x7f8] sm:$0xff] }
 0x17a   :  { %v3075_v31 = vadd.f32 %v3074_v25, %v3073_v22  ;;  %v2484_v32 = vmax.f32 %v1514_v23, 0.0  ;;  %v3078_v42 = vsel %vm293_vm0, %v2738_v26, 0.0 }
 0x17b   :  { %v3076_v35 = vsel %vm293_vm0, %v2737_v27, 0.0  ;;  %v2483_v37 = vmax.f32 %v1509_v28, 0.0  ;;  %v9985_v38 = vpop.f32.mrb[78].mxu0  ;;  %10248 = vmatmul.mubr.msk.f32.gmra.mrb[6].mxu1 %vm293_vm0, %v281_v20 }
 0x17c   :  { %v3077_v39 = vadd.f32 %v3076_v35, %v3075_v31  ;;  %v1524_v40 = vadd.f32 %v11260_v60, %v9985_v38  ;;  %v1518_v41 = vpop.f32.mrb[79].mxu0  ;;  %10143 = vmatmul.mubr.msk.f32.gmra.mrb[184].mxu0 %vm293_vm0, %v211_v29  ;;  %v2740_v43 = vmin.f32 %v2484_v32, 6.0  ;;  %v219_v31 = vld [vmem:[%s14296_s0 + $0x608] sm:$0xff] }
 0x17d   :  { %v2739_v44 = vmin.f32 %v2483_v37, 6.0  ;;  %v1519_v45 = vadd.f32 %v11260_v60, %v1518_v41  ;;  %10145 = vmatprep.mubr.msk.f32.mxu0 %vm293_vm0, %v212_v33 }
 0x17e   :  { %v3079_v48 = vadd.f32 %v3078_v42, %v3077_v39  ;;  %v2486_v50 = vmax.f32 %v1524_v40, 0.0  ;;  %v3082_v59 = vsel %vm293_vm0, %v2740_v43, 0.0 }
 0x17f   :  { %v3080_v53 = vsel %vm293_vm0, %v2739_v44, 0.0  ;;  %v2485_v54 = vmax.f32 %v1519_v45, 0.0  ;;  %v9988_v55 = vpop.f32.mrb[80].mxu0 }
 0x180   :  { %v3081_v56 = vadd.f32 %v3080_v53, %v3079_v48  ;;  %v1534_v57 = vadd.f32 %v11260_v60, %v9988_v55  ;;  %v1528_v58 = vpop.f32.mrb[81].mxu0  ;;  %10146 = vmatmul.mubr.msk.f32.gmra.mrb[186].mxu0 %vm293_vm0, %v213_v46  ;;  %v2742_v61 = vmin.f32 %v2486_v50, 6.0  ;;  %v221_v46 = vld [vmem:[%s14296_s0 + $0x618] sm:$0xff]  ;;  %v222_v50 = vld [vmem:[%s14296_s0 + $0x620] sm:$0xff] }
 0x181   :  { %v2741_v49 = vmin.f32 %v2485_v54, 6.0  ;;  %v1529_v36 = vadd.f32 %v11260_v60, %v1528_v58  ;;  %10148 = vmatprep.mubr.msk.f32.mxu0 %vm293_vm0, %v214_v51 }
 0x182   :  { %v3083_v0 = vadd.f32 %v3082_v59, %v3081_v56  ;;  %v2488_v1 = vmax.f32 %v1534_v57, 0.0  ;;  %v3086_v10 = vsel %vm293_vm0, %v2742_v61, 0.0 }
 0x183   :  { %v3084_v4 = vsel %vm293_vm0, %v2741_v49, 0.0  ;;  %v2487_v5 = vmax.f32 %v1529_v36, 0.0  ;;  %v9991_v6 = vpop.f32.mrb[82].mxu0  ;;  %v223_v49 = vld [vmem:[%s14296_s0 + $0x628] sm:$0xff] }
 0x184   :  { %v3085_v7 = vadd.f32 %v3084_v4, %v3083_v0  ;;  %v1544_v8 = vadd.f32 %v11260_v60, %v9991_v6  ;;  %v1538_v9 = vpop.f32.mrb[83].mxu0  ;;  %10149 = vmatmul.mubr.msk.f32.gmra.mrb[188].mxu0 %vm293_vm0, %v215_v62  ;;  %v2744_v11 = vmin.f32 %v2488_v1, 6.0 }
 0x185   :  { %v2743_v12 = vmin.f32 %v2487_v5, 6.0  ;;  %v1539_v13 = vadd.f32 %v11260_v60, %v1538_v9  ;;  %10151 = vmatprep.mubr.msk.f32.mxu0 %vm293_vm0, %v216_v2 }
 0x186   :  { %v3087_v17 = vadd.f32 %v3086_v10, %v3085_v7  ;;  %v2490_v18 = vmax.f32 %v1544_v8, 0.0  ;;  %v3090_v27 = vsel %vm293_vm0, %v2744_v11, 0.0  ;;  %v225_v10 = vld [vmem:[%s14296_s0 + $0x638] sm:$0xff] }
 0x187   :  { %v3088_v21 = vsel %vm293_vm0, %v2743_v12, 0.0  ;;  %v2489_v22 = vmax.f32 %v1539_v13, 0.0  ;;  %v9994_v23 = vpop.f32.mrb[84].mxu0  ;;  %v226_v13 = vld [vmem:[%s14296_s0 + $0x640] sm:$0xff] }
 0x188   :  { %v3089_v24 = vadd.f32 %v3088_v21, %v3087_v17  ;;  %v1554_v25 = vadd.f32 %v11260_v60, %v9994_v23  ;;  %v1548_v26 = vpop.f32.mrb[85].mxu0  ;;  %10152 = vmatmul.mubr.msk.f32.gmra.mrb[190].mxu0 %vm293_vm0, %v217_v14  ;;  %v2746_v28 = vmin.f32 %v2490_v18, 6.0 }
 0x189   :  { %v2745_v29 = vmin.f32 %v2489_v22, 6.0  ;;  %v1549_v30 = vadd.f32 %v11260_v60, %v1548_v26  ;;  %10154 = vmatprep.mubr.msk.f32.mxu0 %vm293_vm0, %v218_v19 }
 0x18a   :  { %v3091_v32 = vadd.f32 %v3090_v27, %v3089_v24  ;;  %v2492_v33 = vmax.f32 %v1554_v25, 0.0  ;;  %v3094_v42 = vsel %vm293_vm0, %v2746_v28, 0.0  ;;  %v227_v25 = vld [vmem:[%s14296_s0 + $0x648] sm:$0xff]  ;;  %v228_v28 = vld [vmem:[%s14296_s0 + $0x650] sm:$0xff] }
 0x18b   :  { %v3092_v35 = vsel %vm293_vm0, %v2745_v29, 0.0  ;;  %v2491_v37 = vmax.f32 %v1549_v30, 0.0  ;;  %v9997_v38 = vpop.f32.mrb[86].mxu0 }
 0x18c   :  { %v3093_v39 = vadd.f32 %v3092_v35, %v3091_v32  ;;  %v1564_v40 = vadd.f32 %v11260_v60, %v9997_v38  ;;  %v1558_v41 = vpop.f32.mrb[87].mxu0  ;;  %10155 = vmatmul.mubr.msk.f32.gmra.mrb[192].mxu0 %vm293_vm0, %v219_v31  ;;  %v2748_v43 = vmin.f32 %v2492_v33, 6.0 }
 0x18d   :  { %v2747_v44 = vmin.f32 %v2491_v37, 6.0  ;;  %v1559_v45 = vadd.f32 %v11260_v60, %v1558_v41  ;;  %10157 = vmatprep.mubr.msk.f32.mxu0 %vm293_vm0, %v220_v34 }
 0x18e   :  { %v3095_v47 = vadd.f32 %v3094_v42, %v3093_v39  ;;  %v2494_v48 = vmax.f32 %v1564_v40, 0.0  ;;  %v3098_v57 = vsel %vm293_vm0, %v2748_v43, 0.0  ;;  %v229_v40 = vld [vmem:[%s14296_s0 + $0x658] sm:$0xff]  ;;  %v230_v43 = vld [vmem:[%s14296_s0 + $0x660] sm:$0xff] }
 0x18f   :  { %v3096_v51 = vsel %vm293_vm0, %v2747_v44, 0.0  ;;  %v2493_v52 = vmax.f32 %v1559_v45, 0.0  ;;  %v10000_v53 = vpop.f32.mrb[88].mxu0 }
 0x190   :  { %v3097_v54 = vadd.f32 %v3096_v51, %v3095_v47  ;;  %v1574_v55 = vadd.f32 %v11260_v60, %v10000_v53  ;;  %v1568_v56 = vpop.f32.mrb[89].mxu0  ;;  %10158 = vmatmul.mubr.msk.f32.gmra.mrb[194].mxu0 %vm293_vm0, %v221_v46  ;;  %v2750_v58 = vmin.f32 %v2494_v48, 6.0 }
 0x191   :  { %v2749_v59 = vmin.f32 %v2493_v52, 6.0  ;;  %v1569_v61 = vadd.f32 %v11260_v60, %v1568_v56  ;;  %10160 = vmatprep.mubr.msk.f32.mxu0 %vm293_vm0, %v222_v50 }
 0x192   :  { %v3099_v36 = vadd.f32 %v3098_v57, %v3097_v54  ;;  %v2496_v62 = vmax.f32 %v1574_v55, 0.0  ;;  %v3102_v6 = vsel %vm293_vm0, %v2750_v58, 0.0  ;;  %v231_v55 = vld [vmem:[%s14296_s0 + $0x668] sm:$0xff]  ;;  %v232_v58 = vld [vmem:[%s14296_s0 + $0x670] sm:$0xff] }
 0x193   :  { %v3100_v0 = vsel %vm293_vm0, %v2749_v59, 0.0  ;;  %v2495_v1 = vmax.f32 %v1569_v61, 0.0  ;;  %v10003_v2 = vpop.f32.mrb[90].mxu0 }
 0x194   :  { %v3101_v3 = vadd.f32 %v3100_v0, %v3099_v36  ;;  %v1584_v4 = vadd.f32 %v11260_v60, %v10003_v2  ;;  %v1578_v5 = vpop.f32.mrb[91].mxu0  ;;  %10161 = vmatmul.mubr.msk.f32.gmra.mrb[196].mxu0 %vm293_vm0, %v223_v49  ;;  %v2752_v7 = vmin.f32 %v2496_v62, 6.0 }
 0x195   :  { %v2751_v8 = vmin.f32 %v2495_v1, 6.0  ;;  %v1579_v9 = vadd.f32 %v11260_v60, %v1578_v5  ;;  %10163 = vmatprep.mubr.msk.f32.mxu0 %vm293_vm0, %v224_v63 }
 0x196   :  { %v3103_v11 = vadd.f32 %v3102_v6, %v3101_v3  ;;  %v2498_v12 = vmax.f32 %v1584_v4, 0.0  ;;  %v3106_v21 = vsel %vm293_vm0, %v2752_v7, 0.0  ;;  %v233_v4 = vld [vmem:[%s14296_s0 + $0x678] sm:$0xff] }
 0x197   :  { %v3104_v14 = vsel %vm293_vm0, %v2751_v8, 0.0  ;;  %v2497_v16 = vmax.f32 %v1579_v9, 0.0  ;;  %v10006_v17 = vpop.f32.mrb[92].mxu0  ;;  %v234_v8 = vld [vmem:[%s14296_s0 + $0x680] sm:$0xff] }
 0x198   :  { %v3105_v18 = vadd.f32 %v3104_v14, %v3103_v11  ;;  %v1594_v19 = vadd.f32 %v11260_v60, %v10006_v17  ;;  %v1588_v20 = vpop.f32.mrb[93].mxu0  ;;  %10164 = vmatmul.mubr.msk.f32.gmra.mrb[198].mxu0 %vm293_vm0, %v225_v10  ;;  %v2754_v22 = vmin.f32 %v2498_v12, 6.0 }
 0x199   :  { %v2753_v23 = vmin.f32 %v2497_v16, 6.0  ;;  %v1589_v24 = vadd.f32 %v11260_v60, %v1588_v20  ;;  %10166 = vmatprep.mubr.msk.f32.mxu0 %vm293_vm0, %v226_v13  ;;  %v235_v20 = vld [vmem:[%s14296_s0 + $0x688] sm:$0xff] }
 0x19a   :  { %v3107_v26 = vadd.f32 %v3106_v21, %v3105_v18  ;;  %v2500_v27 = vmax.f32 %v1594_v19, 0.0  ;;  %v3110_v35 = vsel %vm293_vm0, %v2754_v22, 0.0 }
 0x19b   :  { %v3108_v29 = vsel %vm293_vm0, %v2753_v23, 0.0  ;;  %v2499_v30 = vmax.f32 %v1589_v24, 0.0  ;;  %v10009_v31 = vpop.f32.mrb[94].mxu0  ;;  %v236_v23 = vld [vmem:[%s14296_s0 + $0x690] sm:$0xff] }
 0x19c   :  { %v3109_v32 = vadd.f32 %v3108_v29, %v3107_v26  ;;  %v1604_v33 = vadd.f32 %v11260_v60, %v10009_v31  ;;  %v1598_v34 = vpop.f32.mrb[95].mxu0  ;;  %10167 = vmatmul.mubr.msk.f32.gmra.mrb[200].mxu0 %vm293_vm0, %v227_v25  ;;  %v2756_v37 = vmin.f32 %v2500_v27, 6.0 }
 0x19d   :  { %v2755_v38 = vmin.f32 %v2499_v30, 6.0  ;;  %v1599_v39 = vadd.f32 %v11260_v60, %v1598_v34  ;;  %10169 = vmatprep.mubr.msk.f32.mxu0 %vm293_vm0, %v228_v28 }
 0x19e   :  { %v3111_v41 = vadd.f32 %v3110_v35, %v3109_v32  ;;  %v2502_v42 = vmax.f32 %v1604_v33, 0.0  ;;  %v3114_v51 = vsel %vm293_vm0, %v2756_v37, 0.0  ;;  %v237_v35 = vld [vmem:[%s14296_s0 + $0x698] sm:$0xff] }
 0x19f   :  { %v3112_v44 = vsel %vm293_vm0, %v2755_v38, 0.0  ;;  %v2501_v45 = vmax.f32 %v1599_v39, 0.0  ;;  %v10012_v46 = vpop.f32.mrb[96].mxu0 }
 0x1a0   :  { %v3113_v47 = vadd.f32 %v3112_v44, %v3111_v41  ;;  %v1614_v48 = vadd.f32 %v11260_v60, %v10012_v46  ;;  %v1608_v50 = vpop.f32.mrb[97].mxu0  ;;  %10170 = vmatmul.mubr.msk.f32.gmra.mrb[202].mxu0 %vm293_vm0, %v229_v40  ;;  %v2758_v52 = vmin.f32 %v2502_v42, 6.0  ;;  %v238_v40 = vld [vmem:[%s14296_s0 + $0x6a0] sm:$0xff] }
 0x1a1   :  { %v2757_v53 = vmin.f32 %v2501_v45, 6.0  ;;  %v1609_v54 = vadd.f32 %v11260_v60, %v1608_v50  ;;  %10172 = vmatprep.mubr.msk.f32.mxu0 %vm293_vm0, %v230_v43 }
 0x1a2   :  { %v3115_v56 = vadd.f32 %v3114_v51, %v3113_v47  ;;  %v2504_v57 = vmax.f32 %v1614_v48, 0.0  ;;  %v3118_v1 = vsel %vm293_vm0, %v2758_v52, 0.0 }
 0x1a3   :  { %v3116_v59 = vsel %vm293_vm0, %v2757_v53, 0.0  ;;  %v2503_v61 = vmax.f32 %v1609_v54, 0.0  ;;  %v10015_v49 = vpop.f32.mrb[98].mxu0  ;;  %v239_v53 = vld [vmem:[%s14296_s0 + $0x6a8] sm:$0xff] }
 0x1a4   :  { %v3117_v36 = vadd.f32 %v3116_v59, %v3115_v56  ;;  %v2760_v62 = vmin.f32 %v2504_v57, 6.0  ;;  %v1624_v63 = vadd.f32 %v11260_v60, %v10015_v49  ;;  %v1618_v0 = vpop.f32.mrb[99].mxu0  ;;  %10173 = vmatmul.mubr.msk.f32.gmra.mrb[204].mxu0 %vm293_vm0, %v231_v55  ;;  %v240_v57 = vld [vmem:[%s14296_s0 + $0x6b0] sm:$0xff] }
 0x1a5   :  { %v2759_v2 = vmin.f32 %v2503_v61, 6.0  ;;  %v1619_v3 = vadd.f32 %v11260_v60, %v1618_v0  ;;  %10175 = vmatprep.mubr.msk.f32.mxu0 %vm293_vm0, %v232_v58 }
 0x1a6   :  { %v3119_v5 = vadd.f32 %v3118_v1, %v3117_v36  ;;  %v3127_v6 = vsel %vm293_vm0, %v2760_v62, 0.0  ;;  %v2506_v7 = vmax.f32 %v1624_v63, 0.0 }
 0x1a7   :  { %v3126_v9 = vsel %vm293_vm0, %v2759_v2, 0.0  ;;  %v2505_v10 = vmax.f32 %v1619_v3, 0.0  ;;  %v10018_v11 = vpop.f32.mrb[100].mxu0 }
 0x1a8   :  { %v3120_v12 = vrot.slane %v3119_v5, 4  ;;  %v3128_v13 = vadd.f32 %v3127_v6, %v3126_v9  ;;  %v1634_v14 = vadd.f32 %v11260_v60, %v10018_v11  ;;  %v1628_v16 = vpop.f32.mrb[101].mxu0  ;;  %10176 = vmatmul.mubr.msk.f32.gmra.mrb[206].mxu0 %vm293_vm0, %v233_v4  ;;  %v2762_v17 = vmin.f32 %v2506_v7, 6.0  ;;  %v241_v4 = vld [vmem:[%s14296_s0 + $0x6b8] sm:$0xff] }
 0x1a9   :  { %v2761_v18 = vmin.f32 %v2505_v10, 6.0  ;;  %v1629_v19 = vadd.f32 %v11260_v60, %v1628_v16  ;;  %10178 = vmatprep.mubr.msk.f32.mxu0 %vm293_vm0, %v234_v8  ;;  %v242_v8 = vld [vmem:[%s14296_s0 + $0x6c0] sm:$0xff] }
 0x1aa   :  { %v3121_v21 = vadd.f32 %v3120_v12, %v3119_v5  ;;  %v2508_v22 = vmax.f32 %v1634_v14, 0.0  ;;  %v3131_v31 = vsel %vm293_vm0, %v2762_v17, 0.0 }
 0x1ab   :  { %v3129_v24 = vsel %vm293_vm0, %v2761_v18, 0.0  ;;  %v2507_v25 = vmax.f32 %v1629_v19, 0.0  ;;  %v10021_v26 = vpop.f32.mrb[102].mxu0  ;;  %v243_v19 = vld [vmem:[%s14296_s0 + $0x6c8] sm:$0xff] }
 0x1ac   :  { %v3122_v27 = vrot.slane %v3121_v21, 2  ;;  %v3130_v28 = vadd.f32 %v3129_v24, %v3128_v13  ;;  %v1644_v29 = vadd.f32 %v11260_v60, %v10021_v26  ;;  %v1638_v30 = vpop.f32.mrb[103].mxu0  ;;  %10179 = vmatmul.mubr.msk.f32.gmra.mrb[208].mxu0 %vm293_vm0, %v235_v20  ;;  %v2764_v32 = vmin.f32 %v2508_v22, 6.0  ;;  %v244_v22 = vld [vmem:[%s14296_s0 + $0x6d0] sm:$0xff] }
 0x1ad   :  { %v2763_v33 = vmin.f32 %v2507_v25, 6.0  ;;  %v1639_v34 = vadd.f32 %v11260_v60, %v1638_v30  ;;  %10181 = vmatprep.mubr.msk.f32.mxu0 %vm293_vm0, %v236_v23 }
 0x1ae   :  { %v3123_v37 = vadd.f32 %v3122_v27, %v3121_v21  ;;  %v3132_v38 = vadd.f32 %v3131_v31, %v3130_v28  ;;  %v2510_v39 = vmax.f32 %v1644_v29, 0.0  ;;  %v3135_v48 = vsel %vm293_vm0, %v2764_v32, 0.0 }
 0x1af   :  { %v3133_v41 = vsel %vm293_vm0, %v2763_v33, 0.0  ;;  %v2509_v42 = vmax.f32 %v1639_v34, 0.0  ;;  %v10024_v43 = vpop.f32.mrb[104].mxu0  ;;  %v245_v33 = vld [vmem:[%s14296_s0 + $0x6d8] sm:$0xff] }
 0x1b0   :  { %v3124_v44 = vrot.slane %v3123_v37, 1  ;;  %v3134_v45 = vadd.f32 %v3133_v41, %v3132_v38  ;;  %v1654_v46 = vadd.f32 %v11260_v60, %v10024_v43  ;;  %v1648_v47 = vpop.f32.mrb[105].mxu0  ;;  %10182 = vmatmul.mubr.msk.f32.gmra.mrb[210].mxu0 %vm293_vm0, %v237_v35  ;;  %v2766_v50 = vmin.f32 %v2510_v39, 6.0 }
 0x1b1   :  { %v2765_v51 = vmin.f32 %v2509_v42, 6.0  ;;  %v1649_v52 = vadd.f32 %v11260_v60, %v1648_v47  ;;  %10184 = vmatprep.mubr.msk.f32.mxu0 %vm293_vm0, %v238_v40 }
 0x1b2   :  { %v3125_v54 = vadd.f32 %v3124_v44, %v3123_v37  ;;  %v3136_v55 = vadd.f32 %v3135_v48, %v3134_v45  ;;  %v2512_v56 = vmax.f32 %v1654_v46, 0.0  ;;  %v3139_v0 = vsel %vm293_vm0, %v2766_v50, 0.0  ;;  %v246_v37 = vld [vmem:[%s14296_s0 + $0x6e0] sm:$0xff]  ;;  %v247_v48 = vld [vmem:[%s14296_s0 + $0x6e8] sm:$0xff] }
 0x1b3   :  { %v3137_v58 = vsel %vm293_vm0, %v2765_v51, 0.0  ;;  %v2511_v59 = vmax.f32 %v1649_v52, 0.0  ;;  %v10027_v61 = vpop.f32.mrb[106].mxu0  ;;  %v248_v52 = vld [vmem:[%s14296_s0 + $0x6f0] sm:$0xff] }
 0x1b4   :  { %v3473_v49 = vmul.f32 0.00390625, %v3125_v54  ;;  %v3138_v36 = vadd.f32 %v3137_v58, %v3136_v55  ;;  %v1664_v62 = vadd.f32 %v11260_v60, %v10027_v61  ;;  %v1658_v63 = vpop.f32.mrb[107].mxu0  ;;  %10185 = vmatmul.mubr.msk.f32.gmra.mrb[212].mxu0 %vm293_vm0, %v239_v53  ;;  %v2768_v1 = vmin.f32 %v2512_v56, 6.0 }
 0x1b5   :  { %v2767_v2 = vmin.f32 %v2511_v59, 6.0  ;;  %v1659_v3 = vadd.f32 %v11260_v60, %v1658_v63  ;;  %10187 = vmatprep.mubr.msk.f32.mxu0 %vm293_vm0, %v240_v57 }
 0x1b6   :  { %v11555_v5 = vsel %vm3583_vm2, %v3473_v49, %v11328_v15  ;;  %v3140_v6 = vadd.f32 %v3139_v0, %v3138_v36  ;;  %v2514_v7 = vmax.f32 %v1664_v62, 0.0  ;;  %v3143_v16 = vsel %vm293_vm0, %v2768_v1, 0.0  ;;  %v249_v62 = vld [vmem:[%s14296_s0 + $0x6f8] sm:$0xff]  ;;  %v250_v1 = vld [vmem:[%s14296_s0 + $0x700] sm:$0xff] }
 0x1b7   :  { %v3141_v9 = vsel %vm293_vm0, %v2767_v2, 0.0  ;;  %v2513_v10 = vmax.f32 %v1659_v3, 0.0  ;;  %v10030_v11 = vpop.f32.mrb[108].mxu0 }
 0x1b8   :  { %v3142_v12 = vadd.f32 %v3141_v9, %v3140_v6  ;;  %v1674_v13 = vadd.f32 %v11260_v60, %v10030_v11  ;;  %v1668_v14 = vpop.f32.mrb[109].mxu0  ;;  %10188 = vmatmul.mubr.msk.f32.gmra.mrb[214].mxu0 %vm293_vm0, %v241_v4  ;;  %v2770_v15 = vmin.f32 %v2514_v7, 6.0 }
 0x1b9   :  { %v2769_v17 = vmin.f32 %v2513_v10, 6.0  ;;  %v1669_v18 = vadd.f32 %v11260_v60, %v1668_v14  ;;  %10190 = vmatprep.mubr.msk.f32.mxu0 %vm293_vm0, %v242_v8 }
 0x1ba   :  { %v3144_v20 = vadd.f32 %v3143_v16, %v3142_v12  ;;  %v2516_v21 = vmax.f32 %v1674_v13, 0.0  ;;  %v3147_v29 = vsel %vm293_vm0, %v2770_v15, 0.0  ;;  %v251_v13 = vld [vmem:[%s14296_s0 + $0x708] sm:$0xff]  ;;  %v252_v15 = vld [vmem:[%s14296_s0 + $0x710] sm:$0xff] }
 0x1bb   :  { %v3145_v23 = vsel %vm293_vm0, %v2769_v17, 0.0  ;;  %v2515_v24 = vmax.f32 %v1669_v18, 0.0  ;;  %v10033_v25 = vpop.f32.mrb[110].mxu0 }
 0x1bc   :  { %v3146_v26 = vadd.f32 %v3145_v23, %v3144_v20  ;;  %v1684_v27 = vadd.f32 %v11260_v60, %v10033_v25  ;;  %v1678_v28 = vpop.f32.mrb[111].mxu0  ;;  %10191 = vmatmul.mubr.msk.f32.gmra.mrb[216].mxu0 %vm293_vm0, %v243_v19  ;;  %v2772_v30 = vmin.f32 %v2516_v21, 6.0 }
 0x1bd   :  { %v2771_v31 = vmin.f32 %v2515_v24, 6.0  ;;  %v1679_v32 = vadd.f32 %v11260_v60, %v1678_v28  ;;  %10193 = vmatprep.mubr.msk.f32.mxu0 %vm293_vm0, %v244_v22 }
 0x1be   :  { %v3148_v34 = vadd.f32 %v3147_v29, %v3146_v26  ;;  %v2518_v35 = vmax.f32 %v1684_v27, 0.0  ;;  %v3151_v44 = vsel %vm293_vm0, %v2772_v30, 0.0  ;;  %v253_v27 = vld [vmem:[%s14296_s0 + $0x718] sm:$0xff]  ;;  %v254_v30 = vld [vmem:[%s14296_s0 + $0x720] sm:$0xff] }
 0x1bf   :  { %v3149_v38 = vsel %vm293_vm0, %v2771_v31, 0.0  ;;  %v2517_v39 = vmax.f32 %v1679_v32, 0.0  ;;  %v10036_v40 = vpop.f32.mrb[112].mxu0 }
 0x1c0   :  { %v3150_v41 = vadd.f32 %v3149_v38, %v3148_v34  ;;  %v1694_v42 = vadd.f32 %v11260_v60, %v10036_v40  ;;  %v1688_v43 = vpop.f32.mrb[113].mxu0  ;;  %10194 = vmatmul.mubr.msk.f32.gmra.mrb[218].mxu0 %vm293_vm0, %v245_v33  ;;  %v2774_v45 = vmin.f32 %v2518_v35, 6.0 }
 0x1c1   :  { %v2773_v46 = vmin.f32 %v2517_v39, 6.0  ;;  %v1689_v47 = vadd.f32 %v11260_v60, %v1688_v43  ;;  %10196 = vmatprep.mubr.msk.f32.mxu0 %vm293_vm0, %v246_v37 }
 0x1c2   :  { %v3152_v50 = vadd.f32 %v3151_v44, %v3150_v41  ;;  %v2520_v51 = vmax.f32 %v1694_v42, 0.0  ;;  %v3155_v59 = vsel %vm293_vm0, %v2774_v45, 0.0  ;;  %v255_v42 = vld [vmem:[%s14296_s0 + $0x728] sm:$0xff]  ;;  %v256_v45 = vld [vmem:[%s14296_s0 + $0x730] sm:$0xff] }
 0x1c3   :  { %v3153_v53 = vsel %vm293_vm0, %v2773_v46, 0.0  ;;  %v2519_v54 = vmax.f32 %v1689_v47, 0.0  ;;  %v10039_v55 = vpop.f32.mrb[114].mxu0 }
 0x1c4   :  { %v3154_v56 = vadd.f32 %v3153_v53, %v3152_v50  ;;  %v1704_v57 = vadd.f32 %v11260_v60, %v10039_v55  ;;  %v1698_v58 = vpop.f32.mrb[115].mxu0  ;;  %10197 = vmatmul.mubr.msk.f32.gmra.mrb[220].mxu0 %vm293_vm0, %v247_v48  ;;  %v2776_v61 = vmin.f32 %v2520_v51, 6.0 }
 0x1c5   :  { %v2775_v49 = vmin.f32 %v2519_v54, 6.0  ;;  %v1699_v36 = vadd.f32 %v11260_v60, %v1698_v58  ;;  %10199 = vmatprep.mubr.msk.f32.mxu0 %vm293_vm0, %v248_v52 }
 0x1c6   :  { %v3156_v63 = vadd.f32 %v3155_v59, %v3154_v56  ;;  %v2522_v0 = vmax.f32 %v1704_v57, 0.0  ;;  %v3159_v9 = vsel %vm293_vm0, %v2776_v61, 0.0  ;;  %v257_v57 = vld [vmem:[%s14296_s0 + $0x738] sm:$0xff]  ;;  %v258_v61 = vld [vmem:[%s14296_s0 + $0x740] sm:$0xff] }
 0x1c7   :  { %v3157_v2 = vsel %vm293_vm0, %v2775_v49, 0.0  ;;  %v2521_v3 = vmax.f32 %v1699_v36, 0.0  ;;  %v10042_v4 = vpop.f32.mrb[116].mxu0 }
 0x1c8   :  { %v3158_v6 = vadd.f32 %v3157_v2, %v3156_v63  ;;  %v1714_v7 = vadd.f32 %v11260_v60, %v10042_v4  ;;  %v1708_v8 = vpop.f32.mrb[117].mxu0  ;;  %10200 = vmatmul.mubr.msk.f32.gmra.mrb[222].mxu0 %vm293_vm0, %v249_v62  ;;  %v2778_v10 = vmin.f32 %v2522_v0, 6.0 }
 0x1c9   :  { %v2777_v11 = vmin.f32 %v2521_v3, 6.0  ;;  %v1709_v12 = vadd.f32 %v11260_v60, %v1708_v8  ;;  %10202 = vmatprep.mubr.msk.f32.mxu0 %vm293_vm0, %v250_v1 }
 0x1ca   :  { %v3160_v14 = vadd.f32 %v3159_v9, %v3158_v6  ;;  %v2524_v16 = vmax.f32 %v1714_v7, 0.0  ;;  %v3163_v23 = vsel %vm293_vm0, %v2778_v10, 0.0  ;;  %v11663_v6 = vld [vmem:[%s14297_s2] ss:$0 sm:$0xff]  ;;  %v260_v10 = vld [vmem:[%s14296_s0 + $0x750] sm:$0xff] }
 0x1cb   :  { %v3161_v17 = vsel %vm293_vm0, %v2777_v11, 0.0  ;;  %v2523_v18 = vmax.f32 %v1709_v12, 0.0  ;;  %v10045_v19 = vpop.f32.mrb[118].mxu0 }
 0x1cc   :  { %v3162_v20 = vadd.f32 %v3161_v17, %v3160_v14  ;;  %v1724_v21 = vadd.f32 %v11260_v60, %v10045_v19  ;;  %v1718_v22 = vpop.f32.mrb[119].mxu0  ;;  %10203 = vmatmul.mubr.msk.f32.gmra.mrb[224].mxu0 %vm293_vm0, %v251_v13  ;;  %v2780_v24 = vmin.f32 %v2524_v16, 6.0 }
 0x1cd   :  { %v2779_v25 = vmin.f32 %v2523_v18, 6.0  ;;  %v1719_v26 = vadd.f32 %v11260_v60, %v1718_v22  ;;  %10205 = vmatprep.mubr.msk.f32.mxu0 %vm293_vm0, %v252_v15 }
 0x1ce   :  { %v3164_v28 = vadd.f32 %v3163_v23, %v3162_v20  ;;  %v2526_v29 = vmax.f32 %v1724_v21, 0.0  ;;  %v3167_v38 = vsel %vm293_vm0, %v2780_v24, 0.0  ;;  %v261_v21 = vld [vmem:[%s14296_s0 + $0x758] sm:$0xff]  ;;  %v262_v24 = vld [vmem:[%s14296_s0 + $0x760] sm:$0xff] }
 0x1cf   :  { %v3165_v31 = vsel %vm293_vm0, %v2779_v25, 0.0  ;;  %v2525_v32 = vmax.f32 %v1719_v26, 0.0  ;;  %v10048_v33 = vpop.f32.mrb[120].mxu0 }
 0x1d0   :  { %v3166_v34 = vadd.f32 %v3165_v31, %v3164_v28  ;;  %v1734_v35 = vadd.f32 %v11260_v60, %v10048_v33  ;;  %v1728_v37 = vpop.f32.mrb[121].mxu0  ;;  %10206 = vmatmul.mubr.msk.f32.gmra.mrb[226].mxu0 %vm293_vm0, %v253_v27  ;;  %v2782_v39 = vmin.f32 %v2526_v29, 6.0 }
 0x1d1   :  { %v2781_v40 = vmin.f32 %v2525_v32, 6.0  ;;  %v1729_v41 = vadd.f32 %v11260_v60, %v1728_v37  ;;  %10208 = vmatprep.mubr.msk.f32.mxu0 %vm293_vm0, %v254_v30 }
 0x1d2   :  { %v3168_v43 = vadd.f32 %v3167_v38, %v3166_v34  ;;  %v2528_v44 = vmax.f32 %v1734_v35, 0.0  ;;  %v3171_v53 = vsel %vm293_vm0, %v2782_v39, 0.0  ;;  %v263_v35 = vld [vmem:[%s14296_s0 + $0x768] sm:$0xff]  ;;  %v264_v39 = vld [vmem:[%s14296_s0 + $0x770] sm:$0xff] }
 0x1d3   :  { %v3169_v46 = vsel %vm293_vm0, %v2781_v40, 0.0  ;;  %v2527_v47 = vmax.f32 %v1729_v41, 0.0  ;;  %v10051_v48 = vpop.f32.mrb[122].mxu0 }
 0x1d4   :  { %v3170_v50 = vadd.f32 %v3169_v46, %v3168_v43  ;;  %v1744_v51 = vadd.f32 %v11260_v60, %v10051_v48  ;;  %v1738_v52 = vpop.f32.mrb[123].mxu0  ;;  %10209 = vmatmul.mubr.msk.f32.gmra.mrb[228].mxu0 %vm293_vm0, %v255_v42  ;;  %v2784_v54 = vmin.f32 %v2528_v44, 6.0 }
 0x1d5   :  { %v2783_v55 = vmin.f32 %v2527_v47, 6.0  ;;  %v1739_v56 = vadd.f32 %v11260_v60, %v1738_v52  ;;  %10211 = vmatprep.mubr.msk.f32.mxu0 %vm293_vm0, %v256_v45 }
 0x1d6   :  { %v3172_v58 = vadd.f32 %v3171_v53, %v3170_v50  ;;  %v2530_v59 = vmax.f32 %v1744_v51, 0.0  ;;  %v3175_v2 = vsel %vm293_vm0, %v2784_v54, 0.0  ;;  %v265_v51 = vld [vmem:[%s14296_s0 + $0x778] sm:$0xff] }
 0x1d7   :  { %v3173_v49 = vsel %vm293_vm0, %v2783_v55, 0.0  ;;  %v2529_v36 = vmax.f32 %v1739_v56, 0.0  ;;  %v10054_v62 = vpop.f32.mrb[124].mxu0  ;;  %v266_v55 = vld [vmem:[%s14296_s0 + $0x780] sm:$0xff] }
 0x1d8   :  { %v3174_v63 = vadd.f32 %v3173_v49, %v3172_v58  ;;  %v1754_v0 = vadd.f32 %v11260_v60, %v10054_v62  ;;  %v1748_v1 = vpop.f32.mrb[125].mxu0  ;;  %10212 = vmatmul.mubr.msk.f32.gmra.mrb[230].mxu0 %vm293_vm0, %v257_v57  ;;  %v2786_v3 = vmin.f32 %v2530_v59, 6.0  ;;  %v259_v60 = vld [vmem:[%s14296_s0 + $0x748] sm:$0xff] }
 0x1d9   :  { %v2785_v4 = vmin.f32 %v2529_v36, 6.0  ;;  %v1749_v7 = vadd.f32 %v11663_v6, %v1748_v1  ;;  %10214 = vmatprep.mubr.msk.f32.mxu0 %vm293_vm0, %v258_v61  ;;  %v267_v1 = vld [vmem:[%s14296_s0 + $0x788] sm:$0xff] }
 0x1da   :  { %v3176_v8 = vadd.f32 %v3175_v2, %v3174_v63  ;;  %v2532_v9 = vmax.f32 %v1754_v0, 0.0  ;;  %v3179_v17 = vsel %vm293_vm0, %v2786_v3, 0.0 }
 0x1db   :  { %v3177_v11 = vsel %vm293_vm0, %v2785_v4, 0.0  ;;  %v2531_v12 = vmax.f32 %v1749_v7, 0.0  ;;  %v10057_v13 = vpop.f32.mrb[126].mxu0  ;;  %v268_v4 = vld [vmem:[%s14296_s0 + $0x790] sm:$0xff] }
 0x1dc   :  { %v3178_v14 = vadd.f32 %v3177_v11, %v3176_v8  ;;  %v1764_v16 = vadd.f32 %v11663_v6, %v10057_v13  ;;  %v1758_v15 = vpop.f32.mrb[127].mxu0  ;;  %10215 = vmatmul.mubr.msk.f32.gmra.mrb[232].mxu0 %vm293_vm0, %v259_v60  ;;  %v2788_v18 = vmin.f32 %v2532_v9, 6.0 }
 0x1dd   :  { %v2787_v19 = vmin.f32 %v2531_v12, 6.0  ;;  %v1759_v20 = vadd.f32 %v11663_v6, %v1758_v15  ;;  %10217 = vmatprep.mubr.msk.f32.mxu0 %vm293_vm0, %v260_v10 }
 0x1de   :  { %v3180_v22 = vadd.f32 %v3179_v17, %v3178_v14  ;;  %v2534_v23 = vmax.f32 %v1764_v16, 0.0  ;;  %v3183_v31 = vsel %vm293_vm0, %v2788_v18, 0.0  ;;  %v269_v17 = vld [vmem:[%s14296_s0 + $0x798] sm:$0xff] }
 0x1df   :  { %v3181_v25 = vsel %vm293_vm0, %v2787_v19, 0.0  ;;  %v2533_v26 = vmax.f32 %v1759_v20, 0.0  ;;  %v10060_v27 = vpop.f32.mrb[128].mxu0 }
 0x1e0   :  { %v3182_v28 = vadd.f32 %v3181_v25, %v3180_v22  ;;  %v1774_v29 = vadd.f32 %v11663_v6, %v10060_v27  ;;  %v1768_v30 = vpop.f32.mrb[129].mxu0  ;;  %10218 = vmatmul.mubr.msk.f32.gmra.mrb[234].mxu0 %vm293_vm0, %v261_v21  ;;  %v2790_v32 = vmin.f32 %v2534_v23, 6.0  ;;  %v270_v21 = vld [vmem:[%s14296_s0 + $0x7a0] sm:$0xff] }
 0x1e1   :  { %v2789_v33 = vmin.f32 %v2533_v26, 6.0  ;;  %v1769_v34 = vadd.f32 %v11663_v6, %v1768_v30  ;;  %10220 = vmatprep.mubr.msk.f32.mxu0 %vm293_vm0, %v262_v24 }
 0x1e2   :  { %v3184_v37 = vadd.f32 %v3183_v31, %v3182_v28  ;;  %v2536_v38 = vmax.f32 %v1774_v29, 0.0  ;;  %v3187_v47 = vsel %vm293_vm0, %v2790_v32, 0.0 }
 0x1e3   :  { %v3185_v40 = vsel %vm293_vm0, %v2789_v33, 0.0  ;;  %v2535_v41 = vmax.f32 %v1769_v34, 0.0  ;;  %v10063_v42 = vpop.f32.mrb[130].mxu0  ;;  %v271_v33 = vld [vmem:[%s14296_s0 + $0x7a8] sm:$0xff] }
 0x1e4   :  { %v3186_v43 = vadd.f32 %v3185_v40, %v3184_v37  ;;  %v2792_v44 = vmin.f32 %v2536_v38, 6.0  ;;  %v1784_v45 = vadd.f32 %v11663_v6, %v10063_v42  ;;  %v1778_v46 = vpop.f32.mrb[131].mxu0  ;;  %10221 = vmatmul.mubr.msk.f32.gmra.mrb[236].mxu0 %vm293_vm0, %v263_v35  ;;  %v272_v38 = vld [vmem:[%s14296_s0 + $0x7b0] sm:$0xff] }
 0x1e5   :  { %v2791_v48 = vmin.f32 %v2535_v41, 6.0  ;;  %v1779_v50 = vadd.f32 %v11663_v6, %v1778_v46  ;;  %10223 = vmatprep.mubr.msk.f32.mxu0 %vm293_vm0, %v264_v39 }
 0x1e6   :  { %v3188_v52 = vadd.f32 %v3187_v47, %v3186_v43  ;;  %v3196_v53 = vsel %vm293_vm0, %v2792_v44, 0.0  ;;  %v2538_v54 = vmax.f32 %v1784_v45, 0.0 }
 0x1e7   :  { %v3195_v56 = vsel %vm293_vm0, %v2791_v48, 0.0  ;;  %v2537_v57 = vmax.f32 %v1779_v50, 0.0  ;;  %v10066_v58 = vpop.f32.mrb[132].mxu0 }
 0x1e8   :  { %v3189_v59 = vrot.slane %v3188_v52, 4  ;;  %v3197_v61 = vadd.f32 %v3196_v53, %v3195_v56  ;;  %v1794_v49 = vadd.f32 %v11663_v6, %v10066_v58  ;;  %v1788_v36 = vpop.f32.mrb[133].mxu0  ;;  %10224 = vmatmul.mubr.msk.f32.gmra.mrb[238].mxu0 %vm293_vm0, %v265_v51  ;;  %v2794_v62 = vmin.f32 %v2538_v54, 6.0  ;;  %v273_v51 = vld [vmem:[%s14296_s0 + $0x7b8] sm:$0xff] }
 0x1e9   :  { %v2793_v63 = vmin.f32 %v2537_v57, 6.0  ;;  %v1789_v0 = vadd.f32 %v11663_v6, %v1788_v36  ;;  %10226 = vmatprep.mubr.msk.f32.mxu0 %vm293_vm0, %v266_v55 }
 0x1ea   :  { %v3190_v2 = vadd.f32 %v3189_v59, %v3188_v52  ;;  %v2540_v3 = vmax.f32 %v1794_v49, 0.0  ;;  %v3200_v13 = vsel %vm293_vm0, %v2794_v62, 0.0 }
 0x1eb   :  { %v3198_v7 = vsel %vm293_vm0, %v2793_v63, 0.0  ;;  %v2539_v60 = vmax.f32 %v1789_v0, 0.0  ;;  %v10069_v8 = vpop.f32.mrb[134].mxu0 }
 0x1ec   :  { %v3191_v9 = vrot.slane %v3190_v2, 2  ;;  %v3199_v10 = vadd.f32 %v3198_v7, %v3197_v61  ;;  %v1804_v11 = vadd.f32 %v11663_v6, %v10069_v8  ;;  %v1798_v12 = vpop.f32.mrb[135].mxu0  ;;  %10227 = vmatmul.mubr.msk.f32.gmra.mrb[240].mxu0 %vm293_vm0, %v267_v1  ;;  %v2796_v14 = vmin.f32 %v2540_v3, 6.0 }
 0x1ed   :  { %v2795_v16 = vmin.f32 %v2539_v60, 6.0  ;;  %v1799_v15 = vadd.f32 %v11663_v6, %v1798_v12  ;;  %10229 = vmatprep.mubr.msk.f32.mxu0 %vm293_vm0, %v268_v4 }
 0x1ee   :  { %v3192_v18 = vadd.f32 %v3191_v9, %v3190_v2  ;;  %v3201_v19 = vadd.f32 %v3200_v13, %v3199_v10  ;;  %v2542_v20 = vmax.f32 %v1804_v11, 0.0  ;;  %v3204_v29 = vsel %vm293_vm0, %v2796_v14, 0.0 }
 0x1ef   :  { %v3202_v22 = vsel %vm293_vm0, %v2795_v16, 0.0  ;;  %v2541_v23 = vmax.f32 %v1799_v15, 0.0  ;;  %v10072_v24 = vpop.f32.mrb[136].mxu0 }
 0x1f0   :  { %v3193_v25 = vrot.slane %v3192_v18, 1  ;;  %v3203_v26 = vadd.f32 %v3202_v22, %v3201_v19  ;;  %v1814_v27 = vadd.f32 %v11663_v6, %v10072_v24  ;;  %v1808_v28 = vpop.f32.mrb[137].mxu0  ;;  %10230 = vmatmul.mubr.msk.f32.gmra.mrb[242].mxu0 %vm293_vm0, %v269_v17  ;;  %v2798_v30 = vmin.f32 %v2542_v20, 6.0 }
 0x1f1   :  { %v2797_v31 = vmin.f32 %v2541_v23, 6.0  ;;  %v1809_v32 = vadd.f32 %v11663_v6, %v1808_v28  ;;  %10232 = vmatprep.mubr.msk.f32.mxu0 %vm293_vm0, %v270_v21 }
 0x1f2   :  { %v3194_v34 = vadd.f32 %v3193_v25, %v3192_v18  ;;  %v3205_v35 = vadd.f32 %v3204_v29, %v3203_v26  ;;  %v2544_v37 = vmax.f32 %v1814_v27, 0.0  ;;  %v3208_v46 = vsel %vm293_vm0, %v2798_v30, 0.0 }
 0x1f3   :  { %v3206_v39 = vsel %vm293_vm0, %v2797_v31, 0.0  ;;  %v2543_v40 = vmax.f32 %v1809_v32, 0.0  ;;  %v10075_v41 = vpop.f32.mrb[138].mxu0 }
 0x1f4   :  { %v3474_v42 = vmul.f32 0.00390625, %v3194_v34  ;;  %v3207_v43 = vadd.f32 %v3206_v39, %v3205_v35  ;;  %v1824_v44 = vadd.f32 %v11663_v6, %v10075_v41  ;;  %v1818_v45 = vpop.f32.mrb[139].mxu0  ;;  %10233 = vmatmul.mubr.msk.f32.gmra.mrb[244].mxu0 %vm293_vm0, %v271_v33  ;;  %v2800_v47 = vmin.f32 %v2544_v37, 6.0 }
 0x1f5   :  { %v2799_v48 = vmin.f32 %v2543_v40, 6.0  ;;  %v1819_v50 = vadd.f32 %v11663_v6, %v1818_v45  ;;  %10235 = vmatprep.mubr.msk.f32.mxu0 %vm293_vm0, %v272_v38 }
 0x1f6   :  { %v3209_v52 = vadd.f32 %v3208_v46, %v3207_v43  ;;  %v2546_v53 = vmax.f32 %v1824_v44, 0.0  ;;  %v11755_v54 = vsel %vm3585_vm3, %v3474_v42, %v11555_v5  ;;  %v3212_v49 = vsel %vm293_vm0, %v2800_v47, 0.0 }
 0x1f7   :  { %v3210_v55 = vsel %vm293_vm0, %v2799_v48, 0.0  ;;  %v2545_v56 = vmax.f32 %v1819_v50, 0.0  ;;  %v10078_v57 = vpop.f32.mrb[140].mxu0 }
 0x1f8   :  { %v3211_v58 = vadd.f32 %v3210_v55, %v3209_v52  ;;  %v1834_v59 = vadd.f32 %v11663_v6, %v10078_v57  ;;  %v1828_v61 = vpop.f32.mrb[141].mxu0  ;;  %10236 = vmatmul.mubr.msk.f32.gmra.mrb[246].mxu0 %vm293_vm0, %v273_v51  ;;  %v2802_v36 = vmin.f32 %v2546_v53, 6.0 }
 0x1f9   :  { %v2801_v62 = vmin.f32 %v2545_v56, 6.0  ;;  %v1829_v63 = vadd.f32 %v11663_v6, %v1828_v61 }
 0x1fa   :  { %v3213_v0 = vadd.f32 %v3212_v49, %v3211_v58  ;;  %v2548_v1 = vmax.f32 %v1834_v59, 0.0  ;;  %v3216_v8 = vsel %vm293_vm0, %v2802_v36, 0.0 }
 0x1fb   :  { %v3214_v5 = vsel %vm293_vm0, %v2801_v62, 0.0  ;;  %v2547_v2 = vmax.f32 %v1829_v63, 0.0  ;;  %v10081_v3 = vpop.f32.mrb[142].mxu0 }
 0x1fc   :  { %v3215_v4 = vadd.f32 %v3214_v5, %v3213_v0  ;;  %v1844_v7 = vadd.f32 %v11663_v6, %v10081_v3  ;;  %v1838_v60 = vpop.f32.mrb[143].mxu0  ;;  %v2804_v9 = vmin.f32 %v2548_v1, 6.0 }
 0x1fd   :  { %v2803_v10 = vmin.f32 %v2547_v2, 6.0  ;;  %v1839_v11 = vadd.f32 %v11663_v6, %v1838_v60 }
 0x1fe   :  { %v3217_v12 = vadd.f32 %v3216_v8, %v3215_v4  ;;  %v2550_v13 = vmax.f32 %v1844_v7, 0.0  ;;  %v3220_v20 = vsel %vm293_vm0, %v2804_v9, 0.0 }
 0x1ff   :  { %v3218_v14 = vsel %vm293_vm0, %v2803_v10, 0.0  ;;  %v2549_v16 = vmax.f32 %v1839_v11, 0.0  ;;  %v10084_v15 = vpop.f32.mrb[144].mxu0 }
 0x200   :  { %v3219_v17 = vadd.f32 %v3218_v14, %v3217_v12  ;;  %v1854_v18 = vadd.f32 %v11663_v6, %v10084_v15  ;;  %v1848_v19 = vpop.f32.mrb[145].mxu0  ;;  %v2806_v21 = vmin.f32 %v2550_v13, 6.0 }
 0x201   :  { %v2805_v22 = vmin.f32 %v2549_v16, 6.0  ;;  %v1849_v23 = vadd.f32 %v11663_v6, %v1848_v19 }
 0x202   :  { %v3221_v24 = vadd.f32 %v3220_v20, %v3219_v17  ;;  %v2552_v25 = vmax.f32 %v1854_v18, 0.0  ;;  %v3224_v32 = vsel %vm293_vm0, %v2806_v21, 0.0 }
 0x203   :  { %v3222_v26 = vsel %vm293_vm0, %v2805_v22, 0.0  ;;  %v2551_v27 = vmax.f32 %v1849_v23, 0.0  ;;  %v10087_v28 = vpop.f32.mrb[146].mxu0 }
 0x204   :  { %v3223_v29 = vadd.f32 %v3222_v26, %v3221_v24  ;;  %v1864_v30 = vadd.f32 %v11663_v6, %v10087_v28  ;;  %v1858_v31 = vpop.f32.mrb[147].mxu0  ;;  %v2808_v33 = vmin.f32 %v2552_v25, 6.0 }
 0x205   :  { %v2807_v34 = vmin.f32 %v2551_v27, 6.0  ;;  %v1859_v35 = vadd.f32 %v11663_v6, %v1858_v31 }
 0x206   :  { %v3225_v37 = vadd.f32 %v3224_v32, %v3223_v29  ;;  %v2554_v38 = vmax.f32 %v1864_v30, 0.0  ;;  %v3228_v45 = vsel %vm293_vm0, %v2808_v33, 0.0 }
 0x207   :  { %v3226_v39 = vsel %vm293_vm0, %v2807_v34, 0.0  ;;  %v2553_v40 = vmax.f32 %v1859_v35, 0.0  ;;  %v10090_v41 = vpop.f32.mrb[148].mxu0 }
 0x208   :  { %v3227_v42 = vadd.f32 %v3226_v39, %v3225_v37  ;;  %v1874_v43 = vadd.f32 %v11663_v6, %v10090_v41  ;;  %v1868_v44 = vpop.f32.mrb[149].mxu0  ;;  %v2810_v46 = vmin.f32 %v2554_v38, 6.0 }
 0x209   :  { %v2809_v47 = vmin.f32 %v2553_v40, 6.0  ;;  %v1869_v48 = vadd.f32 %v11663_v6, %v1868_v44 }
 0x20a   :  { %v3229_v50 = vadd.f32 %v3228_v45, %v3227_v42  ;;  %v2556_v51 = vmax.f32 %v1874_v43, 0.0  ;;  %v3232_v59 = vsel %vm293_vm0, %v2810_v46, 0.0 }
 0x20b   :  { %v3230_v52 = vsel %vm293_vm0, %v2809_v47, 0.0  ;;  %v2555_v53 = vmax.f32 %v1869_v48, 0.0  ;;  %v10093_v55 = vpop.f32.mrb[150].mxu0 }
 0x20c   :  { %v3231_v56 = vadd.f32 %v3230_v52, %v3229_v50  ;;  %v1884_v57 = vadd.f32 %v11663_v6, %v10093_v55  ;;  %v1878_v58 = vpop.f32.mrb[151].mxu0  ;;  %v2812_v61 = vmin.f32 %v2556_v51, 6.0 }
 0x20d   :  { %v2811_v49 = vmin.f32 %v2555_v53, 6.0  ;;  %v1879_v36 = vadd.f32 %v11663_v6, %v1878_v58 }
 0x20e   :  { %v3233_v62 = vadd.f32 %v3232_v59, %v3231_v56  ;;  %v2558_v63 = vmax.f32 %v1884_v57, 0.0  ;;  %v3236_v7 = vsel %vm293_vm0, %v2812_v61, 0.0 }
 0x20f   :  { %v3234_v0 = vsel %vm293_vm0, %v2811_v49, 0.0  ;;  %v2557_v1 = vmax.f32 %v1879_v36, 0.0  ;;  %v10096_v5 = vpop.f32.mrb[152].mxu0 }
 0x210   :  { %v3235_v2 = vadd.f32 %v3234_v0, %v3233_v62  ;;  %v1894_v3 = vadd.f32 %v11663_v6, %v10096_v5  ;;  %v1888_v4 = vpop.f32.mrb[153].mxu0  ;;  %v2814_v60 = vmin.f32 %v2558_v63, 6.0 }
 0x211   :  { %v2813_v8 = vmin.f32 %v2557_v1, 6.0  ;;  %v1889_v9 = vadd.f32 %v11663_v6, %v1888_v4 }
 0x212   :  { %v3237_v10 = vadd.f32 %v3236_v7, %v3235_v2  ;;  %v2560_v11 = vmax.f32 %v1894_v3, 0.0  ;;  %v3240_v18 = vsel %vm293_vm0, %v2814_v60, 0.0 }
 0x213   :  { %v3238_v12 = vsel %vm293_vm0, %v2813_v8, 0.0  ;;  %v2559_v13 = vmax.f32 %v1889_v9, 0.0  ;;  %v10099_v14 = vpop.f32.mrb[154].mxu0 }
 0x214   :  { %v3239_v16 = vadd.f32 %v3238_v12, %v3237_v10  ;;  %v1904_v15 = vadd.f32 %v11663_v6, %v10099_v14  ;;  %v1898_v17 = vpop.f32.mrb[155].mxu0  ;;  %v2816_v19 = vmin.f32 %v2560_v11, 6.0 }
 0x215   :  { %v2815_v20 = vmin.f32 %v2559_v13, 6.0  ;;  %v1899_v21 = vadd.f32 %v11663_v6, %v1898_v17 }
 0x216   :  { %v3241_v22 = vadd.f32 %v3240_v18, %v3239_v16  ;;  %v2562_v23 = vmax.f32 %v1904_v15, 0.0  ;;  %v3244_v30 = vsel %vm293_vm0, %v2816_v19, 0.0 }
 0x217   :  { %v3242_v24 = vsel %vm293_vm0, %v2815_v20, 0.0  ;;  %v2561_v25 = vmax.f32 %v1899_v21, 0.0  ;;  %v10102_v26 = vpop.f32.mrb[156].mxu0 }
 0x218   :  { %v3243_v27 = vadd.f32 %v3242_v24, %v3241_v22  ;;  %v1914_v28 = vadd.f32 %v11663_v6, %v10102_v26  ;;  %v1908_v29 = vpop.f32.mrb[157].mxu0  ;;  %v2818_v31 = vmin.f32 %v2562_v23, 6.0 }
 0x219   :  { %v2817_v32 = vmin.f32 %v2561_v25, 6.0  ;;  %v1909_v33 = vadd.f32 %v11663_v6, %v1908_v29 }
 0x21a   :  { %v3245_v34 = vadd.f32 %v3244_v30, %v3243_v27  ;;  %v2564_v35 = vmax.f32 %v1914_v28, 0.0  ;;  %v3248_v43 = vsel %vm293_vm0, %v2818_v31, 0.0 }
 0x21b   :  { %v3246_v37 = vsel %vm293_vm0, %v2817_v32, 0.0  ;;  %v2563_v38 = vmax.f32 %v1909_v33, 0.0  ;;  %v10105_v39 = vpop.f32.mrb[158].mxu0 }
 0x21c   :  { %v3247_v40 = vadd.f32 %v3246_v37, %v3245_v34  ;;  %v1924_v41 = vadd.f32 %v11663_v6, %v10105_v39  ;;  %v1918_v42 = vpop.f32.mrb[159].mxu0  ;;  %v2820_v44 = vmin.f32 %v2564_v35, 6.0 }
 0x21d   :  { %v2819_v45 = vmin.f32 %v2563_v38, 6.0  ;;  %v1919_v46 = vadd.f32 %v11663_v6, %v1918_v42 }
 0x21e   :  { %v3249_v47 = vadd.f32 %v3248_v43, %v3247_v40  ;;  %v2566_v48 = vmax.f32 %v1924_v41, 0.0  ;;  %v3252_v57 = vsel %vm293_vm0, %v2820_v44, 0.0 }
 0x21f   :  { %v3250_v50 = vsel %vm293_vm0, %v2819_v45, 0.0  ;;  %v2565_v51 = vmax.f32 %v1919_v46, 0.0  ;;  %v10108_v52 = vpop.f32.mrb[160].mxu0 }
 0x220   :  { %v3251_v53 = vadd.f32 %v3250_v50, %v3249_v47  ;;  %v1934_v55 = vadd.f32 %v11663_v6, %v10108_v52  ;;  %v1928_v56 = vpop.f32.mrb[161].mxu0  ;;  %v2822_v58 = vmin.f32 %v2566_v48, 6.0 }
 0x221   :  { %v2821_v59 = vmin.f32 %v2565_v51, 6.0  ;;  %v1929_v61 = vadd.f32 %v11663_v6, %v1928_v56 }
 0x222   :  { %v3253_v49 = vadd.f32 %v3252_v57, %v3251_v53  ;;  %v2568_v36 = vmax.f32 %v1934_v55, 0.0  ;;  %v3256_v4 = vsel %vm293_vm0, %v2822_v58, 0.0 }
 0x223   :  { %v3254_v62 = vsel %vm293_vm0, %v2821_v59, 0.0  ;;  %v2567_v63 = vmax.f32 %v1929_v61, 0.0  ;;  %v10111_v0 = vpop.f32.mrb[162].mxu0 }
 0x224   :  { %v3255_v1 = vadd.f32 %v3254_v62, %v3253_v49  ;;  %v2824_v5 = vmin.f32 %v2568_v36, 6.0  ;;  %v1944_v2 = vadd.f32 %v11663_v6, %v10111_v0  ;;  %v1938_v3 = vpop.f32.mrb[163].mxu0 }
 0x225   :  { %v2823_v7 = vmin.f32 %v2567_v63, 6.0  ;;  %v1939_v60 = vadd.f32 %v11663_v6, %v1938_v3 }
 0x226   :  { %v3257_v8 = vadd.f32 %v3256_v4, %v3255_v1  ;;  %v3265_v9 = vsel %vm293_vm0, %v2824_v5, 0.0  ;;  %v2570_v10 = vmax.f32 %v1944_v2, 0.0 }
 0x227   :  { %v3264_v11 = vsel %vm293_vm0, %v2823_v7, 0.0  ;;  %v2569_v12 = vmax.f32 %v1939_v60, 0.0  ;;  %v10114_v13 = vpop.f32.mrb[164].mxu0 }
 0x228   :  { %v3258_v14 = vrot.slane %v3257_v8, 4  ;;  %v3266_v16 = vadd.f32 %v3265_v9, %v3264_v11  ;;  %v1954_v15 = vadd.f32 %v11663_v6, %v10114_v13  ;;  %v1948_v17 = vpop.f32.mrb[165].mxu0  ;;  %v2826_v18 = vmin.f32 %v2570_v10, 6.0 }
 0x229   :  { %v2825_v19 = vmin.f32 %v2569_v12, 6.0  ;;  %v1949_v20 = vadd.f32 %v11663_v6, %v1948_v17 }
 0x22a   :  { %v3259_v21 = vadd.f32 %v3258_v14, %v3257_v8  ;;  %v2572_v22 = vmax.f32 %v1954_v15, 0.0  ;;  %v3269_v30 = vsel %vm293_vm0, %v2826_v18, 0.0 }
 0x22b   :  { %v3267_v23 = vsel %vm293_vm0, %v2825_v19, 0.0  ;;  %v2571_v24 = vmax.f32 %v1949_v20, 0.0  ;;  %v10117_v25 = vpop.f32.mrb[166].mxu0 }
 0x22c   :  { %v3260_v26 = vrot.slane %v3259_v21, 2  ;;  %v3268_v27 = vadd.f32 %v3267_v23, %v3266_v16  ;;  %v1964_v28 = vadd.f32 %v11663_v6, %v10117_v25  ;;  %v1958_v29 = vpop.f32.mrb[167].mxu0  ;;  %v2828_v31 = vmin.f32 %v2572_v22, 6.0 }
 0x22d   :  { %v2827_v32 = vmin.f32 %v2571_v24, 6.0  ;;  %v1959_v33 = vadd.f32 %v11663_v6, %v1958_v29 }
 0x22e   :  { %v3261_v34 = vadd.f32 %v3260_v26, %v3259_v21  ;;  %v3270_v35 = vadd.f32 %v3269_v30, %v3268_v27  ;;  %v2574_v37 = vmax.f32 %v1964_v28, 0.0  ;;  %v3273_v45 = vsel %vm293_vm0, %v2828_v31, 0.0 }
 0x22f   :  { %v3271_v38 = vsel %vm293_vm0, %v2827_v32, 0.0  ;;  %v2573_v39 = vmax.f32 %v1959_v33, 0.0  ;;  %v10120_v40 = vpop.f32.mrb[168].mxu0 }
 0x230   :  { %v3262_v41 = vrot.slane %v3261_v34, 1  ;;  %v3272_v42 = vadd.f32 %v3271_v38, %v3270_v35  ;;  %v1974_v43 = vadd.f32 %v11663_v6, %v10120_v40  ;;  %v1968_v44 = vpop.f32.mrb[169].mxu0  ;;  %v2830_v46 = vmin.f32 %v2574_v37, 6.0 }
 0x231   :  { %v2829_v47 = vmin.f32 %v2573_v39, 6.0  ;;  %v1969_v48 = vadd.f32 %v11663_v6, %v1968_v44 }
 0x232   :  { %v3263_v50 = vadd.f32 %v3262_v41, %v3261_v34  ;;  %v3274_v51 = vadd.f32 %v3273_v45, %v3272_v42  ;;  %v2576_v52 = vmax.f32 %v1974_v43, 0.0  ;;  %v3277_v49 = vsel %vm293_vm0, %v2830_v46, 0.0 }
 0x233   :  { %v3275_v53 = vsel %vm293_vm0, %v2829_v47, 0.0  ;;  %v2575_v55 = vmax.f32 %v1969_v48, 0.0  ;;  %v10123_v56 = vpop.f32.mrb[170].mxu0 }
 0x234   :  { %v3475_v57 = vmul.f32 0.00390625, %v3263_v50  ;;  %v3276_v58 = vadd.f32 %v3275_v53, %v3274_v51  ;;  %v1984_v59 = vadd.f32 %v11663_v6, %v10123_v56  ;;  %v1978_v61 = vpop.f32.mrb[171].mxu0  ;;  %v2832_v36 = vmin.f32 %v2576_v52, 6.0 }
 0x235   :  { %v2831_v62 = vmin.f32 %v2575_v55, 6.0  ;;  %v1979_v63 = vadd.f32 %v11663_v6, %v1978_v61 }
 0x236   :  { %v3278_v0 = vadd.f32 %v3277_v49, %v3276_v58  ;;  %v2578_v1 = vmax.f32 %v1984_v59, 0.0  ;;  %v11823_v5 = vsel %vm3587_vm4, %v3475_v57, %v11755_v54  ;;  %v3281_v9 = vsel %vm293_vm0, %v2832_v36, 0.0 }
 0x237   :  { %v3279_v2 = vsel %vm293_vm0, %v2831_v62, 0.0  ;;  %v2577_v3 = vmax.f32 %v1979_v63, 0.0  ;;  %v10126_v4 = vpop.f32.mrb[172].mxu0 }
 0x238   :  { %v3280_v7 = vadd.f32 %v3279_v2, %v3278_v0  ;;  %v1994_v60 = vadd.f32 %v11663_v6, %v10126_v4  ;;  %v1988_v8 = vpop.f32.mrb[173].mxu0  ;;  %v2834_v10 = vmin.f32 %v2578_v1, 6.0 }
 0x239   :  { %v2833_v11 = vmin.f32 %v2577_v3, 6.0  ;;  %v1989_v12 = vadd.f32 %v11663_v6, %v1988_v8 }
 0x23a   :  { %v3282_v13 = vadd.f32 %v3281_v9, %v3280_v7  ;;  %v2580_v14 = vmax.f32 %v1994_v60, 0.0  ;;  %v3285_v20 = vsel %vm293_vm0, %v2834_v10, 0.0 }
 0x23b   :  { %v3283_v16 = vsel %vm293_vm0, %v2833_v11, 0.0  ;;  %v2579_v54 = vmax.f32 %v1989_v12, 0.0  ;;  %v10129_v15 = vpop.f32.mrb[174].mxu0 }
 0x23c   :  { %v3284_v17 = vadd.f32 %v3283_v16, %v3282_v13  ;;  %v2004_v18 = vadd.f32 %v11663_v6, %v10129_v15  ;;  %v1998_v19 = vpop.f32.mrb[175].mxu0  ;;  %v2836_v21 = vmin.f32 %v2580_v14, 6.0 }
 0x23d   :  { %v2835_v22 = vmin.f32 %v2579_v54, 6.0  ;;  %v1999_v23 = vadd.f32 %v11663_v6, %v1998_v19 }
 0x23e   :  { %v3286_v24 = vadd.f32 %v3285_v20, %v3284_v17  ;;  %v2582_v25 = vmax.f32 %v2004_v18, 0.0  ;;  %v3289_v32 = vsel %vm293_vm0, %v2836_v21, 0.0 }
 0x23f   :  { %v3287_v26 = vsel %vm293_vm0, %v2835_v22, 0.0  ;;  %v2581_v27 = vmax.f32 %v1999_v23, 0.0  ;;  %v10132_v28 = vpop.f32.mrb[176].mxu0 }
 0x240   :  { %v3288_v29 = vadd.f32 %v3287_v26, %v3286_v24  ;;  %v2014_v30 = vadd.f32 %v11663_v6, %v10132_v28  ;;  %v2008_v31 = vpop.f32.mrb[177].mxu0  ;;  %v2838_v33 = vmin.f32 %v2582_v25, 6.0 }
 0x241   :  { %v2837_v34 = vmin.f32 %v2581_v27, 6.0  ;;  %v2009_v35 = vadd.f32 %v11663_v6, %v2008_v31 }
 0x242   :  { %v3290_v37 = vadd.f32 %v3289_v32, %v3288_v29  ;;  %v2584_v38 = vmax.f32 %v2014_v30, 0.0  ;;  %v3293_v45 = vsel %vm293_vm0, %v2838_v33, 0.0  ;;  %v11849_v13 = vpop.f32.mrb[0].mxu1 }
 0x243   :  { %v3291_v39 = vsel %vm293_vm0, %v2837_v34, 0.0  ;;  %v2583_v40 = vmax.f32 %v2009_v35, 0.0  ;;  %v10135_v41 = vpop.f32.mrb[178].mxu0  ;;  %v11852_v15 = vpop.f32.mrb[1].mxu1 }
 0x244   :  { %v3292_v42 = vadd.f32 %v3291_v39, %v3290_v37  ;;  %v2024_v43 = vadd.f32 %v11663_v6, %v10135_v41  ;;  %v2018_v44 = vpop.f32.mrb[179].mxu0  ;;  %v2840_v46 = vmin.f32 %v2584_v38, 6.0 }
 0x245   :  { %v2839_v47 = vmin.f32 %v2583_v40, 6.0  ;;  %v2019_v48 = vadd.f32 %v11663_v6, %v2018_v44 }
 0x246   :  { %v3294_v50 = vadd.f32 %v3293_v45, %v3292_v42  ;;  %v2586_v51 = vmax.f32 %v2024_v43, 0.0  ;;  %v3297_v59 = vsel %vm293_vm0, %v2840_v46, 0.0  ;;  %v11857_v26 = vpop.f32.mrb[2].mxu1 }
 0x247   :  { %v3295_v52 = vsel %vm293_vm0, %v2839_v47, 0.0  ;;  %v2585_v53 = vmax.f32 %v2019_v48, 0.0  ;;  %v10138_v55 = vpop.f32.mrb[180].mxu0  ;;  %v11860_v30 = vpop.f32.mrb[3].mxu1 }
 0x248   :  { %v3296_v56 = vadd.f32 %v3295_v52, %v3294_v50  ;;  %v2034_v57 = vadd.f32 %v11663_v6, %v10138_v55  ;;  %v2028_v58 = vpop.f32.mrb[181].mxu0  ;;  %v2842_v61 = vmin.f32 %v2586_v51, 6.0 }
 0x249   :  { %v2841_v49 = vmin.f32 %v2585_v53, 6.0  ;;  %v2029_v36 = vadd.f32 %v11663_v6, %v2028_v58 }
 0x24a   :  { %v3298_v62 = vadd.f32 %v3297_v59, %v3296_v56  ;;  %v2588_v63 = vmax.f32 %v2034_v57, 0.0  ;;  %v3301_v60 = vsel %vm293_vm0, %v2842_v61, 0.0  ;;  %v11865_v41 = vpop.f32.mrb[4].mxu1 }
 0x24b   :  { %v3299_v0 = vsel %vm293_vm0, %v2841_v49, 0.0  ;;  %v2587_v1 = vmax.f32 %v2029_v36, 0.0  ;;  %v10141_v2 = vpop.f32.mrb[182].mxu0  ;;  %v11868_v45 = vpop.f32.mrb[5].mxu1 }
 0x24c   :  { %v3300_v3 = vadd.f32 %v3299_v0, %v3298_v62  ;;  %v2044_v4 = vadd.f32 %v11663_v6, %v10141_v2  ;;  %v2038_v7 = vpop.f32.mrb[183].mxu0  ;;  %v2844_v8 = vmin.f32 %v2588_v63, 6.0 }
 0x24d   :  { %v2843_v9 = vmin.f32 %v2587_v1, 6.0  ;;  %v2039_v10 = vadd.f32 %v11663_v6, %v2038_v7 }
 0x24e   :  { %v3302_v11 = vadd.f32 %v3301_v60, %v3300_v3  ;;  %v2590_v12 = vmax.f32 %v2044_v4, 0.0  ;;  %v3305_v20 = vsel %vm293_vm0, %v2844_v8, 0.0  ;;  %v11873_v57 = vpop.f32.mrb[6].mxu1 }
 0x24f   :  { %v3303_v14 = vsel %vm293_vm0, %v2843_v9, 0.0  ;;  %v2589_v16 = vmax.f32 %v2039_v10, 0.0  ;;  %v10144_v54 = vpop.f32.mrb[184].mxu0  ;;  %v11876_v49 = vpop.f32.mrb[7].mxu1 }
 0x250   :  { %v3304_v17 = vadd.f32 %v3303_v14, %v3302_v11  ;;  %v2054_v18 = vadd.f32 %v11663_v6, %v10144_v54  ;;  %v2048_v19 = vpop.f32.mrb[185].mxu0  ;;  %v2846_v21 = vmin.f32 %v2590_v12, 6.0 }
 0x251   :  { %v2845_v22 = vmin.f32 %v2589_v16, 6.0  ;;  %v2049_v23 = vadd.f32 %v11663_v6, %v2048_v19 }
 0x252   :  { %v3306_v24 = vadd.f32 %v3305_v20, %v3304_v17  ;;  %v2592_v25 = vmax.f32 %v2054_v18, 0.0  ;;  %v3309_v34 = vsel %vm293_vm0, %v2846_v21, 0.0 }
 0x253   :  { %v3307_v27 = vsel %vm293_vm0, %v2845_v22, 0.0  ;;  %v2591_v28 = vmax.f32 %v2049_v23, 0.0  ;;  %v10147_v29 = vpop.f32.mrb[186].mxu0 }
 0x254   :  { %v3308_v31 = vadd.f32 %v3307_v27, %v3306_v24  ;;  %v2064_v32 = vadd.f32 %v11663_v6, %v10147_v29  ;;  %v2058_v33 = vpop.f32.mrb[187].mxu0  ;;  %v2848_v35 = vmin.f32 %v2592_v25, 6.0 }
 0x255   :  { %v2847_v37 = vmin.f32 %v2591_v28, 6.0  ;;  %v2059_v38 = vadd.f32 %v11663_v6, %v2058_v33 }
 0x256   :  { %v3310_v39 = vadd.f32 %v3309_v34, %v3308_v31  ;;  %v2594_v40 = vmax.f32 %v2064_v32, 0.0  ;;  %v3313_v50 = vsel %vm293_vm0, %v2848_v35, 0.0 }
 0x257   :  { %v3311_v42 = vsel %vm293_vm0, %v2847_v37, 0.0  ;;  %v2593_v43 = vmax.f32 %v2059_v38, 0.0  ;;  %v10150_v44 = vpop.f32.mrb[188].mxu0 }
 0x258   :  { %v3312_v46 = vadd.f32 %v3311_v42, %v3310_v39  ;;  %v2074_v47 = vadd.f32 %v11663_v6, %v10150_v44  ;;  %v2068_v48 = vpop.f32.mrb[189].mxu0  ;;  %v2850_v51 = vmin.f32 %v2594_v40, 6.0 }
 0x259   :  { %v2849_v52 = vmin.f32 %v2593_v43, 6.0  ;;  %v2069_v53 = vadd.f32 %v11663_v6, %v2068_v48 }
 0x25a   :  { %v3314_v55 = vadd.f32 %v3313_v50, %v3312_v46  ;;  %v2596_v56 = vmax.f32 %v2074_v47, 0.0  ;;  %v3317_v0 = vsel %vm293_vm0, %v2850_v51, 0.0 }
 0x25b   :  { %v3315_v58 = vsel %vm293_vm0, %v2849_v52, 0.0  ;;  %v2595_v59 = vmax.f32 %v2069_v53, 0.0  ;;  %v10153_v61 = vpop.f32.mrb[190].mxu0 }
 0x25c   :  { %v3316_v36 = vadd.f32 %v3315_v58, %v3314_v55  ;;  %v2084_v62 = vadd.f32 %v11663_v6, %v10153_v61  ;;  %v2078_v63 = vpop.f32.mrb[191].mxu0  ;;  %v2852_v1 = vmin.f32 %v2596_v56, 6.0  ;;  %v3480_v56 = vld [vmem:[%s14298_s3 + $0x8] sm:$0xff]  ;;  %v3490_v58 = vld [vmem:[%s14298_s3 + $0x58] sm:$0xff] }
 0x25d   :  { %v2851_v2 = vmin.f32 %v2595_v59, 6.0  ;;  %v2079_v3 = vadd.f32 %v11663_v6, %v2078_v63 }
 0x25e   :  { %v3318_v4 = vadd.f32 %v3317_v0, %v3316_v36  ;;  %v2598_v7 = vmax.f32 %v2084_v62, 0.0  ;;  %v3321_v14 = vsel %vm293_vm0, %v2852_v1, 0.0  ;;  %v3479_v0 = vld [vmem:[%s14298_s3] sm:$0xff]  ;;  %v3489_v1 = vld [vmem:[%s14298_s3 + $0x50] sm:$0xff] }
 0x25f   :  { %v3319_v60 = vsel %vm293_vm0, %v2851_v2, 0.0  ;;  %v2597_v8 = vmax.f32 %v2079_v3, 0.0  ;;  %v10156_v9 = vpop.f32.mrb[192].mxu0 }
 0x260   :  { %v3320_v10 = vadd.f32 %v3319_v60, %v3318_v4  ;;  %v2094_v11 = vadd.f32 %v11663_v6, %v10156_v9  ;;  %v2088_v12 = vpop.f32.mrb[193].mxu0  ;;  %v2854_v16 = vmin.f32 %v2598_v7, 6.0  ;;  %v10258_v4 = vpack.c.bf16 %v3490_v58, %v3480_v56 }
 0x261   :  { %v2853_v54 = vmin.f32 %v2597_v8, 6.0  ;;  %v2089_v17 = vadd.f32 %v11663_v6, %v2088_v12  ;;  %v10260_v7 = vpack.c.bf16 %v3489_v1, %v3479_v0 }
 0x262   :  { %v3322_v18 = vadd.f32 %v3321_v14, %v3320_v10  ;;  %v2600_v19 = vmax.f32 %v2094_v11, 0.0  ;;  %v3325_v28 = vsel %vm293_vm0, %v2854_v16, 0.0  ;;  %10259 = vmatprep.subr.bf16.mxu1 %v10258_v4  ;;  %v3500_v16 = vld [vmem:[%s14298_s3 + $0xa8] sm:$0xff] }
 0x263   :  { %v3323_v20 = vsel %vm293_vm0, %v2853_v54, 0.0  ;;  %v2599_v21 = vmax.f32 %v2089_v17, 0.0  ;;  %v10159_v22 = vpop.f32.mrb[194].mxu0  ;;  %10261 = vmatpush1.bf16.msra.mxu1 %v10260_v7 }
 0x264   :  { %v3324_v23 = vadd.f32 %v3323_v20, %v3322_v18  ;;  %v2856_v24 = vmin.f32 %v2600_v19, 6.0  ;;  %v2104_v25 = vadd.f32 %v11663_v6, %v10159_v22  ;;  %v2098_v27 = vpop.f32.mrb[195].mxu0  ;;  %v11920_v19 = vld [vmem:[%s14297_s2] ss:$0 sm:$0xff] }
 0x265   :  { %v2855_v29 = vmin.f32 %v2599_v21, 6.0  ;;  %v2099_v31 = vadd.f32 %v11663_v6, %v2098_v27  ;;  %v3499_v22 = vld [vmem:[%s14298_s3 + $0xa0] sm:$0xff] }
 0x266   :  { %v3326_v32 = vadd.f32 %v3325_v28, %v3324_v23  ;;  %v3334_v33 = vsel %vm293_vm0, %v2856_v24, 0.0  ;;  %v2602_v34 = vmax.f32 %v2104_v25, 0.0  ;;  %v3509_v23 = vld [vmem:[%s14298_s3 + $0xf0] sm:$0xff] }
 0x267   :  { %v3333_v35 = vsel %vm293_vm0, %v2855_v29, 0.0  ;;  %v2601_v37 = vmax.f32 %v2099_v31, 0.0  ;;  %v10162_v38 = vpop.f32.mrb[196].mxu0  ;;  %v10264_v28 = vpack.c.bf16 %v3509_v23, %v3499_v22 }
 0x268   :  { %v3327_v39 = vrot.slane %v3326_v32, 4  ;;  %v3335_v40 = vadd.f32 %v3334_v33, %v3333_v35  ;;  %v2858_v42 = vmin.f32 %v2602_v34, 6.0  ;;  %v2114_v43 = vadd.f32 %v11663_v6, %v10162_v38  ;;  %v2108_v44 = vpop.f32.mrb[197].mxu0  ;;  %v3482_v33 = vld [vmem:[%s14298_s3 + $0x18] sm:$0xff]  ;;  %v3492_v34 = vld [vmem:[%s14298_s3 + $0x68] sm:$0xff] }
 0x269   :  { %v2857_v46 = vmin.f32 %v2601_v37, 6.0  ;;  %v2109_v47 = vadd.f32 %v11663_v6, %v2108_v44 }
 0x26a   :  { %v3328_v48 = vadd.f32 %v3327_v39, %v3326_v32  ;;  %v2604_v50 = vmax.f32 %v2114_v43, 0.0  ;;  %v3338_v51 = vsel %vm293_vm0, %v2858_v42, 0.0  ;;  %v10266_v39 = vpack.c.bf16 %v3492_v34, %v3482_v33 }
 0x26b   :  { %v3336_v52 = vsel %vm293_vm0, %v2857_v46, 0.0  ;;  %v2603_v53 = vmax.f32 %v2109_v47, 0.0  ;;  %v10165_v55 = vpop.f32.mrb[198].mxu0  ;;  %v10377_v46 = vmov 0.0  }
 0x26c   :  { %v3329_v59 = vrot.slane %v3328_v48, 2  ;;  %v3337_v61 = vadd.f32 %v3336_v52, %v3335_v40  ;;  %v2860_v36 = vmin.f32 %v2604_v50, 6.0  ;;  %v2124_v62 = vadd.f32 %v11663_v6, %v10165_v55  ;;  %v2118_v63 = vpop.f32.mrb[199].mxu0  ;;  %3661 = vmatprep.mubr.f32.mxu1 %v10377_v46 }
 0x26d   :  { %v2859_v2 = vmin.f32 %v2603_v53, 6.0  ;;  %v2119_v3 = vadd.f32 %v11663_v6, %v2118_v63  ;;  %v3510_v6 = vld [vmem:[%s14298_s3 + $0xf8] sm:$0xff] }
 0x26e   :  { %v3330_v60 = vadd.f32 %v3329_v59, %v3328_v48  ;;  %v3339_v8 = vadd.f32 %v3338_v51, %v3337_v61  ;;  %v2606_v9 = vmax.f32 %v2124_v62, 0.0  ;;  %v3342_v10 = vsel %vm293_vm0, %v2860_v36, 0.0 }
 0x26f   :  { %v3340_v11 = vsel %vm293_vm0, %v2859_v2, 0.0  ;;  %v2605_v12 = vmax.f32 %v2119_v3, 0.0  ;;  %v10168_v14 = vpop.f32.mrb[200].mxu0  ;;  %v10262_v27 = vpack.c.bf16 %v3510_v6, %v3500_v16 }
 0x270   :  { %v3331_v54 = vrot.slane %v3330_v60, 1  ;;  %v3341_v17 = vadd.f32 %v3340_v11, %v3339_v8  ;;  %v2862_v18 = vmin.f32 %v2606_v9, 6.0  ;;  %v2134_v20 = vadd.f32 %v11920_v19, %v10168_v14  ;;  %v2128_v21 = vpop.f32.mrb[201].mxu0 }
 0x271   :  { %v2861_v24 = vmin.f32 %v2605_v12, 6.0  ;;  %v2129_v25 = vadd.f32 %v11920_v19, %v2128_v21  ;;  %10263 = vmatprep.subr.bf16.mxu1 %v10262_v27 }
 0x272   :  { %v3332_v29 = vadd.f32 %v3331_v54, %v3330_v60  ;;  %v3343_v31 = vadd.f32 %v3342_v10, %v3341_v17  ;;  %v2608_v32 = vmax.f32 %v2134_v20, 0.0  ;;  %10265 = vmatpush1.bf16.msra.mxu1 %v10264_v28  ;;  %v3346_v47 = vsel %vm293_vm0, %v2862_v18, 0.0 }
 0x273   :  { %v3344_v35 = vsel %vm293_vm0, %v2861_v24, 0.0  ;;  %v2607_v37 = vmax.f32 %v2129_v25, 0.0  ;;  %v10171_v38 = vpop.f32.mrb[202].mxu0  ;;  %10267 = vmatprep.subr.bf16.mxu1 %v10266_v39 }
 0x274   :  { %v3476_v40 = vmul.f32 0.00390625, %v3332_v29  ;;  %v3345_v42 = vadd.f32 %v3344_v35, %v3343_v31  ;;  %v2144_v43 = vadd.f32 %v11920_v19, %v10171_v38  ;;  %v2138_v44 = vpop.f32.mrb[203].mxu0  ;;  %v2864_v48 = vmin.f32 %v2608_v32, 6.0 }
 0x275   :  { %v2863_v50 = vmin.f32 %v2607_v37, 6.0  ;;  %v2139_v51 = vadd.f32 %v11920_v19, %v2138_v44 }
 0x276   :  { %v3347_v52 = vadd.f32 %v3346_v47, %v3345_v42  ;;  %v2610_v53 = vmax.f32 %v2144_v43, 0.0  ;;  %v11943_v55 = vsel %vm3589_vm5, %v3476_v40, %v11823_v5  ;;  %v3350_v63 = vsel %vm293_vm0, %v2864_v48, 0.0 }
 0x277   :  { %v3348_v56 = vsel %vm293_vm0, %v2863_v50, 0.0  ;;  %v2609_v58 = vmax.f32 %v2139_v51, 0.0  ;;  %v10174_v59 = vpop.f32.mrb[204].mxu0 }
 0x278   :  { %v3349_v61 = vadd.f32 %v3348_v56, %v3347_v52  ;;  %v2154_v36 = vadd.f32 %v11920_v19, %v10174_v59  ;;  %v2148_v62 = vpop.f32.mrb[205].mxu0  ;;  %v2866_v0 = vmin.f32 %v2610_v53, 6.0 }
 0x279   :  { %v2865_v1 = vmin.f32 %v2609_v58, 6.0  ;;  %v2149_v2 = vadd.f32 %v11920_v19, %v2148_v62 }
 0x27a   :  { %v3351_v3 = vadd.f32 %v3350_v63, %v3349_v61  ;;  %v2612_v4 = vmax.f32 %v2154_v36, 0.0  ;;  %v3354_v11 = vsel %vm293_vm0, %v2866_v0, 0.0 }
 0x27b   :  { %v3352_v7 = vsel %vm293_vm0, %v2865_v1, 0.0  ;;  %v2611_v5 = vmax.f32 %v2149_v2, 0.0  ;;  %v10177_v60 = vpop.f32.mrb[206].mxu0 }
 0x27c   :  { %v3353_v8 = vadd.f32 %v3352_v7, %v3351_v3  ;;  %v2164_v9 = vadd.f32 %v11920_v19, %v10177_v60  ;;  %v2158_v10 = vpop.f32.mrb[207].mxu0  ;;  %v2868_v12 = vmin.f32 %v2612_v4, 6.0 }
 0x27d   :  { %v2867_v14 = vmin.f32 %v2611_v5, 6.0  ;;  %v2159_v16 = vadd.f32 %v11920_v19, %v2158_v10 }
 0x27e   :  { %v3355_v6 = vadd.f32 %v3354_v11, %v3353_v8  ;;  %v2614_v54 = vmax.f32 %v2164_v9, 0.0  ;;  %v3358_v24 = vsel %vm293_vm0, %v2868_v12, 0.0 }
 0x27f   :  { %v3356_v17 = vsel %vm293_vm0, %v2867_v14, 0.0  ;;  %v2613_v18 = vmax.f32 %v2159_v16, 0.0  ;;  %v10180_v20 = vpop.f32.mrb[208].mxu0 }
 0x280   :  { %v3357_v21 = vadd.f32 %v3356_v17, %v3355_v6  ;;  %v2174_v22 = vadd.f32 %v11920_v19, %v10180_v20  ;;  %v2168_v23 = vpop.f32.mrb[209].mxu0  ;;  %v2870_v25 = vmin.f32 %v2614_v54, 6.0 }
 0x281   :  { %v2869_v27 = vmin.f32 %v2613_v18, 6.0  ;;  %v2169_v28 = vadd.f32 %v11920_v19, %v2168_v23 }
 0x282   :  { %v3359_v29 = vadd.f32 %v3358_v24, %v3357_v21  ;;  %v2616_v31 = vmax.f32 %v2174_v22, 0.0  ;;  %v3362_v39 = vsel %vm293_vm0, %v2870_v25, 0.0 }
 0x283   :  { %v3360_v32 = vsel %vm293_vm0, %v2869_v27, 0.0  ;;  %v2615_v33 = vmax.f32 %v2169_v28, 0.0  ;;  %v10183_v34 = vpop.f32.mrb[210].mxu0 }
 0x284   :  { %v3361_v35 = vadd.f32 %v3360_v32, %v3359_v29  ;;  %v2184_v37 = vadd.f32 %v11920_v19, %v10183_v34  ;;  %v2178_v38 = vpop.f32.mrb[211].mxu0  ;;  %v2872_v40 = vmin.f32 %v2616_v31, 6.0 }
 0x285   :  { %v2871_v42 = vmin.f32 %v2615_v33, 6.0  ;;  %v2179_v43 = vadd.f32 %v11920_v19, %v2178_v38 }
 0x286   :  { %v3363_v44 = vadd.f32 %v3362_v39, %v3361_v35  ;;  %v2618_v47 = vmax.f32 %v2184_v37, 0.0  ;;  %v3366_v58 = vsel %vm293_vm0, %v2872_v40, 0.0 }
 0x287   :  { %v3364_v48 = vsel %vm293_vm0, %v2871_v42, 0.0  ;;  %v2617_v50 = vmax.f32 %v2179_v43, 0.0  ;;  %v10186_v51 = vpop.f32.mrb[212].mxu0 }
 0x288   :  { %v3365_v52 = vadd.f32 %v3364_v48, %v3363_v44  ;;  %v2194_v53 = vadd.f32 %v11920_v19, %v10186_v51  ;;  %v2188_v56 = vpop.f32.mrb[213].mxu0  ;;  %v2874_v59 = vmin.f32 %v2618_v47, 6.0 }
 0x289   :  { %v2873_v61 = vmin.f32 %v2617_v50, 6.0  ;;  %v2189_v36 = vadd.f32 %v11920_v19, %v2188_v56  ;;  %v3990_v56 = vld [vmem:[%s14299_s5 + $0x40] sm:$0xff] }
 0x28a   :  { %v3367_v62 = vadd.f32 %v3366_v58, %v3365_v52  ;;  %v2620_v63 = vmax.f32 %v2194_v53, 0.0  ;;  %v3370_v5 = vsel %vm293_vm0, %v2874_v59, 0.0  ;;  %v3982_v52 = vld [vmem:[%s14299_s5] sm:$0xff] }
 0x28b   :  { %v3368_v0 = vsel %vm293_vm0, %v2873_v61, 0.0  ;;  %v2619_v1 = vmax.f32 %v2189_v36, 0.0  ;;  %v10189_v2 = vpop.f32.mrb[214].mxu0  ;;  %v3986_v53 = vld [vmem:[%s14299_s5 + $0x20] sm:$0xff] }
 0x28c   :  { %v3369_v3 = vadd.f32 %v3368_v0, %v3367_v62  ;;  %v2204_v4 = vadd.f32 %v11920_v19, %v10189_v2  ;;  %v2198_v7 = vpop.f32.mrb[215].mxu0  ;;  %v2876_v60 = vmin.f32 %v2620_v63, 6.0  ;;  %v8958_v61 = vcombine.low %v3982_v52, %v3986_v53  ;;  %v3994_v62 = vld [vmem:[%s14299_s5 + $0x60] sm:$0xff] }
 0x28d   :  { %v2875_v8 = vmin.f32 %v2619_v1, 6.0  ;;  %v2199_v9 = vadd.f32 %v11920_v19, %v2198_v7  ;;  %v8959_v36 = vcombine.high %v3982_v52, %v3986_v53  ;;  %v3998_v1 = vld [vmem:[%s14299_s5 + $0x80] sm:$0xff] }
 0x28e   :  { %v3371_v10 = vadd.f32 %v3370_v5, %v3369_v3  ;;  %v2622_v11 = vmax.f32 %v2204_v4, 0.0  ;;  %v3374_v18 = vsel %vm293_vm0, %v2876_v60, 0.0  ;;  %v4002_v2 = vld [vmem:[%s14299_s5 + $0xa0] sm:$0xff]  ;;  %v8967_v5 = vcombine.high %v3990_v56, %v3994_v62 }
 0x28f   :  { %v3372_v12 = vsel %vm293_vm0, %v2875_v8, 0.0  ;;  %v2621_v14 = vmax.f32 %v2199_v9, 0.0  ;;  %v10192_v16 = vpop.f32.mrb[216].mxu0  ;;  %7864 = vmatprep.subr.bf16.mxu0 %v8959_v36 }
 0x290   :  { %v3373_v6 = vadd.f32 %v3372_v12, %v3371_v10  ;;  %v2214_v54 = vadd.f32 %v11920_v19, %v10192_v16  ;;  %v2208_v17 = vpop.f32.mrb[217].mxu0  ;;  %v2878_v20 = vmin.f32 %v2622_v11, 6.0  ;;  %7865 = vmatpush1.bf16.msra.mxu0 %v8958_v61  ;;  %v8966_v11 = vcombine.low %v3990_v56, %v3994_v62  ;;  %v4022_v62 = vld [vmem:[%s14299_s5 + $0x140] sm:$0xff] }
 0x291   :  { %v2877_v21 = vmin.f32 %v2621_v14, 6.0  ;;  %v2209_v22 = vadd.f32 %v11920_v19, %v2208_v17  ;;  %7866 = vmatprep.subr.bf16.mxu0 %v8967_v5  ;;  %v4010_v17 = vld [vmem:[%s14299_s5 + $0xe0] sm:$0xff] }
 0x292   :  { %v3375_v23 = vadd.f32 %v3374_v18, %v3373_v6  ;;  %v2624_v24 = vmax.f32 %v2214_v54, 0.0  ;;  %v3378_v34 = vsel %vm293_vm0, %v2878_v20, 0.0  ;;  %v8975_v6 = vcombine.high %v3998_v1, %v4002_v2  ;;  %v4006_v54 = vld [vmem:[%s14299_s5 + $0xc0] sm:$0xff] }
 0x293   :  { %v3376_v25 = vsel %vm293_vm0, %v2877_v21, 0.0  ;;  %v2623_v27 = vmax.f32 %v2209_v22, 0.0  ;;  %v10195_v28 = vpop.f32.mrb[218].mxu0 }
 0x294   :  { %v3377_v29 = vadd.f32 %v3376_v25, %v3375_v23  ;;  %v2880_v31 = vmin.f32 %v2624_v24, 6.0  ;;  %v2224_v32 = vadd.f32 %v11920_v19, %v10195_v28  ;;  %v2218_v33 = vpop.f32.mrb[219].mxu0  ;;  %7867 = vmatpush1.bf16.msra.mxu0 %v8966_v11  ;;  %v8974_v28 = vcombine.low %v3998_v1, %v4002_v2 }
 0x295   :  { %v2879_v35 = vmin.f32 %v2623_v27, 6.0  ;;  %v2219_v37 = vadd.f32 %v11920_v19, %v2218_v33  ;;  %7868 = vmatprep.subr.bf16.mxu0 %v8975_v6 }
 0x296   :  { %v3379_v38 = vadd.f32 %v3378_v34, %v3377_v29  ;;  %v2626_v39 = vmax.f32 %v2224_v32, 0.0  ;;  %v3382_v44 = vsel %vm293_vm0, %v2880_v31, 0.0  ;;  %v8983_v29 = vcombine.high %v4006_v54, %v4010_v17 }
 0x297   :  { %v3380_v40 = vsel %vm293_vm0, %v2879_v35, 0.0  ;;  %v2625_v42 = vmax.f32 %v2219_v37, 0.0  ;;  %v10198_v43 = vpop.f32.mrb[220].mxu0 }
 0x298   :  { %v3381_v47 = vadd.f32 %v3380_v40, %v3379_v38  ;;  %v2882_v48 = vmin.f32 %v2626_v39, 6.0  ;;  %v2234_v50 = vadd.f32 %v11920_v19, %v10198_v43  ;;  %v2228_v51 = vpop.f32.mrb[221].mxu0  ;;  %v4014_v38 = vld [vmem:[%s14299_s5 + $0x100] sm:$0xff]  ;;  %7869 = vmatpush1.bf16.msra.mxu0 %v8974_v28 }
 0x299   :  { %v2881_v58 = vmin.f32 %v2625_v42, 6.0  ;;  %v2229_v59 = vadd.f32 %v11920_v19, %v2228_v51  ;;  %v4018_v39 = vld [vmem:[%s14299_s5 + $0x120] sm:$0xff]  ;;  %v8982_v51 = vcombine.low %v4006_v54, %v4010_v17  ;;  %7870 = vmatprep.subr.bf16.mxu0 %v8983_v29 }
 0x29a   :  { %v3383_v63 = vadd.f32 %v3382_v44, %v3381_v47  ;;  %v2628_v0 = vmax.f32 %v2234_v50, 0.0  ;;  %v3386_v60 = vsel %vm293_vm0, %v2882_v48, 0.0 }
 0x29b   :  { %v3384_v3 = vsel %vm293_vm0, %v2881_v58, 0.0  ;;  %v2627_v4 = vmax.f32 %v2229_v59, 0.0  ;;  %v10201_v7 = vpop.f32.mrb[222].mxu0  ;;  %v8991_v58 = vcombine.high %v4014_v38, %v4018_v39 }
 0x29c   :  { %v3385_v8 = vadd.f32 %v3384_v3, %v3383_v63  ;;  %v2244_v9 = vadd.f32 %v11920_v19, %v10201_v7  ;;  %v2238_v10 = vpop.f32.mrb[223].mxu0  ;;  %v2884_v12 = vmin.f32 %v2628_v0, 6.0  ;;  %v4026_v63 = vld [vmem:[%s14299_s5 + $0x160] sm:$0xff]  ;;  %7871 = vmatpush1.bf16.msra.mxu0 %v8982_v51 }
 0x29d   :  { %v2883_v14 = vmin.f32 %v2627_v4, 6.0  ;;  %v2239_v16 = vadd.f32 %v11920_v19, %v2238_v10  ;;  %7872 = vmatprep.subr.bf16.mxu0 %v8991_v58  ;;  %v8999_v11 = vcombine.high %v4022_v62, %v4026_v63  ;;  %v4046_v58 = vld [vmem:[%s14299_s5 + $0x200] sm:$0xff] }
 0x29e   :  { %v3387_v18 = vadd.f32 %v3386_v60, %v3385_v8  ;;  %v2630_v20 = vmax.f32 %v2244_v9, 0.0  ;;  %v3390_v31 = vsel %vm293_vm0, %v2884_v12, 0.0  ;;  %v8990_v60 = vcombine.low %v4014_v38, %v4018_v39  ;;  %v4030_v12 = vld [vmem:[%s14299_s5 + $0x180] sm:$0xff] }
 0x29f   :  { %v3388_v21 = vsel %vm293_vm0, %v2883_v14, 0.0  ;;  %v2629_v22 = vmax.f32 %v2239_v16, 0.0  ;;  %v10204_v23 = vpop.f32.mrb[224].mxu0  ;;  %v4034_v14 = vld [vmem:[%s14299_s5 + $0x1a0] sm:$0xff] }
 0x2a0   :  { %v3389_v24 = vadd.f32 %v3388_v21, %v3387_v18  ;;  %v2254_v25 = vadd.f32 %v11920_v19, %v10204_v23  ;;  %v2248_v27 = vpop.f32.mrb[225].mxu0  ;;  %v2886_v32 = vmin.f32 %v2630_v20, 6.0  ;;  %v8998_v20 = vcombine.low %v4022_v62, %v4026_v63  ;;  %7873 = vmatpush1.bf16.msra.mxu0 %v8990_v60 }
 0x2a1   :  { %v2885_v33 = vmin.f32 %v2629_v22, 6.0  ;;  %v2249_v34 = vadd.f32 %v11920_v19, %v2248_v27  ;;  %7874 = vmatprep.subr.bf16.mxu0 %v8999_v11 }
 0x2a2   :  { %v3391_v35 = vadd.f32 %v3390_v31, %v3389_v24  ;;  %v2632_v37 = vmax.f32 %v2254_v25, 0.0  ;;  %v3394_v52 = vsel %vm293_vm0, %v2886_v32, 0.0  ;;  %v9007_v25 = vcombine.high %v4030_v12, %v4034_v14  ;;  %v4038_v32 = vld [vmem:[%s14299_s5 + $0x1c0] sm:$0xff] }
 0x2a3   :  { %v3392_v40 = vsel %vm293_vm0, %v2885_v33, 0.0  ;;  %v2631_v42 = vmax.f32 %v2249_v34, 0.0  ;;  %v10207_v43 = vpop.f32.mrb[226].mxu0  ;;  %v4042_v33 = vld [vmem:[%s14299_s5 + $0x1e0] sm:$0xff] }
 0x2a4   :  { %v3393_v44 = vadd.f32 %v3392_v40, %v3391_v35  ;;  %v2888_v47 = vmin.f32 %v2632_v37, 6.0  ;;  %v2264_v48 = vadd.f32 %v11920_v19, %v10207_v43  ;;  %v2258_v50 = vpop.f32.mrb[227].mxu0  ;;  %7875 = vmatpush1.bf16.msra.mxu0 %v8998_v20 }
 0x2a5   :  { %v2887_v53 = vmin.f32 %v2631_v42, 6.0  ;;  %v2259_v56 = vadd.f32 %v11920_v19, %v2258_v50  ;;  %v9006_v42 = vcombine.low %v4030_v12, %v4034_v14  ;;  %v9015_v50 = vcombine.high %v4038_v32, %v4042_v33  ;;  %7876 = vmatprep.subr.bf16.mxu0 %v9007_v25  ;;  %v4054_v12 = vld [vmem:[%s14299_s5 + $0x240] sm:$0xff] }
 0x2a6   :  { %v3395_v59 = vadd.f32 %v3394_v52, %v3393_v44  ;;  %v3403_v61 = vsel %vm293_vm0, %v2888_v47, 0.0  ;;  %v2634_v36 = vmax.f32 %v2264_v48, 0.0  ;;  %v4058_v14 = vld [vmem:[%s14299_s5 + $0x260] sm:$0xff] }
 0x2a7   :  { %v3402_v0 = vsel %vm293_vm0, %v2887_v53, 0.0  ;;  %v2633_v1 = vmax.f32 %v2259_v56, 0.0  ;;  %v10210_v2 = vpop.f32.mrb[228].mxu0  ;;  %v9031_v25 = vcombine.high %v4054_v12, %v4058_v14 }
 0x2a8   :  { %v3396_v3 = vrot.slane %v3395_v59, 4  ;;  %v3404_v4 = vadd.f32 %v3403_v61, %v3402_v0  ;;  %v2274_v7 = vadd.f32 %v11920_v19, %v10210_v2  ;;  %v2268_v5 = vpop.f32.mrb[229].mxu0  ;;  %v2890_v8 = vmin.f32 %v2634_v36, 6.0  ;;  %7877 = vmatpush1.bf16.msra.mxu0 %v9006_v42 }
 0x2a9   :  { %v2889_v9 = vmin.f32 %v2633_v1, 6.0  ;;  %v2269_v10 = vadd.f32 %v11920_v19, %v2268_v5  ;;  %v9014_v2 = vcombine.low %v4038_v32, %v4042_v33  ;;  %7878 = vmatprep.subr.bf16.mxu0 %v9015_v50  ;;  %v4066_v32 = vld [vmem:[%s14299_s5 + $0x2a0] sm:$0xff] }
 0x2aa   :  { %v3397_v16 = vadd.f32 %v3396_v3, %v3395_v59  ;;  %v2636_v6 = vmax.f32 %v2274_v7, 0.0  ;;  %v3407_v27 = vsel %vm293_vm0, %v2890_v8, 0.0  ;;  %v4050_v59 = vld [vmem:[%s14299_s5 + $0x220] sm:$0xff] }
 0x2ab   :  { %v3405_v54 = vsel %vm293_vm0, %v2889_v9, 0.0  ;;  %v2635_v17 = vmax.f32 %v2269_v10, 0.0  ;;  %v10213_v18 = vpop.f32.mrb[230].mxu0  ;;  %v9023_v60 = vcombine.high %v4046_v58, %v4050_v59 }
 0x2ac   :  { %v3398_v21 = vrot.slane %v3397_v16, 2  ;;  %v3406_v22 = vadd.f32 %v3405_v54, %v3404_v4  ;;  %v2284_v23 = vadd.f32 %v11920_v19, %v10213_v18  ;;  %v2278_v24 = vpop.f32.mrb[231].mxu0  ;;  %v2892_v28 = vmin.f32 %v2636_v6, 6.0  ;;  %7879 = vmatpush1.bf16.msra.mxu0 %v9014_v2 }
 0x2ad   :  { %v2891_v29 = vmin.f32 %v2635_v17, 6.0  ;;  %v2279_v31 = vadd.f32 %v11920_v19, %v2278_v24  ;;  %v9022_v24 = vcombine.low %v4046_v58, %v4050_v59  ;;  %7880 = vmatprep.subr.bf16.mxu0 %v9023_v60  ;;  %v4078_v60 = vld [vmem:[%s14299_s5 + $0x300] sm:$0xff] }
 0x2ae   :  { %v3399_v34 = vadd.f32 %v3398_v21, %v3397_v16  ;;  %v3408_v35 = vadd.f32 %v3407_v27, %v3406_v22  ;;  %v2638_v37 = vmax.f32 %v2284_v23, 0.0  ;;  %v3411_v51 = vsel %vm293_vm0, %v2892_v28, 0.0 }
 0x2af   :  { %v3409_v38 = vsel %vm293_vm0, %v2891_v29, 0.0  ;;  %v2637_v39 = vmax.f32 %v2279_v31, 0.0  ;;  %v10216_v40 = vpop.f32.mrb[232].mxu0 }
 0x2b0   :  { %v3400_v43 = vrot.slane %v3399_v34, 1  ;;  %v3410_v44 = vadd.f32 %v3409_v38, %v3408_v35  ;;  %v2294_v47 = vadd.f32 %v11920_v19, %v10216_v40  ;;  %v2288_v48 = vpop.f32.mrb[233].mxu0  ;;  %v2894_v52 = vmin.f32 %v2638_v37, 6.0  ;;  %7881 = vmatpush1.bf16.msra.mxu0 %v9022_v24 }
 0x2b1   :  { %v2893_v53 = vmin.f32 %v2637_v39, 6.0  ;;  %v2289_v56 = vadd.f32 %v11920_v19, %v2288_v48  ;;  %7882 = vmatprep.subr.bf16.mxu0 %v9031_v25  ;;  %v4086_v25 = vld [vmem:[%s14299_s5 + $0x340] sm:$0xff] }
 0x2b2   :  { %v3401_v61 = vadd.f32 %v3400_v43, %v3399_v34  ;;  %v3412_v36 = vadd.f32 %v3411_v51, %v3410_v44  ;;  %v2640_v62 = vmax.f32 %v2294_v47, 0.0  ;;  %v3415_v8 = vsel %vm293_vm0, %v2894_v52, 0.0  ;;  %v4070_v52 = vld [vmem:[%s14299_s5 + $0x2c0] sm:$0xff] }
 0x2b3   :  { %v3413_v63 = vsel %vm293_vm0, %v2893_v53, 0.0  ;;  %v2639_v0 = vmax.f32 %v2289_v56, 0.0  ;;  %v10219_v1 = vpop.f32.mrb[234].mxu0  ;;  %v9030_v43 = vcombine.low %v4054_v12, %v4058_v14  ;;  %v4074_v53 = vld [vmem:[%s14299_s5 + $0x2e0] sm:$0xff] }
 0x2b4   :  { %v3477_v3 = vmul.f32 0.00390625, %v3401_v61  ;;  %v3414_v4 = vadd.f32 %v3413_v63, %v3412_v36  ;;  %v2304_v7 = vadd.f32 %v11920_v19, %v10219_v1  ;;  %v2298_v5 = vpop.f32.mrb[235].mxu0  ;;  %v2896_v9 = vmin.f32 %v2640_v62, 6.0 }
 0x2b5   :  { %v2895_v10 = vmin.f32 %v2639_v0, 6.0  ;;  %v2299_v11 = vadd.f32 %v11920_v19, %v2298_v5  ;;  %7883 = vmatpush1.bf16.msra.mxu0 %v9030_v43  ;;  %v9047_v2 = vcombine.high %v4070_v52, %v4074_v53 }
 0x2b6   :  { %v3416_v16 = vadd.f32 %v3415_v8, %v3414_v4  ;;  %v2642_v6 = vmax.f32 %v2304_v7, 0.0  ;;  %v12071_v54 = vsel %vm3591_vm6, %v3477_v3, %v11943_v55  ;;  %v3419_v27 = vsel %vm293_vm0, %v2896_v9, 0.0  ;;  %v4062_v55 = vld [vmem:[%s14299_s5 + $0x280] sm:$0xff] }
 0x2b7   :  { %v3417_v17 = vsel %vm293_vm0, %v2895_v10, 0.0  ;;  %v2641_v18 = vmax.f32 %v2299_v11, 0.0  ;;  %v10222_v20 = vpop.f32.mrb[236].mxu0  ;;  %v9039_v44 = vcombine.high %v4062_v55, %v4066_v32  ;;  %v9038_v1 = vcombine.low %v4062_v55, %v4066_v32  ;;  %v4082_v8 = vld [vmem:[%s14299_s5 + $0x320] sm:$0xff] }
 0x2b8   :  { %v3418_v21 = vadd.f32 %v3417_v17, %v3416_v16  ;;  %v2314_v22 = vadd.f32 %v11920_v19, %v10222_v20  ;;  %v2308_v23 = vpop.f32.mrb[237].mxu0  ;;  %v2898_v28 = vmin.f32 %v2642_v6, 6.0  ;;  %v9055_v20 = vcombine.high %v4078_v60, %v4082_v8 }
 0x2b9   :  { %v2897_v29 = vmin.f32 %v2641_v18, 6.0  ;;  %v2309_v31 = vadd.f32 %v11920_v19, %v2308_v23  ;;  %7884 = vmatprep.subr.bf16.mxu0 %v9039_v44  ;;  %v9046_v18 = vcombine.low %v4070_v52, %v4074_v53  ;;  %v2374_v52 = vadd.f32 %v11920_v19, %v11849_v13 }
 0x2ba   :  { %v3420_v33 = vadd.f32 %v3419_v27, %v3418_v21  ;;  %v2644_v34 = vmax.f32 %v2314_v22, 0.0  ;;  %v3423_v47 = vsel %vm293_vm0, %v2898_v28, 0.0  ;;  %7885 = vmatpush1.bf16.msra.mxu0 %v9038_v1  ;;  %v4090_v27 = vld [vmem:[%s14299_s5 + $0x360] sm:$0xff] }
 0x2bb   :  { %v3421_v35 = vsel %vm293_vm0, %v2897_v29, 0.0  ;;  %v2643_v37 = vmax.f32 %v2309_v31, 0.0  ;;  %v10225_v38 = vpop.f32.mrb[238].mxu0  ;;  %7886 = vmatprep.subr.bf16.mxu0 %v9047_v2 }
 0x2bc   :  { %v3422_v39 = vadd.f32 %v3421_v35, %v3420_v33  ;;  %v2324_v40 = vadd.f32 %v11920_v19, %v10225_v38  ;;  %v2318_v42 = vpop.f32.mrb[239].mxu0  ;;  %v2900_v48 = vmin.f32 %v2644_v34, 6.0  ;;  %v2369_v33 = vadd.f32 %v11920_v19, %v11852_v15 }
 0x2bd   :  { %v2899_v50 = vmin.f32 %v2643_v37, 6.0  ;;  %v2319_v51 = vadd.f32 %v11920_v19, %v2318_v42  ;;  %v9054_v38 = vcombine.low %v4078_v60, %v4082_v8 }
 0x2be   :  { %v3424_v56 = vadd.f32 %v3423_v47, %v3422_v39  ;;  %v2646_v58 = vmax.f32 %v2324_v40, 0.0  ;;  %v3427_v3 = vsel %vm293_vm0, %v2900_v48, 0.0  ;;  %7887 = vmatpush1.bf16.msra.mxu0 %v9046_v18  ;;  %v9063_v39 = vcombine.high %v4086_v25, %v4090_v27 }
 0x2bf   :  { %v3425_v59 = vsel %vm293_vm0, %v2899_v50, 0.0  ;;  %v2645_v61 = vmax.f32 %v2319_v51, 0.0  ;;  %v10228_v36 = vpop.f32.mrb[240].mxu0  ;;  %7888 = vmatprep.subr.bf16.mxu0 %v9055_v20  ;;  %v2655_v53 = vmax.f32 %v2369_v33, 0.0 }
 0x2c0   :  { %v3426_v62 = vadd.f32 %v3425_v59, %v3424_v56  ;;  %v2334_v63 = vadd.f32 %v11920_v19, %v10228_v36  ;;  %v2328_v0 = vpop.f32.mrb[241].mxu0  ;;  %v2902_v4 = vmin.f32 %v2646_v58, 6.0  ;;  %v9062_v36 = vcombine.low %v4086_v25, %v4090_v27 }
 0x2c1   :  { %v2901_v7 = vmin.f32 %v2645_v61, 6.0  ;;  %v2329_v5 = vadd.f32 %v11920_v19, %v2328_v0  ;;  %v2379_v61 = vadd.f32 %v11920_v19, %v11860_v30  ;;  %v2911_v60 = vmin.f32 %v2655_v53, 6.0 }
 0x2c2   :  { %v3428_v9 = vadd.f32 %v3427_v3, %v3426_v62  ;;  %v2648_v10 = vmax.f32 %v2334_v63, 0.0  ;;  %v3431_v21 = vsel %vm293_vm0, %v2902_v4, 0.0  ;;  %7889 = vmatpush1.bf16.msra.mxu0 %v9054_v38  ;;  %v2384_v30 = vadd.f32 %v11920_v19, %v11857_v26 }
 0x2c3   :  { %v3429_v11 = vsel %vm293_vm0, %v2901_v7, 0.0  ;;  %v2647_v12 = vmax.f32 %v2329_v5, 0.0  ;;  %v10231_v14 = vpop.f32.mrb[242].mxu0  ;;  %7890 = vmatprep.subr.bf16.mxu0 %v9063_v39  ;;  %v2656_v7 = vmax.f32 %v2374_v52, 0.0  ;;  %v2657_v8 = vmax.f32 %v2379_v61, 0.0 }
 0x2c4   :  { %v3430_v16 = vadd.f32 %v3429_v11, %v3428_v9  ;;  %v2344_v6 = vadd.f32 %v11920_v19, %v10231_v14  ;;  %v2338_v17 = vpop.f32.mrb[243].mxu0  ;;  %v2904_v22 = vmin.f32 %v2648_v10, 6.0  ;;  %v3449_v18 = vsel %vm293_vm0, %v2911_v60, 0.0 }
 0x2c5   :  { %v2903_v23 = vmin.f32 %v2647_v12, 6.0  ;;  %v2339_v24 = vadd.f32 %v11920_v19, %v2338_v17  ;;  %v2389_v12 = vadd.f32 %v11920_v19, %v11868_v45  ;;  %v2658_v20 = vmax.f32 %v2384_v30, 0.0  ;;  %v3493_v30 = vld [vmem:[%s14298_s3 + $0x70] sm:$0xff] }
 0x2c6   :  { %v3432_v28 = vadd.f32 %v3431_v21, %v3430_v16  ;;  %v2650_v29 = vmax.f32 %v2344_v6, 0.0  ;;  %v3435_v40 = vsel %vm293_vm0, %v2904_v22, 0.0  ;;  %7891 = vmatpush1.bf16.msra.mxu0 %v9062_v36  ;;  %v2912_v6 = vmin.f32 %v2656_v7, 6.0  ;;  %v3502_v36 = vld [vmem:[%s14298_s3 + $0xb8] sm:$0xff] }
 0x2c7   :  { %v3433_v31 = vsel %vm293_vm0, %v2903_v23, 0.0  ;;  %v2649_v55 = vmax.f32 %v2339_v24, 0.0  ;;  %v10234_v32 = vpop.f32.mrb[244].mxu0  ;;  %v2394_v26 = vadd.f32 %v11920_v19, %v11865_v41  ;;  %v2913_v22 = vmin.f32 %v2657_v8, 6.0  ;;  %v3494_v7 = vld [vmem:[%s14298_s3 + $0x78] sm:$0xff]  ;;  %v3504_v8 = vld [vmem:[%s14298_s3 + $0xc8] sm:$0xff] }
 0x2c8   :  { %v3434_v34 = vadd.f32 %v3433_v31, %v3432_v28  ;;  %v2354_v35 = vadd.f32 %v11920_v19, %v10234_v32  ;;  %v2348_v37 = vpop.f32.mrb[245].mxu0  ;;  %v2906_v42 = vmin.f32 %v2650_v29, 6.0  ;;  %v2659_v23 = vmax.f32 %v2389_v12, 0.0  ;;  %v3503_v12 = vld [vmem:[%s14298_s3 + $0xc0] sm:$0xff] }
 0x2c9   :  { %v2905_v43 = vmin.f32 %v2649_v55, 6.0  ;;  %v2349_v44 = vadd.f32 %v11920_v19, %v2348_v37  ;;  %v2399_v24 = vadd.f32 %v11920_v19, %v11876_v49  ;;  %v3451_v45 = vsel %vm293_vm0, %v2912_v6, 0.0  ;;  %v3496_v6 = vld [vmem:[%s14298_s3 + $0x88] sm:$0xff] }
 0x2ca   :  { %v3436_v47 = vadd.f32 %v3435_v40, %v3434_v34  ;;  %v2652_v48 = vmax.f32 %v2354_v35, 0.0  ;;  %v3439_v62 = vsel %vm293_vm0, %v2906_v42, 0.0  ;;  %v2914_v28 = vmin.f32 %v2658_v20, 6.0  ;;  %v3485_v20 = vld [vmem:[%s14298_s3 + $0x30] sm:$0xff] }
 0x2cb   :  { %v3437_v50 = vsel %vm293_vm0, %v2905_v43, 0.0  ;;  %v2651_v51 = vmax.f32 %v2349_v44, 0.0  ;;  %v10237_v15 = vpop.f32.mrb[246].mxu0  ;;  %v2660_v29 = vmax.f32 %v2394_v26, 0.0  ;;  %v3453_v31 = vsel %vm293_vm0, %v2913_v22, 0.0  ;;  %v3495_v26 = vld [vmem:[%s14298_s3 + $0x80] sm:$0xff] }
 0x2cc   :  { %v3438_v56 = vadd.f32 %v3437_v50, %v3436_v47  ;;  %v2364_v58 = vadd.f32 %v11920_v19, %v10237_v15  ;;  %v2358_v59 = vpop.f32.mrb[247].mxu0  ;;  %v2908_v63 = vmin.f32 %v2652_v48, 6.0  ;;  %v2915_v55 = vmin.f32 %v2659_v23, 6.0  ;;  %v3516_v22 = vld [vmem:[%s14298_s3 + $0x128] sm:$0xff] }
 0x2cd   :  { %v2907_v0 = vmin.f32 %v2651_v51, 6.0  ;;  %v2359_v1 = vadd.f32 %v11920_v19, %v2358_v59  ;;  %v2404_v32 = vadd.f32 %v11920_v19, %v11873_v57  ;;  %v2661_v41 = vmax.f32 %v2399_v24, 0.0  ;;  %v3491_v59 = vld [vmem:[%s14298_s3 + $0x60] sm:$0xff] }
 0x2ce   :  { %v3440_v2 = vadd.f32 %v3439_v62, %v3438_v56  ;;  %v2654_v3 = vmax.f32 %v2364_v58, 0.0  ;;  %v3443_v9 = vsel %vm293_vm0, %v2908_v63, 0.0  ;;  %v3455_v34 = vsel %vm293_vm0, %v2914_v28, 0.0  ;;  %v3481_v58 = vld [vmem:[%s14298_s3 + $0x10] sm:$0xff]  ;;  %v3512_v62 = vld [vmem:[%s14298_s3 + $0x108] sm:$0xff]  ;;  %v3498_v28 = vld [vmem:[%s14298_s3 + $0x98] sm:$0xff] }
 0x2cf   :  { %v3441_v13 = vsel %vm293_vm0, %v2907_v0, 0.0  ;;  %v2653_v4 = vmax.f32 %v2359_v1, 0.0  ;;  %v2916_v37 = vmin.f32 %v2660_v29, 6.0  ;;  %v3457_v49 = vsel %vm293_vm0, %v2915_v55, 0.0  ;;  %v3487_v55 = vld [vmem:[%s14298_s3 + $0x40] sm:$0xff] }
 0x2d0   :  { %v3442_v5 = vadd.f32 %v3441_v13, %v3440_v2  ;;  %v2910_v10 = vmin.f32 %v2654_v3, 6.0  ;;  %v2662_v38 = vmax.f32 %v2404_v32, 0.0  ;;  %v2917_v39 = vmin.f32 %v2661_v41, 6.0  ;;  %v3501_v2 = vld [vmem:[%s14298_s3 + $0xb0] sm:$0xff]  ;;  %v3511_v3 = vld [vmem:[%s14298_s3 + $0x100] sm:$0xff]  ;;  %v3508_v41 = vld [vmem:[%s14298_s3 + $0xe8] sm:$0xff] }
 0x2d1   :  { %v2909_v11 = vmin.f32 %v2653_v4, 6.0  ;;  %v3459_v43 = vsel %vm293_vm0, %v2916_v37, 0.0  ;;  %v10268_v0 = vpack.c.bf16 %v3491_v59, %v3481_v58  ;;  %v10270_v1 = vpack.c.bf16 %v3512_v62, %v3502_v36  ;;  %v3484_v4 = vld [vmem:[%s14298_s3 + $0x28] sm:$0xff]  ;;  %v3497_v32 = vld [vmem:[%s14298_s3 + $0x90] sm:$0xff]  ;;  %v3507_v37 = vld [vmem:[%s14298_s3 + $0xe0] sm:$0xff] }
 0x2d2   :  { %v3444_v14 = vadd.f32 %v3443_v9, %v3442_v5  ;;  %v3447_v21 = vsel %vm293_vm0, %v2910_v10, 0.0  ;;  %v2918_v44 = vmin.f32 %v2662_v38, 6.0  ;;  %v3461_v47 = vsel %vm293_vm0, %v2917_v39, 0.0  ;;  %v3514_v9 = vld [vmem:[%s14298_s3 + $0x118] sm:$0xff]  ;;  %v4238_v38 = vld [vmem:[%s14299_s5 + $0x800] sm:$0xff] }
 0x2d3   :  { %v3445_v16 = vsel %vm293_vm0, %v2909_v11, 0.0  ;;  %v10272_v5 = vpack.c.bf16 %v3511_v3, %v3501_v2  ;;  %v10274_v60 = vpack.c.bf16 %v3494_v7, %v3484_v4  ;;  %v10278_v11 = vpack.c.bf16 %v3514_v9, %v3504_v8  ;;  %v4242_v39 = vld [vmem:[%s14299_s5 + $0x820] sm:$0xff] }
 0x2d4   :  { %v3446_v17 = vadd.f32 %v3445_v16, %v3444_v14  ;;  %v3463_v57 = vsel %vm293_vm0, %v2918_v44, 0.0  ;;  %v3513_v14 = vld [vmem:[%s14298_s3 + $0x110] sm:$0xff]  ;;  %v3486_v16 = vld [vmem:[%s14298_s3 + $0x38] sm:$0xff]  ;;  %v10284_v23 = vpack.c.bf16 %v3495_v26, %v3485_v20  ;;  %v4250_v44 = vld [vmem:[%s14299_s5 + $0x860] sm:$0xff] }
 0x2d5   :  { %v4274_v58 = vld [vmem:[%s14299_s5 + $0x920] sm:$0xff] }
 0x2d6   :  { %v3448_v25 = vadd.f32 %v3447_v21, %v3446_v17  ;;  %v10280_v17 = vpack.c.bf16 %v3513_v14, %v3503_v12  ;;  %v3506_v21 = vld [vmem:[%s14298_s3 + $0xd8] sm:$0xff]  ;;  %v4278_v36 = vld [vmem:[%s14299_s5 + $0x940] sm:$0xff] }
 0x2d7   :  { %v10286_v24 = vpack.c.bf16 %v3516_v22, %v3506_v21  ;;  %v4282_v62 = vld [vmem:[%s14299_s5 + $0x960] sm:$0xff] }
 0x2d8   :  { %v3450_v27 = vadd.f32 %v3449_v18, %v3448_v25  ;;  %v10282_v18 = vpack.c.bf16 %v3496_v6, %v3486_v16  ;;  %v3505_v25 = vld [vmem:[%s14298_s3 + $0xd0] sm:$0xff]  ;;  %v4290_v2 = vld [vmem:[%s14299_s5 + $0x9a0] sm:$0xff]  ;;  %v9254_v3 = vcombine.low %v4278_v36, %v4282_v62 }
 0x2d9   :  { %v4294_v4 = vld [vmem:[%s14299_s5 + $0x9c0] sm:$0xff] }
 0x2da   :  { %v3452_v33 = vadd.f32 %v3451_v45, %v3450_v27  ;;  %v3515_v45 = vld [vmem:[%s14298_s3 + $0x120] sm:$0xff]  ;;  %v3488_v27 = vld [vmem:[%s14298_s3 + $0x48] sm:$0xff] }
 0x2db   :  { %v10288_v29 = vpack.c.bf16 %v3515_v45, %v3505_v25  ;;  %v4298_v7 = vld [vmem:[%s14299_s5 + $0x9e0] sm:$0xff] }
 0x2dc   :  { %v3454_v35 = vadd.f32 %v3453_v31, %v3452_v33  ;;  %v10290_v31 = vpack.c.bf16 %v3498_v28, %v3488_v27  ;;  %v3518_v33 = vld [vmem:[%s14298_s3 + $0x138] sm:$0xff]  ;;  %v9270_v8 = vcombine.low %v4294_v4, %v4298_v7  ;;  %v4318_v6 = vld [vmem:[%s14299_s5 + $0xa80] sm:$0xff] }
 0x2dd   :  { %v4094_v20 = vld [vmem:[%s14299_s5 + $0x380] sm:$0xff] }
 0x2de   :  { %v3456_v40 = vadd.f32 %v3455_v34, %v3454_v35  ;;  %v10292_v34 = vpack.c.bf16 %v3497_v32, %v3487_v55  ;;  %v10294_v35 = vpack.c.bf16 %v3518_v33, %v3508_v41  ;;  %v4098_v26 = vld [vmem:[%s14299_s5 + $0x3a0] sm:$0xff] }
 0x2df   :  { %v9071_v22 = vcombine.high %v4094_v20, %v4098_v26  ;;  %v4330_v25 = vld [vmem:[%s14299_s5 + $0xae0] sm:$0xff] }
 0x2e0   :  { %v3458_v42 = vadd.f32 %v3457_v49, %v3456_v40  ;;  %v3517_v49 = vld [vmem:[%s14298_s3 + $0x130] sm:$0xff]  ;;  %v4102_v27 = vld [vmem:[%s14299_s5 + $0x3c0] sm:$0xff] }
 0x2e1   :  { %v10296_v40 = vpack.c.bf16 %v3517_v49, %v3507_v37  ;;  %7892 = vmatprep.subr.bf16.mxu0 %v9071_v22  ;;  %v4106_v28 = vld [vmem:[%s14299_s5 + $0x3e0] sm:$0xff] }
 0x2e2   :  { %v3460_v48 = vadd.f32 %v3459_v43, %v3458_v42  ;;  %v9215_v42 = vcombine.high %v4238_v38, %v4242_v39  ;;  %v4246_v43 = vld [vmem:[%s14299_s5 + $0x840] sm:$0xff]  ;;  %v9078_v55 = vcombine.low %v4102_v27, %v4106_v28 }
 0x2e3   :  { %v4334_v32 = vld [vmem:[%s14299_s5 + $0xb00] sm:$0xff] }
 0x2e4   :  { %v3462_v50 = vadd.f32 %v3461_v47, %v3460_v48  ;;  %v9214_v47 = vcombine.low %v4238_v38, %v4242_v39  ;;  %v9223_v48 = vcombine.high %v4246_v43, %v4250_v44  ;;  %v4338_v41 = vld [vmem:[%s14299_s5 + $0xb20] sm:$0xff] }
 0x2e5   :  { %v9311_v33 = vcombine.high %v4334_v32, %v4338_v41  ;;  %v9310_v37 = vcombine.low %v4334_v32, %v4338_v41  ;;  %v4342_v39 = vld [vmem:[%s14299_s5 + $0xb40] sm:$0xff] }
 0x2e6   :  { %v3464_v19 = vadd.f32 %v3463_v57, %v3462_v50  ;;  %v4254_v50 = vld [vmem:[%s14299_s5 + $0x880] sm:$0xff]  ;;  %v9222_v57 = vcombine.low %v4246_v43, %v4250_v44 }
 0x2e7   :  { %v4350_v44 = vld [vmem:[%s14299_s5 + $0xb80] sm:$0xff] }
 0x2e8   :  { %v3465_v51 = vrot.slane %v3464_v19, 4 }
 0x2ea   :  { %v3466_v15 = vadd.f32 %v3465_v51, %v3464_v19  ;;  %v4262_v51 = vld [vmem:[%s14299_s5 + $0x8c0] sm:$0xff] }
 0x2ec   :  { %v3467_v52 = vrot.slane %v3466_v15, 2 }
 0x2ee   :  { %v3468_v53 = vadd.f32 %v3467_v52, %v3466_v15  ;;  %v4266_v15 = vld [vmem:[%s14299_s5 + $0x8e0] sm:$0xff] }
 0x2ef   :  { %v9238_v59 = vcombine.low %v4262_v51, %v4266_v15 }
 0x2f0   :  { %v3469_v56 = vrot.slane %v3468_v53, 1 }
 0x2f2   :  { %v3470_v61 = vadd.f32 %v3469_v56, %v3468_v53  ;;  %v9239_v53 = vcombine.high %v4262_v51, %v4266_v15  ;;  %v4270_v56 = vld [vmem:[%s14299_s5 + $0x900] sm:$0xff] }
 0x2f3   :  { %v12381_v15 = vld [vmem:[%s14299_s5 + $0xc00] sm:$0xff] }
 0x2f4   :  { %v3478_v63 = vmul.f32 0.00390625, %v3470_v61  ;;  %v9247_v61 = vcombine.high %v4270_v56, %v4274_v58 }
 0x2f6   :  { %v12168_v13 = vsel %vm3593_vm7, %v3478_v63, %v12071_v54  ;;  %v3483_v54 = vld [vmem:[%s14298_s3 + $0x20] sm:$0xff]  ;;  %v9246_v63 = vcombine.low %v4270_v56, %v4274_v58  ;;  %v3523_v58 = vlaneseq }
 0x2f7   :  { %8953 = vmatmul.mubr.msk.f32.vlgmr.msra.gmra.mrb[8].mxu1 %vm293_vm0, %v12168_v13  ;;  %v10276_v10 = vpack.c.bf16 %v3493_v30, %v3483_v54  ;;  %v4302_v54 = vld [vmem:[%s14299_s5 + $0xa00] sm:$0xff] }
 0x2f8   :  { %10269 = vmatpush1.bf16.msra.mxu1 %v10268_v0  ;;  %3732 = vmatprep.mubr.f32.mxu1 %v10377_v46  ;;  %v9255_v0 = vcombine.high %v4278_v36, %v4282_v62  ;;  %v4306_v30 = vld [vmem:[%s14299_s5 + $0xa20] sm:$0xff] }
 0x2f9   :  { %10271 = vmatprep.subr.bf16.mxu1 %v10270_v1  ;;  %v4286_v1 = vld [vmem:[%s14299_s5 + $0x980] sm:$0xff]  ;;  %v9279_v9 = vcombine.high %v4302_v54, %v4306_v30  ;;  %v9278_v12 = vcombine.low %v4302_v54, %v4306_v30 }
 0x2fa   :  { %v12400_v36 = vld [vmem:[%s14300_s4] sm:$0xff] }
 0x2fc   :  { %10273 = vmatpush1.bf16.msra.mxu1 %v10272_v5  ;;  %v9262_v5 = vcombine.low %v4286_v1, %v4290_v2 }
 0x2fd   :  { %10275 = vmatprep.subr.bf16.mxu1 %v10274_v60  ;;  %v9271_v60 = vcombine.high %v4294_v4, %v4298_v7 }
 0x2ff   :  { %8954 = vmatmul.mubr.msk.f32.vlgmr.msra.gmra.mrb[10].mxu1 %vm293_vm0, %v12168_v13 }
 0x300   :  { %10277 = vmatpush1.bf16.msra.mxu1 %v10276_v10  ;;  %3803 = vmatprep.mubr.f32.mxu1 %v10377_v46  ;;  %v4310_v10 = vld [vmem:[%s14299_s5 + $0xa40] sm:$0xff] }
 0x301   :  { %10279 = vmatprep.subr.bf16.mxu1 %v10278_v11  ;;  %v4314_v11 = vld [vmem:[%s14299_s5 + $0xa60] sm:$0xff] }
 0x302   :  { %v9287_v14 = vcombine.high %v4310_v10, %v4314_v11  ;;  %v9286_v16 = vcombine.low %v4310_v10, %v4314_v11 }
 0x304   :  { %10281 = vmatpush1.bf16.msra.mxu1 %v10280_v17  ;;  %v4322_v17 = vld [vmem:[%s14299_s5 + $0xaa0] sm:$0xff] }
 0x305   :  { %10283 = vmatprep.subr.bf16.mxu1 %v10282_v18  ;;  %v9295_v18 = vcombine.high %v4318_v6, %v4322_v17  ;;  %v9294_v21 = vcombine.low %v4318_v6, %v4322_v17 }
 0x307   :  { %8955 = vmatmul.mubr.msk.f32.vlgmr.msra.gmra.mrb[12].mxu1 %vm293_vm0, %v12168_v13 }
 0x308   :  { %10285 = vmatpush1.bf16.msra.mxu1 %v10284_v23  ;;  %3874 = vmatprep.mubr.f32.mxu1 %v10377_v46  ;;  %v9070_v23 = vcombine.low %v4094_v20, %v4098_v26  ;;  %v4126_v20 = vld [vmem:[%s14299_s5 + $0x480] sm:$0xff] }
 0x309   :  { %10287 = vmatprep.subr.bf16.mxu1 %v10286_v24  ;;  %v4326_v24 = vld [vmem:[%s14299_s5 + $0xac0] sm:$0xff] }
 0x30a   :  { %7893 = vmatpush1.bf16.msra.mxu0 %v9070_v23  ;;  %v9303_v45 = vcombine.high %v4326_v24, %v4330_v25  ;;  %v4130_v26 = vld [vmem:[%s14299_s5 + $0x4a0] sm:$0xff] }
 0x30c   :  { %10289 = vmatpush1.bf16.msra.mxu1 %v10288_v29  ;;  %v9302_v29 = vcombine.low %v4326_v24, %v4330_v25  ;;  %v9103_v24 = vcombine.high %v4126_v20, %v4130_v26 }
 0x30d   :  { %10291 = vmatprep.subr.bf16.mxu1 %v10290_v31  ;;  %v9079_v31 = vcombine.high %v4102_v27, %v4106_v28  ;;  %v4134_v27 = vld [vmem:[%s14299_s5 + $0x4c0] sm:$0xff] }
 0x30e   :  { %v4138_v28 = vld [vmem:[%s14299_s5 + $0x4e0] sm:$0xff] }
 0x30f   :  { %8956 = vmatmul.mubr.msk.f32.vlgmr.msra.gmra.mrb[14].mxu1 %vm293_vm0, %v12168_v13  ;;  %7894 = vmatprep.subr.bf16.mxu0 %v9079_v31 }
 0x310   :  { %10293 = vmatpush1.bf16.msra.mxu1 %v10292_v34  ;;  %3945 = vmatprep.mubr.f32.mxu1 %v10377_v46  ;;  %v4258_v46 = vld [vmem:[%s14299_s5 + $0x8a0] sm:$0xff] }
 0x311   :  { %10295 = vmatprep.subr.bf16.mxu1 %v10294_v35  ;;  %v9231_v19 = vcombine.high %v4254_v50, %v4258_v46  ;;  %v9230_v52 = vcombine.low %v4254_v50, %v4258_v46  ;;  %7895 = vmatpush1.bf16.msra.mxu0 %v9078_v55  ;;  %v12349_v34 = vld [vmem:[%s14299_s5 + $0x400] sm:$0xff]  ;;  %v9102_v55 = vcombine.low %v4126_v20, %v4130_v26 }
 0x312   :  { %v12354_v35 = vld [vmem:[%s14299_s5 + $0x420] sm:$0xff] }
 0x313   :  { %v9087_v49 = vcombine.high %v12349_v34, %v12354_v35  ;;  %v9086_v38 = vcombine.low %v12349_v34, %v12354_v35  ;;  %v4358_v46 = vld [vmem:[%s14299_s5 + $0xbc0] sm:$0xff] }
 0x314   :  { %10297 = vmatpush1.bf16.msra.mxu1 %v10296_v40  ;;  %v4346_v40 = vld [vmem:[%s14299_s5 + $0xb60] sm:$0xff] }
 0x315   :  { %7946 = vmatprep.subr.bf16.mxu1 %v9215_v42  ;;  %7905 = vmatprep.subr.bf16.mxu0 %v9087_v49  ;;  %v9319_v42 = vcombine.high %v4342_v39, %v4346_v40  ;;  %v9318_v43 = vcombine.low %v4342_v39, %v4346_v40  ;;  %v4146_v49 = vld [vmem:[%s14299_s5 + $0x520] sm:$0xff]  ;;  %v9110_v40 = vcombine.low %v4134_v27, %v4138_v28 }
 0x317   :  { %8957 = vmatmul.mubr.msk.f32.vlgmr.msra.gmra.mrb[16].mxu1 %vm293_vm0, %v12168_v13  ;;  %v9263_v13 = vcombine.high %v4286_v1, %v4290_v2 }
 0x318   :  { %7947 = vmatpush1.bf16.msra.mxu1 %v9214_v47  ;;  %v4354_v47 = vld [vmem:[%s14299_s5 + $0xba0] sm:$0xff] }
 0x319   :  { %7948 = vmatprep.subr.bf16.mxu1 %v9223_v48  ;;  %v9327_v48 = vcombine.high %v4350_v44, %v4354_v47  ;;  %v9326_v50 = vcombine.low %v4350_v44, %v4354_v47  ;;  %v4374_v44 = vld [vmem:[%s14299_s5 + $0xc40] sm:$0xff] }
 0x31c   :  { %7949 = vmatpush1.bf16.msra.mxu1 %v9222_v57  ;;  %v4362_v57 = vld [vmem:[%s14299_s5 + $0xbe0] sm:$0xff] }
 0x31d   :  { %7950 = vmatprep.subr.bf16.mxu1 %v9231_v19  ;;  %v9335_v19 = vcombine.high %v4358_v46, %v4362_v57  ;;  %v9334_v51 = vcombine.low %v4358_v46, %v4362_v57  ;;  %v4150_v46 = vld [vmem:[%s14299_s5 + $0x540] sm:$0xff] }
 0x31e   :  { %v4154_v57 = vld [vmem:[%s14299_s5 + $0x560] sm:$0xff] }
 0x320   :  { %7951 = vmatpush1.bf16.msra.mxu1 %v9230_v52  ;;  %v12386_v52 = vld [vmem:[%s14299_s5 + $0xc20] sm:$0xff] }
 0x321   :  { %7952 = vmatprep.subr.bf16.mxu1 %v9239_v53  ;;  %v9343_v53 = vcombine.high %v12381_v15, %v12386_v52  ;;  %v9342_v56 = vcombine.low %v12381_v15, %v12386_v52  ;;  %v4166_v15 = vld [vmem:[%s14299_s5 + $0x5c0] sm:$0xff] }
 0x322   :  { %v4170_v52 = vld [vmem:[%s14299_s5 + $0x5e0] sm:$0xff] }
 0x324   :  { %7953 = vmatpush1.bf16.msra.mxu1 %v9238_v59  ;;  %v12392_v59 = vshrl.u32 %v3523_v58, 7 }
 0x325   :  { %7954 = vmatprep.subr.bf16.mxu1 %v9247_v61 }
 0x326   :  { %v12395_v61 = vsub.s32 0, %v12392_v59  ;;  %v12403_v62 = vsub.s32 1, %v12392_v59  ;;  %v3537_v4 = vsub.s32 3, %v12392_v59  ;;  %v3541_v6 = vsub.s32 4, %v12392_v59 }
 0x327   :  { %v3553_v35 = vsub.s32 7, %v12392_v59 }
 0x328   :  { %7955 = vmatpush1.bf16.msra.mxu1 %v9246_v63  ;;  %v3526_v63 = vrot.slane %v12400_v36, %v12395_v61  ;;  %v3538_v30 = vrot.slane %v12400_v36, %v3537_v4  ;;  %v3542_v23 = vrot.slane %v12400_v36, %v3541_v6 }
 0x329   :  { %7956 = vmatprep.subr.bf16.mxu1 %v9255_v0  ;;  %v3530_v0 = vrot.slane %v12400_v36, %v12403_v62 }
 0x32c   :  { %7957 = vmatpush1.bf16.msra.mxu1 %v9254_v3 }
 0x32d   :  { %7958 = vmatprep.subr.bf16.mxu1 %v9263_v13 }
 0x330   :  { %7959 = vmatpush1.bf16.msra.mxu1 %v9262_v5 }
 0x331   :  { %7960 = vmatprep.subr.bf16.mxu1 %v9271_v60 }
 0x334   :  { %7961 = vmatpush1.bf16.msra.mxu1 %v9270_v8  ;;  %v4118_v8 = vld [vmem:[%s14299_s5 + $0x440] sm:$0xff] }
 0x335   :  { %7962 = vmatprep.subr.bf16.mxu1 %v9279_v9  ;;  %v4122_v9 = vld [vmem:[%s14299_s5 + $0x460] sm:$0xff] }
 0x336   :  { %v9094_v22 = vcombine.low %v4118_v8, %v4122_v9 }
 0x338   :  { %7963 = vmatpush1.bf16.msra.mxu1 %v9278_v12 }
 0x339   :  { %7964 = vmatprep.subr.bf16.mxu1 %v9287_v14 }
 0x33c   :  { %7965 = vmatpush1.bf16.msra.mxu1 %v9286_v16  ;;  %v9095_v16 = vcombine.high %v4118_v8, %v4122_v9 }
 0x33d   :  { %7966 = vmatprep.subr.bf16.mxu1 %v9295_v18  ;;  %v3545_v18 = vsub.s32 5, %v12392_v59 }
 0x340   :  { %7967 = vmatpush1.bf16.msra.mxu1 %v9294_v21 }
 0x341   :  { %7968 = vmatprep.subr.bf16.mxu1 %v9303_v45  ;;  %v3546_v45 = vrot.slane %v12400_v36, %v3545_v18 }
 0x344   :  { %7969 = vmatpush1.bf16.msra.mxu1 %v9302_v29 }
 0x345   :  { %7970 = vmatprep.subr.bf16.mxu1 %v9311_v33  ;;  %v9111_v33 = vcombine.high %v4134_v27, %v4138_v28  ;;  %v4174_v27 = vld [vmem:[%s14299_s5 + $0x600] sm:$0xff] }
 0x346   :  { %v4178_v28 = vld [vmem:[%s14299_s5 + $0x620] sm:$0xff] }
 0x348   :  { %7971 = vmatpush1.bf16.msra.mxu1 %v9310_v37  ;;  %v4142_v37 = vld [vmem:[%s14299_s5 + $0x500] sm:$0xff] }
 0x349   :  { %7972 = vmatprep.subr.bf16.mxu1 %v9319_v42 }
 0x34c   :  { %7973 = vmatpush1.bf16.msra.mxu1 %v9318_v43  ;;  %v9119_v43 = vcombine.high %v4142_v37, %v4146_v49 }
 0x34d   :  { %7974 = vmatprep.subr.bf16.mxu1 %v9327_v48  ;;  %v3554_v48 = vrot.slane %v12400_v36, %v3553_v35 }
 0x350   :  { %7975 = vmatpush1.bf16.msra.mxu1 %v9326_v50  ;;  %v4378_v50 = vld [vmem:[%s14299_s5 + $0xc60] sm:$0xff] }
 0x351   :  { %7976 = vmatprep.subr.bf16.mxu1 %v9335_v19 }
 0x354   :  { %7977 = vmatpush1.bf16.msra.mxu1 %v9334_v51 }
 0x355   :  { %7987 = vmatprep.subr.bf16.mxu1 %v9343_v53  ;;  %v9118_v53 = vcombine.low %v4142_v37, %v4146_v49  ;;  %v4182_v37 = vld [vmem:[%s14299_s5 + $0x640] sm:$0xff] }
 0x356   :  { %v4186_v49 = vld [vmem:[%s14299_s5 + $0x660] sm:$0xff] }
 0x3ca   :  { %v3663_v1 = vpop.f32.mrb[8].mxu1 }
 0x3cb   :  { %v3664_v2 = vadd.f32 %v3663_v1, %v3526_v63  ;;  %v3665_v3 = vpop.f32.mrb[9].mxu1  ;;  %v9127_v1 = vcombine.high %v4150_v46, %v4154_v57 }
 0x3cc   :  { %v3666_v13 = vadd.f32 %v3665_v3, %v3530_v0  ;;  %v9351_v0 = vcombine.high %v4374_v44, %v4378_v50 }
 0x3cd   :  { %v3952_v7 = vmax.f32 %v3664_v2, 0.0  ;;  %v4382_v2 = vld [vmem:[%s14299_s5 + $0xc80] sm:$0xff] }
 0x3ce   :  { %v3953_v5 = vmax.f32 %v3666_v13, 0.0  ;;  %v4386_v13 = vld [vmem:[%s14299_s5 + $0xca0] sm:$0xff] }
 0x3cf   :  { %v3962_v60 = vmin.f32 %v3952_v7, 6.0  ;;  %v4158_v7 = vld [vmem:[%s14299_s5 + $0x580] sm:$0xff]  ;;  %v9359_v8 = vcombine.high %v4382_v2, %v4386_v13  ;;  %v9358_v26 = vcombine.low %v4382_v2, %v4386_v13 }
 0x3d0   :  { %v3963_v54 = vmin.f32 %v3953_v5, 6.0  ;;  %v4162_v5 = vld [vmem:[%s14299_s5 + $0x5a0] sm:$0xff] }
 0x3d1   :  { %v12423_v12 = vpack.c.bf16 %v3962_v60, %v3962_v60  ;;  %v9135_v9 = vcombine.high %v4158_v7, %v4162_v5  ;;  %v4202_v2 = vld [vmem:[%s14299_s5 + $0x6e0] sm:$0xff] }
 0x3d2   :  { %v12419_v10 = vpack.c.bf16 %v3963_v54, %v3963_v54  ;;  %v12421_v11 = vpop.f32.mrb[10].mxu1  ;;  %v9350_v54 = vcombine.low %v4374_v44, %v4378_v50  ;;  %v4418_v44 = vld [vmem:[%s14299_s5 + $0xda0] sm:$0xff] }
 0x3d3   :  { %v3736_v14 = vpop.f32.mrb[11].mxu1 }
 0x3d4   :  { %v3737_v17 = vadd.f32 %v3736_v14, %v3538_v30  ;;  %7896 = vmatprep.mubr.bf16.mxu0 %v12419_v10  ;;  %v9126_v30 = vcombine.low %v4150_v46, %v4154_v57  ;;  %v4390_v14 = vld [vmem:[%s14299_s5 + $0xcc0] sm:$0xff]  ;;  %v9158_v46 = vcombine.low %v4182_v37, %v4186_v49 }
 0x3d5   :  { %7897 = vmatmul.mubr.bf16.vlgmr.msra.gmra.mrb[248].mxu0 %v12423_v12 }
 0x3d6   :  { %v3955_v21 = vmax.f32 %v3737_v17, 0.0  ;;  %7906 = vmatpush1.bf16.msra.mxu0 %v9086_v38  ;;  %v4394_v17 = vld [vmem:[%s14299_s5 + $0xce0] sm:$0xff] }
 0x3d7   :  { %7907 = vmatprep.subr.bf16.mxu0 %v9095_v16 }
 0x3d8   :  { %v3965_v25 = vmin.f32 %v3955_v21, 6.0  ;;  %v9134_v21 = vcombine.low %v4158_v7, %v4162_v5 }
 0x3da   :  { %v12447_v29 = vpack.c.bf16 %v3965_v25, %v3965_v25  ;;  %v3805_v31 = vpop.f32.mrb[12].mxu1  ;;  %7908 = vmatpush1.bf16.msra.mxu0 %v9094_v22  ;;  %v4398_v25 = vld [vmem:[%s14299_s5 + $0xd00] sm:$0xff] }
 0x3db   :  { %v3806_v32 = vadd.f32 %v3805_v31, %v3542_v23  ;;  %v3807_v41 = vpop.f32.mrb[13].mxu1  ;;  %7909 = vmatprep.subr.bf16.mxu0 %v9103_v24  ;;  %v9367_v23 = vcombine.high %v4390_v14, %v4394_v17  ;;  %v9143_v24 = vcombine.high %v4166_v15, %v4170_v52  ;;  %v9366_v31 = vcombine.low %v4390_v14, %v4394_v17 }
 0x3dc   :  { %v3808_v34 = vadd.f32 %v3807_v41, %v3546_v45  ;;  %7937 = vmatprep.mubr.bf16.mxu0 %v12447_v29  ;;  %v4402_v45 = vld [vmem:[%s14299_s5 + $0xd20] sm:$0xff]  ;;  %v9151_v41 = vcombine.high %v4174_v27, %v4178_v28 }
 0x3dd   :  { %v3956_v38 = vmax.f32 %v3806_v32, 0.0  ;;  %v9375_v32 = vcombine.high %v4398_v25, %v4402_v45 }
 0x3de   :  { %v3957_v39 = vmax.f32 %v3808_v34, 0.0  ;;  %7910 = vmatpush1.bf16.msra.mxu0 %v9102_v55  ;;  %v9142_v55 = vcombine.low %v4166_v15, %v4170_v52  ;;  %v4410_v34 = vld [vmem:[%s14299_s5 + $0xd60] sm:$0xff] }
 0x3df   :  { %v3966_v42 = vmin.f32 %v3956_v38, 6.0  ;;  %7911 = vmatprep.subr.bf16.mxu0 %v9111_v33  ;;  %v4406_v33 = vld [vmem:[%s14299_s5 + $0xd40] sm:$0xff]  ;;  %v9374_v38 = vcombine.low %v4398_v25, %v4402_v45 }
 0x3e0   :  { %v3967_v47 = vmin.f32 %v3957_v39, 6.0  ;;  %v9150_v39 = vcombine.low %v4174_v27, %v4178_v28  ;;  %v9382_v50 = vcombine.low %v4406_v33, %v4410_v34  ;;  %v4438_v52 = vld [vmem:[%s14299_s5 + $0xe40] sm:$0xff] }
 0x3e1   :  { %v12476_v58 = vpack.c.bf16 %v3966_v42, %v3966_v42  ;;  %v9159_v42 = vcombine.high %v4182_v37, %v4186_v49 }
 0x3e2   :  { %v12472_v19 = vpack.c.bf16 %v3967_v47, %v3967_v47  ;;  %v12474_v51 = vpop.f32.mrb[14].mxu1  ;;  %7912 = vmatpush1.bf16.msra.mxu0 %v9110_v40  ;;  %v9383_v40 = vcombine.high %v4406_v33, %v4410_v34  ;;  %v4190_v47 = vld [vmem:[%s14299_s5 + $0x680] sm:$0xff] }
 0x3e3   :  { %v3878_v63 = vpop.f32.mrb[15].mxu1  ;;  %7913 = vmatprep.subr.bf16.mxu0 %v9119_v43  ;;  %v4414_v43 = vld [vmem:[%s14299_s5 + $0xd80] sm:$0xff] }
 0x3e4   :  { %v3879_v3 = vadd.f32 %v3878_v63, %v3554_v48  ;;  %7978 = vmatprep.mubr.bf16.mxu1 %v12472_v19  ;;  %v4194_v48 = vld [vmem:[%s14299_s5 + $0x6a0] sm:$0xff]  ;;  %v9391_v57 = vcombine.high %v4414_v43, %v4418_v44 }
 0x3e5   :  { %7979 = vmatmul.mubr.bf16.vlgmr.msra.gmra.mrb[20].mxu1 %v12476_v58  ;;  %v4422_v63 = vld [vmem:[%s14299_s5 + $0xdc0] sm:$0xff]  ;;  %v9166_v13 = vcombine.low %v4190_v47, %v4194_v48 }
 0x3e6   :  { %v3959_v60 = vmax.f32 %v3879_v3, 0.0  ;;  %7988 = vmatpush1.bf16.msra.mxu1 %v9342_v56  ;;  %7914 = vmatpush1.bf16.msra.mxu0 %v9118_v53  ;;  %v9167_v53 = vcombine.high %v4190_v47, %v4194_v48  ;;  %v9390_v3 = vcombine.low %v4414_v43, %v4418_v44 }
 0x3e7   :  { %7989 = vmatprep.subr.bf16.mxu1 %v9351_v0  ;;  %7915 = vmatprep.subr.bf16.mxu0 %v9127_v1  ;;  %v4426_v0 = vld [vmem:[%s14299_s5 + $0xde0] sm:$0xff] }
 0x3e8   :  { %v3969_v16 = vmin.f32 %v3959_v60, 6.0  ;;  %v4198_v1 = vld [vmem:[%s14299_s5 + $0x6c0] sm:$0xff]  ;;  %v9399_v7 = vcombine.high %v4422_v63, %v4426_v0 }
 0x3e9   :  { %v9175_v5 = vcombine.high %v4198_v1, %v4202_v2  ;;  %v4430_v60 = vld [vmem:[%s14299_s5 + $0xe00] sm:$0xff]  ;;  %v9174_v14 = vcombine.low %v4198_v1, %v4202_v2 }
 0x3ea   :  { %v12507_v56 = vpack.c.bf16 %v3969_v16, %v3969_v16  ;;  %7990 = vmatpush1.bf16.msra.mxu1 %v9350_v54  ;;  %v12509_v20 = vpop.f32.mrb[16].mxu1  ;;  %7916 = vmatpush1.bf16.msra.mxu0 %v9126_v30  ;;  %v4434_v54 = vld [vmem:[%s14299_s5 + $0xe20] sm:$0xff]  ;;  %v3533_v16 = vsub.s32 2, %v12392_v59 }
 0x3eb   :  { %v12511_v22 = vpop.f32.mrb[17].mxu1  ;;  %7991 = vmatprep.subr.bf16.mxu1 %v9359_v8  ;;  %7917 = vmatprep.subr.bf16.mxu0 %v9135_v9  ;;  %v4206_v30 = vld [vmem:[%s14299_s5 + $0x700] sm:$0xff]  ;;  %v9398_v9 = vcombine.low %v4422_v63, %v4426_v0  ;;  %v9407_v17 = vcombine.high %v4430_v60, %v4434_v54  ;;  %v3988_v63 = vld [vmem:[%s14299_s5 + $0x30] sm:$0xff] }
 0x3ec   :  { %8019 = vmatprep.mubr.bf16.mxu1 %v12507_v56  ;;  %v4210_v8 = vld [vmem:[%s14299_s5 + $0x720] sm:$0xff]  ;;  %v3534_v45 = vrot.slane %v12400_v36, %v3533_v16 }
 0x3ed   :  { %v9183_v15 = vcombine.high %v4206_v30, %v4210_v8  ;;  %v9182_v25 = vcombine.low %v4206_v30, %v4210_v8  ;;  %v3992_v30 = vld [vmem:[%s14299_s5 + $0x50] sm:$0xff] }
 0x3ee   :  { %7992 = vmatpush1.bf16.msra.mxu1 %v9358_v26  ;;  %7918 = vmatpush1.bf16.msra.mxu0 %v9134_v21  ;;  %v4442_v26 = vld [vmem:[%s14299_s5 + $0xe60] sm:$0xff]  ;;  %v3735_v37 = vadd.f32 %v12421_v11, %v3534_v45  ;;  %v3996_v8 = vld [vmem:[%s14299_s5 + $0x70] sm:$0xff] }
 0x3ef   :  { %7993 = vmatprep.subr.bf16.mxu1 %v9367_v23  ;;  %7919 = vmatprep.subr.bf16.mxu0 %v9143_v24  ;;  %v4214_v21 = vld [vmem:[%s14299_s5 + $0x740] sm:$0xff]  ;;  %v9406_v24 = vcombine.low %v4430_v60, %v4434_v54  ;;  %v9415_v27 = vcombine.high %v4438_v52, %v4442_v26  ;;  %v9414_v33 = vcombine.low %v4438_v52, %v4442_v26  ;;  %v12637_v54 = vld [vmem:[%s14300_s4 + $0x8] sm:$0x3] }
 0x3f0   :  { %v4218_v23 = vld [vmem:[%s14299_s5 + $0x760] sm:$0xff]  ;;  %v3954_v47 = vmax.f32 %v3735_v37, 0.0 }
 0x3f1   :  { %v9191_v28 = vcombine.high %v4214_v21, %v4218_v23  ;;  %v9190_v34 = vcombine.low %v4214_v21, %v4218_v23  ;;  %v4234_v11 = vld [vmem:[%s14299_s5 + $0x7e0] sm:$0xff]  ;;  %v3562_v21 = vrot.slane %v12637_v54, %v12403_v62  ;;  %v8971_v23 = vcombine.high %v3992_v30, %v3996_v8 }
 0x3f2   :  { %7994 = vmatpush1.bf16.msra.mxu1 %v9366_v31  ;;  %7920 = vmatpush1.bf16.msra.mxu0 %v9142_v55  ;;  %v4446_v31 = vld [vmem:[%s14299_s5 + $0xe80] sm:$0xff]  ;;  %v3964_v2 = vmin.f32 %v3954_v47, 6.0 }
 0x3f3   :  { %7995 = vmatprep.subr.bf16.mxu1 %v9375_v32  ;;  %7921 = vmatprep.subr.bf16.mxu0 %v9151_v41  ;;  %v4450_v55 = vld [vmem:[%s14299_s5 + $0xea0] sm:$0xff] }
 0x3f4   :  { %v4222_v32 = vld [vmem:[%s14299_s5 + $0x780] sm:$0xff]  ;;  %v9423_v49 = vcombine.high %v4446_v31, %v4450_v55  ;;  %v9422_v43 = vcombine.low %v4446_v31, %v4450_v55 }
 0x3f5   :  { %v4226_v41 = vld [vmem:[%s14299_s5 + $0x7a0] sm:$0xff] }
 0x3f6   :  { %7996 = vmatpush1.bf16.msra.mxu1 %v9374_v38  ;;  %7922 = vmatpush1.bf16.msra.mxu0 %v9150_v39  ;;  %v9199_v38 = vcombine.high %v4222_v32, %v4226_v41  ;;  %v4454_v39 = vld [vmem:[%s14299_s5 + $0xec0] sm:$0xff]  ;;  %v9198_v44 = vcombine.low %v4222_v32, %v4226_v41  ;;  %v3950_v41 = vadd.f32 %v12511_v22, %v3562_v21 }
 0x3f7   :  { %7997 = vmatprep.subr.bf16.mxu1 %v9383_v40  ;;  %7923 = vmatprep.subr.bf16.mxu0 %v9159_v42  ;;  %v4458_v40 = vld [vmem:[%s14299_s5 + $0xee0] sm:$0xff] }
 0x3f8   :  { %v4230_v42 = vld [vmem:[%s14299_s5 + $0x7c0] sm:$0xff]  ;;  %v9431_v48 = vcombine.high %v4454_v39, %v4458_v40  ;;  %v9430_v0 = vcombine.low %v4454_v39, %v4458_v40 }
 0x3f9   :  { %v9206_v1 = vcombine.low %v4230_v42, %v4234_v11  ;;  %v4474_v60 = vld [vmem:[%s14299_s5 + $0xf60] sm:$0xff] }
 0x3fa   :  { %7998 = vmatpush1.bf16.msra.mxu1 %v9382_v50  ;;  %7924 = vmatpush1.bf16.msra.mxu0 %v9158_v46  ;;  %v9207_v50 = vcombine.high %v4230_v42, %v4234_v11  ;;  %v4462_v46 = vld [vmem:[%s14299_s5 + $0xf00] sm:$0xff]  ;;  %v3961_v42 = vmax.f32 %v3950_v41, 0.0 }
 0x3fb   :  { %7999 = vmatprep.subr.bf16.mxu1 %v9391_v57  ;;  %7925 = vmatprep.subr.bf16.mxu0 %v9167_v53  ;;  %v4466_v57 = vld [vmem:[%s14299_s5 + $0xf20] sm:$0xff]  ;;  %v3984_v53 = vld [vmem:[%s14299_s5 + $0x10] sm:$0xff] }
 0x3fc   :  { %v4478_v26 = vld [vmem:[%s14299_s5 + $0xf80] sm:$0xff] }
 0x3fd   :  { %v4486_v32 = vld [vmem:[%s14299_s5 + $0xfc0] sm:$0xff] }
 0x3fe   :  { %8000 = vmatpush1.bf16.msra.mxu1 %v9390_v3  ;;  %7926 = vmatpush1.bf16.msra.mxu0 %v9166_v13  ;;  %v3549_v3 = vsub.s32 6, %v12392_v59  ;;  %v9439_v13 = vcombine.high %v4462_v46, %v4466_v57  ;;  %v4494_v40 = vld [vmem:[%s14299_s5 + $0x1000] sm:$0xff] }
 0x3ff   :  { %8001 = vmatprep.subr.bf16.mxu1 %v9399_v7  ;;  %7927 = vmatprep.subr.bf16.mxu0 %v9175_v5  ;;  %v8963_v7 = vcombine.high %v3984_v53, %v3988_v63  ;;  %v4470_v5 = vld [vmem:[%s14299_s5 + $0xf40] sm:$0xff] }
 0x400   :  { %v9447_v52 = vcombine.high %v4470_v5, %v4474_v60  ;;  %v9446_v45 = vcombine.low %v4470_v5, %v4474_v60  ;;  %v4498_v11 = vld [vmem:[%s14299_s5 + $0x1020] sm:$0xff] }
 0x401   :  { %v4526_v41 = vld [vmem:[%s14299_s5 + $0x1100] sm:$0xff] }
 0x402   :  { %8002 = vmatpush1.bf16.msra.mxu1 %v9398_v9  ;;  %7928 = vmatpush1.bf16.msra.mxu0 %v9174_v14  ;;  %v9438_v9 = vcombine.low %v4462_v46, %v4466_v57  ;;  %v8962_v14 = vcombine.low %v3984_v53, %v3988_v63  ;;  %v9471_v46 = vcombine.high %v4494_v40, %v4498_v11  ;;  %v3971_v53 = vmin.f32 %v3961_v42, 6.0  ;;  %v4502_v63 = vld [vmem:[%s14299_s5 + $0x1040] sm:$0xff]  ;;  %v4056_v42 = vld [vmem:[%s14299_s5 + $0x250] sm:$0xff] }
 0x403   :  { %8003 = vmatprep.subr.bf16.mxu1 %v9407_v17  ;;  %7929 = vmatprep.subr.bf16.mxu0 %v9183_v15  ;;  %v12645_v17 = vpack.c.bf16 %v3964_v2, %v3964_v2  ;;  %v3550_v15 = vrot.slane %v12400_v36, %v3549_v3  ;;  %v4004_v36 = vld [vmem:[%s14299_s5 + $0xb0] sm:$0xff] }
 0x404   :  { %v4028_v2 = vld [vmem:[%s14299_s5 + $0x170] sm:$0xff] }
 0x406   :  { %8004 = vmatpush1.bf16.msra.mxu1 %v9406_v24  ;;  %7930 = vmatpush1.bf16.msra.mxu0 %v9182_v25  ;;  %v4482_v24 = vld [vmem:[%s14299_s5 + $0xfa0] sm:$0xff]  ;;  %v4000_v25 = vld [vmem:[%s14299_s5 + $0x90] sm:$0xff] }
 0x407   :  { %8005 = vmatprep.subr.bf16.mxu1 %v9415_v27  ;;  %7931 = vmatprep.subr.bf16.mxu0 %v9191_v28  ;;  %v8970_v27 = vcombine.low %v3992_v30, %v3996_v8  ;;  %v3877_v28 = vadd.f32 %v12474_v51, %v3550_v15  ;;  %v9455_v31 = vcombine.high %v4478_v26, %v4482_v24  ;;  %v4008_v51 = vld [vmem:[%s14299_s5 + $0xd0] sm:$0xff] }
 0x408   :  { %v8979_v55 = vcombine.high %v4000_v25, %v4004_v36  ;;  %v9454_v37 = vcombine.low %v4478_v26, %v4482_v24  ;;  %v12706_v30 = vpack.c.bf16 %v3971_v53, %v3971_v53  ;;  %v4032_v15 = vld [vmem:[%s14299_s5 + $0x190] sm:$0xff] }
 0x409   :  { %v4068_v53 = vld [vmem:[%s14299_s5 + $0x2b0] sm:$0xff] }
 0x40a   :  { %8006 = vmatpush1.bf16.msra.mxu1 %v9414_v33  ;;  %7932 = vmatpush1.bf16.msra.mxu0 %v9190_v34  ;;  %v4490_v33 = vld [vmem:[%s14299_s5 + $0xfe0] sm:$0xff]  ;;  %v4012_v34 = vld [vmem:[%s14299_s5 + $0xf0] sm:$0xff] }
 0x40b   :  { %8007 = vmatprep.subr.bf16.mxu1 %v9423_v49  ;;  %7933 = vmatprep.subr.bf16.mxu0 %v9199_v38  ;;  %v8978_v49 = vcombine.low %v4000_v25, %v4004_v36  ;;  %v3958_v38 = vmax.f32 %v3877_v28, 0.0  ;;  %v9463_v22 = vcombine.high %v4486_v32, %v4490_v33  ;;  %v8987_v39 = vcombine.high %v4008_v51, %v4012_v34  ;;  %v4518_v25 = vld [vmem:[%s14299_s5 + $0x10c0] sm:$0xff] }
 0x40c   :  { %v9462_v47 = vcombine.low %v4486_v32, %v4490_v33  ;;  %v4522_v36 = vld [vmem:[%s14299_s5 + $0x10e0] sm:$0xff] }
 0x40d   :  { %v4530_v33 = vld [vmem:[%s14299_s5 + $0x1120] sm:$0xff] }
 0x40e   :  { %8008 = vmatpush1.bf16.msra.mxu1 %v9422_v43  ;;  %7934 = vmatpush1.bf16.msra.mxu0 %v9198_v44  ;;  %v4016_v43 = vld [vmem:[%s14299_s5 + $0x110] sm:$0xff] }
 0x40f   :  { %8009 = vmatprep.subr.bf16.mxu1 %v9431_v48  ;;  %7935 = vmatprep.subr.bf16.mxu0 %v9207_v50  ;;  %v4020_v44 = vld [vmem:[%s14299_s5 + $0x130] sm:$0xff]  ;;  %v8986_v48 = vcombine.low %v4008_v51, %v4012_v34  ;;  %v3968_v50 = vmin.f32 %v3958_v38, 6.0  ;;  %v9503_v38 = vcombine.high %v4526_v41, %v4530_v33 }
 0x410   :  { %v8995_v57 = vcombine.high %v4016_v43, %v4020_v44  ;;  %v8994_v5 = vcombine.low %v4016_v43, %v4020_v44  ;;  %v4048_v51 = vld [vmem:[%s14299_s5 + $0x210] sm:$0xff]  ;;  %v9502_v43 = vcombine.low %v4526_v41, %v4530_v33 }
 0x411   :  { %v4052_v34 = vld [vmem:[%s14299_s5 + $0x230] sm:$0xff] }
 0x412   :  { %8010 = vmatpush1.bf16.msra.mxu1 %v9430_v0  ;;  %7936 = vmatpush1.bf16.msra.mxu0 %v9206_v1  ;;  %v4506_v0 = vld [vmem:[%s14299_s5 + $0x1060] sm:$0xff]  ;;  %v4024_v1 = vld [vmem:[%s14299_s5 + $0x150] sm:$0xff]  ;;  %v9026_v44 = vcombine.low %v4048_v51, %v4052_v34 }
 0x413   :  { %8011 = vmatprep.subr.bf16.mxu1 %v9439_v13  ;;  %8274 = vmatprep.subr.bf16.mxu0 %v8963_v7  ;;  %v9470_v13 = vcombine.low %v4494_v40, %v4498_v11  ;;  %v12704_v7 = vpack.c.bf16 %v3968_v50, %v3968_v50  ;;  %v9479_v60 = vcombine.high %v4502_v63, %v4506_v0  ;;  %v4538_v40 = vld [vmem:[%s14299_s5 + $0x1160] sm:$0xff]  ;;  %v4060_v11 = vld [vmem:[%s14299_s5 + $0x270] sm:$0xff] }
 0x414   :  { %v9003_v8 = vcombine.high %v4024_v1, %v4028_v2  ;;  %v9478_v26 = vcombine.low %v4502_v63, %v4506_v0  ;;  %v9002_v21 = vcombine.low %v4024_v1, %v4028_v2  ;;  %v4542_v50 = vld [vmem:[%s14299_s5 + $0x1180] sm:$0xff]  ;;  %v9034_v0 = vcombine.low %v4056_v42, %v4060_v11 }
 0x415   :  { %7938 = vmatmul.mubr.bf16.vlgmr.msra.gmra.mrb[248].mxu0 %v12645_v17 }
 0x416   :  { %8012 = vmatpush1.bf16.msra.mxu1 %v9438_v9  ;;  %8275 = vmatpush1.bf16.msra.mxu0 %v8962_v14  ;;  %v4510_v9 = vld [vmem:[%s14299_s5 + $0x1080] sm:$0xff] }
 0x417   :  { %8306 = vmatprep.mubr.bf16.mxu0 %v12419_v10  ;;  %8013 = vmatprep.subr.bf16.mxu1 %v9447_v52  ;;  %v4514_v14 = vld [vmem:[%s14299_s5 + $0x10a0] sm:$0xff]  ;;  %v4036_v52 = vld [vmem:[%s14299_s5 + $0x1b0] sm:$0xff] }
 0x418   :  { %8276 = vmatprep.subr.bf16.mxu0 %v8971_v23  ;;  %v9487_v23 = vcombine.high %v4510_v9, %v4514_v14  ;;  %v9011_v24 = vcombine.high %v4032_v15, %v4036_v52  ;;  %v9486_v28 = vcombine.low %v4510_v9, %v4514_v14 }
 0x41a   :  { %8014 = vmatpush1.bf16.msra.mxu1 %v9446_v45  ;;  %8277 = vmatpush1.bf16.msra.mxu0 %v8970_v27  ;;  %v4040_v45 = vld [vmem:[%s14299_s5 + $0x1d0] sm:$0xff] }
 0x41b   :  { %8015 = vmatprep.subr.bf16.mxu1 %v9455_v31  ;;  %8278 = vmatprep.subr.bf16.mxu0 %v8979_v55  ;;  %v4044_v27 = vld [vmem:[%s14299_s5 + $0x1f0] sm:$0xff]  ;;  %v9010_v31 = vcombine.low %v4032_v15, %v4036_v52  ;;  %v9495_v55 = vcombine.high %v4518_v25, %v4522_v36 }
 0x41c   :  { %v9019_v32 = vcombine.high %v4040_v45, %v4044_v27 }
 0x41e   :  { %8016 = vmatpush1.bf16.msra.mxu1 %v9454_v37  ;;  %8279 = vmatpush1.bf16.msra.mxu0 %v8978_v49  ;;  %v9494_v37 = vcombine.low %v4518_v25, %v4522_v36  ;;  %v9018_v49 = vcombine.low %v4040_v45, %v4044_v27 }
 0x41f   :  { %8017 = vmatprep.subr.bf16.mxu1 %v9463_v22  ;;  %8280 = vmatprep.subr.bf16.mxu0 %v8987_v39  ;;  %v9027_v22 = vcombine.high %v4048_v51, %v4052_v34  ;;  %v4534_v39 = vld [vmem:[%s14299_s5 + $0x1140] sm:$0xff] }
 0x420   :  { %v9510_v63 = vcombine.low %v4534_v39, %v4538_v40 }
 0x422   :  { %8018 = vmatpush1.bf16.msra.mxu1 %v9462_v47  ;;  %8281 = vmatpush1.bf16.msra.mxu0 %v8986_v48  ;;  %v9511_v47 = vcombine.high %v4534_v39, %v4538_v40  ;;  %v9035_v48 = vcombine.high %v4056_v42, %v4060_v11 }
 0x423   :  { %8028 = vmatprep.subr.bf16.mxu1 %v9471_v46  ;;  %8282 = vmatprep.subr.bf16.mxu0 %v8995_v57  ;;  %v4546_v46 = vld [vmem:[%s14299_s5 + $0x11a0] sm:$0xff]  ;;  %v4064_v57 = vld [vmem:[%s14299_s5 + $0x290] sm:$0xff] }
 0x424   :  { %v9519_v1 = vcombine.high %v4542_v50, %v4546_v46  ;;  %v9043_v2 = vcombine.high %v4064_v57, %v4068_v53  ;;  %v9518_v9 = vcombine.low %v4542_v50, %v4546_v46  ;;  %v9042_v14 = vcombine.low %v4064_v57, %v4068_v53 }
 0x425   :  { %8020 = vmatmul.mubr.bf16.vlgmr.msra.gmra.mrb[20].mxu1 %v12704_v7 }
 0x426   :  { %8029 = vmatpush1.bf16.msra.mxu1 %v9470_v13  ;;  %8060 = vmatprep.mubr.bf16.mxu1 %v12706_v30  ;;  %v4550_v13 = vld [vmem:[%s14299_s5 + $0x11c0] sm:$0xff] }
 0x427   :  { %8283 = vmatpush1.bf16.msra.mxu0 %v8994_v5  ;;  %8030 = vmatprep.subr.bf16.mxu1 %v9479_v60  ;;  %v4554_v5 = vld [vmem:[%s14299_s5 + $0x11e0] sm:$0xff]  ;;  %v4072_v60 = vld [vmem:[%s14299_s5 + $0x2d0] sm:$0xff] }
 0x428   :  { %8284 = vmatprep.subr.bf16.mxu0 %v9003_v8  ;;  %v4076_v8 = vld [vmem:[%s14299_s5 + $0x2f0] sm:$0xff]  ;;  %v9527_v15 = vcombine.high %v4550_v13, %v4554_v5  ;;  %v9526_v25 = vcombine.low %v4550_v13, %v4554_v5 }
 0x429   :  { %v9051_v52 = vcombine.high %v4072_v60, %v4076_v8  ;;  %v9050_v36 = vcombine.low %v4072_v60, %v4076_v8 }
 0x42a   :  { %8031 = vmatpush1.bf16.msra.mxu1 %v9478_v26  ;;  %v4558_v26 = vld [vmem:[%s14299_s5 + $0x1200] sm:$0xff] }
 0x42b   :  { %8285 = vmatpush1.bf16.msra.mxu0 %v9002_v21  ;;  %8032 = vmatprep.subr.bf16.mxu1 %v9487_v23  ;;  %v4562_v21 = vld [vmem:[%s14299_s5 + $0x1220] sm:$0xff]  ;;  %v4080_v23 = vld [vmem:[%s14299_s5 + $0x310] sm:$0xff] }
 0x42c   :  { %8286 = vmatprep.subr.bf16.mxu0 %v9011_v24  ;;  %v4084_v24 = vld [vmem:[%s14299_s5 + $0x330] sm:$0xff]  ;;  %v9535_v45 = vcombine.high %v4558_v26, %v4562_v21  ;;  %v9534_v41 = vcombine.low %v4558_v26, %v4562_v21  ;;  %v3558_v21 = vrot.slane %v12637_v54, %v12395_v61 }
 0x42d   :  { %v9059_v27 = vcombine.high %v4080_v23, %v4084_v24  ;;  %v9058_v33 = vcombine.low %v4080_v23, %v4084_v24  ;;  %v4132_v54 = vld [vmem:[%s14299_s5 + $0x4b0] sm:$0xff] }
 0x42e   :  { %8033 = vmatpush1.bf16.msra.mxu1 %v9486_v28  ;;  %v4566_v28 = vld [vmem:[%s14299_s5 + $0x1240] sm:$0xff] }
 0x42f   :  { %8287 = vmatpush1.bf16.msra.mxu0 %v9010_v31  ;;  %8034 = vmatprep.subr.bf16.mxu1 %v9495_v55  ;;  %v4570_v31 = vld [vmem:[%s14299_s5 + $0x1260] sm:$0xff]  ;;  %v4088_v55 = vld [vmem:[%s14299_s5 + $0x350] sm:$0xff] }
 0x430   :  { %8288 = vmatprep.subr.bf16.mxu0 %v9019_v32  ;;  %v4092_v32 = vld [vmem:[%s14299_s5 + $0x370] sm:$0xff]  ;;  %v9543_v51 = vcombine.high %v4566_v28, %v4570_v31  ;;  %v9542_v39 = vcombine.low %v4566_v28, %v4570_v31  ;;  %v3948_v31 = vadd.f32 %v12509_v20, %v3558_v21 }
 0x431   :  { %v9067_v34 = vcombine.high %v4088_v55, %v4092_v32  ;;  %v9066_v40 = vcombine.low %v4088_v55, %v4092_v32  ;;  %v4136_v20 = vld [vmem:[%s14299_s5 + $0x4d0] sm:$0xff] }
 0x432   :  { %8035 = vmatpush1.bf16.msra.mxu1 %v9494_v37  ;;  %v4574_v37 = vld [vmem:[%s14299_s5 + $0x1280] sm:$0xff] }
 0x433   :  { %8289 = vmatpush1.bf16.msra.mxu0 %v9018_v49  ;;  %8036 = vmatprep.subr.bf16.mxu1 %v9503_v38  ;;  %v4578_v49 = vld [vmem:[%s14299_s5 + $0x12a0] sm:$0xff]  ;;  %v4096_v38 = vld [vmem:[%s14299_s5 + $0x390] sm:$0xff] }
 0x434   :  { %8290 = vmatprep.subr.bf16.mxu0 %v9027_v22  ;;  %v4100_v22 = vld [vmem:[%s14299_s5 + $0x3b0] sm:$0xff]  ;;  %v9551_v42 = vcombine.high %v4574_v37, %v4578_v49  ;;  %v9550_v50 = vcombine.low %v4574_v37, %v4578_v49  ;;  %v3960_v49 = vmax.f32 %v3948_v31, 0.0 }
 0x435   :  { %v9075_v11 = vcombine.high %v4096_v38, %v4100_v22  ;;  %v9074_v46 = vcombine.low %v4096_v38, %v4100_v22 }
 0x436   :  { %8037 = vmatpush1.bf16.msra.mxu1 %v9502_v43  ;;  %v4582_v43 = vld [vmem:[%s14299_s5 + $0x12c0] sm:$0xff] }
 0x437   :  { %8291 = vmatpush1.bf16.msra.mxu0 %v9026_v44  ;;  %8038 = vmatprep.subr.bf16.mxu1 %v9511_v47  ;;  %v4586_v44 = vld [vmem:[%s14299_s5 + $0x12e0] sm:$0xff]  ;;  %v4104_v47 = vld [vmem:[%s14299_s5 + $0x3d0] sm:$0xff] }
 0x438   :  { %8292 = vmatprep.subr.bf16.mxu0 %v9035_v48  ;;  %v4108_v48 = vld [vmem:[%s14299_s5 + $0x3f0] sm:$0xff]  ;;  %v9559_v57 = vcombine.high %v4582_v43, %v4586_v44  ;;  %v9558_v13 = vcombine.low %v4582_v43, %v4586_v44 }
 0x439   :  { %v9083_v53 = vcombine.high %v4104_v47, %v4108_v48  ;;  %v9082_v5 = vcombine.low %v4104_v47, %v4108_v48  ;;  %v4148_v43 = vld [vmem:[%s14299_s5 + $0x530] sm:$0xff]  ;;  %v3970_v47 = vmin.f32 %v3960_v49, 6.0  ;;  %v4023_v49 = vld [vmem:[%s14299_s5 + $0x148] sm:$0xff] }
 0x43a   :  { %8039 = vmatpush1.bf16.msra.mxu1 %v9510_v63  ;;  %v4590_v63 = vld [vmem:[%s14299_s5 + $0x1300] sm:$0xff] }
 0x43b   :  { %8293 = vmatpush1.bf16.msra.mxu0 %v9034_v0  ;;  %8040 = vmatprep.subr.bf16.mxu1 %v9519_v1  ;;  %v4594_v0 = vld [vmem:[%s14299_s5 + $0x1320] sm:$0xff]  ;;  %v4112_v1 = vld [vmem:[%s14299_s5 + $0x410] sm:$0xff] }
 0x43c   :  { %8294 = vmatprep.subr.bf16.mxu0 %v9043_v2  ;;  %v4116_v2 = vld [vmem:[%s14299_s5 + $0x430] sm:$0xff]  ;;  %v9567_v60 = vcombine.high %v4590_v63, %v4594_v0  ;;  %v9566_v26 = vcombine.low %v4590_v63, %v4594_v0 }
 0x43d   :  { %v9091_v8 = vcombine.high %v4112_v1, %v4116_v2  ;;  %v9090_v23 = vcombine.low %v4112_v1, %v4116_v2  ;;  %v4152_v63 = vld [vmem:[%s14299_s5 + $0x550] sm:$0xff]  ;;  %v12907_v2 = vpack.c.bf16 %v3970_v47, %v3970_v47  ;;  %v4035_v47 = vld [vmem:[%s14299_s5 + $0x1a8] sm:$0xff] }
 0x43e   :  { %8041 = vmatpush1.bf16.msra.mxu1 %v9518_v9  ;;  %v4598_v9 = vld [vmem:[%s14299_s5 + $0x1340] sm:$0xff]  ;;  %v4156_v0 = vld [vmem:[%s14299_s5 + $0x570] sm:$0xff] }
 0x43f   :  { %8295 = vmatpush1.bf16.msra.mxu0 %v9042_v14  ;;  %8042 = vmatprep.subr.bf16.mxu1 %v9527_v15  ;;  %v4602_v14 = vld [vmem:[%s14299_s5 + $0x1360] sm:$0xff]  ;;  %v4120_v15 = vld [vmem:[%s14299_s5 + $0x450] sm:$0xff] }
 0x440   :  { %8296 = vmatprep.subr.bf16.mxu0 %v9051_v52  ;;  %v4124_v52 = vld [vmem:[%s14299_s5 + $0x470] sm:$0xff]  ;;  %v9575_v24 = vcombine.high %v4598_v9, %v4602_v14  ;;  %v9574_v28 = vcombine.low %v4598_v9, %v4602_v14  ;;  %v4003_v9 = vld [vmem:[%s14299_s5 + $0xa8] sm:$0xff] }
 0x441   :  { %v9098_v55 = vcombine.low %v4120_v15, %v4124_v52  ;;  %v4160_v14 = vld [vmem:[%s14299_s5 + $0x590] sm:$0xff] }
 0x442   :  { %8043 = vmatpush1.bf16.msra.mxu1 %v9526_v25  ;;  %v9099_v25 = vcombine.high %v4120_v15, %v4124_v52  ;;  %v4164_v15 = vld [vmem:[%s14299_s5 + $0x5b0] sm:$0xff] }
 0x443   :  { %8297 = vmatpush1.bf16.msra.mxu0 %v9050_v36  ;;  %8044 = vmatprep.subr.bf16.mxu1 %v9535_v45  ;;  %v4606_v36 = vld [vmem:[%s14299_s5 + $0x1380] sm:$0xff] }
 0x444   :  { %8298 = vmatprep.subr.bf16.mxu0 %v9059_v27  ;;  %v4610_v45 = vld [vmem:[%s14299_s5 + $0x13a0] sm:$0xff]  ;;  %v4128_v27 = vld [vmem:[%s14299_s5 + $0x490] sm:$0xff] }
 0x445   :  { %v9583_v32 = vcombine.high %v4606_v36, %v4610_v45  ;;  %v9582_v37 = vcombine.low %v4606_v36, %v4610_v45  ;;  %v9106_v38 = vcombine.low %v4128_v27, %v4132_v54  ;;  %v4168_v36 = vld [vmem:[%s14299_s5 + $0x5d0] sm:$0xff] }
 0x446   :  { %8045 = vmatpush1.bf16.msra.mxu1 %v9534_v41  ;;  %v9107_v41 = vcombine.high %v4128_v27, %v4132_v54  ;;  %v4172_v45 = vld [vmem:[%s14299_s5 + $0x5f0] sm:$0xff]  ;;  %v9138_v54 = vcombine.low %v4160_v14, %v4164_v15 }
 0x447   :  { %8299 = vmatpush1.bf16.msra.mxu0 %v9058_v33  ;;  %8046 = vmatprep.subr.bf16.mxu1 %v9543_v51  ;;  %v4614_v33 = vld [vmem:[%s14299_s5 + $0x13c0] sm:$0xff]  ;;  %v9147_v31 = vcombine.high %v4168_v36, %v4172_v45 }
 0x448   :  { %8300 = vmatprep.subr.bf16.mxu0 %v9067_v34  ;;  %v4618_v51 = vld [vmem:[%s14299_s5 + $0x13e0] sm:$0xff]  ;;  %v4140_v34 = vld [vmem:[%s14299_s5 + $0x4f0] sm:$0xff] }
 0x449   :  { %v9591_v22 = vcombine.high %v4614_v33, %v4618_v51  ;;  %v9590_v44 = vcombine.low %v4614_v33, %v4618_v51  ;;  %v9114_v48 = vcombine.low %v4136_v20, %v4140_v34  ;;  %v4180_v33 = vld [vmem:[%s14299_s5 + $0x630] sm:$0xff] }
 0x44a   :  { %8047 = vmatpush1.bf16.msra.mxu1 %v9542_v39  ;;  %v9115_v39 = vcombine.high %v4136_v20, %v4140_v34  ;;  %v9146_v20 = vcombine.low %v4168_v36, %v4172_v45  ;;  %v4055_v45 = vld [vmem:[%s14299_s5 + $0x248] sm:$0xff] }
 0x44b   :  { %8301 = vmatpush1.bf16.msra.mxu0 %v9066_v40  ;;  %8048 = vmatprep.subr.bf16.mxu1 %v9551_v42  ;;  %v3983_v40 = vld [vmem:[%s14299_s5 + $0x8] sm:$0xff] }
 0x44c   :  { %8302 = vmatprep.subr.bf16.mxu0 %v9075_v11  ;;  %v3987_v42 = vld [vmem:[%s14299_s5 + $0x28] sm:$0xff]  ;;  %v4144_v11 = vld [vmem:[%s14299_s5 + $0x510] sm:$0xff] }
 0x44d   :  { %v8960_v1 = vcombine.low %v3983_v40, %v3987_v42 }
 0x44e   :  { %8049 = vmatpush1.bf16.msra.mxu1 %v9550_v50  ;;  %v8961_v50 = vcombine.high %v3983_v40, %v3987_v42 }
 0x44f   :  { %8303 = vmatpush1.bf16.msra.mxu0 %v9074_v46  ;;  %8050 = vmatprep.subr.bf16.mxu1 %v9559_v57  ;;  %v9123_v46 = vcombine.high %v4144_v11, %v4148_v43  ;;  %v3991_v57 = vld [vmem:[%s14299_s5 + $0x48] sm:$0xff] }
 0x450   :  { %8304 = vmatprep.subr.bf16.mxu0 %v9083_v53  ;;  %v3995_v53 = vld [vmem:[%s14299_s5 + $0x68] sm:$0xff] }
 0x451   :  { %v8968_v52 = vcombine.low %v3991_v57, %v3995_v53 }
 0x452   :  { %8051 = vmatpush1.bf16.msra.mxu1 %v9558_v13  ;;  %v9122_v13 = vcombine.low %v4144_v11, %v4148_v43 }
 0x453   :  { %8305 = vmatpush1.bf16.msra.mxu0 %v9082_v5  ;;  %8052 = vmatprep.subr.bf16.mxu1 %v9567_v60  ;;  %v8969_v5 = vcombine.high %v3991_v57, %v3995_v53  ;;  %v9131_v60 = vcombine.high %v4152_v63, %v4156_v0 }
 0x454   :  { %8315 = vmatprep.subr.bf16.mxu0 %v9091_v8  ;;  %v3999_v8 = vld [vmem:[%s14299_s5 + $0x88] sm:$0xff] }
 0x455   :  { %v8977_v21 = vcombine.high %v3999_v8, %v4003_v9  ;;  %v8976_v27 = vcombine.low %v3999_v8, %v4003_v9 }
 0x456   :  { %8053 = vmatpush1.bf16.msra.mxu1 %v9566_v26  ;;  %8307 = vmatmul.mubr.bf16.vlgmr.msra.gmra.mrb[252].mxu0 %v12423_v12  ;;  %v9130_v26 = vcombine.low %v4152_v63, %v4156_v0  ;;  %v4039_v0 = vld [vmem:[%s14299_s5 + $0x1c8] sm:$0xff] }
 0x457   :  { %8316 = vmatpush1.bf16.msra.mxu0 %v9090_v23  ;;  %8347 = vmatprep.mubr.bf16.mxu0 %v12447_v29  ;;  %v9139_v23 = vcombine.high %v4160_v14, %v4164_v15  ;;  %v4047_v15 = vld [vmem:[%s14299_s5 + $0x208] sm:$0xff] }
 0x458   :  { %8054 = vmatprep.subr.bf16.mxu1 %v9575_v24  ;;  %8317 = vmatprep.subr.bf16.mxu0 %v9099_v25  ;;  %v4007_v24 = vld [vmem:[%s14299_s5 + $0xc8] sm:$0xff] }
 0x459   :  { %v4011_v25 = vld [vmem:[%s14299_s5 + $0xe8] sm:$0xff] }
 0x45a   :  { %8055 = vmatpush1.bf16.msra.mxu1 %v9574_v28  ;;  %v8985_v28 = vcombine.high %v4007_v24, %v4011_v25  ;;  %v8984_v51 = vcombine.low %v4007_v24, %v4011_v25 }
 0x45b   :  { %8318 = vmatpush1.bf16.msra.mxu0 %v9098_v55  ;;  %8056 = vmatprep.subr.bf16.mxu1 %v9583_v32  ;;  %v4015_v55 = vld [vmem:[%s14299_s5 + $0x108] sm:$0xff] }
 0x45c   :  { %8319 = vmatprep.subr.bf16.mxu0 %v9107_v41  ;;  %v4019_v32 = vld [vmem:[%s14299_s5 + $0x128] sm:$0xff]  ;;  %v4176_v41 = vld [vmem:[%s14299_s5 + $0x610] sm:$0xff] }
 0x45d   :  { %v8993_v34 = vcombine.high %v4015_v55, %v4019_v32  ;;  %v8992_v40 = vcombine.low %v4015_v55, %v4019_v32  ;;  %v9154_v42 = vcombine.low %v4176_v41, %v4180_v33 }
 0x45e   :  { %8057 = vmatpush1.bf16.msra.mxu1 %v9582_v37  ;;  %v9155_v37 = vcombine.high %v4176_v41, %v4180_v33  ;;  %v4063_v33 = vld [vmem:[%s14299_s5 + $0x288] sm:$0xff] }
 0x45f   :  { %8320 = vmatpush1.bf16.msra.mxu0 %v9106_v38  ;;  %8058 = vmatprep.subr.bf16.mxu1 %v9591_v22  ;;  %v4027_v38 = vld [vmem:[%s14299_s5 + $0x168] sm:$0xff]  ;;  %v4184_v22 = vld [vmem:[%s14299_s5 + $0x650] sm:$0xff] }
 0x460   :  { %8321 = vmatprep.subr.bf16.mxu0 %v9115_v39  ;;  %v4188_v39 = vld [vmem:[%s14299_s5 + $0x670] sm:$0xff]  ;;  %v9001_v11 = vcombine.high %v4023_v49, %v4027_v38 }
 0x461   :  { %v9163_v43 = vcombine.high %v4184_v22, %v4188_v39  ;;  %v9162_v57 = vcombine.low %v4184_v22, %v4188_v39  ;;  %v4071_v39 = vld [vmem:[%s14299_s5 + $0x2c8] sm:$0xff] }
 0x462   :  { %8059 = vmatpush1.bf16.msra.mxu1 %v9590_v44  ;;  %v4031_v44 = vld [vmem:[%s14299_s5 + $0x188] sm:$0xff] }
 0x463   :  { %8322 = vmatpush1.bf16.msra.mxu0 %v9114_v48  ;;  %8069 = vmatprep.subr.bf16.mxu1 %v8961_v50  ;;  %v4192_v48 = vld [vmem:[%s14299_s5 + $0x690] sm:$0xff]  ;;  %v9009_v53 = vcombine.high %v4031_v44, %v4035_v47 }
 0x464   :  { %8323 = vmatprep.subr.bf16.mxu0 %v9123_v46  ;;  %v4196_v50 = vld [vmem:[%s14299_s5 + $0x6b0] sm:$0xff]  ;;  %v9000_v46 = vcombine.low %v4023_v49, %v4027_v38 }
 0x465   :  { %8061 = vmatmul.mubr.bf16.vlgmr.msra.gmra.mrb[20].mxu1 %v12907_v2  ;;  %v9171_v63 = vcombine.high %v4192_v48, %v4196_v50  ;;  %v9170_v8 = vcombine.low %v4192_v48, %v4196_v50  ;;  %v4079_v50 = vld [vmem:[%s14299_s5 + $0x308] sm:$0xff] }
 0x466   :  { %8070 = vmatpush1.bf16.msra.mxu1 %v8960_v1  ;;  %8101 = vmatprep.mubr.bf16.mxu1 %v12419_v10  ;;  %v4043_v1 = vld [vmem:[%s14299_s5 + $0x1e8] sm:$0xff] }
 0x467   :  { %8324 = vmatpush1.bf16.msra.mxu0 %v9122_v13  ;;  %8071 = vmatprep.subr.bf16.mxu1 %v8969_v5  ;;  %v4200_v13 = vld [vmem:[%s14299_s5 + $0x6d0] sm:$0xff]  ;;  %v9017_v9 = vcombine.high %v4039_v0, %v4043_v1 }
 0x468   :  { %8325 = vmatprep.subr.bf16.mxu0 %v9131_v60  ;;  %v4204_v5 = vld [vmem:[%s14299_s5 + $0x6f0] sm:$0xff]  ;;  %v9008_v60 = vcombine.low %v4031_v44, %v4035_v47 }
 0x469   :  { %v9179_v14 = vcombine.high %v4200_v13, %v4204_v5  ;;  %v9178_v24 = vcombine.low %v4200_v13, %v4204_v5  ;;  %v4087_v5 = vld [vmem:[%s14299_s5 + $0x348] sm:$0xff] }
 0x46a   :  { %8072 = vmatpush1.bf16.msra.mxu1 %v8968_v52  ;;  %v4051_v52 = vld [vmem:[%s14299_s5 + $0x228] sm:$0xff] }
 0x46b   :  { %8326 = vmatpush1.bf16.msra.mxu0 %v9130_v26  ;;  %8073 = vmatprep.subr.bf16.mxu1 %v8977_v21  ;;  %v4208_v26 = vld [vmem:[%s14299_s5 + $0x710] sm:$0xff]  ;;  %v9025_v25 = vcombine.high %v4047_v15, %v4051_v52 }
 0x46c   :  { %8327 = vmatprep.subr.bf16.mxu0 %v9139_v23  ;;  %v4212_v21 = vld [vmem:[%s14299_s5 + $0x730] sm:$0xff]  ;;  %v9016_v23 = vcombine.low %v4039_v0, %v4043_v1 }
 0x46d   :  { %v9187_v36 = vcombine.high %v4208_v26, %v4212_v21  ;;  %v9186_v55 = vcombine.low %v4208_v26, %v4212_v21  ;;  %v4095_v21 = vld [vmem:[%s14299_s5 + $0x388] sm:$0xff] }
 0x46e   :  { %8074 = vmatpush1.bf16.msra.mxu1 %v8976_v27  ;;  %v4059_v27 = vld [vmem:[%s14299_s5 + $0x268] sm:$0xff] }
 0x46f   :  { %8328 = vmatpush1.bf16.msra.mxu0 %v9138_v54  ;;  %8075 = vmatprep.subr.bf16.mxu1 %v8985_v28  ;;  %v4216_v54 = vld [vmem:[%s14299_s5 + $0x750] sm:$0xff]  ;;  %v9033_v32 = vcombine.high %v4055_v45, %v4059_v27 }
 0x470   :  { %8329 = vmatprep.subr.bf16.mxu0 %v9147_v31  ;;  %v4220_v28 = vld [vmem:[%s14299_s5 + $0x770] sm:$0xff]  ;;  %v9024_v31 = vcombine.low %v4047_v15, %v4051_v52 }
 0x471   :  { %v9195_v41 = vcombine.high %v4216_v54, %v4220_v28  ;;  %v9194_v49 = vcombine.low %v4216_v54, %v4220_v28  ;;  %v4103_v28 = vld [vmem:[%s14299_s5 + $0x3c8] sm:$0xff] }
 0x472   :  { %8076 = vmatpush1.bf16.msra.mxu1 %v8984_v51  ;;  %v4067_v51 = vld [vmem:[%s14299_s5 + $0x2a8] sm:$0xff] }
 0x473   :  { %8330 = vmatpush1.bf16.msra.mxu0 %v9146_v20  ;;  %8077 = vmatprep.subr.bf16.mxu1 %v8993_v34  ;;  %v4224_v20 = vld [vmem:[%s14299_s5 + $0x790] sm:$0xff]  ;;  %v9041_v38 = vcombine.high %v4063_v33, %v4067_v51 }
 0x474   :  { %8331 = vmatprep.subr.bf16.mxu0 %v9155_v37  ;;  %v4228_v34 = vld [vmem:[%s14299_s5 + $0x7b0] sm:$0xff]  ;;  %v9032_v37 = vcombine.low %v4055_v45, %v4059_v27 }
 0x475   :  { %v9203_v22 = vcombine.high %v4224_v20, %v4228_v34  ;;  %v9202_v44 = vcombine.low %v4224_v20, %v4228_v34  ;;  %v4111_v34 = vld [vmem:[%s14299_s5 + $0x408] sm:$0xff] }
 0x476   :  { %8078 = vmatpush1.bf16.msra.mxu1 %v8992_v40  ;;  %v4075_v40 = vld [vmem:[%s14299_s5 + $0x2e8] sm:$0xff] }
 0x477   :  { %8332 = vmatpush1.bf16.msra.mxu0 %v9154_v42  ;;  %8079 = vmatprep.subr.bf16.mxu1 %v9001_v11  ;;  %v4232_v42 = vld [vmem:[%s14299_s5 + $0x7d0] sm:$0xff]  ;;  %v9049_v47 = vcombine.high %v4071_v39, %v4075_v40 }
 0x478   :  { %8333 = vmatprep.subr.bf16.mxu0 %v9163_v43  ;;  %v4236_v11 = vld [vmem:[%s14299_s5 + $0x7f0] sm:$0xff]  ;;  %v9040_v43 = vcombine.low %v4063_v33, %v4067_v51 }
 0x479   :  { %v9211_v48 = vcombine.high %v4232_v42, %v4236_v11  ;;  %v9210_v0 = vcombine.low %v4232_v42, %v4236_v11  ;;  %v4119_v11 = vld [vmem:[%s14299_s5 + $0x448] sm:$0xff] }
 0x47a   :  { %8080 = vmatpush1.bf16.msra.mxu1 %v9000_v46  ;;  %v4083_v46 = vld [vmem:[%s14299_s5 + $0x328] sm:$0xff] }
 0x47b   :  { %8334 = vmatpush1.bf16.msra.mxu0 %v9162_v57  ;;  %8081 = vmatprep.subr.bf16.mxu1 %v9009_v53  ;;  %v4240_v57 = vld [vmem:[%s14299_s5 + $0x810] sm:$0xff]  ;;  %v9057_v1 = vcombine.high %v4079_v50, %v4083_v46 }
 0x47c   :  { %8335 = vmatprep.subr.bf16.mxu0 %v9171_v63  ;;  %v4244_v53 = vld [vmem:[%s14299_s5 + $0x830] sm:$0xff]  ;;  %v9048_v63 = vcombine.low %v4071_v39, %v4075_v40 }
 0x47d   :  { %v9219_v13 = vcombine.high %v4240_v57, %v4244_v53  ;;  %v9218_v15 = vcombine.low %v4240_v57, %v4244_v53  ;;  %v4127_v53 = vld [vmem:[%s14299_s5 + $0x488] sm:$0xff] }
 0x47e   :  { %8082 = vmatpush1.bf16.msra.mxu1 %v9008_v60  ;;  %v4091_v60 = vld [vmem:[%s14299_s5 + $0x368] sm:$0xff] }
 0x47f   :  { %8336 = vmatpush1.bf16.msra.mxu0 %v9170_v8  ;;  %8083 = vmatprep.subr.bf16.mxu1 %v9017_v9  ;;  %v4248_v8 = vld [vmem:[%s14299_s5 + $0x850] sm:$0xff]  ;;  %v9065_v52 = vcombine.high %v4087_v5, %v4091_v60 }
 0x480   :  { %8337 = vmatprep.subr.bf16.mxu0 %v9179_v14  ;;  %v4252_v9 = vld [vmem:[%s14299_s5 + $0x870] sm:$0xff]  ;;  %v9056_v14 = vcombine.low %v4079_v50, %v4083_v46 }
 0x481   :  { %v9227_v26 = vcombine.high %v4248_v8, %v4252_v9  ;;  %v9226_v45 = vcombine.low %v4248_v8, %v4252_v9  ;;  %v4135_v9 = vld [vmem:[%s14299_s5 + $0x4c8] sm:$0xff] }
 0x482   :  { %8084 = vmatpush1.bf16.msra.mxu1 %v9016_v23  ;;  %v4099_v23 = vld [vmem:[%s14299_s5 + $0x3a8] sm:$0xff] }
 0x483   :  { %8338 = vmatpush1.bf16.msra.mxu0 %v9178_v24  ;;  %8085 = vmatprep.subr.bf16.mxu1 %v9025_v25  ;;  %v4256_v24 = vld [vmem:[%s14299_s5 + $0x890] sm:$0xff]  ;;  %v9073_v27 = vcombine.high %v4095_v21, %v4099_v23 }
 0x484   :  { %8339 = vmatprep.subr.bf16.mxu0 %v9187_v36  ;;  %v4260_v25 = vld [vmem:[%s14299_s5 + $0x8b0] sm:$0xff]  ;;  %v9064_v36 = vcombine.low %v4087_v5, %v4091_v60 }
 0x485   :  { %v9235_v54 = vcombine.high %v4256_v24, %v4260_v25  ;;  %v9234_v33 = vcombine.low %v4256_v24, %v4260_v25  ;;  %v4143_v25 = vld [vmem:[%s14299_s5 + $0x508] sm:$0xff] }
 0x486   :  { %8086 = vmatpush1.bf16.msra.mxu1 %v9024_v31  ;;  %v4107_v31 = vld [vmem:[%s14299_s5 + $0x3e8] sm:$0xff] }
 0x487   :  { %8340 = vmatpush1.bf16.msra.mxu0 %v9186_v55  ;;  %8087 = vmatprep.subr.bf16.mxu1 %v9033_v32  ;;  %v4264_v55 = vld [vmem:[%s14299_s5 + $0x8d0] sm:$0xff]  ;;  %v9081_v51 = vcombine.high %v4103_v28, %v4107_v31 }
 0x488   :  { %8341 = vmatprep.subr.bf16.mxu0 %v9195_v41  ;;  %v4268_v32 = vld [vmem:[%s14299_s5 + $0x8f0] sm:$0xff]  ;;  %v9072_v41 = vcombine.low %v4095_v21, %v4099_v23 }
 0x489   :  { %v9243_v20 = vcombine.high %v4264_v55, %v4268_v32  ;;  %v9242_v39 = vcombine.low %v4264_v55, %v4268_v32  ;;  %v4151_v32 = vld [vmem:[%s14299_s5 + $0x548] sm:$0xff] }
 0x48a   :  { %8088 = vmatpush1.bf16.msra.mxu1 %v9032_v37  ;;  %v4115_v37 = vld [vmem:[%s14299_s5 + $0x428] sm:$0xff] }
 0x48b   :  { %8342 = vmatpush1.bf16.msra.mxu0 %v9194_v49  ;;  %8089 = vmatprep.subr.bf16.mxu1 %v9041_v38  ;;  %v4272_v49 = vld [vmem:[%s14299_s5 + $0x910] sm:$0xff]  ;;  %v9089_v40 = vcombine.high %v4111_v34, %v4115_v37 }
 0x48c   :  { %8343 = vmatprep.subr.bf16.mxu0 %v9203_v22  ;;  %v4276_v38 = vld [vmem:[%s14299_s5 + $0x930] sm:$0xff]  ;;  %v9080_v22 = vcombine.low %v4103_v28, %v4107_v31 }
 0x48d   :  { %v9251_v42 = vcombine.high %v4272_v49, %v4276_v38  ;;  %v9250_v50 = vcombine.low %v4272_v49, %v4276_v38  ;;  %v4159_v38 = vld [vmem:[%s14299_s5 + $0x588] sm:$0xff] }
 0x48e   :  { %8090 = vmatpush1.bf16.msra.mxu1 %v9040_v43  ;;  %v4123_v43 = vld [vmem:[%s14299_s5 + $0x468] sm:$0xff] }
 0x48f   :  { %8344 = vmatpush1.bf16.msra.mxu0 %v9202_v44  ;;  %8091 = vmatprep.subr.bf16.mxu1 %v9049_v47  ;;  %v4280_v44 = vld [vmem:[%s14299_s5 + $0x950] sm:$0xff]  ;;  %v9097_v46 = vcombine.high %v4119_v11, %v4123_v43 }
 0x490   :  { %8345 = vmatprep.subr.bf16.mxu0 %v9211_v48  ;;  %v4284_v47 = vld [vmem:[%s14299_s5 + $0x970] sm:$0xff]  ;;  %v9088_v48 = vcombine.low %v4111_v34, %v4115_v37 }
 0x491   :  { %v9259_v57 = vcombine.high %v4280_v44, %v4284_v47  ;;  %v9258_v5 = vcombine.low %v4280_v44, %v4284_v47  ;;  %v4167_v47 = vld [vmem:[%s14299_s5 + $0x5c8] sm:$0xff] }
 0x492   :  { %8092 = vmatpush1.bf16.msra.mxu1 %v9048_v63  ;;  %v4131_v63 = vld [vmem:[%s14299_s5 + $0x4a8] sm:$0xff] }
 0x493   :  { %8346 = vmatpush1.bf16.msra.mxu0 %v9210_v0  ;;  %8093 = vmatprep.subr.bf16.mxu1 %v9057_v1  ;;  %v4288_v0 = vld [vmem:[%s14299_s5 + $0x990] sm:$0xff]  ;;  %v9105_v60 = vcombine.high %v4127_v53, %v4131_v63 }
 0x494   :  { %8356 = vmatprep.subr.bf16.mxu0 %v9219_v13  ;;  %v4292_v1 = vld [vmem:[%s14299_s5 + $0x9b0] sm:$0xff]  ;;  %v9096_v13 = vcombine.low %v4119_v11, %v4123_v43 }
 0x495   :  { %v9267_v8 = vcombine.high %v4288_v0, %v4292_v1  ;;  %v9266_v21 = vcombine.low %v4288_v0, %v4292_v1  ;;  %v4175_v1 = vld [vmem:[%s14299_s5 + $0x608] sm:$0xff] }
 0x496   :  { %8094 = vmatpush1.bf16.msra.mxu1 %v9056_v14  ;;  %8348 = vmatmul.mubr.bf16.vlgmr.msra.gmra.mrb[252].mxu0 %v12645_v17  ;;  %v4139_v14 = vld [vmem:[%s14299_s5 + $0x4e8] sm:$0xff] }
 0x497   :  { %8357 = vmatpush1.bf16.msra.mxu0 %v9218_v15  ;;  %8388 = vmatprep.mubr.bf16.mxu0 %v12472_v19  ;;  %v4296_v15 = vld [vmem:[%s14299_s5 + $0x9d0] sm:$0xff]  ;;  %v9113_v23 = vcombine.high %v4135_v9, %v4139_v14 }
 0x498   :  { %8095 = vmatprep.subr.bf16.mxu1 %v9065_v52  ;;  %8358 = vmatprep.subr.bf16.mxu0 %v9227_v26  ;;  %v4300_v52 = vld [vmem:[%s14299_s5 + $0x9f0] sm:$0xff]  ;;  %v9104_v26 = vcombine.low %v4127_v53, %v4131_v63 }
 0x499   :  { %v9275_v24 = vcombine.high %v4296_v15, %v4300_v52  ;;  %v9274_v28 = vcombine.low %v4296_v15, %v4300_v52  ;;  %v4183_v52 = vld [vmem:[%s14299_s5 + $0x648] sm:$0xff] }
 0x49a   :  { %8096 = vmatpush1.bf16.msra.mxu1 %v9064_v36  ;;  %v4147_v36 = vld [vmem:[%s14299_s5 + $0x528] sm:$0xff] }
 0x49b   :  { %8359 = vmatpush1.bf16.msra.mxu0 %v9226_v45  ;;  %8097 = vmatprep.subr.bf16.mxu1 %v9073_v27  ;;  %v4304_v45 = vld [vmem:[%s14299_s5 + $0xa10] sm:$0xff]  ;;  %v9121_v31 = vcombine.high %v4143_v25, %v4147_v36 }
 0x49c   :  { %8360 = vmatprep.subr.bf16.mxu0 %v9235_v54  ;;  %v4308_v27 = vld [vmem:[%s14299_s5 + $0xa30] sm:$0xff]  ;;  %v9112_v54 = vcombine.low %v4135_v9, %v4139_v14 }
 0x49d   :  { %v9283_v55 = vcombine.high %v4304_v45, %v4308_v27  ;;  %v9282_v34 = vcombine.low %v4304_v45, %v4308_v27  ;;  %v4191_v27 = vld [vmem:[%s14299_s5 + $0x688] sm:$0xff] }
 0x49e   :  { %8098 = vmatpush1.bf16.msra.mxu1 %v9072_v41  ;;  %v4155_v41 = vld [vmem:[%s14299_s5 + $0x568] sm:$0xff] }
 0x49f   :  { %8361 = vmatpush1.bf16.msra.mxu0 %v9234_v33  ;;  %8099 = vmatprep.subr.bf16.mxu1 %v9081_v51  ;;  %v4312_v33 = vld [vmem:[%s14299_s5 + $0xa50] sm:$0xff]  ;;  %v9129_v37 = vcombine.high %v4151_v32, %v4155_v41 }
 0x4a0   :  { %8362 = vmatprep.subr.bf16.mxu0 %v9243_v20  ;;  %v4316_v51 = vld [vmem:[%s14299_s5 + $0xa70] sm:$0xff]  ;;  %v9120_v20 = vcombine.low %v4143_v25, %v4147_v36 }
 0x4a1   :  { %v9291_v49 = vcombine.high %v4312_v33, %v4316_v51  ;;  %v9290_v11 = vcombine.low %v4312_v33, %v4316_v51  ;;  %v4199_v51 = vld [vmem:[%s14299_s5 + $0x6c8] sm:$0xff] }
 0x4a2   :  { %8100 = vmatpush1.bf16.msra.mxu1 %v9080_v22  ;;  %v4163_v22 = vld [vmem:[%s14299_s5 + $0x5a8] sm:$0xff] }
 0x4a3   :  { %8363 = vmatpush1.bf16.msra.mxu0 %v9242_v39  ;;  %8110 = vmatprep.subr.bf16.mxu1 %v9089_v40  ;;  %v4320_v39 = vld [vmem:[%s14299_s5 + $0xa90] sm:$0xff]  ;;  %v9137_v43 = vcombine.high %v4159_v38, %v4163_v22 }
 0x4a4   :  { %8364 = vmatprep.subr.bf16.mxu0 %v9251_v42  ;;  %v4324_v40 = vld [vmem:[%s14299_s5 + $0xab0] sm:$0xff]  ;;  %v9128_v42 = vcombine.low %v4151_v32, %v4155_v41 }
 0x4a5   :  { %8102 = vmatmul.mubr.bf16.vlgmr.msra.gmra.mrb[24].mxu1 %v12423_v12  ;;  %v9299_v44 = vcombine.high %v4320_v39, %v4324_v40  ;;  %v9298_v53 = vcombine.low %v4320_v39, %v4324_v40  ;;  %v4207_v40 = vld [vmem:[%s14299_s5 + $0x708] sm:$0xff] }
 0x4a6   :  { %8111 = vmatpush1.bf16.msra.mxu1 %v9088_v48  ;;  %8142 = vmatprep.mubr.bf16.mxu1 %v12447_v29  ;;  %v4171_v48 = vld [vmem:[%s14299_s5 + $0x5e8] sm:$0xff] }
 0x4a7   :  { %8365 = vmatpush1.bf16.msra.mxu0 %v9250_v50  ;;  %8112 = vmatprep.subr.bf16.mxu1 %v9097_v46  ;;  %v4328_v50 = vld [vmem:[%s14299_s5 + $0xad0] sm:$0xff]  ;;  %v9145_v63 = vcombine.high %v4167_v47, %v4171_v48 }
 0x4a8   :  { %8366 = vmatprep.subr.bf16.mxu0 %v9259_v57  ;;  %v4332_v46 = vld [vmem:[%s14299_s5 + $0xaf0] sm:$0xff]  ;;  %v9136_v57 = vcombine.low %v4159_v38, %v4163_v22 }
 0x4a9   :  { %v9307_v0 = vcombine.high %v4328_v50, %v4332_v46  ;;  %v9306_v9 = vcombine.low %v4328_v50, %v4332_v46  ;;  %v4215_v46 = vld [vmem:[%s14299_s5 + $0x748] sm:$0xff] }
 0x4aa   :  { %8113 = vmatpush1.bf16.msra.mxu1 %v9096_v13  ;;  %v4179_v13 = vld [vmem:[%s14299_s5 + $0x628] sm:$0xff] }
 0x4ab   :  { %8367 = vmatpush1.bf16.msra.mxu0 %v9258_v5  ;;  %8114 = vmatprep.subr.bf16.mxu1 %v9105_v60  ;;  %v4336_v5 = vld [vmem:[%s14299_s5 + $0xb10] sm:$0xff]  ;;  %v9153_v14 = vcombine.high %v4175_v1, %v4179_v13 }
 0x4ac   :  { %8368 = vmatprep.subr.bf16.mxu0 %v9267_v8  ;;  %v4340_v60 = vld [vmem:[%s14299_s5 + $0xb30] sm:$0xff]  ;;  %v9144_v8 = vcombine.low %v4167_v47, %v4171_v48 }
 0x4ad   :  { %v9315_v15 = vcombine.high %v4336_v5, %v4340_v60  ;;  %v9314_v25 = vcombine.low %v4336_v5, %v4340_v60  ;;  %v4223_v60 = vld [vmem:[%s14299_s5 + $0x788] sm:$0xff] }
 0x4ae   :  { %8115 = vmatpush1.bf16.msra.mxu1 %v9104_v26  ;;  %v4187_v26 = vld [vmem:[%s14299_s5 + $0x668] sm:$0xff] }
 0x4af   :  { %8369 = vmatpush1.bf16.msra.mxu0 %v9266_v21  ;;  %8116 = vmatprep.subr.bf16.mxu1 %v9113_v23  ;;  %v4344_v21 = vld [vmem:[%s14299_s5 + $0xb50] sm:$0xff]  ;;  %v9161_v36 = vcombine.high %v4183_v52, %v4187_v26 }
 0x4b0   :  { %8370 = vmatprep.subr.bf16.mxu0 %v9275_v24  ;;  %v4348_v23 = vld [vmem:[%s14299_s5 + $0xb70] sm:$0xff]  ;;  %v9152_v24 = vcombine.low %v4175_v1, %v4179_v13 }
 0x4b1   :  { %v9323_v45 = vcombine.high %v4344_v21, %v4348_v23  ;;  %v9322_v32 = vcombine.low %v4344_v21, %v4348_v23  ;;  %v4231_v23 = vld [vmem:[%s14299_s5 + $0x7c8] sm:$0xff] }
 0x4b2   :  { %8117 = vmatpush1.bf16.msra.mxu1 %v9112_v54  ;;  %v4195_v54 = vld [vmem:[%s14299_s5 + $0x6a8] sm:$0xff] }
 0x4b3   :  { %8371 = vmatpush1.bf16.msra.mxu0 %v9274_v28  ;;  %8118 = vmatprep.subr.bf16.mxu1 %v9121_v31  ;;  %v4352_v28 = vld [vmem:[%s14299_s5 + $0xb90] sm:$0xff]  ;;  %v9169_v41 = vcombine.high %v4191_v27, %v4195_v54 }
 0x4b4   :  { %8372 = vmatprep.subr.bf16.mxu0 %v9283_v55  ;;  %v4356_v31 = vld [vmem:[%s14299_s5 + $0xbb0] sm:$0xff]  ;;  %v9160_v55 = vcombine.low %v4183_v52, %v4187_v26 }
 0x4b5   :  { %v9331_v33 = vcombine.high %v4352_v28, %v4356_v31  ;;  %v9330_v38 = vcombine.low %v4352_v28, %v4356_v31  ;;  %v4239_v31 = vld [vmem:[%s14299_s5 + $0x808] sm:$0xff] }
 0x4b6   :  { %8119 = vmatpush1.bf16.msra.mxu1 %v9120_v20  ;;  %v4203_v20 = vld [vmem:[%s14299_s5 + $0x6e8] sm:$0xff] }
 0x4b7   :  { %8373 = vmatpush1.bf16.msra.mxu0 %v9282_v34  ;;  %8120 = vmatprep.subr.bf16.mxu1 %v9129_v37  ;;  %v4360_v34 = vld [vmem:[%s14299_s5 + $0xbd0] sm:$0xff]  ;;  %v9177_v22 = vcombine.high %v4199_v51, %v4203_v20 }
 0x4b8   :  { %8374 = vmatprep.subr.bf16.mxu0 %v9291_v49  ;;  %v4364_v37 = vld [vmem:[%s14299_s5 + $0xbf0] sm:$0xff]  ;;  %v9168_v49 = vcombine.low %v4191_v27, %v4195_v54 }
 0x4b9   :  { %v9339_v39 = vcombine.high %v4360_v34, %v4364_v37  ;;  %v9338_v47 = vcombine.low %v4360_v34, %v4364_v37  ;;  %v4247_v37 = vld [vmem:[%s14299_s5 + $0x848] sm:$0xff] }
 0x4ba   :  { %8121 = vmatpush1.bf16.msra.mxu1 %v9128_v42  ;;  %v4211_v42 = vld [vmem:[%s14299_s5 + $0x728] sm:$0xff] }
 0x4bb   :  { %8375 = vmatpush1.bf16.msra.mxu0 %v9290_v11  ;;  %8122 = vmatprep.subr.bf16.mxu1 %v9137_v43  ;;  %v4368_v11 = vld [vmem:[%s14299_s5 + $0xc10] sm:$0xff]  ;;  %v9185_v48 = vcombine.high %v4207_v40, %v4211_v42 }
 0x4bc   :  { %8376 = vmatprep.subr.bf16.mxu0 %v9299_v44  ;;  %v4372_v43 = vld [vmem:[%s14299_s5 + $0xc30] sm:$0xff]  ;;  %v9176_v44 = vcombine.low %v4199_v51, %v4203_v20 }
 0x4bd   :  { %v9347_v50 = vcombine.high %v4368_v11, %v4372_v43  ;;  %v9346_v1 = vcombine.low %v4368_v11, %v4372_v43  ;;  %v4255_v43 = vld [vmem:[%s14299_s5 + $0x888] sm:$0xff] }
 0x4be   :  { %8123 = vmatpush1.bf16.msra.mxu1 %v9136_v57  ;;  %v4219_v57 = vld [vmem:[%s14299_s5 + $0x768] sm:$0xff] }
 0x4bf   :  { %8377 = vmatpush1.bf16.msra.mxu0 %v9298_v53  ;;  %8124 = vmatprep.subr.bf16.mxu1 %v9145_v63  ;;  %v4376_v53 = vld [vmem:[%s14299_s5 + $0xc50] sm:$0xff]  ;;  %v9193_v13 = vcombine.high %v4215_v46, %v4219_v57 }
 0x4c0   :  { %8378 = vmatprep.subr.bf16.mxu0 %v9307_v0  ;;  %v4380_v63 = vld [vmem:[%s14299_s5 + $0xc70] sm:$0xff]  ;;  %v9184_v0 = vcombine.low %v4207_v40, %v4211_v42 }
 0x4c1   :  { %v9355_v5 = vcombine.high %v4376_v53, %v4380_v63  ;;  %v9354_v52 = vcombine.low %v4376_v53, %v4380_v63 }
 0x4c2   :  { %8125 = vmatpush1.bf16.msra.mxu1 %v9144_v8  ;;  %v4227_v8 = vld [vmem:[%s14299_s5 + $0x7a8] sm:$0xff] }
 0x4c3   :  { %8379 = vmatpush1.bf16.msra.mxu0 %v9306_v9  ;;  %8126 = vmatprep.subr.bf16.mxu1 %v9153_v14  ;;  %v4384_v9 = vld [vmem:[%s14299_s5 + $0xc90] sm:$0xff]  ;;  %v9201_v26 = vcombine.high %v4223_v60, %v4227_v8 }
 0x4c4   :  { %8380 = vmatprep.subr.bf16.mxu0 %v9315_v15  ;;  %v4388_v14 = vld [vmem:[%s14299_s5 + $0xcb0] sm:$0xff]  ;;  %v9192_v15 = vcombine.low %v4215_v46, %v4219_v57 }
 0x4c5   :  { %v9363_v21 = vcombine.high %v4384_v9, %v4388_v14  ;;  %v9362_v27 = vcombine.low %v4384_v9, %v4388_v14 }
 0x4c6   :  { %8127 = vmatpush1.bf16.msra.mxu1 %v9152_v24  ;;  %v4235_v24 = vld [vmem:[%s14299_s5 + $0x7e8] sm:$0xff] }
 0x4c7   :  { %8381 = vmatpush1.bf16.msra.mxu0 %v9314_v25  ;;  %8128 = vmatprep.subr.bf16.mxu1 %v9161_v36  ;;  %v4392_v25 = vld [vmem:[%s14299_s5 + $0xcd0] sm:$0xff]  ;;  %v9209_v54 = vcombine.high %v4231_v23, %v4235_v24 }
 0x4c8   :  { %8382 = vmatprep.subr.bf16.mxu0 %v9323_v45  ;;  %v4396_v36 = vld [vmem:[%s14299_s5 + $0xcf0] sm:$0xff]  ;;  %v9200_v45 = vcombine.low %v4223_v60, %v4227_v8 }
 0x4c9   :  { %v9371_v28 = vcombine.high %v4392_v25, %v4396_v36  ;;  %v9370_v51 = vcombine.low %v4392_v25, %v4396_v36  ;;  %v4428_v60 = vld [vmem:[%s14299_s5 + $0xdf0] sm:$0xff] }
 0x4ca   :  { %8129 = vmatpush1.bf16.msra.mxu1 %v9160_v55  ;;  %v4243_v55 = vld [vmem:[%s14299_s5 + $0x828] sm:$0xff]  ;;  %v4436_v25 = vld [vmem:[%s14299_s5 + $0xe30] sm:$0xff] }
 0x4cb   :  { %8383 = vmatpush1.bf16.msra.mxu0 %v9322_v32  ;;  %8130 = vmatprep.subr.bf16.mxu1 %v9169_v41  ;;  %v4400_v32 = vld [vmem:[%s14299_s5 + $0xd10] sm:$0xff]  ;;  %v9217_v20 = vcombine.high %v4239_v31, %v4243_v55 }
 0x4cc   :  { %8384 = vmatprep.subr.bf16.mxu0 %v9331_v33  ;;  %v4404_v41 = vld [vmem:[%s14299_s5 + $0xd30] sm:$0xff]  ;;  %v9208_v33 = vcombine.low %v4231_v23, %v4235_v24  ;;  %v4275_v23 = vld [vmem:[%s14299_s5 + $0x928] sm:$0xff] }
 0x4cd   :  { %v9379_v34 = vcombine.high %v4400_v32, %v4404_v41  ;;  %v9378_v40 = vcombine.low %v4400_v32, %v4404_v41  ;;  %v4432_v24 = vld [vmem:[%s14299_s5 + $0xe10] sm:$0xff] }
 0x4ce   :  { %8131 = vmatpush1.bf16.msra.mxu1 %v9168_v49  ;;  %v4251_v49 = vld [vmem:[%s14299_s5 + $0x868] sm:$0xff]  ;;  %v4444_v32 = vld [vmem:[%s14299_s5 + $0xe70] sm:$0xff] }
 0x4cf   :  { %8385 = vmatpush1.bf16.msra.mxu0 %v9330_v38  ;;  %8132 = vmatprep.subr.bf16.mxu1 %v9177_v22  ;;  %v4408_v38 = vld [vmem:[%s14299_s5 + $0xd50] sm:$0xff]  ;;  %v9225_v42 = vcombine.high %v4247_v37, %v4251_v49 }
 0x4d0   :  { %8386 = vmatprep.subr.bf16.mxu0 %v9339_v39  ;;  %v4412_v22 = vld [vmem:[%s14299_s5 + $0xd70] sm:$0xff]  ;;  %v9216_v39 = vcombine.low %v4239_v31, %v4243_v55  ;;  %v4283_v31 = vld [vmem:[%s14299_s5 + $0x968] sm:$0xff] }
 0x4d1   :  { %v9387_v11 = vcombine.high %v4408_v38, %v4412_v22  ;;  %v9386_v46 = vcombine.low %v4408_v38, %v4412_v22  ;;  %v4440_v55 = vld [vmem:[%s14299_s5 + $0xe50] sm:$0xff] }
 0x4d2   :  { %8133 = vmatpush1.bf16.msra.mxu1 %v9176_v44  ;;  %v4259_v44 = vld [vmem:[%s14299_s5 + $0x8a8] sm:$0xff]  ;;  %v4452_v38 = vld [vmem:[%s14299_s5 + $0xeb0] sm:$0xff] }
 0x4d3   :  { %8387 = vmatpush1.bf16.msra.mxu0 %v9338_v47  ;;  %8134 = vmatprep.subr.bf16.mxu1 %v9185_v48  ;;  %v4416_v47 = vld [vmem:[%s14299_s5 + $0xd90] sm:$0xff]  ;;  %v9233_v57 = vcombine.high %v4255_v43, %v4259_v44  ;;  %v9232_v9 = vcombine.low %v4255_v43, %v4259_v44  ;;  %v4299_v43 = vld [vmem:[%s14299_s5 + $0x9e8] sm:$0xff] }
 0x4d4   :  { %8397 = vmatprep.subr.bf16.mxu0 %v9347_v50  ;;  %v4420_v48 = vld [vmem:[%s14299_s5 + $0xdb0] sm:$0xff]  ;;  %v9224_v50 = vcombine.low %v4247_v37, %v4251_v49  ;;  %v4291_v37 = vld [vmem:[%s14299_s5 + $0x9a8] sm:$0xff] }
 0x4d5   :  { %v9395_v63 = vcombine.high %v4416_v47, %v4420_v48  ;;  %v4448_v49 = vld [vmem:[%s14299_s5 + $0xe90] sm:$0xff] }
 0x4d6   :  { %8135 = vmatpush1.bf16.msra.mxu1 %v9184_v0  ;;  %8389 = vmatmul.mubr.bf16.vlgmr.msra.gmra.mrb[252].mxu0 %v12476_v58  ;;  %v4263_v0 = vld [vmem:[%s14299_s5 + $0x8c8] sm:$0xff]  ;;  %v4456_v44 = vld [vmem:[%s14299_s5 + $0xed0] sm:$0xff] }
 0x4d7   :  { %8398 = vmatpush1.bf16.msra.mxu0 %v9346_v1  ;;  %8429 = vmatprep.mubr.bf16.mxu0 %v12507_v56  ;;  %v4267_v1 = vld [vmem:[%s14299_s5 + $0x8e8] sm:$0xff] }
 0x4d8   :  { %8136 = vmatprep.subr.bf16.mxu1 %v9193_v13  ;;  %8399 = vmatprep.subr.bf16.mxu0 %v9355_v5  ;;  %v4424_v5 = vld [vmem:[%s14299_s5 + $0xdd0] sm:$0xff]  ;;  %v9240_v36 = vcombine.low %v4263_v0, %v4267_v1 }
 0x4da   :  { %8137 = vmatpush1.bf16.msra.mxu1 %v9192_v15  ;;  %v9394_v15 = vcombine.low %v4416_v47, %v4420_v48  ;;  %v4460_v47 = vld [vmem:[%s14299_s5 + $0xef0] sm:$0xff] }
 0x4db   :  { %8400 = vmatpush1.bf16.msra.mxu0 %v9354_v52  ;;  %8138 = vmatprep.subr.bf16.mxu1 %v9201_v26  ;;  %v9241_v52 = vcombine.high %v4263_v0, %v4267_v1  ;;  %v9403_v26 = vcombine.high %v4424_v5, %v4428_v60  ;;  %v4307_v0 = vld [vmem:[%s14299_s5 + $0xa28] sm:$0xff]  ;;  %v4464_v1 = vld [vmem:[%s14299_s5 + $0xf10] sm:$0xff] }
 0x4dc   :  { %8401 = vmatprep.subr.bf16.mxu0 %v9363_v21  ;;  %v4271_v21 = vld [vmem:[%s14299_s5 + $0x908] sm:$0xff] }
 0x4dd   :  { %v9248_v41 = vcombine.low %v4271_v21, %v4275_v23 }
 0x4de   :  { %8139 = vmatpush1.bf16.msra.mxu1 %v9200_v45  ;;  %v9402_v45 = vcombine.low %v4424_v5, %v4428_v60  ;;  %v4468_v5 = vld [vmem:[%s14299_s5 + $0xf30] sm:$0xff] }
 0x4df   :  { %8402 = vmatpush1.bf16.msra.mxu0 %v9362_v27  ;;  %8140 = vmatprep.subr.bf16.mxu1 %v9209_v54  ;;  %v9249_v27 = vcombine.high %v4271_v21, %v4275_v23  ;;  %v9411_v54 = vcombine.high %v4432_v24, %v4436_v25  ;;  %v4476_v21 = vld [vmem:[%s14299_s5 + $0xf70] sm:$0xff] }
 0x4e0   :  { %8403 = vmatprep.subr.bf16.mxu0 %v9371_v28  ;;  %v4279_v28 = vld [vmem:[%s14299_s5 + $0x948] sm:$0xff] }
 0x4e1   :  { %v9256_v22 = vcombine.low %v4279_v28, %v4283_v31 }
 0x4e2   :  { %8141 = vmatpush1.bf16.msra.mxu1 %v9208_v33  ;;  %v9410_v33 = vcombine.low %v4432_v24, %v4436_v25  ;;  %v9442_v24 = vcombine.low %v4464_v1, %v4468_v5 }
 0x4e3   :  { %8404 = vmatpush1.bf16.msra.mxu0 %v9370_v51  ;;  %8151 = vmatprep.subr.bf16.mxu1 %v9217_v20  ;;  %v9257_v51 = vcombine.high %v4279_v28, %v4283_v31  ;;  %v9419_v20 = vcombine.high %v4440_v55, %v4444_v32  ;;  %v4484_v28 = vld [vmem:[%s14299_s5 + $0xfb0] sm:$0xff] }
 0x4e4   :  { %8405 = vmatprep.subr.bf16.mxu0 %v9379_v34  ;;  %v4287_v34 = vld [vmem:[%s14299_s5 + $0x988] sm:$0xff] }
 0x4e5   :  { %8143 = vmatmul.mubr.bf16.vlgmr.msra.gmra.mrb[24].mxu1 %v12645_v17  ;;  %v9264_v48 = vcombine.low %v4287_v34, %v4291_v37 }
 0x4e6   :  { %8152 = vmatpush1.bf16.msra.mxu1 %v9216_v39  ;;  %8183 = vmatprep.mubr.bf16.mxu1 %v12472_v19  ;;  %v9418_v39 = vcombine.low %v4440_v55, %v4444_v32 }
 0x4e7   :  { %8406 = vmatpush1.bf16.msra.mxu0 %v9378_v40  ;;  %8153 = vmatprep.subr.bf16.mxu1 %v9225_v42  ;;  %v9265_v40 = vcombine.high %v4287_v34, %v4291_v37  ;;  %v9427_v42 = vcombine.high %v4448_v49, %v4452_v38  ;;  %v4492_v34 = vld [vmem:[%s14299_s5 + $0xff0] sm:$0xff] }
 0x4e8   :  { %v13315_v53 = vpop.f32.mrb[248].mxu0  ;;  %8407 = vmatprep.subr.bf16.mxu0 %v9387_v11  ;;  %v4295_v11 = vld [vmem:[%s14299_s5 + $0x9c8] sm:$0xff] }
 0x4e9   :  { %v13323_v13 = vpop.f32.mrb[249].mxu0  ;;  %v9272_v60 = vcombine.low %v4295_v11, %v4299_v43 }
 0x4ea   :  { %8154 = vmatpush1.bf16.msra.mxu1 %v9224_v50  ;;  %v7943_v8 = vpop.f32.mrb[250].mxu0  ;;  %v9426_v50 = vcombine.low %v4448_v49, %v4452_v38 }
 0x4eb   :  { %8408 = vmatpush1.bf16.msra.mxu0 %v9386_v46  ;;  %v7944_v14 = vpop.f32.mrb[251].mxu0  ;;  %8155 = vmatprep.subr.bf16.mxu1 %v9233_v57  ;;  %v9273_v46 = vcombine.high %v4295_v11, %v4299_v43  ;;  %v9435_v57 = vcombine.high %v4456_v44, %v4460_v47  ;;  %v9434_v8 = vcombine.low %v4456_v44, %v4460_v47  ;;  %v4500_v11 = vld [vmem:[%s14299_s5 + $0x1030] sm:$0xff] }
 0x4ec   :  { %8409 = vmatprep.subr.bf16.mxu0 %v9395_v63  ;;  %v4303_v63 = vld [vmem:[%s14299_s5 + $0xa08] sm:$0xff]  ;;  %v9443_v14 = vcombine.high %v4464_v1, %v4468_v5 }
 0x4ed   :  { %v9280_v23 = vcombine.low %v4303_v63, %v4307_v0 }
 0x4ee   :  { %8156 = vmatpush1.bf16.msra.mxu1 %v9232_v9  ;;  %v9281_v9 = vcombine.high %v4303_v63, %v4307_v0  ;;  %v4508_v63 = vld [vmem:[%s14299_s5 + $0x1070] sm:$0xff] }
 0x4ef   :  { %8410 = vmatpush1.bf16.msra.mxu0 %v9394_v15  ;;  %8157 = vmatprep.subr.bf16.mxu1 %v9241_v52  ;;  %v4311_v15 = vld [vmem:[%s14299_s5 + $0xa48] sm:$0xff] }
 0x4f0   :  { %8411 = vmatprep.subr.bf16.mxu0 %v9403_v26  ;;  %v4315_v52 = vld [vmem:[%s14299_s5 + $0xa68] sm:$0xff]  ;;  %v4472_v26 = vld [vmem:[%s14299_s5 + $0xf50] sm:$0xff] }
 0x4f1   :  { %v9289_v25 = vcombine.high %v4311_v15, %v4315_v52  ;;  %v9288_v31 = vcombine.low %v4311_v15, %v4315_v52  ;;  %v9450_v55 = vcombine.low %v4472_v26, %v4476_v21  ;;  %v4516_v15 = vld [vmem:[%s14299_s5 + $0x10b0] sm:$0xff] }
 0x4f2   :  { %8158 = vmatpush1.bf16.msra.mxu1 %v9240_v36  ;;  %v9451_v36 = vcombine.high %v4472_v26, %v4476_v21 }
 0x4f3   :  { %8412 = vmatpush1.bf16.msra.mxu0 %v9402_v45  ;;  %8159 = vmatprep.subr.bf16.mxu1 %v9249_v27  ;;  %v4319_v45 = vld [vmem:[%s14299_s5 + $0xa88] sm:$0xff] }
 0x4f4   :  { %8413 = vmatprep.subr.bf16.mxu0 %v9411_v54  ;;  %v4323_v27 = vld [vmem:[%s14299_s5 + $0xaa8] sm:$0xff]  ;;  %v4480_v54 = vld [vmem:[%s14299_s5 + $0xf90] sm:$0xff] }
 0x4f5   :  { %v9297_v32 = vcombine.high %v4319_v45, %v4323_v27  ;;  %v9296_v37 = vcombine.low %v4319_v45, %v4323_v27  ;;  %v9458_v49 = vcombine.low %v4480_v54, %v4484_v28  ;;  %v4524_v45 = vld [vmem:[%s14299_s5 + $0x10f0] sm:$0xff] }
 0x4f6   :  { %8160 = vmatpush1.bf16.msra.mxu1 %v9248_v41  ;;  %v9459_v41 = vcombine.high %v4480_v54, %v4484_v28 }
 0x4f7   :  { %8414 = vmatpush1.bf16.msra.mxu0 %v9410_v33  ;;  %8161 = vmatprep.subr.bf16.mxu1 %v9257_v51  ;;  %v4327_v33 = vld [vmem:[%s14299_s5 + $0xac8] sm:$0xff] }
 0x4f8   :  { %8415 = vmatprep.subr.bf16.mxu0 %v9419_v20  ;;  %v4331_v51 = vld [vmem:[%s14299_s5 + $0xae8] sm:$0xff]  ;;  %v4488_v20 = vld [vmem:[%s14299_s5 + $0xfd0] sm:$0xff] }
 0x4f9   :  { %v9305_v38 = vcombine.high %v4327_v33, %v4331_v51  ;;  %v9304_v43 = vcombine.low %v4327_v33, %v4331_v51  ;;  %v9466_v44 = vcombine.low %v4488_v20, %v4492_v34  ;;  %v4532_v33 = vld [vmem:[%s14299_s5 + $0x1130] sm:$0xff] }
 0x4fa   :  { %8162 = vmatpush1.bf16.msra.mxu1 %v9256_v22  ;;  %v9467_v22 = vcombine.high %v4488_v20, %v4492_v34 }
 0x4fb   :  { %8416 = vmatpush1.bf16.msra.mxu0 %v9418_v39  ;;  %8163 = vmatprep.subr.bf16.mxu1 %v9265_v40  ;;  %v4335_v39 = vld [vmem:[%s14299_s5 + $0xb08] sm:$0xff] }
 0x4fc   :  { %8417 = vmatprep.subr.bf16.mxu0 %v9427_v42  ;;  %v4339_v40 = vld [vmem:[%s14299_s5 + $0xb28] sm:$0xff]  ;;  %v4496_v42 = vld [vmem:[%s14299_s5 + $0x1010] sm:$0xff] }
 0x4fd   :  { %v9313_v47 = vcombine.high %v4335_v39, %v4339_v40  ;;  %v9312_v0 = vcombine.low %v4335_v39, %v4339_v40  ;;  %v9474_v1 = vcombine.low %v4496_v42, %v4500_v11  ;;  %v4540_v39 = vld [vmem:[%s14299_s5 + $0x1170] sm:$0xff] }
 0x4fe   :  { %8164 = vmatpush1.bf16.msra.mxu1 %v9264_v48  ;;  %v9475_v48 = vcombine.high %v4496_v42, %v4500_v11 }
 0x4ff   :  { %8418 = vmatpush1.bf16.msra.mxu0 %v9426_v50  ;;  %8165 = vmatprep.subr.bf16.mxu1 %v9273_v46  ;;  %v4343_v50 = vld [vmem:[%s14299_s5 + $0xb48] sm:$0xff] }
 0x500   :  { %8419 = vmatprep.subr.bf16.mxu0 %v9435_v57  ;;  %v4347_v46 = vld [vmem:[%s14299_s5 + $0xb68] sm:$0xff]  ;;  %v4504_v57 = vld [vmem:[%s14299_s5 + $0x1050] sm:$0xff] }
 0x501   :  { %v9321_v5 = vcombine.high %v4343_v50, %v4347_v46  ;;  %v9320_v52 = vcombine.low %v4343_v50, %v4347_v46  ;;  %v9482_v26 = vcombine.low %v4504_v57, %v4508_v63  ;;  %v4548_v50 = vld [vmem:[%s14299_s5 + $0x11b0] sm:$0xff] }
 0x502   :  { %8166 = vmatpush1.bf16.msra.mxu1 %v9272_v60  ;;  %v9483_v60 = vcombine.high %v4504_v57, %v4508_v63 }
 0x503   :  { %8420 = vmatpush1.bf16.msra.mxu0 %v9434_v8  ;;  %8167 = vmatprep.subr.bf16.mxu1 %v9281_v9  ;;  %v4351_v8 = vld [vmem:[%s14299_s5 + $0xb88] sm:$0xff] }
 0x504   :  { %8421 = vmatprep.subr.bf16.mxu0 %v9443_v14  ;;  %v4355_v9 = vld [vmem:[%s14299_s5 + $0xba8] sm:$0xff]  ;;  %v4512_v14 = vld [vmem:[%s14299_s5 + $0x1090] sm:$0xff] }
 0x505   :  { %v9329_v21 = vcombine.high %v4351_v8, %v4355_v9  ;;  %v9328_v27 = vcombine.low %v4351_v8, %v4355_v9  ;;  %v9490_v54 = vcombine.low %v4512_v14, %v4516_v15  ;;  %v4556_v8 = vld [vmem:[%s14299_s5 + $0x11f0] sm:$0xff] }
 0x506   :  { %8168 = vmatpush1.bf16.msra.mxu1 %v9280_v23  ;;  %v9491_v23 = vcombine.high %v4512_v14, %v4516_v15 }
 0x507   :  { %8422 = vmatpush1.bf16.msra.mxu0 %v9442_v24  ;;  %8169 = vmatprep.subr.bf16.mxu1 %v9289_v25  ;;  %v4359_v24 = vld [vmem:[%s14299_s5 + $0xbc8] sm:$0xff] }
 0x508   :  { %8423 = vmatprep.subr.bf16.mxu0 %v9451_v36  ;;  %v4363_v25 = vld [vmem:[%s14299_s5 + $0xbe8] sm:$0xff]  ;;  %v4520_v36 = vld [vmem:[%s14299_s5 + $0x10d0] sm:$0xff] }
 0x509   :  { %v9337_v28 = vcombine.high %v4359_v24, %v4363_v25  ;;  %v9336_v51 = vcombine.low %v4359_v24, %v4363_v25  ;;  %v9498_v20 = vcombine.low %v4520_v36, %v4524_v45  ;;  %v4564_v24 = vld [vmem:[%s14299_s5 + $0x1230] sm:$0xff] }
 0x50a   :  { %8170 = vmatpush1.bf16.msra.mxu1 %v9288_v31  ;;  %v9499_v31 = vcombine.high %v4520_v36, %v4524_v45 }
 0x50b   :  { %8424 = vmatpush1.bf16.msra.mxu0 %v9450_v55  ;;  %8171 = vmatprep.subr.bf16.mxu1 %v9297_v32  ;;  %v4367_v55 = vld [vmem:[%s14299_s5 + $0xc08] sm:$0xff] }
 0x50c   :  { %8425 = vmatprep.subr.bf16.mxu0 %v9459_v41  ;;  %v4371_v32 = vld [vmem:[%s14299_s5 + $0xc28] sm:$0xff]  ;;  %v4528_v41 = vld [vmem:[%s14299_s5 + $0x1110] sm:$0xff] }
 0x50d   :  { %v9345_v34 = vcombine.high %v4367_v55, %v4371_v32  ;;  %v9344_v40 = vcombine.low %v4367_v55, %v4371_v32  ;;  %v9506_v42 = vcombine.low %v4528_v41, %v4532_v33  ;;  %v4568_v55 = vld [vmem:[%s14299_s5 + $0x1250] sm:$0xff] }
 0x50e   :  { %8172 = vmatpush1.bf16.msra.mxu1 %v9296_v37  ;;  %v9507_v37 = vcombine.high %v4528_v41, %v4532_v33  ;;  %v4572_v32 = vld [vmem:[%s14299_s5 + $0x1270] sm:$0xff] }
 0x50f   :  { %8426 = vmatpush1.bf16.msra.mxu0 %v9458_v49  ;;  %8173 = vmatprep.subr.bf16.mxu1 %v9305_v38  ;;  %v4375_v49 = vld [vmem:[%s14299_s5 + $0xc48] sm:$0xff] }
 0x510   :  { %8427 = vmatprep.subr.bf16.mxu0 %v9467_v22  ;;  %v4379_v38 = vld [vmem:[%s14299_s5 + $0xc68] sm:$0xff]  ;;  %v4536_v22 = vld [vmem:[%s14299_s5 + $0x1150] sm:$0xff] }
 0x511   :  { %v9353_v11 = vcombine.high %v4375_v49, %v4379_v38  ;;  %v9352_v46 = vcombine.low %v4375_v49, %v4379_v38  ;;  %v9514_v57 = vcombine.low %v4536_v22, %v4540_v39  ;;  %v4415_v49 = vld [vmem:[%s14299_s5 + $0xd88] sm:$0xff] }
 0x512   :  { %8174 = vmatpush1.bf16.msra.mxu1 %v9304_v43  ;;  %v9515_v43 = vcombine.high %v4536_v22, %v4540_v39  ;;  %v4419_v38 = vld [vmem:[%s14299_s5 + $0xda8] sm:$0xff]  ;;  %v4580_v22 = vld [vmem:[%s14299_s5 + $0x12b0] sm:$0xff] }
 0x513   :  { %8428 = vmatpush1.bf16.msra.mxu0 %v9466_v44  ;;  %8175 = vmatprep.subr.bf16.mxu1 %v9313_v47  ;;  %v4383_v44 = vld [vmem:[%s14299_s5 + $0xc88] sm:$0xff] }
 0x514   :  { %8438 = vmatprep.subr.bf16.mxu0 %v9475_v48  ;;  %v4387_v47 = vld [vmem:[%s14299_s5 + $0xca8] sm:$0xff]  ;;  %v4544_v48 = vld [vmem:[%s14299_s5 + $0x1190] sm:$0xff] }
 0x515   :  { %v9361_v63 = vcombine.high %v4383_v44, %v4387_v47  ;;  %v9360_v9 = vcombine.low %v4383_v44, %v4387_v47  ;;  %v9522_v14 = vcombine.low %v4544_v48, %v4548_v50  ;;  %v4423_v47 = vld [vmem:[%s14299_s5 + $0xdc8] sm:$0xff] }
 0x516   :  { %8176 = vmatpush1.bf16.msra.mxu1 %v9312_v0  ;;  %8430 = vmatmul.mubr.bf16.vlgmr.msra.gmra.mrb[252].mxu0 %v12704_v7  ;;  %v9523_v0 = vcombine.high %v4544_v48, %v4548_v50  ;;  %v4427_v48 = vld [vmem:[%s14299_s5 + $0xde8] sm:$0xff] }
 0x517   :  { %8439 = vmatpush1.bf16.msra.mxu0 %v9474_v1  ;;  %8470 = vmatprep.mubr.bf16.mxu0 %v12706_v30  ;;  %v4391_v1 = vld [vmem:[%s14299_s5 + $0xcc8] sm:$0xff] }
 0x518   :  { %8177 = vmatprep.subr.bf16.mxu1 %v9321_v5  ;;  %8440 = vmatprep.subr.bf16.mxu0 %v9483_v60  ;;  %v4395_v5 = vld [vmem:[%s14299_s5 + $0xce8] sm:$0xff]  ;;  %v4552_v60 = vld [vmem:[%s14299_s5 + $0x11d0] sm:$0xff] }
 0x519   :  { %v9369_v15 = vcombine.high %v4391_v1, %v4395_v5  ;;  %v9368_v25 = vcombine.low %v4391_v1, %v4395_v5  ;;  %v9530_v36 = vcombine.low %v4552_v60, %v4556_v8 }
 0x51a   :  { %8178 = vmatpush1.bf16.msra.mxu1 %v9320_v52  ;;  %v9531_v52 = vcombine.high %v4552_v60, %v4556_v8  ;;  %v9401_v60 = vcombine.high %v4423_v47, %v4427_v48 }
 0x51b   :  { %8441 = vmatpush1.bf16.msra.mxu0 %v9482_v26  ;;  %8179 = vmatprep.subr.bf16.mxu1 %v9329_v21  ;;  %v4399_v26 = vld [vmem:[%s14299_s5 + $0xd08] sm:$0xff] }
 0x51c   :  { %8442 = vmatprep.subr.bf16.mxu0 %v9491_v23  ;;  %v4403_v21 = vld [vmem:[%s14299_s5 + $0xd28] sm:$0xff]  ;;  %v4560_v23 = vld [vmem:[%s14299_s5 + $0x1210] sm:$0xff] }
 0x51d   :  { %v9377_v45 = vcombine.high %v4399_v26, %v4403_v21  ;;  %v9376_v41 = vcombine.low %v4399_v26, %v4403_v21  ;;  %v9400_v26 = vcombine.low %v4423_v47, %v4427_v48  ;;  %v4467_v47 = vld [vmem:[%s14299_s5 + $0xf28] sm:$0xff] }
 0x51e   :  { %8180 = vmatpush1.bf16.msra.mxu1 %v9328_v27  ;;  %v13542_v27 = vld [vmem:[%s14301_s6] sm:$0xff] }
 0x51f   :  { %8443 = vmatpush1.bf16.msra.mxu0 %v9490_v54  ;;  %8181 = vmatprep.subr.bf16.mxu1 %v9337_v28  ;;  %v9539_v54 = vcombine.high %v4560_v23, %v4564_v24  ;;  %v4407_v28 = vld [vmem:[%s14299_s5 + $0xd48] sm:$0xff]  ;;  %v4627_v33 = vrot.slane %v13542_v27, %v12395_v61  ;;  %v4576_v61 = vld [vmem:[%s14299_s5 + $0x1290] sm:$0xff] }
 0x520   :  { %8444 = vmatprep.subr.bf16.mxu0 %v9499_v31  ;;  %v4411_v31 = vld [vmem:[%s14299_s5 + $0xd68] sm:$0xff]  ;;  %v9555_v44 = vcombine.high %v4576_v61, %v4580_v22  ;;  %v9554_v5 = vcombine.low %v4576_v61, %v4580_v22 }
 0x521   :  { %v10302_v39 = vadd.f32 %v13315_v53, %v4627_v33  ;;  %v4584_v53 = vld [vmem:[%s14299_s5 + $0x12d0] sm:$0xff]  ;;  %v4451_v33 = vld [vmem:[%s14299_s5 + $0xea8] sm:$0xff] }
 0x522   :  { %8182 = vmatpush1.bf16.msra.mxu1 %v9336_v51  ;;  %v9538_v51 = vcombine.low %v4560_v23, %v4564_v24  ;;  %v4455_v61 = vld [vmem:[%s14299_s5 + $0xec8] sm:$0xff] }
 0x523   :  { %8445 = vmatpush1.bf16.msra.mxu0 %v9498_v20  ;;  %8192 = vmatprep.subr.bf16.mxu1 %v9345_v34  ;;  %v9385_v20 = vcombine.high %v4407_v28, %v4411_v31  ;;  %v4631_v34 = vrot.slane %v13542_v27, %v12403_v62  ;;  %v9384_v62 = vcombine.low %v4407_v28, %v4411_v31  ;;  %v4459_v22 = vld [vmem:[%s14299_s5 + $0xee8] sm:$0xff] }
 0x524   :  { %8446 = vmatprep.subr.bf16.mxu0 %v9507_v37  ;;  %v9547_v37 = vcombine.high %v4568_v55, %v4572_v32  ;;  %v9432_v48 = vcombine.low %v4455_v61, %v4459_v22 }
 0x525   :  { %8184 = vmatmul.mubr.bf16.vlgmr.msra.gmra.mrb[24].mxu1 %v12476_v58 }
 0x526   :  { %8193 = vmatpush1.bf16.msra.mxu1 %v9344_v40  ;;  %8224 = vmatprep.mubr.bf16.mxu1 %v12507_v56  ;;  %v9546_v40 = vcombine.low %v4568_v55, %v4572_v32 }
 0x527   :  { %8447 = vmatpush1.bf16.msra.mxu0 %v9506_v42  ;;  %8194 = vmatprep.subr.bf16.mxu1 %v9353_v11  ;;  %v9393_v42 = vcombine.high %v4415_v49, %v4419_v38  ;;  %v10304_v11 = vadd.f32 %v13323_v13, %v4631_v34  ;;  %v4588_v13 = vld [vmem:[%s14299_s5 + $0x12f0] sm:$0xff] }
 0x528   :  { %8448 = vmatprep.subr.bf16.mxu0 %v9515_v43  ;;  %v9563_v8 = vcombine.high %v4584_v53, %v4588_v13  ;;  %v9562_v21 = vcombine.low %v4584_v53, %v4588_v13  ;;  %v4471_v53 = vld [vmem:[%s14299_s5 + $0xf48] sm:$0xff] }
 0x529   :  { %v4475_v13 = vld [vmem:[%s14299_s5 + $0xf68] sm:$0xff] }
 0x52a   :  { %8195 = vmatpush1.bf16.msra.mxu1 %v9352_v46 }
 0x52b   :  { %8449 = vmatpush1.bf16.msra.mxu0 %v9514_v57  ;;  %8196 = vmatprep.subr.bf16.mxu1 %v9361_v63 }
 0x52c   :  { %8450 = vmatprep.subr.bf16.mxu0 %v9523_v0  ;;  %v9392_v0 = vcombine.low %v4415_v49, %v4419_v38 }
 0x52e   :  { %8197 = vmatpush1.bf16.msra.mxu1 %v9360_v9  ;;  %v4431_v9 = vld [vmem:[%s14299_s5 + $0xe08] sm:$0xff] }
 0x52f   :  { %8451 = vmatpush1.bf16.msra.mxu0 %v9522_v14  ;;  %8198 = vmatprep.subr.bf16.mxu1 %v9369_v15  ;;  %v4435_v14 = vld [vmem:[%s14299_s5 + $0xe28] sm:$0xff]  ;;  %v4592_v15 = vld [vmem:[%s14299_s5 + $0x1310] sm:$0xff] }
 0x530   :  { %8452 = vmatprep.subr.bf16.mxu0 %v9531_v52  ;;  %v4596_v52 = vld [vmem:[%s14299_s5 + $0x1330] sm:$0xff]  ;;  %v9409_v23 = vcombine.high %v4431_v9, %v4435_v14  ;;  %v9408_v28 = vcombine.low %v4431_v9, %v4435_v14  ;;  %v4491_v9 = vld [vmem:[%s14299_s5 + $0xfe8] sm:$0xff] }
 0x531   :  { %v9571_v24 = vcombine.high %v4592_v15, %v4596_v52  ;;  %v9570_v31 = vcombine.low %v4592_v15, %v4596_v52  ;;  %v4495_v52 = vld [vmem:[%s14299_s5 + $0x1008] sm:$0xff] }
 0x532   :  { %8199 = vmatpush1.bf16.msra.mxu1 %v9368_v25  ;;  %v4439_v25 = vld [vmem:[%s14299_s5 + $0xe48] sm:$0xff] }
 0x533   :  { %8453 = vmatpush1.bf16.msra.mxu0 %v9530_v36  ;;  %8200 = vmatprep.subr.bf16.mxu1 %v9377_v45  ;;  %v4443_v36 = vld [vmem:[%s14299_s5 + $0xe68] sm:$0xff]  ;;  %v4600_v45 = vld [vmem:[%s14299_s5 + $0x1350] sm:$0xff] }
 0x534   :  { %8454 = vmatprep.subr.bf16.mxu0 %v9539_v54  ;;  %v4604_v54 = vld [vmem:[%s14299_s5 + $0x1370] sm:$0xff]  ;;  %v9417_v55 = vcombine.high %v4439_v25, %v4443_v36  ;;  %v9416_v34 = vcombine.low %v4439_v25, %v4443_v36  ;;  %v4507_v25 = vld [vmem:[%s14299_s5 + $0x1068] sm:$0xff] }
 0x535   :  { %v9579_v32 = vcombine.high %v4600_v45, %v4604_v54 }
 0x536   :  { %8201 = vmatpush1.bf16.msra.mxu1 %v9376_v41  ;;  %v4447_v41 = vld [vmem:[%s14299_s5 + $0xe88] sm:$0xff] }
 0x537   :  { %8455 = vmatpush1.bf16.msra.mxu0 %v9538_v51  ;;  %8202 = vmatprep.subr.bf16.mxu1 %v9385_v20  ;;  %v4608_v51 = vld [vmem:[%s14299_s5 + $0x1390] sm:$0xff]  ;;  %v9425_v49 = vcombine.high %v4447_v41, %v4451_v33 }
 0x538   :  { %v8062_v43 = vpop.f32.mrb[20].mxu1  ;;  %8456 = vmatprep.subr.bf16.mxu0 %v9547_v37  ;;  %v4612_v20 = vld [vmem:[%s14299_s5 + $0x13b0] sm:$0xff]  ;;  %v9578_v37 = vcombine.low %v4600_v45, %v4604_v54  ;;  %v4511_v54 = vld [vmem:[%s14299_s5 + $0x1088] sm:$0xff] }
 0x539   :  { %v10303_v50 = vadd.f32 %v10302_v39, %v8062_v43  ;;  %v8064_v46 = vpop.f32.mrb[21].mxu1  ;;  %v9587_v38 = vcombine.high %v4608_v51, %v4612_v20  ;;  %v4620_v39 = vld [vmem:[%s14299_s5 + $0x13f0] sm:$0xff] }
 0x53a   :  { %v10305_v57 = vadd.f32 %v10304_v11, %v8064_v46  ;;  %v8066_v63 = vpop.f32.mrb[22].mxu1  ;;  %8203 = vmatpush1.bf16.msra.mxu1 %v9384_v62  ;;  %v4616_v62 = vld [vmem:[%s14299_s5 + $0x13d0] sm:$0xff]  ;;  %v9433_v11 = vcombine.high %v4455_v61, %v4459_v22  ;;  %v4539_v61 = vld [vmem:[%s14299_s5 + $0x1168] sm:$0xff] }
 0x53b   :  { %8684 = vst [vmem:[%s14302_s7] sm:$0xff] %v10303_v50  ;;  %v8067_v1 = vpop.f32.mrb[23].mxu1  ;;  %8457 = vmatpush1.bf16.msra.mxu0 %v9546_v40  ;;  %8204 = vmatprep.subr.bf16.mxu1 %v9393_v42  ;;  %v9424_v40 = vcombine.low %v4447_v41, %v4451_v33  ;;  %v9586_v42 = vcombine.low %v4608_v51, %v4612_v20  ;;  %v4523_v41 = vld [vmem:[%s14299_s5 + $0x10e8] sm:$0xff] }
 0x53c   :  { %8685 = vst [vmem:[%s14302_s7 + $0x8] sm:$0xff] %v10305_v57  ;;  %8458 = vmatprep.subr.bf16.mxu0 %v9555_v44  ;;  %v9595_v43 = vcombine.high %v4616_v62, %v4620_v39  ;;  %v4463_v44 = vld [vmem:[%s14299_s5 + $0xf08] sm:$0xff]  ;;  %v9594_v50 = vcombine.low %v4616_v62, %v4620_v39  ;;  %v9449_v63 = vcombine.high %v4471_v53, %v4475_v13 }
 0x53d   :  { %v9441_v46 = vcombine.high %v4463_v44, %v4467_v47  ;;  %v9440_v57 = vcombine.low %v4463_v44, %v4467_v47  ;;  %v4483_v1 = vld [vmem:[%s14299_s5 + $0xfa8] sm:$0xff] }
 0x53e   :  { %8205 = vmatpush1.bf16.msra.mxu1 %v9392_v0  ;;  %v4479_v0 = vld [vmem:[%s14299_s5 + $0xf88] sm:$0xff] }
 0x53f   :  { %8459 = vmatpush1.bf16.msra.mxu0 %v9554_v5  ;;  %8206 = vmatprep.subr.bf16.mxu1 %v9401_v60  ;;  %v9448_v5 = vcombine.low %v4471_v53, %v4475_v13  ;;  %v9457_v60 = vcombine.high %v4479_v0, %v4483_v1  ;;  %v9456_v14 = vcombine.low %v4479_v0, %v4483_v1  ;;  %v4527_v20 = vld [vmem:[%s14299_s5 + $0x1108] sm:$0xff] }
 0x540   :  { %8460 = vmatprep.subr.bf16.mxu0 %v9563_v8  ;;  %v4487_v8 = vld [vmem:[%s14299_s5 + $0xfc8] sm:$0xff] }
 0x541   :  { %v9465_v15 = vcombine.high %v4487_v8, %v4491_v9  ;;  %v4543_v39 = vld [vmem:[%s14299_s5 + $0x1188] sm:$0xff] }
 0x542   :  { %8207 = vmatpush1.bf16.msra.mxu1 %v9400_v26  ;;  %v4499_v26 = vld [vmem:[%s14299_s5 + $0x1028] sm:$0xff] }
 0x543   :  { %8461 = vmatpush1.bf16.msra.mxu0 %v9562_v21  ;;  %8208 = vmatprep.subr.bf16.mxu1 %v9409_v23  ;;  %v9464_v21 = vcombine.low %v4487_v8, %v4491_v9  ;;  %v9473_v23 = vcombine.high %v4495_v52, %v4499_v26  ;;  %v9472_v36 = vcombine.low %v4495_v52, %v4499_v26  ;;  %v4555_v44 = vld [vmem:[%s14299_s5 + $0x11e8] sm:$0xff] }
 0x544   :  { %8462 = vmatprep.subr.bf16.mxu0 %v9571_v24  ;;  %v4503_v24 = vld [vmem:[%s14299_s5 + $0x1048] sm:$0xff] }
 0x545   :  { %v9481_v45 = vcombine.high %v4503_v24, %v4507_v25 }
 0x546   :  { %8209 = vmatpush1.bf16.msra.mxu1 %v9408_v28  ;;  %v4515_v28 = vld [vmem:[%s14299_s5 + $0x10a8] sm:$0xff] }
 0x547   :  { %8463 = vmatpush1.bf16.msra.mxu0 %v9570_v31  ;;  %8210 = vmatprep.subr.bf16.mxu1 %v9417_v55  ;;  %v9480_v31 = vcombine.low %v4503_v24, %v4507_v25  ;;  %v9489_v55 = vcombine.high %v4511_v54, %v4515_v28  ;;  %v9488_v33 = vcombine.low %v4511_v54, %v4515_v28 }
 0x548   :  { %8464 = vmatprep.subr.bf16.mxu0 %v9579_v32  ;;  %v4519_v32 = vld [vmem:[%s14299_s5 + $0x10c8] sm:$0xff] }
 0x549   :  { %v9497_v51 = vcombine.high %v4519_v32, %v4523_v41 }
 0x54a   :  { %8211 = vmatpush1.bf16.msra.mxu1 %v9416_v34  ;;  %v4531_v34 = vld [vmem:[%s14299_s5 + $0x1128] sm:$0xff] }
 0x54b   :  { %8465 = vmatpush1.bf16.msra.mxu0 %v9578_v37  ;;  %8212 = vmatprep.subr.bf16.mxu1 %v9425_v49  ;;  %v9496_v37 = vcombine.low %v4519_v32, %v4523_v41  ;;  %v9505_v49 = vcombine.high %v4527_v20, %v4531_v34  ;;  %v9504_v22 = vcombine.low %v4527_v20, %v4531_v34 }
 0x54c   :  { %8466 = vmatprep.subr.bf16.mxu0 %v9587_v38  ;;  %v4535_v38 = vld [vmem:[%s14299_s5 + $0x1148] sm:$0xff] }
 0x54d   :  { %v9513_v62 = vcombine.high %v4535_v38, %v4539_v61 }
 0x54e   :  { %8213 = vmatpush1.bf16.msra.mxu1 %v9424_v40  ;;  %v4547_v40 = vld [vmem:[%s14299_s5 + $0x11a8] sm:$0xff] }
 0x54f   :  { %8467 = vmatpush1.bf16.msra.mxu0 %v9586_v42  ;;  %8214 = vmatprep.subr.bf16.mxu1 %v9433_v11  ;;  %v9512_v42 = vcombine.low %v4535_v38, %v4539_v61  ;;  %v9521_v11 = vcombine.high %v4543_v39, %v4547_v40  ;;  %v9520_v47 = vcombine.low %v4543_v39, %v4547_v40 }
 0x550   :  { %8468 = vmatprep.subr.bf16.mxu0 %v9595_v43  ;;  %v4551_v43 = vld [vmem:[%s14299_s5 + $0x11c8] sm:$0xff] }
 0x551   :  { %v9528_v53 = vcombine.low %v4551_v43, %v4555_v44 }
 0x552   :  { %8215 = vmatpush1.bf16.msra.mxu1 %v9432_v48  ;;  %v9529_v48 = vcombine.high %v4551_v43, %v4555_v44 }
 0x553   :  { %8469 = vmatpush1.bf16.msra.mxu0 %v9594_v50  ;;  %8216 = vmatprep.subr.bf16.mxu1 %v9441_v46  ;;  %v4559_v50 = vld [vmem:[%s14299_s5 + $0x1208] sm:$0xff] }
 0x554   :  { %v4563_v46 = vld [vmem:[%s14299_s5 + $0x1228] sm:$0xff] }
 0x555   :  { %v9537_v13 = vcombine.high %v4559_v50, %v4563_v46  ;;  %v9536_v0 = vcombine.low %v4559_v50, %v4563_v46 }
 0x556   :  { %8217 = vmatpush1.bf16.msra.mxu1 %v9440_v57  ;;  %8471 = vmatmul.mubr.bf16.vlgmr.msra.gmra.mrb[252].mxu0 %v12907_v2  ;;  %v4567_v57 = vld [vmem:[%s14299_s5 + $0x1248] sm:$0xff] }
 0x557   :  { %8218 = vmatprep.subr.bf16.mxu1 %v9449_v63  ;;  %v4571_v63 = vld [vmem:[%s14299_s5 + $0x1268] sm:$0xff] }
 0x558   :  { %v9545_v1 = vcombine.high %v4567_v57, %v4571_v63  ;;  %v9544_v8 = vcombine.low %v4567_v57, %v4571_v63  ;;  %v4025_v63 = vld [vmem:[%s14299_s5 + $0x158] sm:$0xff] }
 0x55a   :  { %8219 = vmatpush1.bf16.msra.mxu1 %v9448_v5  ;;  %v4575_v5 = vld [vmem:[%s14299_s5 + $0x1288] sm:$0xff] }
 0x55b   :  { %8220 = vmatprep.subr.bf16.mxu1 %v9457_v60  ;;  %v4579_v60 = vld [vmem:[%s14299_s5 + $0x12a8] sm:$0xff] }
 0x55c   :  { %v9553_v9 = vcombine.high %v4575_v5, %v4579_v60  ;;  %v9552_v52 = vcombine.low %v4575_v5, %v4579_v60  ;;  %v4033_v60 = vld [vmem:[%s14299_s5 + $0x198] sm:$0xff] }
 0x55e   :  { %8221 = vmatpush1.bf16.msra.mxu1 %v9456_v14  ;;  %v4583_v14 = vld [vmem:[%s14299_s5 + $0x12c8] sm:$0xff] }
 0x55f   :  { %8222 = vmatprep.subr.bf16.mxu1 %v9465_v15  ;;  %v4587_v15 = vld [vmem:[%s14299_s5 + $0x12e8] sm:$0xff] }
 0x560   :  { %v9561_v26 = vcombine.high %v4583_v14, %v4587_v15  ;;  %v9560_v24 = vcombine.low %v4583_v14, %v4587_v15  ;;  %v4041_v15 = vld [vmem:[%s14299_s5 + $0x1d8] sm:$0xff] }
 0x562   :  { %8223 = vmatpush1.bf16.msra.mxu1 %v9464_v21  ;;  %v4591_v21 = vld [vmem:[%s14299_s5 + $0x1308] sm:$0xff] }
 0x563   :  { %8233 = vmatprep.subr.bf16.mxu1 %v9473_v23  ;;  %v4595_v23 = vld [vmem:[%s14299_s5 + $0x1328] sm:$0xff] }
 0x564   :  { %v9569_v25 = vcombine.high %v4591_v21, %v4595_v23  ;;  %v9568_v54 = vcombine.low %v4591_v21, %v4595_v23  ;;  %v4049_v23 = vld [vmem:[%s14299_s5 + $0x218] sm:$0xff] }
 0x565   :  { %8225 = vmatmul.mubr.bf16.vlgmr.msra.gmra.mrb[24].mxu1 %v12704_v7 }
 0x566   :  { %8234 = vmatpush1.bf16.msra.mxu1 %v9472_v36  ;;  %8265 = vmatprep.mubr.bf16.mxu1 %v12706_v30  ;;  %v4599_v36 = vld [vmem:[%s14299_s5 + $0x1348] sm:$0xff] }
 0x567   :  { %8235 = vmatprep.subr.bf16.mxu1 %v9481_v45  ;;  %v4603_v45 = vld [vmem:[%s14299_s5 + $0x1368] sm:$0xff] }
 0x568   :  { %v9577_v28 = vcombine.high %v4599_v36, %v4603_v45  ;;  %v9576_v32 = vcombine.low %v4599_v36, %v4603_v45  ;;  %v4057_v45 = vld [vmem:[%s14299_s5 + $0x258] sm:$0xff] }
 0x56a   :  { %8236 = vmatpush1.bf16.msra.mxu1 %v9480_v31  ;;  %v4607_v31 = vld [vmem:[%s14299_s5 + $0x1388] sm:$0xff] }
 0x56b   :  { %8237 = vmatprep.subr.bf16.mxu1 %v9489_v55  ;;  %v4611_v55 = vld [vmem:[%s14299_s5 + $0x13a8] sm:$0xff] }
 0x56c   :  { %v9585_v41 = vcombine.high %v4607_v31, %v4611_v55  ;;  %v9584_v20 = vcombine.low %v4607_v31, %v4611_v55  ;;  %v4065_v55 = vld [vmem:[%s14299_s5 + $0x298] sm:$0xff] }
 0x56e   :  { %8238 = vmatpush1.bf16.msra.mxu1 %v9488_v33  ;;  %v4615_v33 = vld [vmem:[%s14299_s5 + $0x13c8] sm:$0xff] }
 0x56f   :  { %8239 = vmatprep.subr.bf16.mxu1 %v9497_v51  ;;  %v4619_v51 = vld [vmem:[%s14299_s5 + $0x13e8] sm:$0xff] }
 0x570   :  { %v9593_v34 = vcombine.high %v4615_v33, %v4619_v51  ;;  %v9592_v38 = vcombine.low %v4615_v33, %v4619_v51  ;;  %v4073_v51 = vld [vmem:[%s14299_s5 + $0x2d8] sm:$0xff] }
 0x572   :  { %8240 = vmatpush1.bf16.msra.mxu1 %v9496_v37  ;;  %v3985_v37 = vld [vmem:[%s14299_s5 + $0x18] sm:$0xff] }
 0x573   :  { %8241 = vmatprep.subr.bf16.mxu1 %v9505_v49  ;;  %v3989_v49 = vld [vmem:[%s14299_s5 + $0x38] sm:$0xff] }
 0x574   :  { %v8965_v61 = vcombine.high %v3985_v37, %v3989_v49  ;;  %v8964_v39 = vcombine.low %v3985_v37, %v3989_v49  ;;  %v4081_v49 = vld [vmem:[%s14299_s5 + $0x318] sm:$0xff] }
 0x576   :  { %8242 = vmatpush1.bf16.msra.mxu1 %v9504_v22  ;;  %v3993_v22 = vld [vmem:[%s14299_s5 + $0x58] sm:$0xff] }
 0x577   :  { %8243 = vmatprep.subr.bf16.mxu1 %v9513_v62  ;;  %v3997_v62 = vld [vmem:[%s14299_s5 + $0x78] sm:$0xff] }
 0x578   :  { %v8973_v40 = vcombine.high %v3993_v22, %v3997_v62  ;;  %v8972_v43 = vcombine.low %v3993_v22, %v3997_v62  ;;  %v4089_v62 = vld [vmem:[%s14299_s5 + $0x358] sm:$0xff] }
 0x57a   :  { %8244 = vmatpush1.bf16.msra.mxu1 %v9512_v42  ;;  %v4001_v42 = vld [vmem:[%s14299_s5 + $0x98] sm:$0xff] }
 0x57b   :  { %8245 = vmatprep.subr.bf16.mxu1 %v9521_v11  ;;  %v4005_v11 = vld [vmem:[%s14299_s5 + $0xb8] sm:$0xff] }
 0x57c   :  { %v8981_v44 = vcombine.high %v4001_v42, %v4005_v11  ;;  %v8980_v50 = vcombine.low %v4001_v42, %v4005_v11  ;;  %v4097_v11 = vld [vmem:[%s14299_s5 + $0x398] sm:$0xff] }
 0x57e   :  { %8246 = vmatpush1.bf16.msra.mxu1 %v9520_v47  ;;  %v4009_v47 = vld [vmem:[%s14299_s5 + $0xd8] sm:$0xff] }
 0x57f   :  { %8247 = vmatprep.subr.bf16.mxu1 %v9529_v48  ;;  %v4013_v48 = vld [vmem:[%s14299_s5 + $0xf8] sm:$0xff] }
 0x580   :  { %v8989_v46 = vcombine.high %v4009_v47, %v4013_v48 }
 0x582   :  { %8248 = vmatpush1.bf16.msra.mxu1 %v9528_v53  ;;  %v4017_v53 = vld [vmem:[%s14299_s5 + $0x118] sm:$0xff] }
 0x583   :  { %8249 = vmatprep.subr.bf16.mxu1 %v9537_v13  ;;  %v8988_v13 = vcombine.low %v4009_v47, %v4013_v48  ;;  %v4105_v48 = vld [vmem:[%s14299_s5 + $0x3d8] sm:$0xff] }
 0x586   :  { %8250 = vmatpush1.bf16.msra.mxu1 %v9536_v0  ;;  %v4029_v0 = vld [vmem:[%s14299_s5 + $0x178] sm:$0xff] }
 0x587   :  { %8251 = vmatprep.subr.bf16.mxu1 %v9545_v1  ;;  %v9005_v5 = vcombine.high %v4025_v63, %v4029_v0 }
 0x58a   :  { %8252 = vmatpush1.bf16.msra.mxu1 %v9544_v8  ;;  %v4037_v8 = vld [vmem:[%s14299_s5 + $0x1b8] sm:$0xff] }
 0x58b   :  { %8253 = vmatprep.subr.bf16.mxu1 %v9553_v9  ;;  %v9004_v9 = vcombine.low %v4025_v63, %v4029_v0  ;;  %v9013_v14 = vcombine.high %v4033_v60, %v4037_v8  ;;  %v4121_v0 = vld [vmem:[%s14299_s5 + $0x458] sm:$0xff] }
 0x58e   :  { %8254 = vmatpush1.bf16.msra.mxu1 %v9552_v52  ;;  %v4045_v52 = vld [vmem:[%s14299_s5 + $0x1f8] sm:$0xff] }
 0x58f   :  { %8255 = vmatprep.subr.bf16.mxu1 %v9561_v26  ;;  %v9012_v26 = vcombine.low %v4033_v60, %v4037_v8  ;;  %v9021_v21 = vcombine.high %v4041_v15, %v4045_v52  ;;  %v4129_v8 = vld [vmem:[%s14299_s5 + $0x498] sm:$0xff] }
 0x592   :  { %8256 = vmatpush1.bf16.msra.mxu1 %v9560_v24  ;;  %v4053_v24 = vld [vmem:[%s14299_s5 + $0x238] sm:$0xff] }
 0x593   :  { %8257 = vmatprep.subr.bf16.mxu1 %v9569_v25  ;;  %v9020_v25 = vcombine.low %v4041_v15, %v4045_v52  ;;  %v9029_v36 = vcombine.high %v4049_v23, %v4053_v24  ;;  %v4137_v52 = vld [vmem:[%s14299_s5 + $0x4d8] sm:$0xff] }
 0x596   :  { %8258 = vmatpush1.bf16.msra.mxu1 %v9568_v54  ;;  %v4061_v54 = vld [vmem:[%s14299_s5 + $0x278] sm:$0xff] }
 0x597   :  { %8259 = vmatprep.subr.bf16.mxu1 %v9577_v28  ;;  %v9028_v28 = vcombine.low %v4049_v23, %v4053_v24  ;;  %v9037_v31 = vcombine.high %v4057_v45, %v4061_v54 }
 0x59a   :  { %8260 = vmatpush1.bf16.msra.mxu1 %v9576_v32  ;;  %v4069_v32 = vld [vmem:[%s14299_s5 + $0x2b8] sm:$0xff] }
 0x59b   :  { %8261 = vmatprep.subr.bf16.mxu1 %v9585_v41  ;;  %v9036_v41 = vcombine.low %v4057_v45, %v4061_v54  ;;  %v9045_v33 = vcombine.high %v4065_v55, %v4069_v32  ;;  %v4157_v45 = vld [vmem:[%s14299_s5 + $0x578] sm:$0xff] }
 0x59e   :  { %8262 = vmatpush1.bf16.msra.mxu1 %v9584_v20  ;;  %v4077_v20 = vld [vmem:[%s14299_s5 + $0x2f8] sm:$0xff] }
 0x59f   :  { %8263 = vmatprep.subr.bf16.mxu1 %v9593_v34  ;;  %v9044_v34 = vcombine.low %v4065_v55, %v4069_v32  ;;  %v9053_v37 = vcombine.high %v4073_v51, %v4077_v20  ;;  %v4165_v55 = vld [vmem:[%s14299_s5 + $0x5b8] sm:$0xff] }
 0x5a2   :  { %8264 = vmatpush1.bf16.msra.mxu1 %v9592_v38  ;;  %v4085_v38 = vld [vmem:[%s14299_s5 + $0x338] sm:$0xff] }
 0x5a3   :  { %8479 = vmatprep.subr.bf16.mxu1 %v8965_v61  ;;  %v9052_v61 = vcombine.low %v4073_v51, %v4077_v20  ;;  %v9061_v22 = vcombine.high %v4081_v49, %v4085_v38  ;;  %v4173_v51 = vld [vmem:[%s14299_s5 + $0x5f8] sm:$0xff] }
 0x5a5   :  { %8266 = vmatmul.mubr.bf16.vlgmr.msra.gmra.mrb[24].mxu1 %v12907_v2 }
 0x5a6   :  { %8480 = vmatpush1.bf16.msra.mxu1 %v8964_v39  ;;  %8511 = vmatprep.mubr.bf16.mxu1 %v12419_v10  ;;  %v4021_v10 = vld [vmem:[%s14299_s5 + $0x138] sm:$0xff] }
 0x5a7   :  { %8481 = vmatprep.subr.bf16.mxu1 %v8973_v40  ;;  %v8997_v57 = vcombine.high %v4017_v53, %v4021_v10  ;;  %v8996_v1 = vcombine.low %v4017_v53, %v4021_v10  ;;  %v4093_v39 = vld [vmem:[%s14299_s5 + $0x378] sm:$0xff]  ;;  %v9060_v40 = vcombine.low %v4081_v49, %v4085_v38 }
 0x5a8   :  { %v9069_v42 = vcombine.high %v4089_v62, %v4093_v39  ;;  %v4113_v10 = vld [vmem:[%s14299_s5 + $0x418] sm:$0xff] }
 0x5a9   :  { %v4181_v49 = vld [vmem:[%s14299_s5 + $0x638] sm:$0xff] }
 0x5aa   :  { %8482 = vmatpush1.bf16.msra.mxu1 %v8972_v43  ;;  %v4101_v43 = vld [vmem:[%s14299_s5 + $0x3b8] sm:$0xff] }
 0x5ab   :  { %8483 = vmatprep.subr.bf16.mxu1 %v8981_v44  ;;  %v9068_v44 = vcombine.low %v4089_v62, %v4093_v39  ;;  %v9077_v47 = vcombine.high %v4097_v11, %v4101_v43  ;;  %v4189_v62 = vld [vmem:[%s14299_s5 + $0x678] sm:$0xff] }
 0x5ae   :  { %8484 = vmatpush1.bf16.msra.mxu1 %v8980_v50  ;;  %v4109_v50 = vld [vmem:[%s14299_s5 + $0x3f8] sm:$0xff] }
 0x5af   :  { %8485 = vmatprep.subr.bf16.mxu1 %v8989_v46  ;;  %v9076_v46 = vcombine.low %v4097_v11, %v4101_v43  ;;  %v9085_v53 = vcombine.high %v4105_v48, %v4109_v50  ;;  %v4197_v11 = vld [vmem:[%s14299_s5 + $0x6b8] sm:$0xff] }
 0x5b2   :  { %8486 = vmatpush1.bf16.msra.mxu1 %v8988_v13  ;;  %v4117_v13 = vld [vmem:[%s14299_s5 + $0x438] sm:$0xff] }
 0x5b3   :  { %8487 = vmatprep.subr.bf16.mxu1 %v8997_v57  ;;  %v9084_v57 = vcombine.low %v4105_v48, %v4109_v50  ;;  %v9093_v63 = vcombine.high %v4113_v10, %v4117_v13  ;;  %v4205_v48 = vld [vmem:[%s14299_s5 + $0x6f8] sm:$0xff] }
 0x5b6   :  { %8488 = vmatpush1.bf16.msra.mxu1 %v8996_v1  ;;  %v4125_v1 = vld [vmem:[%s14299_s5 + $0x478] sm:$0xff] }
 0x5b7   :  { %8489 = vmatprep.subr.bf16.mxu1 %v9005_v5  ;;  %v9092_v5 = vcombine.low %v4113_v10, %v4117_v13  ;;  %v9101_v60 = vcombine.high %v4121_v0, %v4125_v1  ;;  %v4213_v10 = vld [vmem:[%s14299_s5 + $0x738] sm:$0xff] }
 0x5ba   :  { %8490 = vmatpush1.bf16.msra.mxu1 %v9004_v9  ;;  %v4133_v9 = vld [vmem:[%s14299_s5 + $0x4b8] sm:$0xff] }
 0x5bb   :  { %8491 = vmatprep.subr.bf16.mxu1 %v9013_v14  ;;  %v9100_v14 = vcombine.low %v4121_v0, %v4125_v1  ;;  %v9109_v15 = vcombine.high %v4129_v8, %v4133_v9  ;;  %v4221_v0 = vld [vmem:[%s14299_s5 + $0x778] sm:$0xff] }
 0x5be   :  { %8492 = vmatpush1.bf16.msra.mxu1 %v9012_v26  ;;  %v4141_v26 = vld [vmem:[%s14299_s5 + $0x4f8] sm:$0xff] }
 0x5bf   :  { %8493 = vmatprep.subr.bf16.mxu1 %v9021_v21  ;;  %v9108_v21 = vcombine.low %v4129_v8, %v4133_v9  ;;  %v9117_v23 = vcombine.high %v4137_v52, %v4141_v26  ;;  %v9116_v24 = vcombine.low %v4137_v52, %v4141_v26  ;;  %v4229_v8 = vld [vmem:[%s14299_s5 + $0x7b8] sm:$0xff] }
 0x5c0   :  { %v4237_v52 = vld [vmem:[%s14299_s5 + $0x7f8] sm:$0xff] }
 0x5c2   :  { %8494 = vmatpush1.bf16.msra.mxu1 %v9020_v25 }
 0x5c3   :  { %8495 = vmatprep.subr.bf16.mxu1 %v9029_v36  ;;  %v4153_v36 = vld [vmem:[%s14299_s5 + $0x558] sm:$0xff] }
 0x5c4   :  { %v9132_v32 = vcombine.low %v4153_v36, %v4157_v45 }
 0x5c6   :  { %8496 = vmatpush1.bf16.msra.mxu1 %v9028_v28  ;;  %v9133_v28 = vcombine.high %v4153_v36, %v4157_v45  ;;  %v4253_v36 = vld [vmem:[%s14299_s5 + $0x878] sm:$0xff] }
 0x5c7   :  { %8497 = vmatprep.subr.bf16.mxu1 %v9037_v31  ;;  %v4161_v31 = vld [vmem:[%s14299_s5 + $0x598] sm:$0xff] }
 0x5c8   :  { %v9140_v20 = vcombine.low %v4161_v31, %v4165_v55 }
 0x5ca   :  { %8498 = vmatpush1.bf16.msra.mxu1 %v9036_v41  ;;  %v9141_v41 = vcombine.high %v4161_v31, %v4165_v55  ;;  %v4261_v31 = vld [vmem:[%s14299_s5 + $0x8b8] sm:$0xff]  ;;  %v4643_v55 = vrot.slane %v13542_v27, %v3541_v6 }
 0x5cb   :  { %8499 = vmatprep.subr.bf16.mxu1 %v9045_v33  ;;  %v4169_v33 = vld [vmem:[%s14299_s5 + $0x5d8] sm:$0xff] }
 0x5cc   :  { %v9148_v38 = vcombine.low %v4169_v33, %v4173_v51 }
 0x5ce   :  { %8500 = vmatpush1.bf16.msra.mxu1 %v9044_v34  ;;  %v9149_v34 = vcombine.high %v4169_v33, %v4173_v51  ;;  %v4265_v51 = vld [vmem:[%s14299_s5 + $0x8d8] sm:$0xff] }
 0x5cf   :  { %8501 = vmatprep.subr.bf16.mxu1 %v9053_v37  ;;  %v4177_v37 = vld [vmem:[%s14299_s5 + $0x618] sm:$0xff] }
 0x5d0   :  { %v9156_v39 = vcombine.low %v4177_v37, %v4181_v49 }
 0x5d2   :  { %8502 = vmatpush1.bf16.msra.mxu1 %v9052_v61  ;;  %v9157_v61 = vcombine.high %v4177_v37, %v4181_v49 }
 0x5d3   :  { %8503 = vmatprep.subr.bf16.mxu1 %v9061_v22  ;;  %v4185_v22 = vld [vmem:[%s14299_s5 + $0x658] sm:$0xff] }
 0x5d4   :  { %v9164_v43 = vcombine.low %v4185_v22, %v4189_v62 }
 0x5d6   :  { %8504 = vmatpush1.bf16.msra.mxu1 %v9060_v40  ;;  %v9165_v40 = vcombine.high %v4185_v22, %v4189_v62 }
 0x5d7   :  { %8505 = vmatprep.subr.bf16.mxu1 %v9069_v42  ;;  %v4193_v42 = vld [vmem:[%s14299_s5 + $0x698] sm:$0xff] }
 0x5d8   :  { %v9172_v50 = vcombine.low %v4193_v42, %v4197_v11 }
 0x5da   :  { %8506 = vmatpush1.bf16.msra.mxu1 %v9068_v44  ;;  %v9173_v44 = vcombine.high %v4193_v42, %v4197_v11 }
 0x5db   :  { %8507 = vmatprep.subr.bf16.mxu1 %v9077_v47  ;;  %v4201_v47 = vld [vmem:[%s14299_s5 + $0x6d8] sm:$0xff] }
 0x5dc   :  { %v9180_v13 = vcombine.low %v4201_v47, %v4205_v48 }
 0x5de   :  { %8508 = vmatpush1.bf16.msra.mxu1 %v9076_v46  ;;  %v9181_v46 = vcombine.high %v4201_v47, %v4205_v48 }
 0x5df   :  { %8509 = vmatprep.subr.bf16.mxu1 %v9085_v53  ;;  %v4209_v53 = vld [vmem:[%s14299_s5 + $0x718] sm:$0xff] }
 0x5e0   :  { %v9188_v1 = vcombine.low %v4209_v53, %v4213_v10 }
 0x5e2   :  { %8510 = vmatpush1.bf16.msra.mxu1 %v9084_v57  ;;  %v9189_v57 = vcombine.high %v4209_v53, %v4213_v10 }
 0x5e3   :  { %8520 = vmatprep.subr.bf16.mxu1 %v9093_v63  ;;  %v4217_v63 = vld [vmem:[%s14299_s5 + $0x758] sm:$0xff] }
 0x5e4   :  { %v9196_v9 = vcombine.low %v4217_v63, %v4221_v0 }
 0x5e5   :  { %8512 = vmatmul.mubr.bf16.vlgmr.msra.gmra.mrb[28].mxu1 %v12423_v12  ;;  %v4145_v12 = vld [vmem:[%s14299_s5 + $0x518] sm:$0xff] }
 0x5e6   :  { %8521 = vmatpush1.bf16.msra.mxu1 %v9092_v5  ;;  %8552 = vmatprep.mubr.bf16.mxu1 %v12447_v29  ;;  %v4149_v29 = vld [vmem:[%s14299_s5 + $0x538] sm:$0xff]  ;;  %v9197_v5 = vcombine.high %v4217_v63, %v4221_v0 }
 0x5e7   :  { %8522 = vmatprep.subr.bf16.mxu1 %v9101_v60  ;;  %v9125_v25 = vcombine.high %v4145_v12, %v4149_v29  ;;  %v9124_v54 = vcombine.low %v4145_v12, %v4149_v29  ;;  %v4225_v60 = vld [vmem:[%s14299_s5 + $0x798] sm:$0xff] }
 0x5e8   :  { %v9204_v26 = vcombine.low %v4225_v60, %v4229_v8  ;;  %v4245_v12 = vld [vmem:[%s14299_s5 + $0x838] sm:$0xff] }
 0x5ea   :  { %8523 = vmatpush1.bf16.msra.mxu1 %v9100_v14  ;;  %v9205_v14 = vcombine.high %v4225_v60, %v4229_v8 }
 0x5eb   :  { %8524 = vmatprep.subr.bf16.mxu1 %v9109_v15  ;;  %v4233_v15 = vld [vmem:[%s14299_s5 + $0x7d8] sm:$0xff] }
 0x5ec   :  { %v9212_v29 = vcombine.low %v4233_v15, %v4237_v52 }
 0x5ee   :  { %8525 = vmatpush1.bf16.msra.mxu1 %v9108_v21  ;;  %v9213_v21 = vcombine.high %v4233_v15, %v4237_v52 }
 0x5ef   :  { %8526 = vmatprep.subr.bf16.mxu1 %v9117_v23  ;;  %v4241_v23 = vld [vmem:[%s14299_s5 + $0x818] sm:$0xff] }
 0x5f0   :  { %v9220_v45 = vcombine.low %v4241_v23, %v4245_v12 }
 0x5f2   :  { %8527 = vmatpush1.bf16.msra.mxu1 %v9116_v24  ;;  %v9221_v24 = vcombine.high %v4241_v23, %v4245_v12 }
 0x5f3   :  { %8528 = vmatprep.subr.bf16.mxu1 %v9125_v25  ;;  %v4249_v25 = vld [vmem:[%s14299_s5 + $0x858] sm:$0xff] }
 0x5f6   :  { %8529 = vmatpush1.bf16.msra.mxu1 %v9124_v54  ;;  %v9229_v54 = vcombine.high %v4249_v25, %v4253_v36 }
 0x5f7   :  { %8530 = vmatprep.subr.bf16.mxu1 %v9133_v28  ;;  %v4257_v28 = vld [vmem:[%s14299_s5 + $0x898] sm:$0xff] }
 0x5f8   :  { %v9237_v33 = vcombine.high %v4257_v28, %v4261_v31  ;;  %v9236_v6 = vcombine.low %v4257_v28, %v4261_v31 }
 0x5fa   :  { %8531 = vmatpush1.bf16.msra.mxu1 %v9132_v32  ;;  %v9228_v32 = vcombine.low %v4249_v25, %v4253_v36 }
 0x5fb   :  { %8532 = vmatprep.subr.bf16.mxu1 %v9141_v41  ;;  %v4647_v41 = vrot.slane %v13542_v27, %v3545_v18  ;;  %v4273_v27 = vld [vmem:[%s14299_s5 + $0x918] sm:$0xff] }
 0x5fe   :  { %8533 = vmatpush1.bf16.msra.mxu1 %v9140_v20 }
 0x5ff   :  { %8534 = vmatprep.subr.bf16.mxu1 %v9149_v34 }
 0x602   :  { %8535 = vmatpush1.bf16.msra.mxu1 %v9148_v38 }
 0x603   :  { %8536 = vmatprep.subr.bf16.mxu1 %v9157_v61  ;;  %v4277_v61 = vld [vmem:[%s14299_s5 + $0x938] sm:$0xff] }
 0x604   :  { %v9253_v62 = vcombine.high %v4273_v27, %v4277_v61  ;;  %v9252_v42 = vcombine.low %v4273_v27, %v4277_v61 }
 0x606   :  { %8537 = vmatpush1.bf16.msra.mxu1 %v9156_v39  ;;  %v4281_v39 = vld [vmem:[%s14299_s5 + $0x958] sm:$0xff] }
 0x607   :  { %8538 = vmatprep.subr.bf16.mxu1 %v9165_v40  ;;  %v4285_v40 = vld [vmem:[%s14299_s5 + $0x978] sm:$0xff] }
 0x608   :  { %v9261_v11 = vcombine.high %v4281_v39, %v4285_v40  ;;  %v9260_v47 = vcombine.low %v4281_v39, %v4285_v40 }
 0x60a   :  { %8539 = vmatpush1.bf16.msra.mxu1 %v9164_v43  ;;  %v4289_v43 = vld [vmem:[%s14299_s5 + $0x998] sm:$0xff] }
 0x60b   :  { %8540 = vmatprep.subr.bf16.mxu1 %v9173_v44  ;;  %v4293_v44 = vld [vmem:[%s14299_s5 + $0x9b8] sm:$0xff] }
 0x60c   :  { %v9269_v48 = vcombine.high %v4289_v43, %v4293_v44  ;;  %v9268_v53 = vcombine.low %v4289_v43, %v4293_v44 }
 0x60e   :  { %8541 = vmatpush1.bf16.msra.mxu1 %v9172_v50  ;;  %v4297_v50 = vld [vmem:[%s14299_s5 + $0x9d8] sm:$0xff] }
 0x60f   :  { %8542 = vmatprep.subr.bf16.mxu1 %v9181_v46  ;;  %v4301_v46 = vld [vmem:[%s14299_s5 + $0x9f8] sm:$0xff] }
 0x610   :  { %v9277_v10 = vcombine.high %v4297_v50, %v4301_v46  ;;  %v9276_v63 = vcombine.low %v4297_v50, %v4301_v46  ;;  %v4409_v50 = vld [vmem:[%s14299_s5 + $0xd58] sm:$0xff] }
 0x611   :  { %v4413_v46 = vld [vmem:[%s14299_s5 + $0xd78] sm:$0xff] }
 0x612   :  { %8543 = vmatpush1.bf16.msra.mxu1 %v9180_v13  ;;  %v4305_v13 = vld [vmem:[%s14299_s5 + $0xa18] sm:$0xff] }
 0x613   :  { %8544 = vmatprep.subr.bf16.mxu1 %v9189_v57  ;;  %v4309_v57 = vld [vmem:[%s14299_s5 + $0xa38] sm:$0xff] }
 0x614   :  { %v9285_v0 = vcombine.high %v4305_v13, %v4309_v57  ;;  %v9284_v60 = vcombine.low %v4305_v13, %v4309_v57  ;;  %v4417_v13 = vld [vmem:[%s14299_s5 + $0xd98] sm:$0xff] }
 0x615   :  { %v4421_v57 = vld [vmem:[%s14299_s5 + $0xdb8] sm:$0xff] }
 0x616   :  { %8545 = vmatpush1.bf16.msra.mxu1 %v9188_v1  ;;  %v4313_v1 = vld [vmem:[%s14299_s5 + $0xa58] sm:$0xff] }
 0x617   :  { %8546 = vmatprep.subr.bf16.mxu1 %v9197_v5  ;;  %v4317_v5 = vld [vmem:[%s14299_s5 + $0xa78] sm:$0xff] }
 0x618   :  { %v9293_v8 = vcombine.high %v4313_v1, %v4317_v5  ;;  %v9292_v15 = vcombine.low %v4313_v1, %v4317_v5  ;;  %v9388_v5 = vcombine.low %v4409_v50, %v4413_v46 }
 0x61a   :  { %8547 = vmatpush1.bf16.msra.mxu1 %v9196_v9  ;;  %v4321_v9 = vld [vmem:[%s14299_s5 + $0xa98] sm:$0xff] }
 0x61b   :  { %8548 = vmatprep.subr.bf16.mxu1 %v9205_v14  ;;  %v4325_v14 = vld [vmem:[%s14299_s5 + $0xab8] sm:$0xff] }
 0x61c   :  { %v9301_v52 = vcombine.high %v4321_v9, %v4325_v14  ;;  %v9300_v23 = vcombine.low %v4321_v9, %v4325_v14  ;;  %v4425_v9 = vld [vmem:[%s14299_s5 + $0xdd8] sm:$0xff] }
 0x61d   :  { %v4429_v14 = vld [vmem:[%s14299_s5 + $0xdf8] sm:$0xff] }
 0x61e   :  { %8549 = vmatpush1.bf16.msra.mxu1 %v9204_v26  ;;  %v4329_v26 = vld [vmem:[%s14299_s5 + $0xad8] sm:$0xff] }
 0x61f   :  { %8550 = vmatprep.subr.bf16.mxu1 %v9213_v21  ;;  %v4333_v21 = vld [vmem:[%s14299_s5 + $0xaf8] sm:$0xff] }
 0x620   :  { %v9309_v12 = vcombine.high %v4329_v26, %v4333_v21  ;;  %v9308_v25 = vcombine.low %v4329_v26, %v4333_v21  ;;  %v9396_v21 = vcombine.low %v4417_v13, %v4421_v57 }
 0x622   :  { %8551 = vmatpush1.bf16.msra.mxu1 %v9212_v29  ;;  %v4337_v29 = vld [vmem:[%s14299_s5 + $0xb18] sm:$0xff] }
 0x623   :  { %8561 = vmatprep.subr.bf16.mxu1 %v9221_v24  ;;  %v4341_v24 = vld [vmem:[%s14299_s5 + $0xb38] sm:$0xff] }
 0x624   :  { %v9317_v36 = vcombine.high %v4337_v29, %v4341_v24  ;;  %v9316_v28 = vcombine.low %v4337_v29, %v4341_v24  ;;  %v4437_v29 = vld [vmem:[%s14299_s5 + $0xe38] sm:$0xff]  ;;  %v9404_v24 = vcombine.low %v4425_v9, %v4429_v14 }
 0x625   :  { %8553 = vmatmul.mubr.bf16.vlgmr.msra.gmra.mrb[28].mxu1 %v12645_v17  ;;  %v4269_v17 = vld [vmem:[%s14299_s5 + $0x8f8] sm:$0xff] }
 0x626   :  { %8562 = vmatpush1.bf16.msra.mxu1 %v9220_v45  ;;  %8593 = vmatprep.mubr.bf16.mxu1 %v12472_v19  ;;  %v9245_v38 = vcombine.high %v4265_v51, %v4269_v17  ;;  %v9244_v22 = vcombine.low %v4265_v51, %v4269_v17  ;;  %v4345_v45 = vld [vmem:[%s14299_s5 + $0xb58] sm:$0xff] }
 0x627   :  { %8563 = vmatprep.subr.bf16.mxu1 %v9229_v54  ;;  %v4349_v54 = vld [vmem:[%s14299_s5 + $0xb78] sm:$0xff] }
 0x628   :  { %v9325_v31 = vcombine.high %v4345_v45, %v4349_v54  ;;  %v4361_v51 = vld [vmem:[%s14299_s5 + $0xbd8] sm:$0xff] }
 0x629   :  { %v8472_v19 = vpop.f32.mrb[252].mxu0  ;;  %v4365_v17 = vld [vmem:[%s14299_s5 + $0xbf8] sm:$0xff] }
 0x62a   :  { %v10308_v20 = vadd.f32 %v8472_v19, %v4643_v55  ;;  %v8474_v34 = vpop.f32.mrb[253].mxu0  ;;  %8564 = vmatpush1.bf16.msra.mxu1 %v9228_v32  ;;  %v4353_v55 = vld [vmem:[%s14299_s5 + $0xb98] sm:$0xff] }
 0x62b   :  { %v10309_v37 = vadd.f32 %v8474_v34, %v4647_v41  ;;  %v8476_v49 = vpop.f32.mrb[254].mxu0  ;;  %8565 = vmatprep.subr.bf16.mxu1 %v9237_v33  ;;  %v4357_v32 = vld [vmem:[%s14299_s5 + $0xbb8] sm:$0xff]  ;;  %v9324_v41 = vcombine.low %v4345_v45, %v4349_v54 }
 0x62c   :  { %8688 = vst [vmem:[%s14302_s7 + $0x20] sm:$0xff] %v10308_v20  ;;  %v8477_v18 = vpop.f32.mrb[255].mxu0  ;;  %v9333_v33 = vcombine.high %v4353_v55, %v4357_v32  ;;  %v9332_v19 = vcombine.low %v4353_v55, %v4357_v32  ;;  %v9341_v20 = vcombine.high %v4361_v51, %v4365_v17  ;;  %v4369_v34 = vld [vmem:[%s14299_s5 + $0xc18] sm:$0xff] }
 0x62d   :  { %8689 = vst [vmem:[%s14302_s7 + $0x28] sm:$0xff] %v10309_v37  ;;  %v9340_v37 = vcombine.low %v4361_v51, %v4365_v17  ;;  %v4381_v18 = vld [vmem:[%s14299_s5 + $0xc78] sm:$0xff] }
 0x62e   :  { %8566 = vmatpush1.bf16.msra.mxu1 %v9236_v6  ;;  %v4373_v6 = vld [vmem:[%s14299_s5 + $0xc38] sm:$0xff] }
 0x62f   :  { %8567 = vmatprep.subr.bf16.mxu1 %v9245_v38  ;;  %v9349_v49 = vcombine.high %v4369_v34, %v4373_v6  ;;  %v4377_v38 = vld [vmem:[%s14299_s5 + $0xc58] sm:$0xff]  ;;  %v9348_v27 = vcombine.low %v4369_v34, %v4373_v6 }
 0x630   :  { %v9357_v61 = vcombine.high %v4377_v38, %v4381_v18  ;;  %v9356_v39 = vcombine.low %v4377_v38, %v4381_v18  ;;  %v4445_v45 = vld [vmem:[%s14299_s5 + $0xe78] sm:$0xff] }
 0x631   :  { %v4453_v55 = vld [vmem:[%s14299_s5 + $0xeb8] sm:$0xff] }
 0x632   :  { %8568 = vmatpush1.bf16.msra.mxu1 %v9244_v22  ;;  %v4385_v22 = vld [vmem:[%s14299_s5 + $0xc98] sm:$0xff] }
 0x633   :  { %8569 = vmatprep.subr.bf16.mxu1 %v9253_v62  ;;  %v4389_v62 = vld [vmem:[%s14299_s5 + $0xcb8] sm:$0xff] }
 0x634   :  { %v9365_v40 = vcombine.high %v4385_v22, %v4389_v62  ;;  %v9364_v43 = vcombine.low %v4385_v22, %v4389_v62  ;;  %v4461_v51 = vld [vmem:[%s14299_s5 + $0xef8] sm:$0xff] }
 0x635   :  { %v4469_v34 = vld [vmem:[%s14299_s5 + $0xf38] sm:$0xff] }
 0x636   :  { %8570 = vmatpush1.bf16.msra.mxu1 %v9252_v42  ;;  %v4393_v42 = vld [vmem:[%s14299_s5 + $0xcd8] sm:$0xff] }
 0x637   :  { %8571 = vmatprep.subr.bf16.mxu1 %v9261_v11  ;;  %v4397_v11 = vld [vmem:[%s14299_s5 + $0xcf8] sm:$0xff] }
 0x638   :  { %v9373_v44 = vcombine.high %v4393_v42, %v4397_v11  ;;  %v4477_v38 = vld [vmem:[%s14299_s5 + $0xf78] sm:$0xff] }
 0x639   :  { %v4485_v22 = vld [vmem:[%s14299_s5 + $0xfb8] sm:$0xff] }
 0x63a   :  { %8572 = vmatpush1.bf16.msra.mxu1 %v9260_v47  ;;  %v9372_v47 = vcombine.low %v4393_v42, %v4397_v11  ;;  %v4493_v42 = vld [vmem:[%s14299_s5 + $0xff8] sm:$0xff] }
 0x63b   :  { %8573 = vmatprep.subr.bf16.mxu1 %v9269_v48 }
 0x63e   :  { %8574 = vmatpush1.bf16.msra.mxu1 %v9268_v53 }
 0x63f   :  { %8575 = vmatprep.subr.bf16.mxu1 %v9277_v10  ;;  %v9389_v10 = vcombine.high %v4409_v50, %v4413_v46  ;;  %v4509_v50 = vld [vmem:[%s14299_s5 + $0x1078] sm:$0xff] }
 0x642   :  { %8576 = vmatpush1.bf16.msra.mxu1 %v9276_v63  ;;  %v14116_v63 = vld [vmem:[%s14301_s6] sm:$0xff] }
 0x643   :  { %8577 = vmatprep.subr.bf16.mxu1 %v9285_v0  ;;  %v4635_v0 = vrot.slane %v14116_v63, %v3533_v16  ;;  %v4639_v1 = vrot.slane %v14116_v63, %v3537_v4 }
 0x646   :  { %8578 = vmatpush1.bf16.msra.mxu1 %v9284_v60  ;;  %v9397_v60 = vcombine.high %v4417_v13, %v4421_v57  ;;  %v4517_v13 = vld [vmem:[%s14299_s5 + $0x10b8] sm:$0xff] }
 0x647   :  { %8579 = vmatprep.subr.bf16.mxu1 %v9293_v8 }
 0x64a   :  { %8580 = vmatpush1.bf16.msra.mxu1 %v9292_v15 }
 0x64b   :  { %8581 = vmatprep.subr.bf16.mxu1 %v9301_v52 }
 0x64e   :  { %8582 = vmatpush1.bf16.msra.mxu1 %v9300_v23  ;;  %v9405_v23 = vcombine.high %v4425_v9, %v4429_v14 }
 0x64f   :  { %8583 = vmatprep.subr.bf16.mxu1 %v9309_v12  ;;  %v4433_v12 = vld [vmem:[%s14299_s5 + $0xe18] sm:$0xff] }
 0x650   :  { %v9412_v54 = vcombine.low %v4433_v12, %v4437_v29 }
 0x652   :  { %8584 = vmatpush1.bf16.msra.mxu1 %v9308_v25  ;;  %v9413_v25 = vcombine.high %v4433_v12, %v4437_v29  ;;  %v4553_v29 = vld [vmem:[%s14299_s5 + $0x11d8] sm:$0xff] }
 0x653   :  { %8585 = vmatprep.subr.bf16.mxu1 %v9317_v36  ;;  %v4441_v36 = vld [vmem:[%s14299_s5 + $0xe58] sm:$0xff] }
 0x654   :  { %v9420_v32 = vcombine.low %v4441_v36, %v4445_v45 }
 0x656   :  { %8586 = vmatpush1.bf16.msra.mxu1 %v9316_v28  ;;  %v9421_v28 = vcombine.high %v4441_v36, %v4445_v45  ;;  %v4561_v45 = vld [vmem:[%s14299_s5 + $0x1218] sm:$0xff] }
 0x657   :  { %8587 = vmatprep.subr.bf16.mxu1 %v9325_v31  ;;  %v4449_v31 = vld [vmem:[%s14299_s5 + $0xe98] sm:$0xff] }
 0x658   :  { %v9428_v17 = vcombine.low %v4449_v31, %v4453_v55 }
 0x65a   :  { %8588 = vmatpush1.bf16.msra.mxu1 %v9324_v41  ;;  %v9429_v41 = vcombine.high %v4449_v31, %v4453_v55  ;;  %v4569_v55 = vld [vmem:[%s14299_s5 + $0x1258] sm:$0xff] }
 0x65b   :  { %8589 = vmatprep.subr.bf16.mxu1 %v9333_v33  ;;  %v4457_v33 = vld [vmem:[%s14299_s5 + $0xed8] sm:$0xff] }
 0x65c   :  { %v9436_v6 = vcombine.low %v4457_v33, %v4461_v51 }
 0x65e   :  { %8590 = vmatpush1.bf16.msra.mxu1 %v9332_v19  ;;  %v9437_v19 = vcombine.high %v4457_v33, %v4461_v51  ;;  %v4577_v51 = vld [vmem:[%s14299_s5 + $0x1298] sm:$0xff] }
 0x65f   :  { %8591 = vmatprep.subr.bf16.mxu1 %v9341_v20  ;;  %v4465_v20 = vld [vmem:[%s14299_s5 + $0xf18] sm:$0xff] }
 0x660   :  { %v9444_v18 = vcombine.low %v4465_v20, %v4469_v34 }
 0x662   :  { %8592 = vmatpush1.bf16.msra.mxu1 %v9340_v37  ;;  %v9445_v37 = vcombine.high %v4465_v20, %v4469_v34  ;;  %v4585_v34 = vld [vmem:[%s14299_s5 + $0x12d8] sm:$0xff] }
 0x663   :  { %8602 = vmatprep.subr.bf16.mxu1 %v9349_v49  ;;  %v4473_v49 = vld [vmem:[%s14299_s5 + $0xf58] sm:$0xff] }
 0x664   :  { %v9452_v62 = vcombine.low %v4473_v49, %v4477_v38 }
 0x665   :  { %8594 = vmatmul.mubr.bf16.vlgmr.msra.gmra.mrb[28].mxu1 %v12476_v58  ;;  %v4401_v58 = vld [vmem:[%s14299_s5 + $0xd18] sm:$0xff] }
 0x666   :  { %8603 = vmatpush1.bf16.msra.mxu1 %v9348_v27  ;;  %8634 = vmatprep.mubr.bf16.mxu1 %v12507_v56  ;;  %v4405_v56 = vld [vmem:[%s14299_s5 + $0xd38] sm:$0xff]  ;;  %v9453_v27 = vcombine.high %v4473_v49, %v4477_v38 }
 0x667   :  { %8604 = vmatprep.subr.bf16.mxu1 %v9357_v61  ;;  %v9381_v48 = vcombine.high %v4401_v58, %v4405_v56  ;;  %v9380_v53 = vcombine.low %v4401_v58, %v4405_v56  ;;  %v4481_v61 = vld [vmem:[%s14299_s5 + $0xf98] sm:$0xff] }
 0x668   :  { %v9460_v11 = vcombine.low %v4481_v61, %v4485_v22  ;;  %v4501_v58 = vld [vmem:[%s14299_s5 + $0x1038] sm:$0xff] }
 0x669   :  { %v4593_v38 = vld [vmem:[%s14299_s5 + $0x1318] sm:$0xff] }
 0x66a   :  { %8605 = vmatpush1.bf16.msra.mxu1 %v9356_v39  ;;  %v9461_v39 = vcombine.high %v4481_v61, %v4485_v22  ;;  %v4601_v22 = vld [vmem:[%s14299_s5 + $0x1358] sm:$0xff] }
 0x66b   :  { %8606 = vmatprep.subr.bf16.mxu1 %v9365_v40  ;;  %v4489_v40 = vld [vmem:[%s14299_s5 + $0xfd8] sm:$0xff] }
 0x66c   :  { %v9468_v56 = vcombine.low %v4489_v40, %v4493_v42 }
 0x66e   :  { %8607 = vmatpush1.bf16.msra.mxu1 %v9364_v43  ;;  %v9469_v43 = vcombine.high %v4489_v40, %v4493_v42  ;;  %v4609_v42 = vld [vmem:[%s14299_s5 + $0x1398] sm:$0xff] }
 0x66f   :  { %8608 = vmatprep.subr.bf16.mxu1 %v9373_v44  ;;  %v4497_v44 = vld [vmem:[%s14299_s5 + $0x1018] sm:$0xff] }
 0x670   :  { %v9476_v46 = vcombine.low %v4497_v44, %v4501_v58 }
 0x672   :  { %8609 = vmatpush1.bf16.msra.mxu1 %v9372_v47  ;;  %v9477_v47 = vcombine.high %v4497_v44, %v4501_v58  ;;  %v4617_v58 = vld [vmem:[%s14299_s5 + $0x13d8] sm:$0xff] }
 0x673   :  { %8610 = vmatprep.subr.bf16.mxu1 %v9381_v48  ;;  %v4505_v48 = vld [vmem:[%s14299_s5 + $0x1058] sm:$0xff] }
 0x674   :  { %v9484_v57 = vcombine.low %v4505_v48, %v4509_v50 }
 0x676   :  { %8611 = vmatpush1.bf16.msra.mxu1 %v9380_v53  ;;  %v9485_v53 = vcombine.high %v4505_v48, %v4509_v50 }
 0x677   :  { %8612 = vmatprep.subr.bf16.mxu1 %v9389_v10  ;;  %v4513_v10 = vld [vmem:[%s14299_s5 + $0x1098] sm:$0xff] }
 0x678   :  { %v8267_v8 = vpop.f32.mrb[24].mxu1 }
 0x679   :  { %v10306_v15 = vadd.f32 %v8267_v8, %v4635_v0  ;;  %v8269_v52 = vpop.f32.mrb[25].mxu1  ;;  %v9493_v0 = vcombine.high %v4513_v10, %v4517_v13 }
 0x67a   :  { %v10307_v16 = vadd.f32 %v8269_v52, %v4639_v1  ;;  %v8271_v26 = vpop.f32.mrb[26].mxu1  ;;  %8613 = vmatpush1.bf16.msra.mxu1 %v9388_v5  ;;  %v4521_v1 = vld [vmem:[%s14299_s5 + $0x10d8] sm:$0xff] }
 0x67b   :  { %8686 = vst [vmem:[%s14302_s7 + $0x10] sm:$0xff] %v10306_v15  ;;  %v8272_v4 = vpop.f32.mrb[27].mxu1  ;;  %8614 = vmatprep.subr.bf16.mxu1 %v9397_v60  ;;  %v4525_v5 = vld [vmem:[%s14299_s5 + $0x10f8] sm:$0xff]  ;;  %v9492_v60 = vcombine.low %v4513_v10, %v4517_v13 }
 0x67c   :  { %8687 = vst [vmem:[%s14302_s7 + $0x18] sm:$0xff] %v10307_v16  ;;  %v9501_v8 = vcombine.high %v4521_v1, %v4525_v5  ;;  %v9500_v9 = vcombine.low %v4521_v1, %v4525_v5  ;;  %v4537_v15 = vld [vmem:[%s14299_s5 + $0x1158] sm:$0xff] }
 0x67d   :  { %v4541_v52 = vld [vmem:[%s14299_s5 + $0x1178] sm:$0xff] }
 0x67e   :  { %8615 = vmatpush1.bf16.msra.mxu1 %v9396_v21  ;;  %v9517_v26 = vcombine.high %v4537_v15, %v4541_v52  ;;  %v4545_v21 = vld [vmem:[%s14299_s5 + $0x1198] sm:$0xff] }
 0x67f   :  { %8616 = vmatprep.subr.bf16.mxu1 %v9405_v23  ;;  %v4549_v4 = vld [vmem:[%s14299_s5 + $0x11b8] sm:$0xff]  ;;  %v9516_v23 = vcombine.low %v4537_v15, %v4541_v52 }
 0x680   :  { %v9525_v12 = vcombine.high %v4545_v21, %v4549_v4 }
 0x682   :  { %8617 = vmatpush1.bf16.msra.mxu1 %v9404_v24  ;;  %v4557_v24 = vld [vmem:[%s14299_s5 + $0x11f8] sm:$0xff] }
 0x683   :  { %8618 = vmatprep.subr.bf16.mxu1 %v9413_v25  ;;  %v9524_v25 = vcombine.low %v4545_v21, %v4549_v4  ;;  %v9533_v36 = vcombine.high %v4553_v29, %v4557_v24 }
 0x686   :  { %8619 = vmatpush1.bf16.msra.mxu1 %v9412_v54  ;;  %v4565_v54 = vld [vmem:[%s14299_s5 + $0x1238] sm:$0xff] }
 0x687   :  { %8620 = vmatprep.subr.bf16.mxu1 %v9421_v28  ;;  %v9532_v28 = vcombine.low %v4553_v29, %v4557_v24  ;;  %v9541_v31 = vcombine.high %v4561_v45, %v4565_v54 }
 0x68a   :  { %8621 = vmatpush1.bf16.msra.mxu1 %v9420_v32  ;;  %v4573_v32 = vld [vmem:[%s14299_s5 + $0x1278] sm:$0xff] }
 0x68b   :  { %8622 = vmatprep.subr.bf16.mxu1 %v9429_v41  ;;  %v9540_v41 = vcombine.low %v4561_v45, %v4565_v54  ;;  %v9549_v33 = vcombine.high %v4569_v55, %v4573_v32 }
 0x68e   :  { %8623 = vmatpush1.bf16.msra.mxu1 %v9428_v17  ;;  %v4581_v17 = vld [vmem:[%s14299_s5 + $0x12b8] sm:$0xff] }
 0x68f   :  { %8624 = vmatprep.subr.bf16.mxu1 %v9437_v19  ;;  %v9548_v19 = vcombine.low %v4569_v55, %v4573_v32  ;;  %v9557_v20 = vcombine.high %v4577_v51, %v4581_v17 }
 0x692   :  { %8625 = vmatpush1.bf16.msra.mxu1 %v9436_v6  ;;  %v4589_v6 = vld [vmem:[%s14299_s5 + $0x12f8] sm:$0xff] }
 0x693   :  { %8626 = vmatprep.subr.bf16.mxu1 %v9445_v37  ;;  %v9556_v37 = vcombine.low %v4577_v51, %v4581_v17  ;;  %v9565_v49 = vcombine.high %v4585_v34, %v4589_v6 }
 0x696   :  { %8627 = vmatpush1.bf16.msra.mxu1 %v9444_v18  ;;  %v4597_v18 = vld [vmem:[%s14299_s5 + $0x1338] sm:$0xff] }
 0x697   :  { %8628 = vmatprep.subr.bf16.mxu1 %v9453_v27  ;;  %v9564_v27 = vcombine.low %v4585_v34, %v4589_v6  ;;  %v9573_v61 = vcombine.high %v4593_v38, %v4597_v18 }
 0x69a   :  { %8629 = vmatpush1.bf16.msra.mxu1 %v9452_v62  ;;  %v4605_v62 = vld [vmem:[%s14299_s5 + $0x1378] sm:$0xff] }
 0x69b   :  { %8630 = vmatprep.subr.bf16.mxu1 %v9461_v39  ;;  %v9572_v39 = vcombine.low %v4593_v38, %v4597_v18  ;;  %v9581_v40 = vcombine.high %v4601_v22, %v4605_v62 }
 0x69e   :  { %8631 = vmatpush1.bf16.msra.mxu1 %v9460_v11  ;;  %v4613_v11 = vld [vmem:[%s14299_s5 + $0x13b8] sm:$0xff] }
 0x69f   :  { %8632 = vmatprep.subr.bf16.mxu1 %v9469_v43  ;;  %v9580_v43 = vcombine.low %v4601_v22, %v4605_v62  ;;  %v9589_v44 = vcombine.high %v4609_v42, %v4613_v11 }
 0x6a2   :  { %8633 = vmatpush1.bf16.msra.mxu1 %v9468_v56  ;;  %v4621_v56 = vld [vmem:[%s14299_s5 + $0x13f8] sm:$0xff] }
 0x6a3   :  { %8643 = vmatprep.subr.bf16.mxu1 %v9477_v47  ;;  %v9588_v47 = vcombine.low %v4609_v42, %v4613_v11  ;;  %v9597_v48 = vcombine.high %v4617_v58, %v4621_v56  ;;  %v9596_v50 = vcombine.low %v4617_v58, %v4621_v56 }
 0x6a5   :  { %8635 = vmatmul.mubr.bf16.vlgmr.msra.gmra.mrb[28].mxu1 %v12704_v7  ;;  %v4529_v7 = vld [vmem:[%s14299_s5 + $0x1118] sm:$0xff] }
 0x6a6   :  { %8644 = vmatpush1.bf16.msra.mxu1 %v9476_v46  ;;  %8675 = vmatprep.mubr.bf16.mxu1 %v12706_v30  ;;  %v4533_v30 = vld [vmem:[%s14299_s5 + $0x1138] sm:$0xff]  ;;  %v4651_v46 = vrot.slane %v14116_v63, %v3549_v3 }
 0x6a7   :  { %8645 = vmatprep.subr.bf16.mxu1 %v9485_v53  ;;  %v9509_v14 = vcombine.high %v4529_v7, %v4533_v30  ;;  %v9508_v16 = vcombine.low %v4529_v7, %v4533_v30  ;;  %v4655_v53 = vrot.slane %v14116_v63, %v3553_v35 }
 0x6aa   :  { %8646 = vmatpush1.bf16.msra.mxu1 %v9484_v57 }
 0x6ab   :  { %8647 = vmatprep.subr.bf16.mxu1 %v9493_v0 }
 0x6ae   :  { %8648 = vmatpush1.bf16.msra.mxu1 %v9492_v60 }
 0x6af   :  { %8649 = vmatprep.subr.bf16.mxu1 %v9501_v8 }
 0x6b2   :  { %8650 = vmatpush1.bf16.msra.mxu1 %v9500_v9 }
 0x6b3   :  { %8651 = vmatprep.subr.bf16.mxu1 %v9509_v14 }
 0x6b6   :  { %8652 = vmatpush1.bf16.msra.mxu1 %v9508_v16 }
 0x6b7   :  { %8653 = vmatprep.subr.bf16.mxu1 %v9517_v26 }
 0x6ba   :  { %8654 = vmatpush1.bf16.msra.mxu1 %v9516_v23 }
 0x6bb   :  { %8655 = vmatprep.subr.bf16.mxu1 %v9525_v12 }
 0x6be   :  { %8656 = vmatpush1.bf16.msra.mxu1 %v9524_v25 }
 0x6bf   :  { %8657 = vmatprep.subr.bf16.mxu1 %v9533_v36 }
 0x6c2   :  { %8658 = vmatpush1.bf16.msra.mxu1 %v9532_v28 }
 0x6c3   :  { %8659 = vmatprep.subr.bf16.mxu1 %v9541_v31 }
 0x6c6   :  { %8660 = vmatpush1.bf16.msra.mxu1 %v9540_v41 }
 0x6c7   :  { %8661 = vmatprep.subr.bf16.mxu1 %v9549_v33 }
 0x6ca   :  { %8662 = vmatpush1.bf16.msra.mxu1 %v9548_v19 }
 0x6cb   :  { %8663 = vmatprep.subr.bf16.mxu1 %v9557_v20 }
 0x6ce   :  { %8664 = vmatpush1.bf16.msra.mxu1 %v9556_v37 }
 0x6cf   :  { %8665 = vmatprep.subr.bf16.mxu1 %v9565_v49 }
 0x6d2   :  { %8666 = vmatpush1.bf16.msra.mxu1 %v9564_v27 }
 0x6d3   :  { %8667 = vmatprep.subr.bf16.mxu1 %v9573_v61 }
 0x6d6   :  { %8668 = vmatpush1.bf16.msra.mxu1 %v9572_v39 }
 0x6d7   :  { %8669 = vmatprep.subr.bf16.mxu1 %v9581_v40 }
 0x6da   :  { %8670 = vmatpush1.bf16.msra.mxu1 %v9580_v43 }
 0x6db   :  { %8671 = vmatprep.subr.bf16.mxu1 %v9589_v44 }
 0x6de   :  { %8672 = vmatpush1.bf16.msra.mxu1 %v9588_v47 }
 0x6df   :  { %8673 = vmatprep.subr.bf16.mxu1 %v9597_v48 }
 0x6e2   :  { %8674 = vmatpush1.bf16.msra.mxu1 %v9596_v50 }
 0x6e5   :  { %8676 = vmatmul.mubr.bf16.vlgmr.msra.gmra.mrb[28].mxu1 %v12907_v2 }
 0x7b8   :  { %v8677_v10 = vpop.f32.mrb[28].mxu1 }
 0x7b9   :  { %v10310_v13 = vadd.f32 %v8677_v10, %v4651_v46  ;;  %v8679_v57 = vpop.f32.mrb[29].mxu1 }
 0x7ba   :  { %v10311_v0 = vadd.f32 %v8679_v57, %v4655_v53  ;;  %v8681_v1 = vpop.f32.mrb[30].mxu1 }
 0x7bb   :  { %8690 = vst [vmem:[%s14302_s7 + $0x30] sm:$0xff] %v10310_v13  ;;  %v8682_v5 = vpop.f32.mrb[31].mxu1 }
 0x7bc   :  { %8691 = vst [vmem:[%s14302_s7 + $0x38] sm:$0xff] %v10311_v0 }

</bundles_post_ra>
